<compile_context>
chip_gen: v5e
topology: v5e:2x2
jax: 0.10.0
libtpu: 0.0.40
codegen_flags: <defaults>
</compile_context>

<pallas_src>
import numpy as np
import jax
import jax.numpy as jnp
from jax.experimental import pallas as pl
from jax.experimental.pallas import tpu as pltpu

# ---- GRCL(__init__) hyper-parameters ----
INPUT_CHANNEL = 16
OUTPUT_CHANNEL = 32
NUM_ITERATION = 2
KERNEL_SIZE = 3
PAD = 1
EPS = 1e-5


# =======================  fused Pallas kernel  =======================

def _make_grcl_kernel(N, H, W, C):
    """Builds the kernel for fixed (static) shapes."""
    M = N * H * W
    K = KERNEL_SIZE
    inv_m = 1.0 / M
    # lane margin of the flattened state buffer; must cover |dh*W + dw| <= W+PAD
    margin = ((W + PAD + 127) // 128) * 128

    def kernel(xslab_ref, wu_ref, wrc_ref, wgr_ref, mask_ref, bn_ref,
               out_ref, uhat_ref, slab_ref, hbuf_ref):
        """Channel-major layout; spatial positions flattened on the lane axis.

        xslab_ref : (9*Cin, M)        bf16  im2col slab of the (constant) input
        wu_ref    : (2*C, 9*Cin)      bf16  [Wf ; Wgf embedded at centre tap]
        wrc_ref   : (C, 9*C)          bf16  Wr (3x3 recurrent conv)
        wgr_ref   : (C, C)            bf16  Wgr (1x1 recurrent gate conv)
        mask_ref  : (9, M)            f32   per-tap zero-padding masks
        bn_ref    : (C, 2+10*ITER)    f32   packed BN gamma/beta columns
        out_ref   : (C, M)            f32   output (lane-dense)
        uhat_ref  : (2*C, M)          f32   scratch: normalized [wf_u ; wgf_u]
        slab_ref  : (9*C, M)          bf16  scratch: recurrent im2col slab
        hbuf_ref  : (C, 2*margin+M)   bf16  scratch: state with zero lane margins
        """

        def row_stats(x):
            # training-mode BatchNorm stats (biased var), per channel row,
            # two-pass for numerical stability; reduction runs on the XLU.
            mean = jnp.sum(x, axis=1, keepdims=True) * inv_m
            d = x - mean
            var = jnp.sum(d * d, axis=1, keepdims=True) * inv_m
            return mean, var

        def normalize(x):
            mean, var = row_stats(x)
            return (x - mean) * jax.lax.rsqrt(var + EPS)

        def affine(xhat, col):
            # BN affine: gamma * xhat + beta, gamma/beta are (C, 1) columns
            return xhat * bn_ref[:, col:col + 1] + bn_ref[:, col + 1:col + 2]

        def store_state(h):
            hbuf_ref[:, margin:margin + M] = h.astype(hbuf_ref.dtype)

        # clear only the two zero margins; the interior is overwritten below
        zero_margin = jnp.zeros((C, margin), hbuf_ref.dtype)
        hbuf_ref[:, 0:margin] = zero_margin
        hbuf_ref[:, margin + M:2 * margin + M] = zero_margin

        # ---- input convs (constant over recurrence): one K=9*Cin matmul ----
        uw = jnp.dot(wu_ref[...], xslab_ref[...],
                     preferred_element_type=jnp.float32)        # (2C, M)
        uhat_ref[...] = normalize(uw)     # stage normalized pre-acts in VMEM

        # ---- x0 = relu(BN_x_init(wf_u)) ----
        h = jnp.maximum(affine(uhat_ref[0:C, :], 0), 0.0)
        if NUM_ITERATION == 0:
            out_ref[...] = h
        store_state(h)

        # ---- recurrence ----
        for i in range(NUM_ITERATION):
            col = 2 + 10 * i
            h_state = hbuf_ref[:, margin:margin + M]            # (C, M) bf16

            # gate: G = sigmoid(BN_gfu(wgf_u) + BN_grx(Wgr @ x)) (1x1 conv)
            hwg = jnp.dot(wgr_ref[...], h_state,
                          preferred_element_type=jnp.float32)
            zg = affine(uhat_ref[C:2 * C, :], col) + affine(normalize(hwg), col + 2)
            g = 1.0 / (1.0 + jnp.exp(-zg))

            # recurrent 3x3 conv: build the im2col slab with lane-shifted reads
            # from the margin-padded state (+ boundary masks), one K=9*C matmul
            for t in range(K * K):
                dh, dw = t // K - 1, t % K - 1
                off = dh * W + dw
                tap = hbuf_ref[:, margin + off:margin + off + M]
                slab_ref[t * C:(t + 1) * C, :] = (
                    tap * mask_ref[t:t + 1, :]).astype(slab_ref.dtype)
            hwc = jnp.dot(wrc_ref[...], slab_ref[...],
                          preferred_element_type=jnp.float32)   # (C, M)

            e = affine(normalize(hwc), col + 6) * g             # BN_rx(wr_x) * G
            h = jnp.maximum(affine(uhat_ref[0:C, :], col + 4)   # BN_fu(wf_u)
                            + affine(normalize(e), col + 8),    # + BN_Gx(.)
                            0.0)

            if i + 1 < NUM_ITERATION:
                store_state(h)
            else:
                out_ref[...] = h

    return kernel, margin


# =======================  wrapper / parameter packing  =======================

def grcl_forward_pallas(x_nchw, params):
    N, Cin, H, W = x_nchw.shape
    C = params["Wf"].shape[0]
    M = N * H * W
    K = KERNEL_SIZE

    # ---- im2col slab of the time-constant input, channel-major, bf16 ----
    xpad = jnp.pad(x_nchw, ((0, 0), (0, 0), (PAD, PAD), (PAD, PAD)))
    taps = []
    for kh in range(K):
        for kw in range(K):
            p = xpad[:, :, kh:kh + H, kw:kw + W]               # (N, Cin, H, W)
            taps.append(jnp.transpose(p, (1, 0, 2, 3)).reshape(Cin, M))
    x_slab = jnp.concatenate(taps, axis=0).astype(jnp.bfloat16)    # (9*Cin, M)

    # ---- weights: 3x3 candidate rows + 1x1 gate embedded at the centre tap ----
    wf = jnp.transpose(params["Wf"], (0, 2, 3, 1)).reshape(C, K * K * Cin)
    wgf = (jnp.zeros((C, K * K, Cin), jnp.float32)
           .at[:, (K * K) // 2, :].set(params["Wgf"][:, :, 0, 0])
           .reshape(C, K * K * Cin))
    wu = jnp.concatenate([wf, wgf], axis=0).astype(jnp.bfloat16)   # (2C, 9*Cin)
    wrc = jnp.transpose(params["Wr"], (0, 2, 3, 1)).reshape(
        C, K * K * C).astype(jnp.bfloat16)                          # (C, 9*C)
    wgr = params["Wgr"][:, :, 0, 0].astype(jnp.bfloat16)            # (C, C)

    # ---- per-tap zero-padding masks over the flattened (n, h, w) lane axis ----
    m_idx = np.arange(M)
    wi = m_idx % W
    hi = (m_idx // W) % H
    rows = []
    for t in range(K * K):
        dh, dw = t // K - 1, t % K - 1
        valid = (hi + dh >= 0) & (hi + dh < H) & (wi + dw >= 0) & (wi + dw < W)
        rows.append(valid.astype(np.float32))
    masks = jnp.asarray(np.stack(rows, axis=0))                     # (9, M) f32

    # ---- packed BN gamma/beta columns: [init | per-iter gfu,grx,fu,rx,gx] ----
    cols = [params["g_init"], params["b_init"]]
    for i in range(NUM_ITERATION):
        for name in ("gfu", "grx", "fu", "rx", "gx"):
            cols.append(params["g_" + name][i])
            cols.append(params["b_" + name][i])
    bnp = jnp.stack(cols, axis=1)                                   # (C, 2+10*ITER)

    kernel, margin = _make_grcl_kernel(N, H, W, C)
    out = pl.pallas_call(
        kernel,
        out_shape=jax.ShapeDtypeStruct((C, M), jnp.float32),
        scratch_shapes=[
            pltpu.VMEM((2 * C, M), jnp.float32),             # uhat
            pltpu.VMEM((K * K * C, M), jnp.bfloat16),        # recurrent im2col slab
            pltpu.VMEM((C, 2 * margin + M), jnp.bfloat16),   # margin-padded state
        ],
        compiler_params=pltpu.CompilerParams(vmem_limit_bytes=32 * 1024 * 1024),
    )(x_slab, wu, wrc, wgr, masks, bnp)
    # TODO(synk): for production sizes add a grid over batch/row tiles with
    # dimension_semantics=("parallel",...) to use both v7x TensorCores and stay
    # under its 64 MiB VMEM; BN stats would then need a cross-tile reduction.

    return jnp.transpose(out.reshape(C, N, H, W), (1, 0, 2, 3))     # NCHW


# =======================  pure-JAX reference (exact f32)  =======================

def _conv_nchw(x, w, pad):
    return jax.lax.conv_general_dilated(
        x, w, window_strides=(1, 1), padding=((pad, pad), (pad, pad)),
        dimension_numbers=("NCHW", "OIHW", "NCHW"),
        precision=jax.lax.Precision.HIGHEST)


def _bn_train(x, gamma, beta):
    mean = jnp.mean(x, axis=(0, 2, 3), keepdims=True)
    var = jnp.var(x, axis=(0, 2, 3), keepdims=True)   # biased, like PyTorch BN fwd
    return ((x - mean) / jnp.sqrt(var + EPS)) * gamma[None, :, None, None] \
        + beta[None, :, None, None]


def grcl_reference(x, params):
    wgf_u = _conv_nchw(x, params["Wgf"], 0)
    wf_u = _conv_nchw(x, params["Wf"], PAD)
    h = jax.nn.relu(_bn_train(wf_u, params["g_init"], params["b_init"]))
    for i in range(NUM_ITERATION):
        wgr_x = _conv_nchw(h, params["Wgr"], 0)
        wr_x = _conv_nchw(h, params["Wr"], PAD)
        G = jax.nn.sigmoid(_bn_train(wgf_u, params["g_gfu"][i], params["b_gfu"][i])
                           + _bn_train(wgr_x, params["g_grx"][i], params["b_grx"][i]))
        h = jax.nn.relu(
            _bn_train(wf_u, params["g_fu"][i], params["b_fu"][i])
            + _bn_train(_bn_train(wr_x, params["g_rx"][i], params["b_rx"][i]) * G,
                        params["g_gx"][i], params["b_gx"][i]))
    return h


# =======================  deterministic param init  =======================

def init_params(key):
    ks = jax.random.split(key, 5)

    def w(k, shape):
        return 0.1 * jax.random.normal(k, shape, jnp.float32)

    params = {
        "Wgf": w(ks[0], (OUTPUT_CHANNEL, INPUT_CHANNEL, 1, 1)),
        "Wgr": w(ks[1], (OUTPUT_CHANNEL, OUTPUT_CHANNEL, 1, 1)),
        "Wf": w(ks[2], (OUTPUT_CHANNEL, INPUT_CHANNEL, KERNEL_SIZE, KERNEL_SIZE)),
        "Wr": w(ks[3], (OUTPUT_CHANNEL, OUTPUT_CHANNEL, KERNEL_SIZE, KERNEL_SIZE)),
    }
    names = ["init", "gfu", "grx", "fu", "rx", "gx"]
    bn_keys = jax.random.split(ks[4], 2 * len(names))
    for j, name in enumerate(names):
        shape = (OUTPUT_CHANNEL,) if name == "init" else (NUM_ITERATION, OUTPUT_CHANNEL)
        params["g_" + name] = 1.0 + 0.1 * jax.random.normal(bn_keys[2 * j], shape, jnp.float32)
        params["b_" + name] = 0.05 * jax.random.normal(bn_keys[2 * j + 1], shape, jnp.float32)
    return params


# =======================  main  =======================

if __name__ == "__main__":
    key = jax.random.PRNGKey(0)
    pk, xk = jax.random.split(key)
    params = init_params(pk)

    N, H, W = 2, 8, 16
    x = jax.random.normal(xk, (N, INPUT_CHANNEL, H, W), jnp.float32)

    fwd = jax.jit(grcl_forward_pallas)
    out = jax.block_until_ready(fwd(x, params))

    ref = grcl_reference(x, params)
    assert out.shape == ref.shape == (N, OUTPUT_CHANNEL, H, W)
    # Tolerance covers bf16 MXU operands / bf16 recurrent state (the reference
    # uses exact HIGHEST-precision f32 convs).
    assert bool(jnp.allclose(out, ref, rtol=5e-2, atol=5e-2)), \
        float(jnp.max(jnp.abs(out - ref)))

    print("KERNEL_OK")
</pallas_src>

<mosaic_0001>
module attributes {stable_mosaic.version = 11 : i64} {
  func.func @kernel(%arg0: memref<144x256xbf16, #tpu.memory_space<vmem>>, %arg1: memref<64x144xbf16, #tpu.memory_space<vmem>>, %arg2: memref<32x288xbf16, #tpu.memory_space<vmem>>, %arg3: memref<32x32xbf16, #tpu.memory_space<vmem>>, %arg4: memref<9x256xf32, #tpu.memory_space<vmem>>, %arg5: memref<32x22xf32, #tpu.memory_space<vmem>>, %arg6: memref<32x256xf32, #tpu.memory_space<vmem>>, %arg7: memref<64x256xf32, #tpu.memory_space<vmem>>, %arg8: memref<288x256xbf16, #tpu.memory_space<vmem>>, %arg9: memref<32x512xbf16, #tpu.memory_space<vmem>>) attributes {dimension_semantics = [], scalar_prefetch = 0 : i64, scratch_operands = 3 : i64, tpu.core_type = #tpu.core_type<tc>} {
    %cst = arith.constant 0.000000e+00 : bf16
    %0 = vector.broadcast %cst : bf16 to vector<32x128xbf16>
    %c0 = arith.constant 0 : index
    %c0_0 = arith.constant 0 : index
    %1 = vector.load %arg9[%c0, %c0_0] : memref<32x512xbf16, #tpu.memory_space<vmem>>, vector<32x128xbf16>
    tpu.vector_store %arg9[%c0, %c0_0], %0 {strides = array<i32>} : memref<32x512xbf16, #tpu.memory_space<vmem>>, vector<32x128xbf16>,
    %c0_1 = arith.constant 0 : index
    %c384 = arith.constant 384 : index
    %2 = vector.load %arg9[%c0_1, %c384] : memref<32x512xbf16, #tpu.memory_space<vmem>>, vector<32x128xbf16>
    tpu.vector_store %arg9[%c0_1, %c384], %0 {strides = array<i32>} : memref<32x512xbf16, #tpu.memory_space<vmem>>, vector<32x128xbf16>,
    %c0_2 = arith.constant 0 : index
    %c0_3 = arith.constant 0 : index
    %3 = vector.load %arg1[%c0_2, %c0_3] : memref<64x144xbf16, #tpu.memory_space<vmem>>, vector<64x144xbf16>
    %c0_4 = arith.constant 0 : index
    %c0_5 = arith.constant 0 : index
    %4 = vector.load %arg0[%c0_4, %c0_5] : memref<144x256xbf16, #tpu.memory_space<vmem>>, vector<144x256xbf16>
    %cst_6 = arith.constant dense<0.000000e+00> : vector<64x256xf32>
    %5 = tpu.matmul %3, %4, %cst_6 {dimension_numbers = #tpu.dot_dimension_numbers<[1], [0], [0], [1], [0, 0, 1, 1], [], []>} : vector<64x144xbf16>, vector<144x256xbf16>, vector<64x256xf32> -> vector<64x256xf32>
    %cst_7 = arith.constant dense<0.000000e+00> : vector<64xf32>
    %6 = vector.multi_reduction <add>, %5, %cst_7 [1] : vector<64x256xf32> to vector<64xf32>
    %7 = vector.shape_cast %6 : vector<64xf32> to vector<64x1xf32>
    %cst_8 = arith.constant 3.906250e-03 : f32
    %8 = vector.broadcast %cst_8 : f32 to vector<64x1xf32>
    %9 = arith.mulf %7, %8 : vector<64x1xf32>
    %10 = vector.broadcast %9 : vector<64x1xf32> to vector<64x256xf32>
    %11 = arith.subf %5, %10 : vector<64x256xf32>
    %12 = arith.mulf %11, %11 : vector<64x256xf32>
    %cst_9 = arith.constant dense<0.000000e+00> : vector<64xf32>
    %13 = vector.multi_reduction <add>, %12, %cst_9 [1] : vector<64x256xf32> to vector<64xf32>
    %14 = vector.shape_cast %13 : vector<64xf32> to vector<64x1xf32>
    %cst_10 = arith.constant 3.906250e-03 : f32
    %15 = vector.broadcast %cst_10 : f32 to vector<64x1xf32>
    %16 = arith.mulf %14, %15 : vector<64x1xf32>
    %17 = vector.broadcast %9 : vector<64x1xf32> to vector<64x256xf32>
    %18 = arith.subf %5, %17 : vector<64x256xf32>
    %cst_11 = arith.constant 9.99999974E-6 : f32
    %19 = vector.broadcast %cst_11 : f32 to vector<64x1xf32>
    %20 = arith.addf %16, %19 : vector<64x1xf32>
    %21 = math.rsqrt %20 : vector<64x1xf32>
    %22 = vector.broadcast %21 : vector<64x1xf32> to vector<64x256xf32>
    %23 = arith.mulf %18, %22 : vector<64x256xf32>
    %c0_12 = arith.constant 0 : index
    %c0_13 = arith.constant 0 : index
    %24 = vector.load %arg7[%c0_12, %c0_13] : memref<64x256xf32, #tpu.memory_space<vmem>>, vector<64x256xf32>
    tpu.vector_store %arg7[%c0_12, %c0_13], %23 {strides = array<i32>} : memref<64x256xf32, #tpu.memory_space<vmem>>, vector<64x256xf32>,
    %c0_14 = arith.constant 0 : index
    %c0_15 = arith.constant 0 : index
    %25 = vector.load %arg7[%c0_14, %c0_15] : memref<64x256xf32, #tpu.memory_space<vmem>>, vector<32x256xf32>
    %c0_16 = arith.constant 0 : index
    %c0_17 = arith.constant 0 : index
    %26 = vector.load %arg5[%c0_16, %c0_17] : memref<32x22xf32, #tpu.memory_space<vmem>>, vector<32x1xf32>
    %27 = vector.broadcast %26 : vector<32x1xf32> to vector<32x256xf32>
    %28 = arith.mulf %25, %27 : vector<32x256xf32>
    %c0_18 = arith.constant 0 : index
    %c1 = arith.constant 1 : index
    %29 = vector.load %arg5[%c0_18, %c1] : memref<32x22xf32, #tpu.memory_space<vmem>>, vector<32x1xf32>
    %30 = vector.broadcast %29 : vector<32x1xf32> to vector<32x256xf32>
    %31 = arith.addf %28, %30 : vector<32x256xf32>
    %cst_19 = arith.constant 0.000000e+00 : f32
    %32 = vector.broadcast %cst_19 : f32 to vector<32x256xf32>
    %33 = arith.maximumf %31, %32 : vector<32x256xf32>
    %34 = arith.truncf %33 : vector<32x256xf32> to vector<32x256xbf16>
    %c0_20 = arith.constant 0 : index
    %c128 = arith.constant 128 : index
    %35 = vector.load %arg9[%c0_20, %c128] : memref<32x512xbf16, #tpu.memory_space<vmem>>, vector<32x256xbf16>
    tpu.vector_store %arg9[%c0_20, %c128], %34 {strides = array<i32>} : memref<32x512xbf16, #tpu.memory_space<vmem>>, vector<32x256xbf16>,
    %c0_21 = arith.constant 0 : index
    %c128_22 = arith.constant 128 : index
    %36 = vector.load %arg9[%c0_21, %c128_22] : memref<32x512xbf16, #tpu.memory_space<vmem>>, vector<32x256xbf16>
    %c0_23 = arith.constant 0 : index
    %c0_24 = arith.constant 0 : index
    %37 = vector.load %arg3[%c0_23, %c0_24] : memref<32x32xbf16, #tpu.memory_space<vmem>>, vector<32x32xbf16>
    %cst_25 = arith.constant dense<0.000000e+00> : vector<32x256xf32>
    %38 = tpu.matmul %37, %36, %cst_25 {dimension_numbers = #tpu.dot_dimension_numbers<[1], [0], [0], [1], [0, 0, 1, 1], [], []>} : vector<32x32xbf16>, vector<32x256xbf16>, vector<32x256xf32> -> vector<32x256xf32>
    %c32 = arith.constant 32 : index
    %c0_26 = arith.constant 0 : index
    %39 = vector.load %arg7[%c32, %c0_26] : memref<64x256xf32, #tpu.memory_space<vmem>>, vector<32x256xf32>
    %c0_27 = arith.constant 0 : index
    %c2 = arith.constant 2 : index
    %40 = vector.load %arg5[%c0_27, %c2] : memref<32x22xf32, #tpu.memory_space<vmem>>, vector<32x1xf32>
    %41 = vector.broadcast %40 : vector<32x1xf32> to vector<32x256xf32>
    %42 = arith.mulf %39, %41 : vector<32x256xf32>
    %c0_28 = arith.constant 0 : index
    %c3 = arith.constant 3 : index
    %43 = vector.load %arg5[%c0_28, %c3] : memref<32x22xf32, #tpu.memory_space<vmem>>, vector<32x1xf32>
    %44 = vector.broadcast %43 : vector<32x1xf32> to vector<32x256xf32>
    %45 = arith.addf %42, %44 : vector<32x256xf32>
    %cst_29 = arith.constant dense<0.000000e+00> : vector<32xf32>
    %46 = vector.multi_reduction <add>, %38, %cst_29 [1] : vector<32x256xf32> to vector<32xf32>
    %47 = vector.shape_cast %46 : vector<32xf32> to vector<32x1xf32>
    %cst_30 = arith.constant 3.906250e-03 : f32
    %48 = vector.broadcast %cst_30 : f32 to vector<32x1xf32>
    %49 = arith.mulf %47, %48 : vector<32x1xf32>
    %50 = vector.broadcast %49 : vector<32x1xf32> to vector<32x256xf32>
    %51 = arith.subf %38, %50 : vector<32x256xf32>
    %52 = arith.mulf %51, %51 : vector<32x256xf32>
    %cst_31 = arith.constant dense<0.000000e+00> : vector<32xf32>
    %53 = vector.multi_reduction <add>, %52, %cst_31 [1] : vector<32x256xf32> to vector<32xf32>
    %54 = vector.shape_cast %53 : vector<32xf32> to vector<32x1xf32>
    %cst_32 = arith.constant 3.906250e-03 : f32
    %55 = vector.broadcast %cst_32 : f32 to vector<32x1xf32>
    %56 = arith.mulf %54, %55 : vector<32x1xf32>
    %57 = vector.broadcast %49 : vector<32x1xf32> to vector<32x256xf32>
    %58 = arith.subf %38, %57 : vector<32x256xf32>
    %cst_33 = arith.constant 9.99999974E-6 : f32
    %59 = vector.broadcast %cst_33 : f32 to vector<32x1xf32>
    %60 = arith.addf %56, %59 : vector<32x1xf32>
    %61 = math.rsqrt %60 : vector<32x1xf32>
    %62 = vector.broadcast %61 : vector<32x1xf32> to vector<32x256xf32>
    %63 = arith.mulf %58, %62 : vector<32x256xf32>
    %c0_34 = arith.constant 0 : index
    %c4 = arith.constant 4 : index
    %64 = vector.load %arg5[%c0_34, %c4] : memref<32x22xf32, #tpu.memory_space<vmem>>, vector<32x1xf32>
    %65 = vector.broadcast %64 : vector<32x1xf32> to vector<32x256xf32>
    %66 = arith.mulf %63, %65 : vector<32x256xf32>
    %c0_35 = arith.constant 0 : index
    %c5 = arith.constant 5 : index
    %67 = vector.load %arg5[%c0_35, %c5] : memref<32x22xf32, #tpu.memory_space<vmem>>, vector<32x1xf32>
    %68 = vector.broadcast %67 : vector<32x1xf32> to vector<32x256xf32>
    %69 = arith.addf %66, %68 : vector<32x256xf32>
    %70 = arith.addf %45, %69 : vector<32x256xf32>
    %cst_36 = arith.constant 0.000000e+00 : f32
    %71 = vector.broadcast %cst_36 : f32 to vector<32x256xf32>
    %72 = arith.subf %71, %70 : vector<32x256xf32>
    %73 = math.exp %72 : vector<32x256xf32>
    %cst_37 = arith.constant 1.000000e+00 : f32
    %74 = vector.broadcast %cst_37 : f32 to vector<32x256xf32>
    %75 = arith.addf %74, %73 : vector<32x256xf32>
    %cst_38 = arith.constant 1.000000e+00 : f32
    %76 = vector.broadcast %cst_38 : f32 to vector<32x256xf32>
    %77 = arith.divf %76, %75 : vector<32x256xf32>
    %c0_39 = arith.constant 0 : index
    %c111 = arith.constant 111 : index
    %78 = vector.load %arg9[%c0_39, %c111] : memref<32x512xbf16, #tpu.memory_space<vmem>>, vector<32x256xbf16>
    %c0_40 = arith.constant 0 : index
    %c0_41 = arith.constant 0 : index
    %79 = vector.load %arg4[%c0_40, %c0_41] : memref<9x256xf32, #tpu.memory_space<vmem>>, vector<1x256xf32>
    %80 = arith.extf %78 : vector<32x256xbf16> to vector<32x256xf32>
    %81 = vector.broadcast %79 : vector<1x256xf32> to vector<32x256xf32>
    %82 = arith.mulf %80, %81 : vector<32x256xf32>
    %83 = arith.truncf %82 : vector<32x256xf32> to vector<32x256xbf16>
    %c0_42 = arith.constant 0 : index
    %c0_43 = arith.constant 0 : index
    %84 = vector.load %arg8[%c0_42, %c0_43] : memref<288x256xbf16, #tpu.memory_space<vmem>>, vector<32x256xbf16>
    tpu.vector_store %arg8[%c0_42, %c0_43], %83 {strides = array<i32>} : memref<288x256xbf16, #tpu.memory_space<vmem>>, vector<32x256xbf16>,
    %c0_44 = arith.constant 0 : index
    %c112 = arith.constant 112 : index
    %85 = vector.load %arg9[%c0_44, %c112] : memref<32x512xbf16, #tpu.memory_space<vmem>>, vector<32x256xbf16>
    %c1_45 = arith.constant 1 : index
    %c0_46 = arith.constant 0 : index
    %86 = vector.load %arg4[%c1_45, %c0_46] : memref<9x256xf32, #tpu.memory_space<vmem>>, vector<1x256xf32>
    %87 = arith.extf %85 : vector<32x256xbf16> to vector<32x256xf32>
    %88 = vector.broadcast %86 : vector<1x256xf32> to vector<32x256xf32>
    %89 = arith.mulf %87, %88 : vector<32x256xf32>
    %90 = arith.truncf %89 : vector<32x256xf32> to vector<32x256xbf16>
    %c32_47 = arith.constant 32 : index
    %c0_48 = arith.constant 0 : index
    %91 = vector.load %arg8[%c32_47, %c0_48] : memref<288x256xbf16, #tpu.memory_space<vmem>>, vector<32x256xbf16>
    tpu.vector_store %arg8[%c32_47, %c0_48], %90 {strides = array<i32>} : memref<288x256xbf16, #tpu.memory_space<vmem>>, vector<32x256xbf16>,
    %c0_49 = arith.constant 0 : index
    %c113 = arith.constant 113 : index
    %92 = vector.load %arg9[%c0_49, %c113] : memref<32x512xbf16, #tpu.memory_space<vmem>>, vector<32x256xbf16>
    %c2_50 = arith.constant 2 : index
    %c0_51 = arith.constant 0 : index
    %93 = vector.load %arg4[%c2_50, %c0_51] : memref<9x256xf32, #tpu.memory_space<vmem>>, vector<1x256xf32>
    %94 = arith.extf %92 : vector<32x256xbf16> to vector<32x256xf32>
    %95 = vector.broadcast %93 : vector<1x256xf32> to vector<32x256xf32>
    %96 = arith.mulf %94, %95 : vector<32x256xf32>
    %97 = arith.truncf %96 : vector<32x256xf32> to vector<32x256xbf16>
    %c64 = arith.constant 64 : index
    %c0_52 = arith.constant 0 : index
    %98 = vector.load %arg8[%c64, %c0_52] : memref<288x256xbf16, #tpu.memory_space<vmem>>, vector<32x256xbf16>
    tpu.vector_store %arg8[%c64, %c0_52], %97 {strides = array<i32>} : memref<288x256xbf16, #tpu.memory_space<vmem>>, vector<32x256xbf16>,
    %c0_53 = arith.constant 0 : index
    %c127 = arith.constant 127 : index
    %99 = vector.load %arg9[%c0_53, %c127] : memref<32x512xbf16, #tpu.memory_space<vmem>>, vector<32x256xbf16>
    %c3_54 = arith.constant 3 : index
    %c0_55 = arith.constant 0 : index
    %100 = vector.load %arg4[%c3_54, %c0_55] : memref<9x256xf32, #tpu.memory_space<vmem>>, vector<1x256xf32>
    %101 = arith.extf %99 : vector<32x256xbf16> to vector<32x256xf32>
    %102 = vector.broadcast %100 : vector<1x256xf32> to vector<32x256xf32>
    %103 = arith.mulf %101, %102 : vector<32x256xf32>
    %104 = arith.truncf %103 : vector<32x256xf32> to vector<32x256xbf16>
    %c96 = arith.constant 96 : index
    %c0_56 = arith.constant 0 : index
    %105 = vector.load %arg8[%c96, %c0_56] : memref<288x256xbf16, #tpu.memory_space<vmem>>, vector<32x256xbf16>
    tpu.vector_store %arg8[%c96, %c0_56], %104 {strides = array<i32>} : memref<288x256xbf16, #tpu.memory_space<vmem>>, vector<32x256xbf16>,
    %c0_57 = arith.constant 0 : index
    %c128_58 = arith.constant 128 : index
    %106 = vector.load %arg9[%c0_57, %c128_58] : memref<32x512xbf16, #tpu.memory_space<vmem>>, vector<32x256xbf16>
    %c4_59 = arith.constant 4 : index
    %c0_60 = arith.constant 0 : index
    %107 = vector.load %arg4[%c4_59, %c0_60] : memref<9x256xf32, #tpu.memory_space<vmem>>, vector<1x256xf32>
    %108 = arith.extf %106 : vector<32x256xbf16> to vector<32x256xf32>
    %109 = vector.broadcast %107 : vector<1x256xf32> to vector<32x256xf32>
    %110 = arith.mulf %108, %109 : vector<32x256xf32>
    %111 = arith.truncf %110 : vector<32x256xf32> to vector<32x256xbf16>
    %c128_61 = arith.constant 128 : index
    %c0_62 = arith.constant 0 : index
    %112 = vector.load %arg8[%c128_61, %c0_62] : memref<288x256xbf16, #tpu.memory_space<vmem>>, vector<32x256xbf16>
    tpu.vector_store %arg8[%c128_61, %c0_62], %111 {strides = array<i32>} : memref<288x256xbf16, #tpu.memory_space<vmem>>, vector<32x256xbf16>,
    %c0_63 = arith.constant 0 : index
    %c129 = arith.constant 129 : index
    %113 = vector.load %arg9[%c0_63, %c129] : memref<32x512xbf16, #tpu.memory_space<vmem>>, vector<32x256xbf16>
    %c5_64 = arith.constant 5 : index
    %c0_65 = arith.constant 0 : index
    %114 = vector.load %arg4[%c5_64, %c0_65] : memref<9x256xf32, #tpu.memory_space<vmem>>, vector<1x256xf32>
    %115 = arith.extf %113 : vector<32x256xbf16> to vector<32x256xf32>
    %116 = vector.broadcast %114 : vector<1x256xf32> to vector<32x256xf32>
    %117 = arith.mulf %115, %116 : vector<32x256xf32>
    %118 = arith.truncf %117 : vector<32x256xf32> to vector<32x256xbf16>
    %c160 = arith.constant 160 : index
    %c0_66 = arith.constant 0 : index
    %119 = vector.load %arg8[%c160, %c0_66] : memref<288x256xbf16, #tpu.memory_space<vmem>>, vector<32x256xbf16>
    tpu.vector_store %arg8[%c160, %c0_66], %118 {strides = array<i32>} : memref<288x256xbf16, #tpu.memory_space<vmem>>, vector<32x256xbf16>,
    %c0_67 = arith.constant 0 : index
    %c143 = arith.constant 143 : index
    %120 = vector.load %arg9[%c0_67, %c143] : memref<32x512xbf16, #tpu.memory_space<vmem>>, vector<32x256xbf16>
    %c6 = arith.constant 6 : index
    %c0_68 = arith.constant 0 : index
    %121 = vector.load %arg4[%c6, %c0_68] : memref<9x256xf32, #tpu.memory_space<vmem>>, vector<1x256xf32>
    %122 = arith.extf %120 : vector<32x256xbf16> to vector<32x256xf32>
    %123 = vector.broadcast %121 : vector<1x256xf32> to vector<32x256xf32>
    %124 = arith.mulf %122, %123 : vector<32x256xf32>
    %125 = arith.truncf %124 : vector<32x256xf32> to vector<32x256xbf16>
    %c192 = arith.constant 192 : index
    %c0_69 = arith.constant 0 : index
    %126 = vector.load %arg8[%c192, %c0_69] : memref<288x256xbf16, #tpu.memory_space<vmem>>, vector<32x256xbf16>
    tpu.vector_store %arg8[%c192, %c0_69], %125 {strides = array<i32>} : memref<288x256xbf16, #tpu.memory_space<vmem>>, vector<32x256xbf16>,
    %c0_70 = arith.constant 0 : index
    %c144 = arith.constant 144 : index
    %127 = vector.load %arg9[%c0_70, %c144] : memref<32x512xbf16, #tpu.memory_space<vmem>>, vector<32x256xbf16>
    %c7 = arith.constant 7 : index
    %c0_71 = arith.constant 0 : index
    %128 = vector.load %arg4[%c7, %c0_71] : memref<9x256xf32, #tpu.memory_space<vmem>>, vector<1x256xf32>
    %129 = arith.extf %127 : vector<32x256xbf16> to vector<32x256xf32>
    %130 = vector.broadcast %128 : vector<1x256xf32> to vector<32x256xf32>
    %131 = arith.mulf %129, %130 : vector<32x256xf32>
    %132 = arith.truncf %131 : vector<32x256xf32> to vector<32x256xbf16>
    %c224 = arith.constant 224 : index
    %c0_72 = arith.constant 0 : index
    %133 = vector.load %arg8[%c224, %c0_72] : memref<288x256xbf16, #tpu.memory_space<vmem>>, vector<32x256xbf16>
    tpu.vector_store %arg8[%c224, %c0_72], %132 {strides = array<i32>} : memref<288x256xbf16, #tpu.memory_space<vmem>>, vector<32x256xbf16>,
    %c0_73 = arith.constant 0 : index
    %c145 = arith.constant 145 : index
    %134 = vector.load %arg9[%c0_73, %c145] : memref<32x512xbf16, #tpu.memory_space<vmem>>, vector<32x256xbf16>
    %c8 = arith.constant 8 : index
    %c0_74 = arith.constant 0 : index
    %135 = vector.load %arg4[%c8, %c0_74] : memref<9x256xf32, #tpu.memory_space<vmem>>, vector<1x256xf32>
    %136 = arith.extf %134 : vector<32x256xbf16> to vector<32x256xf32>
    %137 = vector.broadcast %135 : vector<1x256xf32> to vector<32x256xf32>
    %138 = arith.mulf %136, %137 : vector<32x256xf32>
    %139 = arith.truncf %138 : vector<32x256xf32> to vector<32x256xbf16>
    %c256 = arith.constant 256 : index
    %c0_75 = arith.constant 0 : index
    %140 = vector.load %arg8[%c256, %c0_75] : memref<288x256xbf16, #tpu.memory_space<vmem>>, vector<32x256xbf16>
    tpu.vector_store %arg8[%c256, %c0_75], %139 {strides = array<i32>} : memref<288x256xbf16, #tpu.memory_space<vmem>>, vector<32x256xbf16>,
    %c0_76 = arith.constant 0 : index
    %c0_77 = arith.constant 0 : index
    %141 = vector.load %arg2[%c0_76, %c0_77] : memref<32x288xbf16, #tpu.memory_space<vmem>>, vector<32x288xbf16>
    %c0_78 = arith.constant 0 : index
    %c0_79 = arith.constant 0 : index
    %142 = vector.load %arg8[%c0_78, %c0_79] : memref<288x256xbf16, #tpu.memory_space<vmem>>, vector<288x256xbf16>
    %cst_80 = arith.constant dense<0.000000e+00> : vector<32x256xf32>
    %143 = tpu.matmul %141, %142, %cst_80 {dimension_numbers = #tpu.dot_dimension_numbers<[1], [0], [0], [1], [0, 0, 1, 1], [], []>} : vector<32x288xbf16>, vector<288x256xbf16>, vector<32x256xf32> -> vector<32x256xf32>
    %cst_81 = arith.constant dense<0.000000e+00> : vector<32xf32>
    %144 = vector.multi_reduction <add>, %143, %cst_81 [1] : vector<32x256xf32> to vector<32xf32>
    %145 = vector.shape_cast %144 : vector<32xf32> to vector<32x1xf32>
    %cst_82 = arith.constant 3.906250e-03 : f32
    %146 = vector.broadcast %cst_82 : f32 to vector<32x1xf32>
    %147 = arith.mulf %145, %146 : vector<32x1xf32>
    %148 = vector.broadcast %147 : vector<32x1xf32> to vector<32x256xf32>
    %149 = arith.subf %143, %148 : vector<32x256xf32>
    %150 = arith.mulf %149, %149 : vector<32x256xf32>
    %cst_83 = arith.constant dense<0.000000e+00> : vector<32xf32>
    %151 = vector.multi_reduction <add>, %150, %cst_83 [1] : vector<32x256xf32> to vector<32xf32>
    %152 = vector.shape_cast %151 : vector<32xf32> to vector<32x1xf32>
    %cst_84 = arith.constant 3.906250e-03 : f32
    %153 = vector.broadcast %cst_84 : f32 to vector<32x1xf32>
    %154 = arith.mulf %152, %153 : vector<32x1xf32>
    %155 = vector.broadcast %147 : vector<32x1xf32> to vector<32x256xf32>
    %156 = arith.subf %143, %155 : vector<32x256xf32>
    %cst_85 = arith.constant 9.99999974E-6 : f32
    %157 = vector.broadcast %cst_85 : f32 to vector<32x1xf32>
    %158 = arith.addf %154, %157 : vector<32x1xf32>
    %159 = math.rsqrt %158 : vector<32x1xf32>
    %160 = vector.broadcast %159 : vector<32x1xf32> to vector<32x256xf32>
    %161 = arith.mulf %156, %160 : vector<32x256xf32>
    %c0_86 = arith.constant 0 : index
    %c8_87 = arith.constant 8 : index
    %162 = vector.load %arg5[%c0_86, %c8_87] : memref<32x22xf32, #tpu.memory_space<vmem>>, vector<32x1xf32>
    %163 = vector.broadcast %162 : vector<32x1xf32> to vector<32x256xf32>
    %164 = arith.mulf %161, %163 : vector<32x256xf32>
    %c0_88 = arith.constant 0 : index
    %c9 = arith.constant 9 : index
    %165 = vector.load %arg5[%c0_88, %c9] : memref<32x22xf32, #tpu.memory_space<vmem>>, vector<32x1xf32>
    %166 = vector.broadcast %165 : vector<32x1xf32> to vector<32x256xf32>
    %167 = arith.addf %164, %166 : vector<32x256xf32>
    %168 = arith.mulf %167, %77 : vector<32x256xf32>
    %c0_89 = arith.constant 0 : index
    %c0_90 = arith.constant 0 : index
    %169 = vector.load %arg7[%c0_89, %c0_90] : memref<64x256xf32, #tpu.memory_space<vmem>>, vector<32x256xf32>
    %c0_91 = arith.constant 0 : index
    %c6_92 = arith.constant 6 : index
    %170 = vector.load %arg5[%c0_91, %c6_92] : memref<32x22xf32, #tpu.memory_space<vmem>>, vector<32x1xf32>
    %171 = vector.broadcast %170 : vector<32x1xf32> to vector<32x256xf32>
    %172 = arith.mulf %169, %171 : vector<32x256xf32>
    %c0_93 = arith.constant 0 : index
    %c7_94 = arith.constant 7 : index
    %173 = vector.load %arg5[%c0_93, %c7_94] : memref<32x22xf32, #tpu.memory_space<vmem>>, vector<32x1xf32>
    %174 = vector.broadcast %173 : vector<32x1xf32> to vector<32x256xf32>
    %175 = arith.addf %172, %174 : vector<32x256xf32>
    %cst_95 = arith.constant dense<0.000000e+00> : vector<32xf32>
    %176 = vector.multi_reduction <add>, %168, %cst_95 [1] : vector<32x256xf32> to vector<32xf32>
    %177 = vector.shape_cast %176 : vector<32xf32> to vector<32x1xf32>
    %cst_96 = arith.constant 3.906250e-03 : f32
    %178 = vector.broadcast %cst_96 : f32 to vector<32x1xf32>
    %179 = arith.mulf %177, %178 : vector<32x1xf32>
    %180 = vector.broadcast %179 : vector<32x1xf32> to vector<32x256xf32>
    %181 = arith.subf %168, %180 : vector<32x256xf32>
    %182 = arith.mulf %181, %181 : vector<32x256xf32>
    %cst_97 = arith.constant dense<0.000000e+00> : vector<32xf32>
    %183 = vector.multi_reduction <add>, %182, %cst_97 [1] : vector<32x256xf32> to vector<32xf32>
    %184 = vector.shape_cast %183 : vector<32xf32> to vector<32x1xf32>
    %cst_98 = arith.constant 3.906250e-03 : f32
    %185 = vector.broadcast %cst_98 : f32 to vector<32x1xf32>
    %186 = arith.mulf %184, %185 : vector<32x1xf32>
    %187 = vector.broadcast %179 : vector<32x1xf32> to vector<32x256xf32>
    %188 = arith.subf %168, %187 : vector<32x256xf32>
    %cst_99 = arith.constant 9.99999974E-6 : f32
    %189 = vector.broadcast %cst_99 : f32 to vector<32x1xf32>
    %190 = arith.addf %186, %189 : vector<32x1xf32>
    %191 = math.rsqrt %190 : vector<32x1xf32>
    %192 = vector.broadcast %191 : vector<32x1xf32> to vector<32x256xf32>
    %193 = arith.mulf %188, %192 : vector<32x256xf32>
    %c0_100 = arith.constant 0 : index
    %c10 = arith.constant 10 : index
    %194 = vector.load %arg5[%c0_100, %c10] : memref<32x22xf32, #tpu.memory_space<vmem>>, vector<32x1xf32>
    %195 = vector.broadcast %194 : vector<32x1xf32> to vector<32x256xf32>
    %196 = arith.mulf %193, %195 : vector<32x256xf32>
    %c0_101 = arith.constant 0 : index
    %c11 = arith.constant 11 : index
    %197 = vector.load %arg5[%c0_101, %c11] : memref<32x22xf32, #tpu.memory_space<vmem>>, vector<32x1xf32>
    %198 = vector.broadcast %197 : vector<32x1xf32> to vector<32x256xf32>
    %199 = arith.addf %196, %198 : vector<32x256xf32>
    %200 = arith.addf %175, %199 : vector<32x256xf32>
    %cst_102 = arith.constant 0.000000e+00 : f32
    %201 = vector.broadcast %cst_102 : f32 to vector<32x256xf32>
    %202 = arith.maximumf %200, %201 : vector<32x256xf32>
    %203 = arith.truncf %202 : vector<32x256xf32> to vector<32x256xbf16>
    %c0_103 = arith.constant 0 : index
    %c128_104 = arith.constant 128 : index
    %204 = vector.load %arg9[%c0_103, %c128_104] : memref<32x512xbf16, #tpu.memory_space<vmem>>, vector<32x256xbf16>
    tpu.vector_store %arg9[%c0_103, %c128_104], %203 {strides = array<i32>} : memref<32x512xbf16, #tpu.memory_space<vmem>>, vector<32x256xbf16>,
    %c0_105 = arith.constant 0 : index
    %c128_106 = arith.constant 128 : index
    %205 = vector.load %arg9[%c0_105, %c128_106] : memref<32x512xbf16, #tpu.memory_space<vmem>>, vector<32x256xbf16>
    %c0_107 = arith.constant 0 : index
    %c0_108 = arith.constant 0 : index
    %206 = vector.load %arg3[%c0_107, %c0_108] : memref<32x32xbf16, #tpu.memory_space<vmem>>, vector<32x32xbf16>
    %cst_109 = arith.constant dense<0.000000e+00> : vector<32x256xf32>
    %207 = tpu.matmul %206, %205, %cst_109 {dimension_numbers = #tpu.dot_dimension_numbers<[1], [0], [0], [1], [0, 0, 1, 1], [], []>} : vector<32x32xbf16>, vector<32x256xbf16>, vector<32x256xf32> -> vector<32x256xf32>
    %c32_110 = arith.constant 32 : index
    %c0_111 = arith.constant 0 : index
    %208 = vector.load %arg7[%c32_110, %c0_111] : memref<64x256xf32, #tpu.memory_space<vmem>>, vector<32x256xf32>
    %c0_112 = arith.constant 0 : index
    %c12 = arith.constant 12 : index
    %209 = vector.load %arg5[%c0_112, %c12] : memref<32x22xf32, #tpu.memory_space<vmem>>, vector<32x1xf32>
    %210 = vector.broadcast %209 : vector<32x1xf32> to vector<32x256xf32>
    %211 = arith.mulf %208, %210 : vector<32x256xf32>
    %c0_113 = arith.constant 0 : index
    %c13 = arith.constant 13 : index
    %212 = vector.load %arg5[%c0_113, %c13] : memref<32x22xf32, #tpu.memory_space<vmem>>, vector<32x1xf32>
    %213 = vector.broadcast %212 : vector<32x1xf32> to vector<32x256xf32>
    %214 = arith.addf %211, %213 : vector<32x256xf32>
    %cst_114 = arith.constant dense<0.000000e+00> : vector<32xf32>
    %215 = vector.multi_reduction <add>, %207, %cst_114 [1] : vector<32x256xf32> to vector<32xf32>
    %216 = vector.shape_cast %215 : vector<32xf32> to vector<32x1xf32>
    %cst_115 = arith.constant 3.906250e-03 : f32
    %217 = vector.broadcast %cst_115 : f32 to vector<32x1xf32>
    %218 = arith.mulf %216, %217 : vector<32x1xf32>
    %219 = vector.broadcast %218 : vector<32x1xf32> to vector<32x256xf32>
    %220 = arith.subf %207, %219 : vector<32x256xf32>
    %221 = arith.mulf %220, %220 : vector<32x256xf32>
    %cst_116 = arith.constant dense<0.000000e+00> : vector<32xf32>
    %222 = vector.multi_reduction <add>, %221, %cst_116 [1] : vector<32x256xf32> to vector<32xf32>
    %223 = vector.shape_cast %222 : vector<32xf32> to vector<32x1xf32>
    %cst_117 = arith.constant 3.906250e-03 : f32
    %224 = vector.broadcast %cst_117 : f32 to vector<32x1xf32>
    %225 = arith.mulf %223, %224 : vector<32x1xf32>
    %226 = vector.broadcast %218 : vector<32x1xf32> to vector<32x256xf32>
    %227 = arith.subf %207, %226 : vector<32x256xf32>
    %cst_118 = arith.constant 9.99999974E-6 : f32
    %228 = vector.broadcast %cst_118 : f32 to vector<32x1xf32>
    %229 = arith.addf %225, %228 : vector<32x1xf32>
    %230 = math.rsqrt %229 : vector<32x1xf32>
    %231 = vector.broadcast %230 : vector<32x1xf32> to vector<32x256xf32>
    %232 = arith.mulf %227, %231 : vector<32x256xf32>
    %c0_119 = arith.constant 0 : index
    %c14 = arith.constant 14 : index
    %233 = vector.load %arg5[%c0_119, %c14] : memref<32x22xf32, #tpu.memory_space<vmem>>, vector<32x1xf32>
    %234 = vector.broadcast %233 : vector<32x1xf32> to vector<32x256xf32>
    %235 = arith.mulf %232, %234 : vector<32x256xf32>
    %c0_120 = arith.constant 0 : index
    %c15 = arith.constant 15 : index
    %236 = vector.load %arg5[%c0_120, %c15] : memref<32x22xf32, #tpu.memory_space<vmem>>, vector<32x1xf32>
    %237 = vector.broadcast %236 : vector<32x1xf32> to vector<32x256xf32>
    %238 = arith.addf %235, %237 : vector<32x256xf32>
    %239 = arith.addf %214, %238 : vector<32x256xf32>
    %cst_121 = arith.constant 0.000000e+00 : f32
    %240 = vector.broadcast %cst_121 : f32 to vector<32x256xf32>
    %241 = arith.subf %240, %239 : vector<32x256xf32>
    %242 = math.exp %241 : vector<32x256xf32>
    %cst_122 = arith.constant 1.000000e+00 : f32
    %243 = vector.broadcast %cst_122 : f32 to vector<32x256xf32>
    %244 = arith.addf %243, %242 : vector<32x256xf32>
    %cst_123 = arith.constant 1.000000e+00 : f32
    %245 = vector.broadcast %cst_123 : f32 to vector<32x256xf32>
    %246 = arith.divf %245, %244 : vector<32x256xf32>
    %c0_124 = arith.constant 0 : index
    %c111_125 = arith.constant 111 : index
    %247 = vector.load %arg9[%c0_124, %c111_125] : memref<32x512xbf16, #tpu.memory_space<vmem>>, vector<32x256xbf16>
    %c0_126 = arith.constant 0 : index
    %c0_127 = arith.constant 0 : index
    %248 = vector.load %arg4[%c0_126, %c0_127] : memref<9x256xf32, #tpu.memory_space<vmem>>, vector<1x256xf32>
    %249 = arith.extf %247 : vector<32x256xbf16> to vector<32x256xf32>
    %250 = vector.broadcast %248 : vector<1x256xf32> to vector<32x256xf32>
    %251 = arith.mulf %249, %250 : vector<32x256xf32>
    %252 = arith.truncf %251 : vector<32x256xf32> to vector<32x256xbf16>
    %c0_128 = arith.constant 0 : index
    %c0_129 = arith.constant 0 : index
    %253 = vector.load %arg8[%c0_128, %c0_129] : memref<288x256xbf16, #tpu.memory_space<vmem>>, vector<32x256xbf16>
    tpu.vector_store %arg8[%c0_128, %c0_129], %252 {strides = array<i32>} : memref<288x256xbf16, #tpu.memory_space<vmem>>, vector<32x256xbf16>,
    %c0_130 = arith.constant 0 : index
    %c112_131 = arith.constant 112 : index
    %254 = vector.load %arg9[%c0_130, %c112_131] : memref<32x512xbf16, #tpu.memory_space<vmem>>, vector<32x256xbf16>
    %c1_132 = arith.constant 1 : index
    %c0_133 = arith.constant 0 : index
    %255 = vector.load %arg4[%c1_132, %c0_133] : memref<9x256xf32, #tpu.memory_space<vmem>>, vector<1x256xf32>
    %256 = arith.extf %254 : vector<32x256xbf16> to vector<32x256xf32>
    %257 = vector.broadcast %255 : vector<1x256xf32> to vector<32x256xf32>
    %258 = arith.mulf %256, %257 : vector<32x256xf32>
    %259 = arith.truncf %258 : vector<32x256xf32> to vector<32x256xbf16>
    %c32_134 = arith.constant 32 : index
    %c0_135 = arith.constant 0 : index
    %260 = vector.load %arg8[%c32_134, %c0_135] : memref<288x256xbf16, #tpu.memory_space<vmem>>, vector<32x256xbf16>
    tpu.vector_store %arg8[%c32_134, %c0_135], %259 {strides = array<i32>} : memref<288x256xbf16, #tpu.memory_space<vmem>>, vector<32x256xbf16>,
    %c0_136 = arith.constant 0 : index
    %c113_137 = arith.constant 113 : index
    %261 = vector.load %arg9[%c0_136, %c113_137] : memref<32x512xbf16, #tpu.memory_space<vmem>>, vector<32x256xbf16>
    %c2_138 = arith.constant 2 : index
    %c0_139 = arith.constant 0 : index
    %262 = vector.load %arg4[%c2_138, %c0_139] : memref<9x256xf32, #tpu.memory_space<vmem>>, vector<1x256xf32>
    %263 = arith.extf %261 : vector<32x256xbf16> to vector<32x256xf32>
    %264 = vector.broadcast %262 : vector<1x256xf32> to vector<32x256xf32>
    %265 = arith.mulf %263, %264 : vector<32x256xf32>
    %266 = arith.truncf %265 : vector<32x256xf32> to vector<32x256xbf16>
    %c64_140 = arith.constant 64 : index
    %c0_141 = arith.constant 0 : index
    %267 = vector.load %arg8[%c64_140, %c0_141] : memref<288x256xbf16, #tpu.memory_space<vmem>>, vector<32x256xbf16>
    tpu.vector_store %arg8[%c64_140, %c0_141], %266 {strides = array<i32>} : memref<288x256xbf16, #tpu.memory_space<vmem>>, vector<32x256xbf16>,
    %c0_142 = arith.constant 0 : index
    %c127_143 = arith.constant 127 : index
    %268 = vector.load %arg9[%c0_142, %c127_143] : memref<32x512xbf16, #tpu.memory_space<vmem>>, vector<32x256xbf16>
    %c3_144 = arith.constant 3 : index
    %c0_145 = arith.constant 0 : index
    %269 = vector.load %arg4[%c3_144, %c0_145] : memref<9x256xf32, #tpu.memory_space<vmem>>, vector<1x256xf32>
    %270 = arith.extf %268 : vector<32x256xbf16> to vector<32x256xf32>
    %271 = vector.broadcast %269 : vector<1x256xf32> to vector<32x256xf32>
    %272 = arith.mulf %270, %271 : vector<32x256xf32>
    %273 = arith.truncf %272 : vector<32x256xf32> to vector<32x256xbf16>
    %c96_146 = arith.constant 96 : index
    %c0_147 = arith.constant 0 : index
    %274 = vector.load %arg8[%c96_146, %c0_147] : memref<288x256xbf16, #tpu.memory_space<vmem>>, vector<32x256xbf16>
    tpu.vector_store %arg8[%c96_146, %c0_147], %273 {strides = array<i32>} : memref<288x256xbf16, #tpu.memory_space<vmem>>, vector<32x256xbf16>,
    %c0_148 = arith.constant 0 : index
    %c128_149 = arith.constant 128 : index
    %275 = vector.load %arg9[%c0_148, %c128_149] : memref<32x512xbf16, #tpu.memory_space<vmem>>, vector<32x256xbf16>
    %c4_150 = arith.constant 4 : index
    %c0_151 = arith.constant 0 : index
    %276 = vector.load %arg4[%c4_150, %c0_151] : memref<9x256xf32, #tpu.memory_space<vmem>>, vector<1x256xf32>
    %277 = arith.extf %275 : vector<32x256xbf16> to vector<32x256xf32>
    %278 = vector.broadcast %276 : vector<1x256xf32> to vector<32x256xf32>
    %279 = arith.mulf %277, %278 : vector<32x256xf32>
    %280 = arith.truncf %279 : vector<32x256xf32> to vector<32x256xbf16>
    %c128_152 = arith.constant 128 : index
    %c0_153 = arith.constant 0 : index
    %281 = vector.load %arg8[%c128_152, %c0_153] : memref<288x256xbf16, #tpu.memory_space<vmem>>, vector<32x256xbf16>
    tpu.vector_store %arg8[%c128_152, %c0_153], %280 {strides = array<i32>} : memref<288x256xbf16, #tpu.memory_space<vmem>>, vector<32x256xbf16>,
    %c0_154 = arith.constant 0 : index
    %c129_155 = arith.constant 129 : index
    %282 = vector.load %arg9[%c0_154, %c129_155] : memref<32x512xbf16, #tpu.memory_space<vmem>>, vector<32x256xbf16>
    %c5_156 = arith.constant 5 : index
    %c0_157 = arith.constant 0 : index
    %283 = vector.load %arg4[%c5_156, %c0_157] : memref<9x256xf32, #tpu.memory_space<vmem>>, vector<1x256xf32>
    %284 = arith.extf %282 : vector<32x256xbf16> to vector<32x256xf32>
    %285 = vector.broadcast %283 : vector<1x256xf32> to vector<32x256xf32>
    %286 = arith.mulf %284, %285 : vector<32x256xf32>
    %287 = arith.truncf %286 : vector<32x256xf32> to vector<32x256xbf16>
    %c160_158 = arith.constant 160 : index
    %c0_159 = arith.constant 0 : index
    %288 = vector.load %arg8[%c160_158, %c0_159] : memref<288x256xbf16, #tpu.memory_space<vmem>>, vector<32x256xbf16>
    tpu.vector_store %arg8[%c160_158, %c0_159], %287 {strides = array<i32>} : memref<288x256xbf16, #tpu.memory_space<vmem>>, vector<32x256xbf16>,
    %c0_160 = arith.constant 0 : index
    %c143_161 = arith.constant 143 : index
    %289 = vector.load %arg9[%c0_160, %c143_161] : memref<32x512xbf16, #tpu.memory_space<vmem>>, vector<32x256xbf16>
    %c6_162 = arith.constant 6 : index
    %c0_163 = arith.constant 0 : index
    %290 = vector.load %arg4[%c6_162, %c0_163] : memref<9x256xf32, #tpu.memory_space<vmem>>, vector<1x256xf32>
    %291 = arith.extf %289 : vector<32x256xbf16> to vector<32x256xf32>
    %292 = vector.broadcast %290 : vector<1x256xf32> to vector<32x256xf32>
    %293 = arith.mulf %291, %292 : vector<32x256xf32>
    %294 = arith.truncf %293 : vector<32x256xf32> to vector<32x256xbf16>
    %c192_164 = arith.constant 192 : index
    %c0_165 = arith.constant 0 : index
    %295 = vector.load %arg8[%c192_164, %c0_165] : memref<288x256xbf16, #tpu.memory_space<vmem>>, vector<32x256xbf16>
    tpu.vector_store %arg8[%c192_164, %c0_165], %294 {strides = array<i32>} : memref<288x256xbf16, #tpu.memory_space<vmem>>, vector<32x256xbf16>,
    %c0_166 = arith.constant 0 : index
    %c144_167 = arith.constant 144 : index
    %296 = vector.load %arg9[%c0_166, %c144_167] : memref<32x512xbf16, #tpu.memory_space<vmem>>, vector<32x256xbf16>
    %c7_168 = arith.constant 7 : index
    %c0_169 = arith.constant 0 : index
    %297 = vector.load %arg4[%c7_168, %c0_169] : memref<9x256xf32, #tpu.memory_space<vmem>>, vector<1x256xf32>
    %298 = arith.extf %296 : vector<32x256xbf16> to vector<32x256xf32>
    %299 = vector.broadcast %297 : vector<1x256xf32> to vector<32x256xf32>
    %300 = arith.mulf %298, %299 : vector<32x256xf32>
    %301 = arith.truncf %300 : vector<32x256xf32> to vector<32x256xbf16>
    %c224_170 = arith.constant 224 : index
    %c0_171 = arith.constant 0 : index
    %302 = vector.load %arg8[%c224_170, %c0_171] : memref<288x256xbf16, #tpu.memory_space<vmem>>, vector<32x256xbf16>
    tpu.vector_store %arg8[%c224_170, %c0_171], %301 {strides = array<i32>} : memref<288x256xbf16, #tpu.memory_space<vmem>>, vector<32x256xbf16>,
    %c0_172 = arith.constant 0 : index
    %c145_173 = arith.constant 145 : index
    %303 = vector.load %arg9[%c0_172, %c145_173] : memref<32x512xbf16, #tpu.memory_space<vmem>>, vector<32x256xbf16>
    %c8_174 = arith.constant 8 : index
    %c0_175 = arith.constant 0 : index
    %304 = vector.load %arg4[%c8_174, %c0_175] : memref<9x256xf32, #tpu.memory_space<vmem>>, vector<1x256xf32>
    %305 = arith.extf %303 : vector<32x256xbf16> to vector<32x256xf32>
    %306 = vector.broadcast %304 : vector<1x256xf32> to vector<32x256xf32>
    %307 = arith.mulf %305, %306 : vector<32x256xf32>
    %308 = arith.truncf %307 : vector<32x256xf32> to vector<32x256xbf16>
    %c256_176 = arith.constant 256 : index
    %c0_177 = arith.constant 0 : index
    %309 = vector.load %arg8[%c256_176, %c0_177] : memref<288x256xbf16, #tpu.memory_space<vmem>>, vector<32x256xbf16>
    tpu.vector_store %arg8[%c256_176, %c0_177], %308 {strides = array<i32>} : memref<288x256xbf16, #tpu.memory_space<vmem>>, vector<32x256xbf16>,
    %c0_178 = arith.constant 0 : index
    %c0_179 = arith.constant 0 : index
    %310 = vector.load %arg2[%c0_178, %c0_179] : memref<32x288xbf16, #tpu.memory_space<vmem>>, vector<32x288xbf16>
    %c0_180 = arith.constant 0 : index
    %c0_181 = arith.constant 0 : index
    %311 = vector.load %arg8[%c0_180, %c0_181] : memref<288x256xbf16, #tpu.memory_space<vmem>>, vector<288x256xbf16>
    %cst_182 = arith.constant dense<0.000000e+00> : vector<32x256xf32>
    %312 = tpu.matmul %310, %311, %cst_182 {dimension_numbers = #tpu.dot_dimension_numbers<[1], [0], [0], [1], [0, 0, 1, 1], [], []>} : vector<32x288xbf16>, vector<288x256xbf16>, vector<32x256xf32> -> vector<32x256xf32>
    %cst_183 = arith.constant dense<0.000000e+00> : vector<32xf32>
    %313 = vector.multi_reduction <add>, %312, %cst_183 [1] : vector<32x256xf32> to vector<32xf32>
    %314 = vector.shape_cast %313 : vector<32xf32> to vector<32x1xf32>
    %cst_184 = arith.constant 3.906250e-03 : f32
    %315 = vector.broadcast %cst_184 : f32 to vector<32x1xf32>
    %316 = arith.mulf %314, %315 : vector<32x1xf32>
    %317 = vector.broadcast %316 : vector<32x1xf32> to vector<32x256xf32>
    %318 = arith.subf %312, %317 : vector<32x256xf32>
    %319 = arith.mulf %318, %318 : vector<32x256xf32>
    %cst_185 = arith.constant dense<0.000000e+00> : vector<32xf32>
    %320 = vector.multi_reduction <add>, %319, %cst_185 [1] : vector<32x256xf32> to vector<32xf32>
    %321 = vector.shape_cast %320 : vector<32xf32> to vector<32x1xf32>
    %cst_186 = arith.constant 3.906250e-03 : f32
    %322 = vector.broadcast %cst_186 : f32 to vector<32x1xf32>
    %323 = arith.mulf %321, %322 : vector<32x1xf32>
    %324 = vector.broadcast %316 : vector<32x1xf32> to vector<32x256xf32>
    %325 = arith.subf %312, %324 : vector<32x256xf32>
    %cst_187 = arith.constant 9.99999974E-6 : f32
    %326 = vector.broadcast %cst_187 : f32 to vector<32x1xf32>
    %327 = arith.addf %323, %326 : vector<32x1xf32>
    %328 = math.rsqrt %327 : vector<32x1xf32>
    %329 = vector.broadcast %328 : vector<32x1xf32> to vector<32x256xf32>
    %330 = arith.mulf %325, %329 : vector<32x256xf32>
    %c0_188 = arith.constant 0 : index
    %c18 = arith.constant 18 : index
    %331 = vector.load %arg5[%c0_188, %c18] : memref<32x22xf32, #tpu.memory_space<vmem>>, vector<32x1xf32>
    %332 = vector.broadcast %331 : vector<32x1xf32> to vector<32x256xf32>
    %333 = arith.mulf %330, %332 : vector<32x256xf32>
    %c0_189 = arith.constant 0 : index
    %c19 = arith.constant 19 : index
    %334 = vector.load %arg5[%c0_189, %c19] : memref<32x22xf32, #tpu.memory_space<vmem>>, vector<32x1xf32>
    %335 = vector.broadcast %334 : vector<32x1xf32> to vector<32x256xf32>
    %336 = arith.addf %333, %335 : vector<32x256xf32>
    %337 = arith.mulf %336, %246 : vector<32x256xf32>
    %c0_190 = arith.constant 0 : index
    %c0_191 = arith.constant 0 : index
    %338 = vector.load %arg7[%c0_190, %c0_191] : memref<64x256xf32, #tpu.memory_space<vmem>>, vector<32x256xf32>
    %c0_192 = arith.constant 0 : index
    %c16 = arith.constant 16 : index
    %339 = vector.load %arg5[%c0_192, %c16] : memref<32x22xf32, #tpu.memory_space<vmem>>, vector<32x1xf32>
    %340 = vector.broadcast %339 : vector<32x1xf32> to vector<32x256xf32>
    %341 = arith.mulf %338, %340 : vector<32x256xf32>
    %c0_193 = arith.constant 0 : index
    %c17 = arith.constant 17 : index
    %342 = vector.load %arg5[%c0_193, %c17] : memref<32x22xf32, #tpu.memory_space<vmem>>, vector<32x1xf32>
    %343 = vector.broadcast %342 : vector<32x1xf32> to vector<32x256xf32>
    %344 = arith.addf %341, %343 : vector<32x256xf32>
    %cst_194 = arith.constant dense<0.000000e+00> : vector<32xf32>
    %345 = vector.multi_reduction <add>, %337, %cst_194 [1] : vector<32x256xf32> to vector<32xf32>
    %346 = vector.shape_cast %345 : vector<32xf32> to vector<32x1xf32>
    %cst_195 = arith.constant 3.906250e-03 : f32
    %347 = vector.broadcast %cst_195 : f32 to vector<32x1xf32>
    %348 = arith.mulf %346, %347 : vector<32x1xf32>
    %349 = vector.broadcast %348 : vector<32x1xf32> to vector<32x256xf32>
    %350 = arith.subf %337, %349 : vector<32x256xf32>
    %351 = arith.mulf %350, %350 : vector<32x256xf32>
    %cst_196 = arith.constant dense<0.000000e+00> : vector<32xf32>
    %352 = vector.multi_reduction <add>, %351, %cst_196 [1] : vector<32x256xf32> to vector<32xf32>
    %353 = vector.shape_cast %352 : vector<32xf32> to vector<32x1xf32>
    %cst_197 = arith.constant 3.906250e-03 : f32
    %354 = vector.broadcast %cst_197 : f32 to vector<32x1xf32>
    %355 = arith.mulf %353, %354 : vector<32x1xf32>
    %356 = vector.broadcast %348 : vector<32x1xf32> to vector<32x256xf32>
    %357 = arith.subf %337, %356 : vector<32x256xf32>
    %cst_198 = arith.constant 9.99999974E-6 : f32
    %358 = vector.broadcast %cst_198 : f32 to vector<32x1xf32>
    %359 = arith.addf %355, %358 : vector<32x1xf32>
    %360 = math.rsqrt %359 : vector<32x1xf32>
    %361 = vector.broadcast %360 : vector<32x1xf32> to vector<32x256xf32>
    %362 = arith.mulf %357, %361 : vector<32x256xf32>
    %c0_199 = arith.constant 0 : index
    %c20 = arith.constant 20 : index
    %363 = vector.load %arg5[%c0_199, %c20] : memref<32x22xf32, #tpu.memory_space<vmem>>, vector<32x1xf32>
    %364 = vector.broadcast %363 : vector<32x1xf32> to vector<32x256xf32>
    %365 = arith.mulf %362, %364 : vector<32x256xf32>
    %c0_200 = arith.constant 0 : index
    %c21 = arith.constant 21 : index
    %366 = vector.load %arg5[%c0_200, %c21] : memref<32x22xf32, #tpu.memory_space<vmem>>, vector<32x1xf32>
    %367 = vector.broadcast %366 : vector<32x1xf32> to vector<32x256xf32>
    %368 = arith.addf %365, %367 : vector<32x256xf32>
    %369 = arith.addf %344, %368 : vector<32x256xf32>
    %cst_201 = arith.constant 0.000000e+00 : f32
    %370 = vector.broadcast %cst_201 : f32 to vector<32x256xf32>
    %371 = arith.maximumf %369, %370 : vector<32x256xf32>
    %c0_202 = arith.constant 0 : index
    %c0_203 = arith.constant 0 : index
    %372 = vector.load %arg6[%c0_202, %c0_203] : memref<32x256xf32, #tpu.memory_space<vmem>>, vector<32x256xf32>
    tpu.vector_store %arg6[%c0_202, %c0_203], %371 {strides = array<i32>} : memref<32x256xf32, #tpu.memory_space<vmem>>, vector<32x256xf32>,
    return
  }
}

</mosaic_0001>

<bundles_post_ra>
// kernel: grcl_forward_pallas.1
= control target key start
LH: loop header
LB: loop body
LE: loop exit
PB: predicated region body
PF: predicated region fallthrough
CT: control target
= control target key end

     0   :  { %v5629_v0 = vmov 0   ;;  %v5630_v5 = vmov 1   ;;  %v5631_v6 = vmov 2   ;;  %v5632_v7 = vmov 3   ;;  %s5634_s11 = smov 16   ;;  %s5635_s30 = smov 127   ;;  %s8714_s5 = inlined_call_operand.vmem [shape: f32[32,22], index: 5, kind: input, shape index: {}]   ;;  %s8715_s0 = inlined_call_operand.vmem [shape: bf16[144,256], index: 0, kind: input, shape index: {}]   ;;  %s8716_s4 = inlined_call_operand.vmem [shape: f32[9,256], index: 4, kind: input, shape index: {}]   ;;  %s8717_s1 = inlined_call_operand.vmem [shape: bf16[64,144], index: 1, kind: input, shape index: {}]   ;;  %s8718_s3 = inlined_call_operand.vmem [shape: bf16[32,32], index: 3, kind: input, shape index: {}]   ;;  %s8719_s2 = inlined_call_operand.vmem [shape: bf16[32,288], index: 2, kind: input, shape index: {}]   ;;  %s8720_s6 = inlined_call_operand.vmem [shape: f32[32,256], index: 6, kind: output, shape index: {}]  }
   0x1   :  { %5436 = vset.pattern.permute.xlu1 %v5629_v0  ;;  %24 = vst [vmem:[#allocation4] sm:$0xf] %v5629_v0  ;;  %v5697_v1 = vld [vmem:[%s8714_s5] sm:$0xff]  ;;  %5437 = vset.pattern.permute.xlu2 %v5629_v0  ;;  %v5702_v2 = vld [vmem:[%s8714_s5 + $0x8] sm:$0xff]  ;;  %v5709_v3 = vld [vmem:[%s8714_s5 + $0x10] sm:$0xff]  ;;  %v5633_v8 = vmov 4  }
   0x2   :  { %25 = vst [vmem:[#allocation4 + $0x10] sm:$0xf] %v5629_v0  ;;  %543 = vperm.xlu1 %5436, %v5697_v1   ;;  %548 = vperm.xlu2 %5437, %v5702_v2   ;;  %v5715_v4 = vld [vmem:[%s8714_s5 + $0x18] sm:$0xff]  ;;  %v5296_v9 = vld [vmem:[%s8715_s0 + $0x74] sm:$0xf]  ;;  %vm8813_vm0 = vcmask 130048  }
   0x3   :  { %26 = vst [vmem:[#allocation4 + $0x20] sm:$0xf] %v5629_v0  ;;  %5438 = vset.pattern.permute.xlu0 %v5629_v0  ;;  %v4838_v10 = vld [vmem:[%s8715_s0 + $0x78] sm:$0xf0]  ;;  %v5294_v12 = vld [vmem:[%s8715_s0 + $0x64] sm:$0xf] }
   0x4   :  { %27 = vst [vmem:[#allocation4 + $0x30] sm:$0xf] %v5629_v0  ;;  %553 = vperm.xlu0 %5438, %v5709_v3   ;;  %v4841_v11 = vor.u32 %v5296_v9, %v4838_v10  ;;  %v4830_v13 = vld [vmem:[%s8715_s0 + $0x68] sm:$0xf0]  ;;  %v4836_v14 = vld [vmem:[%s8715_s0 + $0x70] sm:$0xf] }
   0x5   :  { %28 = vst [vmem:[#allocation4 + $0xc] sm:$0xf] %v5629_v0  ;;  %v5297_v15 = vld [vmem:[%s8715_s0 + $0x74] sm:$0xf0]  ;;  %v4833_v17 = vor.u32 %v5294_v12, %v4830_v13  ;;  %v5292_v18 = vld [vmem:[%s8715_s0 + $0x54] sm:$0xf] }
   0x6   :  { %29 = vst [vmem:[#allocation4 + $0x1c] sm:$0xf] %v5629_v0  ;;  %255 = vmatpush.bf16.msra.mxu2 %v4841_v11  ;;  %v4837_v16 = vor.u32 %v5297_v15, %v4836_v14  ;;  %v4822_v19 = vld [vmem:[%s8715_s0 + $0x58] sm:$0xf0]  ;;  %v4828_v22 = vld [vmem:[%s8715_s0 + $0x60] sm:$0xf] }
   0x7   :  { %30 = vst [vmem:[#allocation4 + $0x2c] sm:$0xf] %v5629_v0  ;;  %v4825_v20 = vor.u32 %v5292_v18, %v4822_v19  ;;  %v5758_v21 = vld [vmem:[%s8716_s4 + $0x7] ss:$8 sm:$0x3]  ;;  %s5636_s12 = smov 113  }
   0x8   :  { %31 = vst [vmem:[#allocation4 + $0x3c] sm:$0xf] %v5629_v0  ;;  %197 = vmatpush.bf16.msra.mxu0 %v4837_v16  ;;  %v1740_v23 = vperm.slane %v5758_v21, 0  ;;  %v5295_v24 = vld [vmem:[%s8715_s0 + $0x64] sm:$0xf0]  ;;  %v5637_v14 = vmov 5  }
   0x9   :  { %v5290_v25 = vld [vmem:[%s8715_s0 + $0x44] sm:$0xf]  ;;  %v4829_v26 = vor.u32 %v5295_v24, %v4828_v22  ;;  %v4814_v27 = vld [vmem:[%s8715_s0 + $0x48] sm:$0xf0]  ;;  %v4820_v28 = vld [vmem:[%s8715_s0 + $0x50] sm:$0xf] }
   0xa   :  { %5439 = vset.pattern.permute.xlu1 %v5630_v5  ;;  %558 = vperm.xlu2 %5437, %v5715_v4   ;;  %v5293_v29 = vld [vmem:[%s8715_s0 + $0x54] sm:$0xf0]  ;;  %v4817_v30 = vor.u32 %v5290_v25, %v4814_v27  ;;  %v5288_v32 = vld [vmem:[%s8715_s0 + $0x34] sm:$0xf]  ;;  %v4806_v33 = vld [vmem:[%s8715_s0 + $0x38] sm:$0xf0] }
   0xb   :  { %570 = vperm.xlu1 %5439, %v5697_v1   ;;  %256 = vmatpush.bf16.msra.mxu2 %v4833_v17  ;;  %v4821_v31 = vor.u32 %v5293_v29, %v4820_v28  ;;  %v4809_v34 = vor.u32 %v5288_v32, %v4806_v33  ;;  %v5792_v35 = vld [vmem:[%s8716_s4 + $0x3] ss:$8 sm:$0x3]  ;;  %v5286_v39 = vld [vmem:[%s8715_s0 + $0x24] sm:$0xf]  ;;  %s5638_s27 = smov 1  }
   0xc   :  { %5442 = vset.pattern.permute.xlu0 %v5631_v6  ;;  %198 = vmatpush.bf16.msra.mxu0 %v4829_v26  ;;  %v4812_v36 = vld [vmem:[%s8715_s0 + $0x40] sm:$0xf]  ;;  %v1397_v37 = vperm.slane %v5792_v35, 1  ;;  %v5291_v38 = vld [vmem:[%s8715_s0 + $0x44] sm:$0xf0]  ;;  %s5639_s29 = smov 111  }
   0xd   :  { %711 = vperm.xlu0 %5442, %v5702_v2   ;;  %v4813_v40 = vor.u32 %v5291_v38, %v4812_v36  ;;  %v4798_v41 = vld [vmem:[%s8715_s0 + $0x28] sm:$0xf0]  ;;  %v4804_v42 = vld [vmem:[%s8715_s0 + $0x30] sm:$0xf]  ;;  %v5289_v43 = vld [vmem:[%s8715_s0 + $0x34] sm:$0xf0] }
   0xe   :  { %v4801_v44 = vor.u32 %v5286_v39, %v4798_v41  ;;  %v4805_v45 = vor.u32 %v5289_v43, %v4804_v42  ;;  %v5817_v46 = vld [vmem:[%s8716_s4 + $0x2] ss:$8 sm:$0x3]  ;;  %v5284_v47 = vld [vmem:[%s8715_s0 + $0x14] sm:$0xf]  ;;  %v1396_v24 = vperm.slane %v5792_v35, 0 }
   0xf   :  { %257 = vmatpush.bf16.msra.mxu2 %v4825_v20  ;;  %v4790_v48 = vld [vmem:[%s8715_s0 + $0x18] sm:$0xf0]  ;;  %v4796_v49 = vld [vmem:[%s8715_s0 + $0x20] sm:$0xf]  ;;  %v5287_v50 = vld [vmem:[%s8715_s0 + $0x24] sm:$0xf0] }
  0x10   :  { %199 = vmatpush.bf16.msra.mxu0 %v4821_v31  ;;  %v5298_v51 = vld [vmem:[%s8715_s0 + $0x84] sm:$0xf]  ;;  %v4846_v52 = vld [vmem:[%s8715_s0 + $0x88] sm:$0xf0]  ;;  %v1293_v53 = vperm.slane %v5817_v46, 0  ;;  %v4793_v55 = vor.u32 %v5284_v47, %v4790_v48  ;;  %v4797_v56 = vor.u32 %v5287_v50, %v4796_v49  ;;  %s5640_s19 = smov 15  }
  0x11   :  { %v4849_v54 = vor.u32 %v5298_v51, %v4846_v52  ;;  %v5282_v57 = vld [vmem:[%s8715_s0 + $0x4] sm:$0xf]  ;;  %v4782_v58 = vld [vmem:[%s8715_s0 + $0x8] sm:$0xf0]  ;;  %v4788_v60 = vld [vmem:[%s8715_s0 + $0x10] sm:$0xf] }
  0x12   :  { %5440 = vset.pattern.permute.xlu2 %v5630_v5  ;;  %v5274_v59 = vld [vmem:[%s8717_s1 + $0x4] sm:$0xf]  ;;  %v5285_v61 = vld [vmem:[%s8715_s0 + $0x14] sm:$0xf0]  ;;  %v4750_v62 = vld [vmem:[%s8717_s1 + $0x8] sm:$0xf0] }
  0x13   :  { %578 = vperm.xlu1 %5439, %v5709_v3   ;;  %574 = vperm.xlu2 %5440, %v5702_v2   ;;  %v4753_v63 = vor.u32 %v5274_v59, %v4750_v62  ;;  %v4844_v0 = vld [vmem:[%s8715_s0 + $0x80] sm:$0xf]  ;;  %v5299_v5 = vld [vmem:[%s8715_s0 + $0x84] sm:$0xf0]  ;;  %v4789_v9 = vor.u32 %v5285_v61, %v4788_v60  ;;  %v4756_v20 = vld [vmem:[%s8717_s1 + $0x10] sm:$0xf] }
  0x14   :  { %258 = vmatpush.bf16.msra.mxu2 %v4817_v30  ;;  %200 = vmatpush.bf16.msra.mxu0 %v4813_v40  ;;  %v4748_v10 = vld [vmem:[%s8717_s1] sm:$0xf]  ;;  %v5275_v11 = vld [vmem:[%s8717_s1 + $0x4] sm:$0xf0]  ;;  %v5277_v22 = vld [vmem:[%s8717_s1 + $0x14] sm:$0xf0] }
  0x15   :  { %5446 = vset.pattern.permute.xlu0 %v5632_v7  ;;  %291 = vmatpush.bf16.msra.mxu3 %v4849_v54  ;;  %v4780_v12 = vld [vmem:[%s8715_s0] sm:$0xf]  ;;  %v5283_v13 = vld [vmem:[%s8715_s0 + $0x4] sm:$0xf0]  ;;  %v4749_v16 = vor.u32 %v5275_v11, %v4748_v10  ;;  %v5278_v32 = vld [vmem:[%s8717_s1 + $0x24] sm:$0xf] }
  0x16   :  { %741 = vperm.xlu0 %5446, %v5709_v3   ;;  %v4781_v17 = vor.u32 %v5283_v13, %v4780_v12  ;;  %v1072_v18 = vld [vmem:[%s8716_s4] ss:$8 sm:$0x3]  ;;  %v4891_v26 = vld [vmem:[%s8716_s4 + $0x6] ss:$8 sm:$0x3] }
  0x17   :  { %v1087_v19 = vperm.slane %v1072_v18, 1  ;;  %v1637_v27 = vperm.slane %v4891_v26, 0  ;;  %v1638_v28 = vperm.slane %v4891_v26, 1  ;;  %v4764_v30 = vld [vmem:[%s8717_s1 + $0x20] sm:$0xf]  ;;  %s5641_s18 = smov 112  }
  0x18   :  { %259 = vmatpush.bf16.msra.mxu2 %v4809_v34  ;;  %201 = vmatpush.bf16.msra.mxu0 %v4805_v45  ;;  %v5279_v31 = vld [vmem:[%s8717_s1 + $0x24] sm:$0xf0]  ;;  %v4766_v33 = vld [vmem:[%s8717_s1 + $0x28] sm:$0xf0]  ;;  %v4774_v60 = vld [vmem:[%s8717_s1 + $0x38] sm:$0xf0] }
  0x19   :  { %4854 = vmatmul.msk.bf16.vlgmr.msra.gmra.mxu3 %vm8813_vm0, %v4753_v63  ;;  %v4769_v34 = vor.u32 %v5278_v32, %v4766_v33  ;;  %v4765_v35 = vor.u32 %v5279_v31, %v4764_v30  ;;  %v4886_v52 = vld [vmem:[%s8716_s4 + $0x1] ss:$8 sm:$0x3]  ;;  %v1722_v12 = vld [vmem:[#allocation4 + $0x2c] sm:$0xf]  ;;  %s5642_s21 = smov 17  }
  0x1a   :  { %v1190_v54 = vperm.slane %v4886_v52, 0  ;;  %v1724_v13 = vld [vmem:[#allocation4 + $0x3c] sm:$0xf]  ;;  %v1615_v33 = vld [vmem:[#allocation4 + $0xc] sm:$0xf]  ;;  %vm8807_vm7 = vcmask 908288  }
  0x1b   :  { %5441 = vset.pattern.permute.xlu1 %v5631_v6  ;;  %582 = vperm.xlu2 %5440, %v5715_v4   ;;  %vm8814_vm8 = vcmask 1039360   ;;  %vm8812_vm11 = vcmask 121856  }
  0x1c   :  { %706 = vperm.xlu1 %5441, %v5697_v1   ;;  %260 = vmatpush.bf16.msra.mxu2 %v4801_v44 }
  0x1d   :  { %202 = vmatpush.bf16.msra.mxu0 %v4797_v56  ;;  %v5281_v56 = vld [vmem:[%s8717_s1 + $0x34] sm:$0xf0] }
  0x1e   :  { %5449 = vset.pattern.permute.xlu0 %v5633_v8 }
  0x1f   :  { %865 = vperm.xlu0 %5449, %v5709_v3  }
  0x20   :  { %261 = vmatpush.bf16.msra.mxu2 %v4793_v55  ;;  %v1191_v55 = vperm.slane %v4886_v52, 1 }
  0x21   :  { %203 = vmatpush.bf16.msra.mxu0 %v4789_v9 }
  0x23   :  { %5443 = vset.pattern.permute.xlu2 %v5631_v6  ;;  %v5869_v6 = vld [vmem:[%s8716_s4 + $0x5] ss:$8 sm:$0x3] }
  0x24   :  { %721 = vperm.xlu1 %5441, %v5715_v4   ;;  %716 = vperm.xlu2 %5443, %v5709_v3   ;;  %v1535_v15 = vperm.slane %v5869_v6, 1  ;;  %v1534_v44 = vperm.slane %v5869_v6, 0 }
  0x25   :  { %204 = vmatpush.bf16.msra.mxu0 %v4781_v17 }
  0x27   :  { %1742 = vrot.lane.b32.xlu0 %v1740_v23, %s5634_s11 }
  0x28   :  { %205 = vmatmul.bf16.vlgmr.msra.gmra.mxu0 %v4749_v16 }
  0x2c   :  { %5445 = vset.pattern.permute.xlu1 %v5632_v7  ;;  %5444 = vset.pattern.permute.xlu2 %v5632_v7  ;;  %v4845_v7 = vor.u32 %v5299_v5, %v4844_v0 }
  0x2d   :  { %737 = vperm.xlu1 %5445, %v5702_v2   ;;  %733 = vperm.xlu2 %5444, %v5697_v1  }
  0x2e   :  { %233 = vmatpush.bf16.msra.mxu1 %v4845_v7 }
  0x2f   :  { %1400 = vrot.lane.b32.xlu0 %v1397_v37, %s5635_s30  ;;  %v1294_v37 = vperm.slane %v5817_v46, 1 }
  0x31   :  { %4850 = vmatmul.msk.bf16.vlgmr.msra.gmra.mxu1 %vm8813_vm0, %v4753_v63 }
  0x35   :  { %5447 = vset.pattern.permute.xlu1 %v5633_v8  ;;  %745 = vperm.xlu2 %5444, %v5715_v4  }
  0x36   :  { %857 = vperm.xlu1 %5447, %v5697_v1  }
  0x37   :  { %1295 = vrot.lane.b32.xlu0 %v1293_v53, %s5636_s12  ;;  %v4772_v53 = vld [vmem:[%s8717_s1 + $0x30] sm:$0xf] }
  0x38   :  { %v4773_v59 = vor.u32 %v5281_v56, %v4772_v53  ;;  %v1516_v56 = vld [vmem:[#allocation4 + $0x2c] sm:$0xf] }
  0x3d   :  { %5448 = vset.pattern.permute.xlu2 %v5633_v8  ;;  %v4785_v8 = vor.u32 %v5282_v57, %v4782_v58  ;;  %v5280_v57 = vld [vmem:[%s8717_s1 + $0x34] sm:$0xf] }
  0x3e   :  { %869 = vperm.xlu1 %5447, %v5715_v4   ;;  %861 = vperm.xlu2 %5448, %v5702_v2   ;;  %v4777_v61 = vor.u32 %v5280_v57, %v4774_v60 }
  0x3f   :  { %262 = vmatpush.bf16.msra.mxu2 %v4785_v8  ;;  %1538 = vrot.lane.b32.xlu0 %v1535_v15, %s5638_s27  ;;  %v1735_v15 = vunpack.c.l.bf16 %v1722_v12  ;;  %v1529_v12 = vunpack.c.l.bf16 %v1516_v56 }
  0x42   :  { %263 = vmatmul.bf16.vlgmr.msra.gmra.mxu2 %v4749_v16  ;;  %v1738_v16 = vunpack.c.l.bf16 %v1724_v13 }
  0x46   :  { %5451 = vset.pattern.permute.xlu1 %v5637_v14  ;;  %5450 = vset.pattern.permute.xlu2 %v5637_v14  ;;  %v1720_v14 = vld [vmem:[#allocation4 + $0x1c] sm:$0xf] }
  0x47   :  { %885 = vperm.xlu1 %5451, %v5702_v2   ;;  %881 = vperm.xlu2 %5450, %v5697_v1   ;;  %v1741_v1 = vperm.slane %v5758_v21, 1  ;;  %v1086_v2 = vperm.slane %v1072_v18, 0  ;;  %v4757_v21 = vor.u32 %v5277_v22, %v4756_v20  ;;  %v1732_v17 = vunpack.c.l.bf16 %v1720_v14  ;;  %v1621_v18 = vld [vmem:[#allocation4 + $0x3c] sm:$0xf]  ;;  %v1718_v20 = vld [vmem:[#allocation4 + $0xc] sm:$0xf] }
  0x48   :  { %1090 = vrot.lane.b32.xlu0 %v1087_v19, %s5639_s29  ;;  %v1729_v30 = vunpack.c.l.bf16 %v1718_v20 }
  0x49   :  { %210 = vmatmul.bf16.gmra.mxu0 %v4757_v21 }
  0x4f   :  { %893 = vperm.xlu1 %5451, %v5715_v4   ;;  %889 = vperm.xlu2 %5450, %v5709_v3   ;;  %v5276_v4 = vld [vmem:[%s8717_s1 + $0x14] sm:$0xf]  ;;  %v4758_v3 = vld [vmem:[%s8717_s1 + $0x18] sm:$0xf0] }
  0x50   :  { %v4761_v23 = vor.u32 %v5276_v4, %v4758_v3 }
  0x52   :  { %4855 = vmatmul.msk.bf16.gmra.mxu3 %vm8813_vm0, %v4761_v23  ;;  %4851 = vmatmul.msk.bf16.gmra.mxu1 %vm8813_vm0, %v4761_v23 }
  0x53   :  { %268 = vmatmul.bf16.gmra.mxu2 %v4757_v21  ;;  %v1635_v21 = vunpack.c.l.bf16 %v1621_v18 }
  0x57   :  { %1744 = vrot.lane.b32.xlu1 %v1741_v1, %s5634_s11  ;;  %1088 = vrot.lane.b32.xlu2 %v1086_v2, %s5639_s29  ;;  %v1619_v1 = vld [vmem:[#allocation4 + $0x2c] sm:$0xf] }
  0x59   :  { %215 = vmatmul.bf16.gmra.mxu0 %v4765_v35 }
  0x5c   :  { %v5913_v25 = vpop.permute.xlu2 %548 }
  0x5f   :  { %1398 = vrot.lane.b32.xlu2 %v1396_v24, %s5635_s30  ;;  %1639 = vrot.lane.b32.xlu1 %v1637_v27, %s5640_s19  ;;  %v1632_v24 = vunpack.c.l.bf16 %v1619_v1 }
  0x62   :  { %4856 = vmatmul.msk.bf16.gmra.mxu3 %vm8813_vm0, %v4769_v34  ;;  %4852 = vmatmul.msk.bf16.gmra.mxu1 %vm8813_vm0, %v4769_v34 }
  0x63   :  { %273 = vmatmul.bf16.gmra.mxu2 %v4765_v35 }
  0x64   :  { %v5920_v29 = vpop.permute.xlu2 %558 }
  0x67   :  { %1641 = vrot.lane.b32.xlu2 %v1638_v28, %s5640_s19  ;;  %1297 = vrot.lane.b32.xlu1 %v1294_v37, %s5636_s12 }
  0x69   :  { %220 = vmatmul.bf16.gmra.mxu0 %v4773_v59 }
  0x6d   :  { %v5937_v36 = vpop.permute.xlu2 %574 }
  0x6f   :  { %1536 = vrot.lane.b32.xlu2 %v1534_v44, %s5638_s27  ;;  %1192 = vrot.lane.b32.xlu1 %v1190_v54, %s5641_s18  ;;  %v1626_v44 = vunpack.c.l.bf16 %v1615_v33 }
  0x72   :  { %4857 = vmatmul.msk.bf16.gmra.mxu3 %vm8813_vm0, %v4777_v61  ;;  %4853 = vmatmul.msk.bf16.gmra.mxu1 %vm8813_vm0, %v4777_v61 }
  0x73   :  { %278 = vmatmul.bf16.gmra.mxu2 %v4773_v59 }
  0x74   :  { %v5941_v38 = vpop.permute.xlu1 %543 }
  0x75   :  { %v5943_v39 = vpop.permute.xlu2 %582 }
  0x76   :  { %v5961_v48 = vpop.permute.xlu0 %553 }
  0x77   :  { %1194 = vrot.lane.b32.xlu2 %v1191_v55, %s5641_s18  ;;  %v4893_v55 = vld [vmem:[%s8716_s4 + $0x10] ss:$8 sm:$0x3] }
  0x78   :  { %v1843_v61 = vperm.slane %v4893_v55, 1  ;;  %v1842_v18 = vperm.slane %v4893_v55, 0 }
  0x7d   :  { %v5945_v40 = vpop.permute.xlu1 %570 }
  0x7e   :  { %v5947_v41 = vpop.permute.xlu2 %716 }
  0x7f   :  { %8816 = vst [vmem:[#allocation5_spill] sm:$0xff] %v5947_v41  ;;  %v5967_v51 = vpop.permute.xlu0 %711 }
  0x80   :  { %8823 = vst [vmem:[#allocation12_spill] sm:$0xff] %v5967_v51 }
  0x85   :  { %v5949_v42 = vpop.permute.xlu1 %578 }
  0x87   :  { %v5951_v43 = vpop.permute.xlu2 %733 }
  0x88   :  { %8817 = vst [vmem:[#allocation6_spill] sm:$0xff] %v5951_v43  ;;  %v5992_v63 = vpop.permute.xlu0 %741 }
  0x89   :  { %8826 = vst [vmem:[#allocation15_spill] sm:$0xff] %v5992_v63 }
  0x8e   :  { %v5955_v45 = vpop.permute.xlu1 %706 }
  0x8f   :  { %8818 = vst [vmem:[#allocation7_spill] sm:$0xff] %v5955_v45  ;;  %v5957_v46 = vpop.permute.xlu2 %745 }
  0x90   :  { %8819 = vst [vmem:[#allocation8_spill] sm:$0xff] %v5957_v46 }
  0x91   :  { %v5998_v6 = vpop.permute.xlu0 %865 }
  0x92   :  { %8829 = vst [vmem:[#allocation18_spill] sm:$0xff] %v5998_v6 }
  0x96   :  { %v5959_v47 = vpop.permute.xlu1 %721 }
  0x97   :  { %8820 = vst [vmem:[#allocation9_spill] sm:$0xff] %v5959_v47 }
  0x98   :  { %v5963_v49 = vpop.permute.xlu2 %861 }
  0x99   :  { %8821 = vst [vmem:[#allocation10_spill] sm:$0xff] %v5963_v49  ;;  %v6004_v9 = vpop.permute.xlu0 %1742 }
  0x9c   :  { %v293_v60 = vpop.f32.mrf.mxu3 }
  0x9f   :  { %v5965_v50 = vpop.permute.xlu1 %737 }
  0xa0   :  { %8822 = vst [vmem:[#allocation11_spill] sm:$0xff] %v5965_v50 }
  0xa1   :  { %v5981_v58 = vpop.permute.xlu2 %881  ;;  %v6010_v19 = vpop.permute.xlu0 %1400 }
  0xa2   :  { %8824 = vst [vmem:[#allocation13_spill] sm:$0xff] %v5981_v58 }
  0xa5   :  { %v206_v13 = vpop.f32.mrf.mxu0 }
  0xa8   :  { %v5990_v62 = vpop.permute.xlu1 %857 }
  0xa9   :  { %8825 = vst [vmem:[#allocation14_spill] sm:$0xff] %v5990_v62  ;;  %v5994_v0 = vpop.permute.xlu2 %889  ;;  %v6025_v35 = vpop.permute.xlu0 %1295 }
  0xaa   :  { %8827 = vst [vmem:[#allocation16_spill] sm:$0xff] %v5994_v0 }
  0xae   :  { %v235_v59 = vpop.f32.mrf.mxu1 }
  0xb0   :  { %v5996_v5 = vpop.permute.xlu1 %869 }
  0xb1   :  { %8828 = vst [vmem:[#allocation17_spill] sm:$0xff] %v5996_v5  ;;  %v6000_v7 = vpop.permute.xlu2 %1088 }
  0xb9   :  { %v6002_v8 = vpop.permute.xlu1 %885  ;;  %v6008_v11 = vpop.permute.xlu2 %1398 }
  0xba   :  { %8830 = vst [vmem:[#allocation19_spill] sm:$0xff] %v6002_v8 }
  0xc1   :  { %v6006_v10 = vpop.permute.xlu1 %893  ;;  %v6017_v23 = vpop.permute.xlu2 %1641 }
  0xc2   :  { %8831 = vst [vmem:[#allocation20_spill] sm:$0xff] %v6006_v10  ;;  %v1659_v31 = vmul.f32 %v6017_v23, %v1635_v21  ;;  %v1656_v32 = vmul.f32 %v6017_v23, %v1632_v24  ;;  %v1650_v54 = vmul.f32 %v6017_v23, %v1626_v44 }
  0xc4   :  { %v1667_v37 = vpack.c.bf16 %v1659_v31, %v1659_v31  ;;  %v1665_v52 = vpack.c.bf16 %v1656_v32, %v1656_v32  ;;  %v1661_v57 = vpack.c.bf16 %v1650_v54, %v1650_v54  ;;  %v6043_v32 = vadd.f32 %v235_v59, %v206_v13 }
  0xc5   :  { %v264_v14 = vpop.f32.mrf.mxu2 }
  0xc6   :  { %v6045_v33 = vadd.f32 %v293_v60, %v264_v14 }
  0xc9   :  { %v6012_v2 = vpop.permute.xlu1 %1744 }
  0xca   :  { %v1758_v22 = vmul.f32 %v6012_v2, %v1735_v15  ;;  %v1761_v4 = vmul.f32 %v6012_v2, %v1738_v16  ;;  %v1755_v3 = vmul.f32 %v6012_v2, %v1732_v17  ;;  %v1752_v34 = vmul.f32 %v6012_v2, %v1729_v30  ;;  %v6034_v15 = vpop.permute.xlu0 %1538  ;;  %v1518_v17 = vld [vmem:[#allocation4 + $0x3c] sm:$0xf] }
  0xcb   :  { %v1553_v16 = vmul.f32 %v6034_v15, %v1529_v12  ;;  %v1532_v1 = vunpack.c.l.bf16 %v1518_v17 }
  0xcc   :  { %v1767_v26 = vpack.c.bf16 %v1758_v22, %v1758_v22  ;;  %v1769_v27 = vpack.c.bf16 %v1761_v4, %v1761_v4  ;;  %v1765_v28 = vpack.c.bf16 %v1755_v3, %v1755_v3  ;;  %v1763_v53 = vpack.c.bf16 %v1752_v34, %v1752_v34  ;;  %v237_v22 = vpop.f32.mrf.mxu1  ;;  %v295_v4 = vpop.f32.mrf.mxu3 }
  0xcd   :  { %v1562_v20 = vpack.c.bf16 %v1553_v16, %v1553_v16  ;;  %v208_v3 = vpop.f32.mrf.mxu0  ;;  %v266_v21 = vpop.f32.mrf.mxu2  ;;  %v1556_v24 = vmul.f32 %v6034_v15, %v1532_v1 }
  0xce   :  { %1788 = vrot.lane.b32.xlu1 %v1767_v26, %s5641_s18  ;;  %1792 = vrot.lane.b32.xlu0 %v1769_v27, %s5641_s18  ;;  %v6049_v54 = vadd.f32 %v237_v22, %v208_v3  ;;  %v6051_v55 = vadd.f32 %v295_v4, %v266_v21 }
  0xcf   :  { %1784 = vrot.lane.b32.xlu2 %v1765_v28, %s5641_s18  ;;  %v1564_v26 = vpack.c.bf16 %v1556_v24, %v1556_v24 }
  0xd0   :  { %v316_v59 = vadd.f32 %v6051_v55, %v6049_v54 }
  0xd4   :  { %v240_v27 = vpop.f32.mrf.mxu1 }
  0xd5   :  { %v298_v28 = vpop.f32.mrf.mxu3  ;;  %v211_v30 = vpop.f32.mrf.mxu0 }
  0xd6   :  { %1780 = vrot.lane.b32.xlu0 %v1763_v53, %s5641_s18  ;;  %1690 = vrot.lane.b32.xlu1 %v1667_v37, %s5636_s12  ;;  %v269_v31 = vpop.f32.mrf.mxu2  ;;  %v313_v53 = vadd.f32 %v6045_v33, %v6043_v32  ;;  %v6061_v22 = vadd.f32 %v240_v27, %v211_v30 }
  0xd7   :  { %1686 = vrot.lane.b32.xlu2 %v1665_v52, %s5636_s12  ;;  %v6063_v4 = vadd.f32 %v298_v28, %v269_v31 }
  0xdc   :  { %v242_v34 = vpop.f32.mrf.mxu1 }
  0xdd   :  { %v300_v37 = vpop.f32.mrf.mxu3  ;;  %v213_v44 = vpop.f32.mrf.mxu0 }
  0xde   :  { %1678 = vrot.lane.b32.xlu1 %v1661_v57, %s5636_s12  ;;  %v271_v52 = vpop.f32.mrf.mxu2 }
  0xdf   :  { %1846 = vrot.lane.b32.xlu2 %v1843_v61, %s5642_s21  ;;  %v6076_v27 = vadd.f32 %v300_v37, %v271_v52  ;;  %v6085_v52 = vpop.permute.xlu1 %1639 }
  0xe4   :  { %v245_v56 = vpop.f32.mrf.mxu1 }
  0xe5   :  { %v303_v57 = vpop.f32.mrf.mxu3  ;;  %v216_v61 = vpop.f32.mrf.mxu0 }
  0xe6   :  { %1844 = vrot.lane.b32.xlu1 %v1842_v18, %s5642_s21  ;;  %v274_v12 = vpop.f32.mrf.mxu2  ;;  %v6055_v60 = vadd.f32 %v245_v56, %v216_v61  ;;  %v6074_v61 = vadd.f32 %v242_v34, %v213_v44 }
  0xe7   :  { %1583 = vrot.lane.b32.xlu2 %v1562_v20, %s5635_s30  ;;  %v6057_v13 = vadd.f32 %v303_v57, %v274_v12  ;;  %v1617_v20 = vld [vmem:[#allocation4 + $0x1c] sm:$0xf] }
  0xe8   :  { %v1629_v24 = vunpack.c.l.bf16 %v1617_v20  ;;  %v1514_v57 = vld [vmem:[#allocation4 + $0x1c] sm:$0xf]  ;;  %v322_v31 = vadd.f32 %v6076_v27, %v6074_v61 }
  0xe9   :  { %v325_v14 = vadd.f32 %v6057_v13, %v6055_v60  ;;  %v1526_v30 = vunpack.c.l.bf16 %v1514_v57 }
  0xea   :  { %v1653_v56 = vmul.f32 %v6017_v23, %v1629_v24 }
  0xeb   :  { %v1550_v12 = vmul.f32 %v6034_v15, %v1526_v30 }
  0xec   :  { %v247_v16 = vpop.f32.mrf.mxu1  ;;  %v1663_v28 = vpack.c.bf16 %v1653_v56, %v1653_v56  ;;  %v6095_v56 = vpop.permute.xlu2 %1536 }
  0xed   :  { %v305_v17 = vpop.f32.mrf.mxu3  ;;  %v218_v18 = vpop.f32.mrf.mxu0 }
  0xee   :  { %1587 = vrot.lane.b32.xlu1 %v1564_v26, %s5635_s30  ;;  %v276_v1 = vpop.f32.mrf.mxu2  ;;  %v6065_v3 = vadd.f32 %v247_v16, %v218_v18 }
  0xef   :  { %v6067_v21 = vadd.f32 %v305_v17, %v276_v1 }
  0xf1   :  { %v328_v26 = vadd.f32 %v6067_v21, %v6065_v3 }
  0xf4   :  { %v250_v17 = vpop.f32.mrf.mxu1 }
  0xf5   :  { %v221_v16 = vpop.f32.mrf.mxu0  ;;  %v308_v1 = vpop.f32.mrf.mxu3 }
  0xf6   :  { %v279_v18 = vpop.f32.mrf.mxu2  ;;  %v6087_v20 = vadd.f32 %v250_v17, %v221_v16 }
  0xf7   :  { %v6089_v24 = vadd.f32 %v308_v1, %v279_v18 }
  0xfd   :  { %v223_v30 = vpop.f32.mrf.mxu0 }
 0x100   :  { %314 = vadd.xlane.f32.xlu0 %v313_v53  ;;  %v319_v53 = vadd.f32 %v6063_v4, %v6061_v22 }
 0x108   :  { %317 = vadd.xlane.f32.xlu0 %v316_v59  ;;  %v1560_v59 = vpack.c.bf16 %v1550_v12, %v1550_v12  ;;  %v281_v12 = vpop.f32.mrf.mxu2 }
 0x110   :  { %326 = vadd.xlane.f32.xlu2 %v325_v14  ;;  %v1512_v14 = vld [vmem:[#allocation4 + $0xc] sm:$0xf] }
 0x111   :  { %v1523_v34 = vunpack.c.l.bf16 %v1512_v14  ;;  %v6101_v14 = vpop.permute.xlu0 %1090 }
 0x113   :  { %v1547_v37 = vmul.f32 %v6034_v15, %v1523_v34 }
 0x115   :  { %v1558_v44 = vpack.c.bf16 %v1547_v37, %v1547_v37 }
 0x118   :  { %329 = vadd.xlane.f32.xlu2 %v328_v26  ;;  %320 = vadd.xlane.f32.xlu1 %v319_v53  ;;  %v331_v26 = vadd.f32 %v6089_v24, %v6087_v20  ;;  %v6093_v53 = vpop.permute.xlu1 %1297 }
 0x11c   :  { %1682 = vrot.lane.b32.xlu0 %v1663_v28, %s5636_s12  ;;  %v6099_v28 = vpop.permute.xlu2 %1194 }
 0x120   :  { %323 = vadd.xlane.f32.xlu1 %v322_v31  ;;  %v6097_v57 = vpop.permute.xlu1 %1192  ;;  %v252_v31 = vpop.f32.mrf.mxu1 }
 0x121   :  { %v6103_v34 = vadd.f32 %v252_v31, %v223_v30 }
 0x124   :  { %1579 = vrot.lane.b32.xlu0 %v1560_v59, %s5635_s30  ;;  %v310_v59 = vpop.f32.mrf.mxu3 }
 0x125   :  { %v6105_v37 = vadd.f32 %v310_v59, %v281_v12 }
 0x127   :  { %v334_v16 = vadd.f32 %v6105_v37, %v6103_v34 }
 0x129   :  { %v6111_v17 = vpop.permute.xlu2 %1784 }
 0x12a   :  { %8833 = vst [vmem:[#allocation22_spill] sm:$0xff] %v6111_v17 }
 0x139   :  { %1575 = vrot.lane.b32.xlu1 %v1558_v44, %s5635_s30 }
 0x140   :  { %v6107_v44 = vpop.permute.xlu1 %1788  ;;  %v6113_v18 = vpop.permute.xlu0 %1792 }
 0x141   :  { %8832 = vst [vmem:[#allocation21_spill] sm:$0xff] %v6107_v44 }
 0x142   :  { %8834 = vst [vmem:[#allocation23_spill] sm:$0xff] %v6113_v18 }
 0x148   :  { %v6115_v1 = vpop.permute.xlu1 %1690  ;;  %v6119_v46 = vpop.permute.xlu0 %1780 }
 0x149   :  { %8835 = vst [vmem:[#allocation24_spill] sm:$0xff] %v6115_v1 }
 0x14e   :  { %332 = vadd.xlane.f32.xlu0 %v331_v26  ;;  %v6117_v26 = vpop.permute.xlu2 %1686 }
 0x14f   :  { %8836 = vst [vmem:[#allocation25_spill] sm:$0xff] %v6117_v26 }
 0x150   :  { %v6121_v30 = vpop.permute.xlu1 %1678 }
 0x151   :  { %8837 = vst [vmem:[#allocation26_spill] sm:$0xff] %v6121_v30 }
 0x156   :  { %v6123_v31 = vpop.permute.xlu2 %1846 }
 0x158   :  { %v6131_v5 = vpop.permute.xlu1 %1844 }
 0x15e   :  { %v6137_v41 = vpop.permute.xlu2 %1583 }
 0x15f   :  { %8838 = vst [vmem:[#allocation27_spill] sm:$0xff] %v6137_v41 }
 0x160   :  { %v6149_v8 = vpop.permute.xlu1 %1587 }
 0x161   :  { %8839 = vst [vmem:[#allocation28_spill] sm:$0xff] %v6149_v8 }
 0x163   :  { %335 = vadd.xlane.f32.xlu1 %v334_v16 }
 0x173   :  { %v315_v12 = vpop.xlane.xlu0 %314 }
 0x174   :  { %v337_v59 = vmul.f32 0.00390625, %v315_v12 }
 0x176   :  { %v6126_v10 = vsub.f32 %v6043_v32, %v337_v59  ;;  %v6129_v47 = vsub.f32 %v6045_v33, %v337_v59 }
 0x178   :  { %v361_v16 = vmul.f32 %v6126_v10, %v6126_v10  ;;  %v362_v63 = vmul.f32 %v6129_v47, %v6129_v47 }
 0x17a   :  { %v377_v0 = vadd.f32 %v362_v63, %v361_v16 }
 0x17b   :  { %v318_v50 = vpop.xlane.xlu0 %317 }
 0x17c   :  { %v338_v6 = vmul.f32 0.00390625, %v318_v50  ;;  %378 = vadd.xlane.f32.xlu2 %v377_v0 }
 0x17e   :  { %v6140_v32 = vsub.f32 %v6049_v54, %v338_v6  ;;  %v6143_v33 = vsub.f32 %v6051_v55, %v338_v6 }
 0x180   :  { %v363_v12 = vmul.f32 %v6140_v32, %v6140_v32  ;;  %v364_v59 = vmul.f32 %v6143_v33, %v6143_v33 }
 0x182   :  { %v380_v63 = vadd.f32 %v364_v59, %v363_v12 }
 0x183   :  { %v327_v16 = vpop.xlane.xlu2 %326 }
 0x184   :  { %v341_v51 = vmul.f32 0.00390625, %v327_v16  ;;  %381 = vadd.xlane.f32.xlu0 %v380_v63 }
 0x186   :  { %v6152_v50 = vsub.f32 %v6055_v60, %v341_v51  ;;  %v6155_v0 = vsub.f32 %v6057_v13, %v341_v51 }
 0x188   :  { %8840 = vst [vmem:[#allocation29_spill] sm:$0xff] %v6152_v50  ;;  %v369_v6 = vmul.f32 %v6152_v50, %v6152_v50  ;;  %v370_v54 = vmul.f32 %v6155_v0, %v6155_v0 }
 0x189   :  { %8841 = vst [vmem:[#allocation30_spill] sm:$0xff] %v6155_v0 }
 0x18a   :  { %v389_v55 = vadd.f32 %v370_v54, %v369_v6 }
 0x18b   :  { %v330_v49 = vpop.xlane.xlu2 %329  ;;  %v321_v43 = vpop.xlane.xlu1 %320 }
 0x18c   :  { %v339_v58 = vmul.f32 0.00390625, %v321_v43  ;;  %390 = vadd.xlane.f32.xlu0 %v389_v55  ;;  %v342_v12 = vmul.f32 0.00390625, %v330_v49 }
 0x18e   :  { %v6162_v59 = vsub.f32 %v6061_v22, %v339_v58  ;;  %v6165_v60 = vsub.f32 %v6063_v4, %v339_v58  ;;  %v6172_v63 = vsub.f32 %v6065_v3, %v342_v12  ;;  %v6175_v16 = vsub.f32 %v6067_v21, %v342_v12 }
 0x190   :  { %v365_v51 = vmul.f32 %v6162_v59, %v6162_v59  ;;  %v366_v13 = vmul.f32 %v6165_v60, %v6165_v60  ;;  %8842 = vst [vmem:[#allocation31_spill] sm:$0xff] %v6172_v63  ;;  %v371_v4 = vmul.f32 %v6172_v63, %v6172_v63  ;;  %v372_v3 = vmul.f32 %v6175_v16, %v6175_v16 }
 0x191   :  { %8843 = vst [vmem:[#allocation32_spill] sm:$0xff] %v6175_v16 }
 0x192   :  { %v383_v43 = vadd.f32 %v366_v13, %v365_v51  ;;  %v392_v12 = vadd.f32 %v372_v3, %v371_v4 }
 0x193   :  { %v324_v49 = vpop.xlane.xlu1 %323 }
 0x194   :  { %v340_v6 = vmul.f32 0.00390625, %v324_v49  ;;  %384 = vadd.xlane.f32.xlu1 %v383_v43 }
 0x196   :  { %v6178_v22 = vsub.f32 %v6074_v61, %v340_v6  ;;  %v6181_v58 = vsub.f32 %v6076_v27, %v340_v6  ;;  %v6191_v61 = vpop.permute.xlu0 %1682 }
 0x197   :  { %8844 = vst [vmem:[#allocation33_spill] sm:$0xff] %v6191_v61 }
 0x198   :  { %v367_v21 = vmul.f32 %v6178_v22, %v6178_v22  ;;  %v368_v54 = vmul.f32 %v6181_v58, %v6181_v58 }
 0x19a   :  { %v386_v55 = vadd.f32 %v368_v54, %v367_v21 }
 0x19c   :  { %387 = vadd.xlane.f32.xlu2 %v386_v55  ;;  %393 = vadd.xlane.f32.xlu1 %v392_v12 }
 0x19e   :  { %v6193_v27 = vpop.permute.xlu0 %1579 }
 0x19f   :  { %8845 = vst [vmem:[#allocation34_spill] sm:$0xff] %v6193_v27 }
 0x1ab   :  { %v6205_v21 = vpop.permute.xlu1 %1575 }
 0x1ac   :  { %8848 = vst [vmem:[#allocation37_spill] sm:$0xff] %v6205_v21 }
 0x1c1   :  { %v333_v51 = vpop.xlane.xlu0 %332 }
 0x1c2   :  { %v343_v13 = vmul.f32 0.00390625, %v333_v51 }
 0x1c4   :  { %v6196_v43 = vsub.f32 %v6087_v20, %v343_v13  ;;  %v6199_v49 = vsub.f32 %v6089_v24, %v343_v13 }
 0x1c6   :  { %8846 = vst [vmem:[#allocation35_spill] sm:$0xff] %v6196_v43  ;;  %v373_v6 = vmul.f32 %v6196_v43, %v6196_v43  ;;  %v374_v4 = vmul.f32 %v6199_v49, %v6199_v49 }
 0x1c7   :  { %8847 = vst [vmem:[#allocation36_spill] sm:$0xff] %v6199_v49 }
 0x1c8   :  { %v395_v3 = vadd.f32 %v374_v4, %v373_v6 }
 0x1ca   :  { %396 = vadd.xlane.f32.xlu2 %v395_v3 }
 0x1d6   :  { %v336_v54 = vpop.xlane.xlu1 %335 }
 0x1d7   :  { %v344_v55 = vmul.f32 0.00390625, %v336_v54 }
 0x1d9   :  { %v6208_v12 = vsub.f32 %v6103_v34, %v344_v55  ;;  %v6211_v20 = vsub.f32 %v6105_v37, %v344_v55 }
 0x1db   :  { %8849 = vst [vmem:[#allocation38_spill] sm:$0xff] %v6208_v12  ;;  %v375_v24 = vmul.f32 %v6208_v12, %v6208_v12  ;;  %v376_v51 = vmul.f32 %v6211_v20, %v6211_v20 }
 0x1dc   :  { %8850 = vst [vmem:[#allocation39_spill] sm:$0xff] %v6211_v20 }
 0x1dd   :  { %v398_v13 = vadd.f32 %v376_v51, %v375_v24 }
 0x1df   :  { %399 = vadd.xlane.f32.xlu0 %v398_v13 }
 0x1ef   :  { %v379_v6 = vpop.xlane.xlu2 %378 }
 0x1f0   :  { %v401_v4 = vmul.f32 0.00390625, %v379_v6 }
 0x1f2   :  { %v409_v3 = vadd.f32 1e-05, %v401_v4 }
 0x1f4   :  { %5495 = vrsqrt.f32 %v409_v3  ;;  %vm423_vm2 = vweird.f32 %v409_v3 }
 0x1f7   :  { %v382_v49 = vpop.xlane.xlu0 %381 }
 0x1f8   :  { %v402_v54 = vmul.f32 0.00390625, %v382_v49 }
 0x1fa   :  { %v5496_v43 = vpop.eup %5495  ;;  %v410_v34 = vadd.f32 1e-05, %v402_v54 }
 0x1fb   :  { %v418_v16 = vmul.f32 %v5496_v43, %v409_v3  ;;  %vm424_vm1 = vweird.f32 %v5496_v43 }
 0x1fc   :  { %5497 = vrsqrt.f32 %v410_v34  ;;  %vm425_vm3 = vmor %vm423_vm2, %vm424_vm1  ;;  %vm433_vm5 = vweird.f32 %v410_v34  ;;  %vm8811_vm1 = vcmask 924672   ;;  %vm8809_vm2 = vcmask 916480  }
 0x1fd   :  { %v419_v37 = vmul.f32 %v5496_v43, %v418_v16 }
 0x1ff   :  { %v420_v55 = vmul.f32 0.5, %v419_v37 }
 0x201   :  { %v421_v63 = vsub.f32 1.5, %v420_v55 }
 0x202   :  { %v5498_v12 = vpop.eup %5497 }
 0x203   :  { %v422_v45 = vmul.f32 %v5496_v43, %v421_v63  ;;  %v428_v20 = vmul.f32 %v5498_v12, %v410_v34  ;;  %vm434_vm4 = vweird.f32 %v5498_v12 }
 0x204   :  { %vm435_vm6 = vmor %vm433_vm5, %vm434_vm4  ;;  %vm8808_vm4 = vcmask 138240   ;;  %vm8794_vm5 = vcmask 1043456  }
 0x205   :  { %v426_v24 = vsel %vm425_vm3, %v5496_v43, %v422_v45  ;;  %v429_v51 = vmul.f32 %v5498_v12, %v428_v20  ;;  %vm8810_vm3 = vcmask 7168  }
 0x206   :  { %v6218_v13 = vmul.f32 %v426_v24, %v6126_v10  ;;  %v6221_v49 = vmul.f32 %v426_v24, %v6129_v47 }
 0x207   :  { %v430_v6 = vmul.f32 0.5, %v429_v51  ;;  %v385_v4 = vpop.xlane.xlu1 %384 }
 0x208   :  { %8851 = vst [vmem:[#allocation40_spill] sm:$0xff] %v6218_v13  ;;  %v561_v16 = vmul.f32 %v5941_v38, %v6218_v13  ;;  %v562_v54 = vmul.f32 %v5941_v38, %v6221_v49  ;;  %v403_v63 = vmul.f32 0.00390625, %v385_v4 }
 0x209   :  { %8852 = vst [vmem:[#allocation41_spill] sm:$0xff] %v6221_v49  ;;  %v431_v3 = vsub.f32 1.5, %v430_v6 }
 0x20a   :  { %v585_v45 = vadd.f32 %v5945_v40, %v561_v16  ;;  %v586_v43 = vadd.f32 %v5945_v40, %v562_v54  ;;  %v411_v10 = vadd.f32 1e-05, %v403_v63 }
 0x20b   :  { %v432_v20 = vmul.f32 %v5498_v12, %v431_v3 }
 0x20c   :  { %v593_v47 = vmax.f32 %v585_v45, 0.0  ;;  %v594_v37 = vmax.f32 %v586_v43, 0.0  ;;  %5499 = vrsqrt.f32 %v411_v10  ;;  %vm443_vm9 = vweird.f32 %v411_v10 }
 0x20d   :  { %v436_v55 = vsel %vm435_vm6, %v5498_v12, %v432_v20  ;;  %vm8795_vm6 = vcmask 261120  }
 0x20e   :  { %v601_v24 = vpack.c.bf16 %v594_v37, %v593_v47  ;;  %v6230_v51 = vmul.f32 %v436_v55, %v6140_v32  ;;  %v6233_v38 = vmul.f32 %v436_v55, %v6143_v33  ;;  %v6249_v37 = vsel %vm8807_vm7, %v6000_v7, %v6101_v14 }
 0x20f   :  { %v388_v6 = vpop.xlane.xlu2 %387 }
 0x210   :  { %8853 = vst [vmem:[#allocation42_spill] sm:$0xff] %v6230_v51  ;;  %v563_v40 = vmul.f32 %v5913_v25, %v6230_v51  ;;  %v564_v34 = vmul.f32 %v5913_v25, %v6233_v38  ;;  %v404_v4 = vmul.f32 0.00390625, %v388_v6  ;;  %v6273_v49 = vunpack.c.h.bf16 %v601_v24 }
 0x211   :  { %8854 = vst [vmem:[#allocation43_spill] sm:$0xff] %v6233_v38 }
 0x212   :  { %605 = vst [vmem:[#allocation4 + $0x4] sm:$0xff] %v601_v24  ;;  %v5500_v16 = vpop.eup %5499  ;;  %v587_v54 = vadd.f32 %v5937_v36, %v563_v40  ;;  %v588_v12 = vadd.f32 %v5937_v36, %v564_v34  ;;  %v6241_v63 = vadd.f32 1e-05, %v404_v4  ;;  %v6259_v40 = vsel %vm8814_vm8, %v6008_v11, %v6010_v19 }
 0x213   :  { %v438_v32 = vmul.f32 %v5500_v16, %v411_v10  ;;  %vm444_vm10 = vweird.f32 %v5500_v16 }
 0x214   :  { %v595_v3 = vmax.f32 %v587_v54, 0.0  ;;  %v596_v33 = vmax.f32 %v588_v12, 0.0  ;;  %5501 = vrsqrt.f32 %v6241_v63  ;;  %vm445_vm12 = vmor %vm443_vm9, %vm444_vm10  ;;  %vm453_vm14 = vweird.f32 %v6241_v63 }
 0x215   :  { %v439_v45 = vmul.f32 %v5500_v16, %v438_v32 }
 0x216   :  { %v6244_v43 = vpack.c.bf16 %v596_v33, %v595_v3 }
 0x217   :  { %v440_v20 = vmul.f32 0.5, %v439_v45 }
 0x218   :  { %606 = vst [vmem:[#allocation4 + $0x14] sm:$0xff] %v6244_v43 }
 0x219   :  { %v1065_v25 = vld [vmem:[#allocation4 + $0x8] sm:$0xf]  ;;  %v1064_v47 = vld [vmem:[#allocation4] sm:$0xff]  ;;  %v441_v34 = vsub.f32 1.5, %v440_v20  ;;  %v6271_v20 = vunpack.c.l.bf16 %v601_v24  ;;  %v6287_v24 = vsel %vm8813_vm0, %v6004_v9, %v6012_v2 }
 0x21a   :  { %v1075_v36 = vunpack.c.l.bf16 %v1065_v25  ;;  %v6252_v55 = vunpack.c.l.bf16 %v1064_v47  ;;  %v6254_v6 = vunpack.c.h.bf16 %v1064_v47  ;;  %v1374_v4 = vld [vmem:[#allocation4 + $0x8] sm:$0xf]  ;;  %v5502_v54 = vpop.eup %5501 }
 0x21b   :  { %v442_v45 = vmul.f32 %v5500_v16, %v441_v34  ;;  %v448_v25 = vmul.f32 %v5502_v54, %v6241_v63  ;;  %v1385_v13 = vunpack.c.l.bf16 %v1374_v4  ;;  %v1271_v4 = vld [vmem:[#allocation4 + $0x8] sm:$0xf]  ;;  %vm454_vm13 = vweird.f32 %v5502_v54 }
 0x21c   :  { %v1099_v12 = vmul.f32 %v6101_v14, %v1075_v36  ;;  %v1097_v32 = vmul.f32 %v6000_v7, %v6252_v55  ;;  %v1098_v3 = vmul.f32 %v6249_v37, %v6254_v6  ;;  %v1407_v33 = vmul.f32 %v6008_v11, %v6252_v55  ;;  %vm455_vm15 = vmor %vm453_vm14, %vm454_vm13 }
 0x21d   :  { %v1408_v10 = vmul.f32 %v6259_v40, %v6254_v6  ;;  %v446_v38 = vsel %vm445_vm12, %v5500_v16, %v442_v45  ;;  %v449_v51 = vmul.f32 %v5502_v54, %v448_v25  ;;  %v1750_v16 = vmul.f32 %v6004_v9, %v6271_v20 }
 0x21e   :  { %v1110_v47 = vpack.c.bf16 %v1099_v12, %v1099_v12  ;;  %v1109_v36 = vpack.c.bf16 %v1098_v3, %v1097_v32  ;;  %v6276_v0 = vmul.f32 %v446_v38, %v6162_v59  ;;  %v6279_v34 = vmul.f32 %v446_v38, %v6165_v60  ;;  %v6303_v38 = vld [vmem:[#allocation4 + $0x8] sm:$0xff]  }
 0x21f   :  { %v1419_v62 = vpack.c.bf16 %v1408_v10, %v1407_v33  ;;  %v450_v50 = vmul.f32 0.5, %v449_v51  ;;  %v6294_v59 = vsel %vm8812_vm11, %v6085_v52, %v6017_v23  ;;  %v1409_v2 = vmul.f32 %v6010_v19, %v1385_v13 }
 0x220   :  { %8855 = vst [vmem:[#allocation44_spill] sm:$0xff] %v6276_v0  ;;  %1127 = vrot.lane.b32.xlu2 %v1110_v47, %s5642_s21  ;;  %1125 = vrot.lane.b32.xlu1 %v1109_v36, %s5642_s21  ;;  %v565_v60 = vmul.f32 %v5961_v48, %v6276_v0  ;;  %v566_v51 = vmul.f32 %v5961_v48, %v6279_v34  ;;  %v1179_v13 = vunpack.c.l.bf16 %v6303_v38  ;;  %v1282_v45 = vunpack.c.l.bf16 %v1271_v4 }
 0x221   :  { %8856 = vst [vmem:[#allocation45_spill] sm:$0xff] %v6279_v34  ;;  %1435 = vrot.lane.b32.xlu0 %v1419_v62, %s5638_s27  ;;  %v1751_v62 = vmul.f32 %v6287_v24, %v6273_v49  ;;  %v451_v12 = vsub.f32 1.5, %v450_v50  ;;  %v1648_v23 = vmul.f32 %v6271_v20, %v6085_v52  ;;  %v1649_v32 = vmul.f32 %v6273_v49, %v6294_v59 }
 0x222   :  { %v589_v3 = vadd.f32 %v5949_v42, %v565_v60  ;;  %v590_v48 = vadd.f32 %v5949_v42, %v566_v51  ;;  %v1420_v47 = vpack.c.bf16 %v1409_v2, %v1409_v2  ;;  %v1203_v63 = vmul.f32 %v6099_v28, %v1179_v13 }
 0x223   :  { %v452_v33 = vmul.f32 %v5502_v54, %v451_v12  ;;  %v1762_v50 = vpack.c.bf16 %v1751_v62, %v1750_v16  ;;  %v1660_v34 = vpack.c.bf16 %v1649_v32, %v1648_v23  ;;  %v1375_v62 = vld [vmem:[#allocation4 + $0x10] sm:$0xff] }
 0x224   :  { %v597_v25 = vmax.f32 %v589_v3, 0.0  ;;  %v598_v10 = vmax.f32 %v590_v48, 0.0  ;;  %v1214_v12 = vpack.c.bf16 %v1203_v63, %v1203_v63  ;;  %v6342_v3 = vunpack.c.l.bf16 %v1375_v62  ;;  %v6374_v63 = vld [vmem:[#allocation4 + $0x18] sm:$0xff]  }
 0x225   :  { %v456_v36 = vsel %vm455_vm15, %v5502_v54, %v452_v33  ;;  %v1306_v54 = vmul.f32 %v6093_v53, %v1282_v45  ;;  %v6344_v48 = vunpack.c.h.bf16 %v1375_v62  ;;  %v6359_v45 = vsel %vm8810_vm3, %v6095_v56, %v6034_v15  ;;  %8859 = vst [vmem:[#allocation48_spill] sm:$0xff] %v6374_v63 }
 0x226   :  { %v6313_v0 = vpack.c.bf16 %v598_v10, %v597_v25  ;;  %v6316_v60 = vmul.f32 %v456_v36, %v6178_v22  ;;  %v6319_v42 = vmul.f32 %v456_v36, %v6181_v58  ;;  %v6334_v58 = vsel %vm8811_vm1, %v6025_v35, %v6093_v53 }
 0x227   :  { %v1305_v51 = vmul.f32 %v6334_v58, %v6254_v6  ;;  %v1317_v23 = vpack.c.bf16 %v1306_v54, %v1306_v54  ;;  %v1410_v25 = vmul.f32 %v6008_v11, %v6342_v3  ;;  %v1411_v10 = vmul.f32 %v6259_v40, %v6344_v48 }
 0x228   :  { %8857 = vst [vmem:[#allocation46_spill] sm:$0xff] %v6316_v60  ;;  %1778 = vrot.lane.b32.xlu2 %v1762_v50, %s5641_s18  ;;  %1437 = vrot.lane.b32.xlu1 %v1420_v47, %s5638_s27  ;;  %v567_v16 = vmul.f32 %v5920_v29, %v6316_v60  ;;  %v568_v22 = vmul.f32 %v5920_v29, %v6319_v42  ;;  %v6377_v54 = vunpack.c.l.bf16 %v6244_v43 }
 0x229   :  { %8858 = vst [vmem:[#allocation47_spill] sm:$0xff] %v6319_v42  ;;  %1676 = vrot.lane.b32.xlu0 %v1660_v34, %s5636_s12  ;;  %v1304_v34 = vmul.f32 %v6025_v35, %v6252_v55  ;;  %v1201_v50 = vmul.f32 %v6097_v57, %v6252_v55  ;;  %v1545_v36 = vmul.f32 %v6271_v20, %v6095_v56 }
 0x22a   :  { %607 = vst [vmem:[#allocation4 + $0x24] sm:$0xff] %v6313_v0  ;;  %v591_v2 = vadd.f32 %v5943_v39, %v567_v16  ;;  %v592_v4 = vadd.f32 %v5943_v39, %v568_v22  ;;  %v6354_v39 = vsel %vm8809_vm2, %v6097_v57, %v6099_v28  ;;  %v1546_v15 = vmul.f32 %v6273_v49, %v6359_v45 }
 0x22b   :  { %v1316_v33 = vpack.c.bf16 %v1305_v51, %v1304_v34  ;;  %v1202_v47 = vmul.f32 %v6354_v39, %v6254_v6  ;;  %v6380_v16 = vunpack.c.h.bf16 %v6244_v43  ;;  %v1421_v22 = vpack.c.bf16 %v1411_v10, %v1410_v25  ;;  %v1170_v10 = vld [vmem:[#allocation4 + $0x18] sm:$0xf] }
 0x22c   :  { %v599_v29 = vmax.f32 %v591_v2, 0.0  ;;  %v600_v32 = vmax.f32 %v592_v4, 0.0  ;;  %v1557_v55 = vpack.c.bf16 %v1546_v15, %v1545_v36  ;;  %v1388_v51 = vunpack.c.l.bf16 %v6374_v63  ;;  %v4870_v15 = vld [vmem:[#allocation4 + $0x14] sm:$0xf0] }
 0x22d   :  { %v1213_v34 = vpack.c.bf16 %v1202_v47, %v1201_v50  ;;  %v1652_v43 = vmul.f32 %v6294_v59, %v6380_v16  ;;  %v5301_v50 = vld [vmem:[#allocation4 + $0x10] sm:$0xf0]  ;;  %v1273_v47 = vld [vmem:[#allocation4 + $0x18] sm:$0xf]  ;;  %v6397_v36 = vmul.f32 %v6342_v3, %v6000_v7 }
 0x22e   :  { %v6346_v13 = vpack.c.bf16 %v600_v32, %v599_v29  ;;  %v1753_v32 = vmul.f32 %v6004_v9, %v6377_v54  ;;  %v1412_v25 = vmul.f32 %v6010_v19, %v1388_v51 }
 0x230   :  { %1231 = vrot.lane.b32.xlu2 %v1214_v12, %s5634_s11  ;;  %1334 = vrot.lane.b32.xlu1 %v1317_v23, %s5640_s19  ;;  %608 = vst [vmem:[#allocation4 + $0x34] sm:$0xff] %v6346_v13  ;;  %v1651_v12 = vmul.f32 %v6085_v52, %v6377_v54 }
 0x231   :  { %1332 = vrot.lane.b32.xlu0 %v1316_v33, %s5640_s19  ;;  %v4876_v6 = vld [vmem:[#allocation4 + $0x24] sm:$0xf]  ;;  %v5302_v2 = vld [vmem:[#allocation4 + $0x28] sm:$0xf]  ;;  %v1754_v33 = vmul.f32 %v6287_v24, %v6380_v16 }
 0x232   :  { %v1377_v60 = vld [vmem:[#allocation4 + $0x20] sm:$0xff] }
 0x237   :  { %v5303_v62 = vld [vmem:[#allocation4 + $0x30] sm:$0xf0]  ;;  %v4878_v4 = vld [vmem:[#allocation4 + $0x34] sm:$0xf0] }
 0x238   :  { %1439 = vrot.lane.b32.xlu2 %v1421_v22, %s5638_s27  ;;  %1229 = vrot.lane.b32.xlu1 %v1213_v34, %s5634_s11  ;;  %v4877_v23 = vor.u32 %v5303_v62, %v4876_v6  ;;  %v4881_v29 = vor.u32 %v5302_v2, %v4878_v4  ;;  %v6401_v22 = vmul.f32 %v6344_v48, %v6249_v37  ;;  %v4868_v6 = vld [vmem:[#allocation4 + $0x4] sm:$0xf]  ;;  %v1182_v62 = vunpack.c.l.bf16 %v1170_v10  ;;  %v5300_v4 = vld [vmem:[#allocation4 + $0x8] sm:$0xf] }
 0x239   :  { %1573 = vrot.lane.b32.xlu0 %v1557_v55, %s5635_s30  ;;  %v1662_v34 = vpack.c.bf16 %v1652_v43, %v1651_v12  ;;  %v1764_v55 = vpack.c.bf16 %v1754_v33, %v1753_v32  ;;  %v1422_v2 = vpack.c.bf16 %v1412_v25, %v1412_v25  ;;  %v4869_v51 = vor.u32 %v5301_v50, %v4868_v6 }
 0x23a   :  { %660 = vmatpush.bf16.msrb.mxu1 %v4877_v23  ;;  %679 = vmatpush.bf16.msrb.mxu3 %v4881_v29  ;;  %v1285_v23 = vunpack.c.l.bf16 %v1273_v47  ;;  %v4873_v42 = vor.u32 %v5300_v4, %v4870_v15  ;;  %v1307_v12 = vmul.f32 %v6342_v3, %v6025_v35  ;;  %v1308_v43 = vmul.f32 %v6344_v48, %v6334_v58  ;;  %v1477_v29 = vld [vmem:[#allocation4 + $0x14] sm:$0xff] }
 0x23b   :  { %v1206_v32 = vmul.f32 %v6099_v28, %v1182_v62  ;;  %v6414_v33 = vunpack.c.l.bf16 %v6313_v0  ;;  %v6418_v10 = vunpack.c.h.bf16 %v6313_v0  ;;  %v6420_v50 = vunpack.c.l.bf16 %v1377_v60 }
 0x23c   :  { %v1309_v25 = vmul.f32 %v6093_v53, %v1285_v23  ;;  %v1318_v47 = vpack.c.bf16 %v1308_v43, %v1307_v12  ;;  %v1548_v0 = vmul.f32 %v6377_v54, %v6095_v56  ;;  %v6456_v43 = vmul.f32 %v6131_v5, %v6377_v54 }
 0x23d   :  { %v1216_v15 = vpack.c.bf16 %v1206_v32, %v1206_v32  ;;  %v1413_v4 = vmul.f32 %v6008_v11, %v6420_v50  ;;  %v1485_v30 = vunpack.c.h.bf16 %v1477_v29  ;;  %v1654_v54 = vmul.f32 %v6414_v33, %v6085_v52 }
 0x23e   :  { %661 = vmatpush.bf16.msrb.mxu1 %v4869_v51  ;;  %680 = vmatpush.bf16.msrb.mxu3 %v4873_v42  ;;  %v6422_v42 = vunpack.c.h.bf16 %v1377_v60  ;;  %v1319_v6 = vpack.c.bf16 %v1309_v25, %v1309_v25  ;;  %v6438_v60 = vmul.f32 %v6131_v5, %v6271_v20  ;;  %v1549_v51 = vmul.f32 %v6380_v16, %v6359_v45  ;;  %v4889_v25 = vld [vmem:[%s8716_s4 + $0x4] ss:$8 sm:$0x3] }
 0x23f   :  { %8860 = vst [vmem:[#allocation49_spill] sm:$0xff] %v6456_v43  ;;  %v1204_v20 = vmul.f32 %v6342_v3, %v6097_v57  ;;  %v1491_v41 = vperm.slane %v4889_v25, 0  ;;  %v1492_v44 = vperm.slane %v4889_v25, 1  ;;  %v1825_v3 = vld [vmem:[#allocation4 + $0x34] sm:$0xff] }
 0x240   :  { %1680 = vrot.lane.b32.xlu2 %v1662_v34, %s5636_s12  ;;  %1782 = vrot.lane.b32.xlu1 %v1764_v55, %s5641_s18  ;;  %v1849_v34 = vsel %vm8808_vm4, %v6131_v5, %v6123_v31  ;;  %v6429_v55 = vmul.f32 %v6131_v5, %v6414_v33  ;;  %v1414_v23 = vmul.f32 %v6259_v40, %v6422_v42  ;;  %v1839_v43 = vunpack.c.h.bf16 %v1825_v3 }
 0x241   :  { %1441 = vrot.lane.b32.xlu0 %v1422_v2, %s5638_s27  ;;  %v6434_v62 = vmul.f32 %v1849_v34, %v6418_v10  ;;  %v1478_v2 = vld [vmem:[#allocation4 + $0x24] sm:$0xff]  ;;  %v6452_v12 = vmul.f32 %v1849_v34, %v6273_v49  ;;  %v6459_v32 = vmul.f32 %v1849_v34, %v6380_v16  ;;  %v1205_v49 = vmul.f32 %v6344_v48, %v6354_v39 }
 0x242   :  { %v1559_v8 = vpack.c.bf16 %v1549_v51, %v1548_v0  ;;  %v1487_v1 = vunpack.c.h.bf16 %v1478_v2  ;;  %v1423_v26 = vpack.c.bf16 %v1414_v23, %v1413_v4  ;;  %v1484_v48 = vunpack.c.l.bf16 %v1477_v29 }
 0x243   :  { %v1215_v61 = vpack.c.bf16 %v1205_v49, %v1204_v20  ;;  %v1838_v16 = vunpack.c.l.bf16 %v1825_v3  ;;  %v6486_v23 = vmul.f32 %v1849_v34, %v1839_v43  ;;  %v1502_v25 = vmul.f32 %v1839_v43, %v1492_v44  ;;  %v1172_v3 = vld [vmem:[#allocation4 + $0x28] sm:$0xf] }
 0x244   :  { %v1500_v63 = vmul.f32 %v1492_v44, %v1487_v1  ;;  %v1655_v1 = vmul.f32 %v6418_v10, %v6294_v59  ;;  %v1311_v49 = vmul.f32 %v6422_v42, %v6334_v58 }
 0x245   :  { %v6484_v29 = vmul.f32 %v6131_v5, %v1838_v16  ;;  %v1501_v20 = vmul.f32 %v1838_v16, %v1491_v41  ;;  %v1067_v16 = vld [vmem:[#allocation4 + $0x18] sm:$0xf] }
 0x247   :  { %v1506_v5 = vpack.c.bf16 %v1502_v25, %v1501_v20  ;;  %v6515_v25 = vld [vmem:[#allocation4 + $0x38] sm:$0xff]  }
 0x248   :  { %1336 = vrot.lane.b32.xlu2 %v1318_v47, %s5640_s19  ;;  %1235 = vrot.lane.b32.xlu1 %v1216_v15, %s5634_s11  ;;  %v6464_v47 = vld [vmem:[#allocation4 + $0x28] sm:$0xff]   ;;  %v1486_v15 = vunpack.c.l.bf16 %v1478_v2 }
 0x249   :  { %1338 = vrot.lane.b32.xlu0 %v1319_v6, %s5640_s19  ;;  %v1476_v6 = vld [vmem:[#allocation4 + $0x4] sm:$0xff]  ;;  %v1391_v18 = vunpack.c.l.bf16 %v6464_v47  ;;  %1510 = vst [vmem:[#allocation3 + $0x98] sm:$0xff] %v1506_v5 }
 0x24a   :  { %v1482_v17 = vunpack.c.l.bf16 %v1476_v6  ;;  %v1483_v21 = vunpack.c.h.bf16 %v1476_v6  ;;  %v1499_v27 = vmul.f32 %v1491_v41, %v1486_v15  ;;  %v1664_v15 = vpack.c.bf16 %v1655_v1, %v1654_v54 }
 0x24b   :  { %v1415_v4 = vmul.f32 %v6010_v19, %v1391_v18  ;;  %v1871_v18 = vpack.c.bf16 %v6486_v23, %v6484_v29  ;;  %v1310_v6 = vmul.f32 %v6420_v50, %v6025_v35  ;;  %v1208_v1 = vmul.f32 %v6422_v42, %v6354_v39 }
 0x24c   :  { %v1505_v0 = vpack.c.bf16 %v1500_v63, %v1499_v27  ;;  %v1495_v2 = vmul.f32 %v1491_v41, %v1482_v17  ;;  %v1496_v51 = vmul.f32 %v1492_v44, %v1483_v21  ;;  %v1756_v17 = vmul.f32 %v6004_v9, %v6414_v33  ;;  %v1275_v21 = vld [vmem:[#allocation4 + $0x28] sm:$0xf] }
 0x24d   :  { %v1424_v34 = vpack.c.bf16 %v1415_v4, %v1415_v4  ;;  %v1185_v4 = vunpack.c.l.bf16 %v1172_v3  ;;  %v1104_v3 = vmul.f32 %v6422_v42, %v6249_v37 }
 0x24e   :  { %1509 = vst [vmem:[#allocation3 + $0x90] sm:$0xff] %v1505_v0  ;;  %v1503_v27 = vpack.c.bf16 %v1496_v51, %v1495_v2  ;;  %v1320_v0 = vpack.c.bf16 %v1311_v49, %v1310_v6  ;;  %v1078_v2 = vunpack.c.l.bf16 %v1067_v16  ;;  %v1103_v16 = vmul.f32 %v6420_v50, %v6000_v7 }
 0x24f   :  { %v1209_v20 = vmul.f32 %v6099_v28, %v1185_v4 }
 0x250   :  { %1577 = vrot.lane.b32.xlu2 %v1559_v8, %s5635_s30  ;;  %1443 = vrot.lane.b32.xlu1 %v1423_v26, %s5638_s27  ;;  %v1497_v8 = vmul.f32 %v1491_v41, %v1484_v48  ;;  %v1498_v26 = vmul.f32 %v1492_v44, %v1485_v30  ;;  %1507 = vst [vmem:[#allocation3 + $0x80] sm:$0xff] %v1503_v27  ;;  %v1288_v41 = vunpack.c.l.bf16 %v1275_v21  ;;  %v1394_v27 = vunpack.c.l.bf16 %v6515_v25 }
 0x251   :  { %1233 = vrot.lane.b32.xlu0 %v1215_v61, %s5634_s11  ;;  %v1757_v61 = vmul.f32 %v6287_v24, %v6418_v10  ;;  %v1551_v44 = vmul.f32 %v6414_v33, %v6095_v56  ;;  %v1552_v30 = vmul.f32 %v6418_v10, %v6359_v45  ;;  %v1102_v33 = vmul.f32 %v6101_v14, %v1078_v2 }
 0x252   :  { %v1504_v63 = vpack.c.bf16 %v1498_v26, %v1497_v8  ;;  %v1312_v54 = vmul.f32 %v6093_v53, %v1288_v41  ;;  %v1207_v10 = vmul.f32 %v6420_v50, %v6097_v57  ;;  %v1069_v8 = vld [vmem:[#allocation4 + $0x28] sm:$0xf]  ;;  %v6518_v26 = vunpack.c.l.bf16 %v6346_v13 }
 0x253   :  { %v1766_v43 = vpack.c.bf16 %v1757_v61, %v1756_v17  ;;  %v1561_v48 = vpack.c.bf16 %v1552_v30, %v1551_v44  ;;  %v1112_v17 = vpack.c.bf16 %v1102_v33, %v1102_v33  ;;  %v6522_v21 = vunpack.c.h.bf16 %v6346_v13  ;;  %v1276_v13 = vld [vmem:[#allocation4 + $0x30] sm:$0xff] }
 0x254   :  { %1508 = vst [vmem:[#allocation3 + $0x88] sm:$0xff] %v1504_v63  ;;  %v1321_v51 = vpack.c.bf16 %v1312_v54, %v1312_v54  ;;  %v1217_v61 = vpack.c.bf16 %v1208_v1, %v1207_v10  ;;  %v1218_v5 = vpack.c.bf16 %v1209_v20, %v1209_v20  ;;  %v1081_v63 = vunpack.c.l.bf16 %v1069_v8  ;;  %v1174_v20 = vld [vmem:[#allocation4 + $0x38] sm:$0xf] }
 0x255   :  { %v1289_v6 = vunpack.c.l.bf16 %v1276_v13  ;;  %v1290_v49 = vunpack.c.h.bf16 %v1276_v13  ;;  %v1113_v2 = vpack.c.bf16 %v1104_v3, %v1103_v16 }
 0x256   :  { %v1105_v41 = vmul.f32 %v6101_v14, %v1081_v63  ;;  %v1658_v63 = vmul.f32 %v6522_v21, %v6294_v59 }
 0x257   :  { %v1210_v50 = vmul.f32 %v1289_v6, %v6097_v57  ;;  %v1211_v42 = vmul.f32 %v1290_v49, %v6354_v39  ;;  %v1416_v10 = vmul.f32 %v6008_v11, %v1289_v6  ;;  %v1417_v1 = vmul.f32 %v6259_v40, %v1290_v49 }
 0x258   :  { %1445 = vrot.lane.b32.xlu2 %v1424_v34, %s5638_s27  ;;  %1684 = vrot.lane.b32.xlu1 %v1664_v15, %s5636_s12  ;;  %v1418_v34 = vmul.f32 %v6010_v19, %v1394_v27  ;;  %v1759_v15 = vmul.f32 %v6004_v9, %v6518_v26  ;;  %v1114_v54 = vpack.c.bf16 %v1105_v41, %v1105_v41  ;;  %v6536_v19 = vpop.xlane.xlu2 %396  ;;  %v1795_v40 = vrot.slane %v6119_v46, 4 }
 0x259   :  { %1786 = vrot.lane.b32.xlu0 %v1766_v43, %s5641_s18  ;;  %v1760_v43 = vmul.f32 %v6287_v24, %v6522_v21  ;;  %v1313_v9 = vmul.f32 %v6025_v35, %v1289_v6  ;;  %v1314_v24 = vmul.f32 %v6334_v58, %v1290_v49  ;;  %v8861_v35 = vpack.c.bf16 %v6401_v22, %v6397_v36 }
 0x25a   :  { %v1426_v44 = vpack.c.bf16 %v1418_v34, %v1418_v34  ;;  %v5643_v58 = vmov 8   ;;  %v1219_v8 = vpack.c.bf16 %v1211_v42, %v1210_v50  ;;  %v1188_v36 = vunpack.c.l.bf16 %v1174_v20  ;;  %v1071_v34 = vld [vmem:[#allocation4 + $0x38] sm:$0xf]  ;;  %v8863_v50 = vld [vmem:[#allocation33_spill] sm:$0xff]  ;;  %v8864_v20 = vld [vmem:[#allocation26_spill] sm:$0xff] }
 0x25b   :  { %v1768_v30 = vpack.c.bf16 %v1760_v43, %v1759_v15  ;;  %5453 = vset.pattern.permute.xlu1 %v5643_v58  ;;  %5452 = vset.pattern.permute.xlu0 %v5643_v58  ;;  %v1425_v22 = vpack.c.bf16 %v1417_v1, %v1416_v10  ;;  %v1107_v39 = vmul.f32 %v1290_v49, %v6249_v37  ;;  %v1084_v41 = vunpack.c.l.bf16 %v1071_v34 }
 0x25c   :  { %5454 = vset.pattern.permute.xlu2 %v5643_v58  ;;  %v1212_v11 = vmul.f32 %v6099_v28, %v1188_v36  ;;  %v1695_v42 = vrot.slane %v8863_v50, 4 }
 0x25e   :  { %v1220_v28 = vpack.c.bf16 %v1212_v11, %v1212_v11 }
 0x260   :  { %1581 = vrot.lane.b32.xlu1 %v1561_v48, %s5635_s30  ;;  %1340 = vrot.lane.b32.xlu2 %v1320_v0, %s5640_s19  ;;  %v1277_v48 = vld [vmem:[#allocation4 + $0x38] sm:$0xf]  ;;  %v1322_v0 = vpack.c.bf16 %v1314_v24, %v1313_v9  ;;  %v1837_v24 = vunpack.c.h.bf16 %v6464_v47  ;;  %v6597_v47 = vld [vmem:[%s8714_s5 + $0x8] sm:$0xff] }
 0x261   :  { %1342 = vrot.lane.b32.xlu0 %v1321_v51, %s5640_s19  ;;  %v1291_v51 = vunpack.c.l.bf16 %v1277_v48 }
 0x263   :  { %v1315_v33 = vmul.f32 %v6093_v53, %v1291_v51  ;;  %v1106_v53 = vmul.f32 %v1289_v6, %v6000_v7  ;;  %v1831_v7 = vunpack.c.h.bf16 %v6303_v38  ;;  %v1108_v38 = vmul.f32 %v6101_v14, %v1084_v41 }
 0x264   :  { %v1555_v6 = vmul.f32 %v6522_v21, %v6359_v45  ;;  %v8862_v51 = vpack.c.bf16 %v6434_v62, %v6429_v55  ;;  %v6615_v62 = vld [vmem:[%s8714_s5 + $0x18] sm:$0xff] }
 0x265   :  { %v1115_v43 = vpack.c.bf16 %v1107_v39, %v1106_v53  ;;  %v1855_v13 = vmul.f32 %v6123_v31, %v1831_v7 }
 0x267   :  { %v1866_v49 = vpack.c.bf16 %v1855_v13, %v1855_v13  ;;  %v5644_v13 = vmov 9  }
 0x268   :  { %1131 = vrot.lane.b32.xlu1 %v1112_v17, %s5642_s21  ;;  %1237 = vrot.lane.b32.xlu2 %v1217_v61, %s5634_s11  ;;  %v1323_v17 = vpack.c.bf16 %v1315_v33, %v1315_v33  ;;  %v6562_v61 = vpop.xlane.xlu0 %390 }
 0x269   :  { %1239 = vrot.lane.b32.xlu0 %v1218_v5, %s5634_s11  ;;  %v1657_v5 = vmul.f32 %v6518_v26, %v6085_v52  ;;  %v6574_v52 = vpop.xlane.xlu1 %393 }
 0x26b   :  { %v1666_v46 = vpack.c.bf16 %v1658_v63, %v1657_v5  ;;  %v8866_v5 = vpack.c.bf16 %v6452_v12, %v6438_v60  ;;  %v8867_v60 = vld [vmem:[#allocation49_spill] sm:$0xff] }
 0x26c   :  { %v8868_v12 = vpack.c.bf16 %v6459_v32, %v8867_v60  ;;  %v8872_v60 = vld [vmem:[#allocation23_spill] sm:$0xff] }
 0x270   :  { %1449 = vrot.lane.b32.xlu1 %v1426_v44, %s5638_s27  ;;  %1790 = vrot.lane.b32.xlu2 %v1768_v30, %s5641_s18  ;;  %v6580_v44 = vpop.xlane.xlu0 %399  ;;  %v1554_v30 = vmul.f32 %v6518_v26, %v6095_v56  ;;  %v1861_v26 = vmul.f32 %v6123_v31, %v1837_v24 }
 0x271   :  { %1135 = vrot.lane.b32.xlu0 %v1114_v54, %s5642_s21  ;;  %v1116_v54 = vpack.c.bf16 %v1108_v38, %v1108_v38 }
 0x272   :  { %v1563_v9 = vpack.c.bf16 %v1555_v6, %v1554_v30  ;;  %v8869_v30 = vld [vmem:[#allocation34_spill] sm:$0xff] }
 0x273   :  { %v1592_v6 = vrot.slane %v8869_v30, 4 }
 0x278   :  { %1344 = vrot.lane.b32.xlu1 %v1322_v0, %s5640_s19  ;;  %1133 = vrot.lane.b32.xlu2 %v1113_v2, %s5642_s21  ;;  %v1840_v0 = vunpack.c.h.bf16 %v6515_v25  ;;  %v1870_v2 = vpack.c.bf16 %v1861_v26, %v1861_v26  ;;  %v6647_v26 = vld [vmem:[%s8714_s5 + $0x10] sm:$0xff] }
 0x279   :  { %1129 = vrot.lane.b32.xlu0 %v8861_v35, %s5642_s21 }
 0x27a   :  { %v1128_v4 = vpop.permute.xlu2 %1127 }
 0x27b   :  { %v1142_v3 = vrot.slane %v1128_v4, 4  ;;  %v1864_v4 = vmul.f32 %v6123_v31, %v1840_v0  ;;  %v6655_v0 = vld [vmem:[%s8714_s5] sm:$0xff] }
 0x27d   :  { %v1872_v39 = vpack.c.bf16 %v1864_v4, %v1864_v4  ;;  %v8871_v4 = vld [vmem:[#allocation22_spill] sm:$0xff] }
 0x27e   :  { %v1797_v50 = vrot.slane %v8871_v4, 4 }
 0x280   :  { %1241 = vrot.lane.b32.xlu1 %v1219_v8, %s5634_s11  ;;  %1346 = vrot.lane.b32.xlu2 %v1323_v17, %s5640_s19  ;;  %v1693_v8 = vrot.slane %v8864_v20, 4 }
 0x281   :  { %1447 = vrot.lane.b32.xlu0 %v1425_v22, %s5638_s27 }
 0x282   :  { %v1779_v57 = vpop.permute.xlu2 %1778 }
 0x283   :  { %v1794_v27 = vrot.slane %v1779_v57, 4 }
 0x285   :  { %v1802_v15 = vsel %vm8794_vm5, %v1794_v27, %v1795_v40  ;;  %v8865_v40 = vld [vmem:[#allocation48_spill] sm:$0xff] }
 0x286   :  { %v1804_v37 = vsel %vm8809_vm2, %v1779_v57, %v1802_v15  ;;  %v1834_v27 = vunpack.c.h.bf16 %v8865_v40 }
 0x287   :  { %1815 = vst [vmem:[#allocation3 + $0xe0] sm:$0xff] %v1804_v37 }
 0x288   :  { %1137 = vrot.lane.b32.xlu1 %v1115_v43, %s5642_s21  ;;  %1243 = vrot.lane.b32.xlu2 %v1220_v28, %s5634_s11  ;;  %v1858_v37 = vmul.f32 %v6123_v31, %v1834_v27 }
 0x289   :  { %1688 = vrot.lane.b32.xlu0 %v1666_v46, %s5636_s12 }
 0x28a   :  { %v6576_v59 = vpop.permute.xlu2 %1231  ;;  %v1868_v46 = vpack.c.bf16 %v1858_v37, %v1858_v37 }
 0x290   :  { %1883 = vrot.lane.b32.xlu1 %v1866_v49, %s5639_s29  ;;  %1139 = vrot.lane.b32.xlu2 %v1116_v54, %s5642_s21  ;;  %v1246_v49 = vrot.slane %v6576_v59, 4 }
 0x291   :  { %1585 = vrot.lane.b32.xlu0 %v1563_v9, %s5635_s30 }
 0x292   :  { %v6590_v14 = vpop.permute.xlu2 %1439  ;;  %v1126_v16 = vpop.permute.xlu1 %1125 }
 0x293   :  { %v1436_v48 = vpop.permute.xlu0 %1435  ;;  %v1141_v56 = vrot.slane %v1126_v16, 4 }
 0x294   :  { %v1451_v33 = vrot.slane %v1436_v48, 4 }
 0x295   :  { %v1150_v45 = vsel %vm8794_vm5, %v1141_v56, %v1142_v3 }
 0x296   :  { %v1152_v21 = vsel %vm8808_vm4, %v1126_v16, %v1150_v45  ;;  %v8870_v16 = vld [vmem:[#allocation37_spill] sm:$0xff] }
 0x297   :  { %1163 = vst [vmem:[#allocation3] sm:$0xff] %v1152_v21  ;;  %v1590_v3 = vrot.slane %v8870_v16, 4 }
 0x298   :  { %2407 = vperm.xlu1 %5453, %v6597_v47   ;;  %1889 = vrot.lane.b32.xlu2 %v8862_v51, %s5639_s29  ;;  %v5645_v51 = vmov 6  }
 0x299   :  { %1891 = vrot.lane.b32.xlu0 %v1870_v2, %s5639_s29 }
 0x29a   :  { %v1681_v35 = vpop.permute.xlu2 %1680  ;;  %v1438_v58 = vpop.permute.xlu1 %1437 }
 0x29b   :  { %v1694_v10 = vrot.slane %v1681_v35, 4  ;;  %v1677_v25 = vpop.permute.xlu0 %1676  ;;  %v1452_v1 = vrot.slane %v1438_v58, 4 }
 0x29c   :  { %v1692_v17 = vrot.slane %v1677_v25, 4 }
 0x29d   :  { %v1703_v36 = vsel %vm8794_vm5, %v1694_v10, %v1695_v42  ;;  %v1459_v55 = vsel %vm8794_vm5, %v1451_v33, %v1452_v1  ;;  %v1453_v10 = vrot.slane %v6590_v14, 4 }
 0x29e   :  { %v1704_v22 = vsel %vm8811_vm1, %v1681_v35, %v1703_v36  ;;  %v1700_v57 = vsel %vm8794_vm5, %v1692_v17, %v1693_v8  ;;  %v1461_v53 = vsel %vm8810_vm3, %v1436_v48, %v1459_v55 }
 0x29f   :  { %1714 = vst [vmem:[#allocation3 + $0xc8] sm:$0xff] %v1704_v22  ;;  %v1702_v11 = vsel %vm8811_vm1, %v1677_v25, %v1700_v57 }
 0x2a0   :  { %1713 = vst [vmem:[#allocation3 + $0xc0] sm:$0xff] %v1702_v11  ;;  %2417 = vperm.xlu1 %5453, %v6615_v62   ;;  %1895 = vrot.lane.b32.xlu2 %v1872_v39, %s5639_s29  ;;  %v5646_v11 = vmov 7  }
 0x2a1   :  { %1472 = vst [vmem:[#allocation3 + $0x60] sm:$0xff] %v1461_v53  ;;  %1881 = vrot.lane.b32.xlu0 %v8866_v5, %s5639_s29 }
 0x2a2   :  { %v6628_v63 = vpop.permute.xlu2 %1336  ;;  %v1335_v34 = vpop.permute.xlu1 %1334 }
 0x2a3   :  { %v1333_v15 = vpop.permute.xlu0 %1332  ;;  %v1349_v7 = vrot.slane %v1335_v34, 4  ;;  %v1350_v57 = vrot.slane %v6628_v63, 4 }
 0x2a4   :  { %v1348_v43 = vrot.slane %v1333_v15, 4 }
 0x2a6   :  { %v1356_v28 = vsel %vm8794_vm5, %v1348_v43, %v1349_v7 }
 0x2a7   :  { %v1358_v41 = vsel %vm8812_vm11, %v1333_v15, %v1356_v28 }
 0x2a8   :  { %1369 = vst [vmem:[#allocation3 + $0x40] sm:$0xff] %v1358_v41  ;;  %5456 = vset.pattern.permute.xlu1 %v5644_v13  ;;  %1885 = vrot.lane.b32.xlu2 %v8868_v12, %s5639_s29  ;;  %v1801_v12 = vrot.slane %v8872_v60, 4 }
 0x2a9   :  { %1887 = vrot.lane.b32.xlu0 %v1868_v46, %s5639_s29  ;;  %2433 = vperm.xlu1 %5456, %v6597_v47  }
 0x2aa   :  { %v1578_v38 = vpop.permute.xlu2 %1577  ;;  %v1230_v31 = vpop.permute.xlu1 %1229 }
 0x2ab   :  { %v1591_v54 = vrot.slane %v1578_v38, 4  ;;  %v1574_v9 = vpop.permute.xlu0 %1573  ;;  %v1245_v24 = vrot.slane %v1230_v31, 4 }
 0x2ac   :  { %v1589_v48 = vrot.slane %v1574_v9, 4 }
 0x2ad   :  { %v1600_v56 = vsel %vm8794_vm5, %v1591_v54, %v1592_v6  ;;  %v1253_v32 = vsel %vm8794_vm5, %v1245_v24, %v1246_v49  ;;  %v5647_v49 = vmov 10  }
 0x2ae   :  { %v1601_v45 = vsel %vm8814_vm8, %v1578_v38, %v1600_v56  ;;  %v1597_v21 = vsel %vm8794_vm5, %v1589_v48, %v1590_v3  ;;  %v1255_v59 = vsel %vm8813_vm0, %v1230_v31, %v1253_v32  ;;  %v8873_v38 = vld [vmem:[#allocation25_spill] sm:$0xff] }
 0x2af   :  { %1611 = vst [vmem:[#allocation3 + $0xa8] sm:$0xff] %v1601_v45  ;;  %v1599_v2 = vsel %vm8814_vm8, %v1574_v9, %v1597_v21  ;;  %v1697_v31 = vrot.slane %v8873_v38, 4  ;;  %v8874_v9 = vld [vmem:[#allocation21_spill] sm:$0xff] }
 0x2b0   :  { %1610 = vst [vmem:[#allocation3 + $0xa0] sm:$0xff] %v1599_v2  ;;  %2412 = vperm.xlu2 %5454, %v6647_v26   ;;  %v1799_v24 = vrot.slane %v8874_v9, 4  ;;  %v8875_v2 = vld [vmem:[#allocation27_spill] sm:$0xff] }
 0x2b1   :  { %1266 = vst [vmem:[#allocation3 + $0x20] sm:$0xff] %v1255_v59  ;;  %2402 = vperm.xlu0 %5452, %v6655_v0   ;;  %5458 = vset.pattern.permute.xlu1 %v5645_v51 }
 0x2b2   :  { %v1446_v35 = vpop.permute.xlu2 %1445  ;;  %2469 = vperm.xlu1 %5458, %v6655_v0   ;;  %v1783_v58 = vpop.permute.xlu1 %1782 }
 0x2b3   :  { %v1442_v42 = vpop.permute.xlu0 %1441  ;;  %v1796_v33 = vrot.slane %v1783_v58, 4  ;;  %v1456_v5 = vrot.slane %v1446_v35, 4 }
 0x2b4   :  { %v1454_v25 = vrot.slane %v1442_v42, 4  ;;  %v5648_v42 = vmov 12  }
 0x2b5   :  { %v1805_v1 = vsel %vm8794_vm5, %v1796_v33, %v1797_v50 }
 0x2b6   :  { %v1462_v20 = vsel %vm8794_vm5, %v1453_v10, %v1454_v25  ;;  %v1806_v8 = vsel %vm8809_vm2, %v1783_v58, %v1805_v1 }
 0x2b7   :  { %v1463_v17 = vsel %vm8810_vm3, %v6590_v14, %v1462_v20  ;;  %1816 = vst [vmem:[#allocation3 + $0xe8] sm:$0xff] %v1806_v8 }
 0x2b8   :  { %1473 = vst [vmem:[#allocation3 + $0x68] sm:$0xff] %v1463_v17  ;;  %5455 = vset.pattern.permute.xlu2 %v5644_v13 }
 0x2b9   :  { %5457 = vset.pattern.permute.xlu0 %v5644_v13  ;;  %2429 = vperm.xlu2 %5455, %v6655_v0  }
 0x2ba   :  { %2441 = vperm.xlu0 %5457, %v6615_v62   ;;  %2477 = vperm.xlu1 %5458, %v6647_v26   ;;  %v6671_v36 = vpop.permute.xlu2 %1340  ;;  %v1236_v55 = vpop.permute.xlu1 %1235 }
 0x2bb   :  { %v1339_v22 = vpop.permute.xlu0 %1338  ;;  %v1248_v7 = vrot.slane %v1236_v55, 4  ;;  %v1352_v4 = vrot.slane %v6671_v36, 4 }
 0x2bc   :  { %v1351_v53 = vrot.slane %v1339_v22, 4 }
 0x2be   :  { %v1359_v39 = vsel %vm8794_vm5, %v1350_v57, %v1351_v53  ;;  %v5341_v55 = vld [vmem:[#allocation3 + $0xe4] sm:$0xf0] }
 0x2bf   :  { %v1360_v14 = vsel %vm8812_vm11, %v6628_v63, %v1359_v39  ;;  %v5032_v39 = vld [vmem:[#allocation3 + $0xe0] sm:$0xf] }
 0x2c0   :  { %1370 = vst [vmem:[#allocation3 + $0x48] sm:$0xff] %v1360_v14 }
 0x2c1   :  { %2437 = vperm.xlu2 %5455, %v6647_v26  }
 0x2c2   :  { %5460 = vset.pattern.permute.xlu0 %v5646_v11  ;;  %5461 = vset.pattern.permute.xlu1 %v5646_v11  ;;  %v6680_v40 = vpop.permute.xlu2 %1237  ;;  %v1444_v27 = vpop.permute.xlu1 %1443 }
 0x2c3   :  { %v1234_v34 = vpop.permute.xlu0 %1233  ;;  %2493 = vperm.xlu0 %5460, %v6655_v0   ;;  %v1455_v15 = vrot.slane %v1444_v27, 4  ;;  %2497 = vperm.xlu1 %5461, %v6597_v47   ;;  %v1249_v14 = vrot.slane %v6680_v40, 4 }
 0x2c4   :  { %v1247_v63 = vrot.slane %v1234_v34, 4 }
 0x2c5   :  { %v1464_v37 = vsel %vm8794_vm5, %v1455_v15, %v1456_v5  ;;  %v5649_v5 = vmov 13   ;;  %v5096_v15 = vld [vmem:[%s8716_s4 + $0x3] ss:$8 sm:$0x3] }
 0x2c6   :  { %v1256_v43 = vsel %vm8794_vm5, %v1247_v63, %v1248_v7  ;;  %v1465_v28 = vsel %vm8810_vm3, %v1444_v27, %v1464_v37  ;;  %v3464_v29 = vperm.slane %v5096_v15, 0 }
 0x2c7   :  { %v1257_v41 = vsel %vm8813_vm0, %v1234_v34, %v1256_v43  ;;  %1474 = vst [vmem:[#allocation3 + $0x70] sm:$0xff] %v1465_v28  ;;  %v5304_v28 = vld [vmem:[%s8718_s3] sm:$0xff] }
 0x2c8   :  { %1267 = vst [vmem:[#allocation3 + $0x28] sm:$0xff] %v1257_v41  ;;  %4884 = vmatmul.msk.bf16.vlgmr.msrb.gmra.mxu3 %vm8795_vm6, %v5304_v28  ;;  %4882 = vmatmul.msk.bf16.vlgmr.msrb.gmra.mxu1 %vm8795_vm6, %v5304_v28 }
 0x2c9   :  { %5459 = vset.pattern.permute.xlu2 %v5645_v51  ;;  %v1594_v51 = vrot.slane %v8875_v2, 4 }
 0x2ca   :  { %v1791_v46 = vpop.permute.xlu2 %1790  ;;  %2473 = vperm.xlu2 %5459, %v6597_v47   ;;  %v1685_v13 = vpop.permute.xlu1 %1684 }
 0x2cb   :  { %v1787_v30 = vpop.permute.xlu0 %1786  ;;  %v1800_v6 = vrot.slane %v1791_v46, 4  ;;  %5465 = vset.pattern.permute.xlu0 %v5647_v49  ;;  %v1696_v54 = vrot.slane %v1685_v13, 4  ;;  %2505 = vperm.xlu1 %5461, %v6615_v62  }
 0x2cc   :  { %v1798_v16 = vrot.slane %v1787_v30, 4  ;;  %2625 = vperm.xlu0 %5465, %v6647_v26  }
 0x2cd   :  { %v1809_v3 = vsel %vm8794_vm5, %v1800_v6, %v1801_v12  ;;  %v1705_v48 = vsel %vm8794_vm5, %v1696_v54, %v1697_v31 }
 0x2ce   :  { %v1807_v56 = vsel %vm8794_vm5, %v1798_v16, %v1799_v24  ;;  %v1810_v32 = vsel %vm8809_vm2, %v1791_v46, %v1809_v3  ;;  %v1706_v45 = vsel %vm8811_vm1, %v1685_v13, %v1705_v48  ;;  %v3465_v46 = vperm.slane %v5096_v15, 1  ;;  %v5100_v16 = vld [vmem:[%s8716_s4 + $0x7] ss:$8 sm:$0x3]  ;;  %v5325_v15 = vld [vmem:[#allocation3 + $0x64] sm:$0xf0] }
 0x2cf   :  { %v1808_v21 = vsel %vm8809_vm2, %v1787_v30, %v1807_v56  ;;  %1818 = vst [vmem:[#allocation3 + $0xf8] sm:$0xff] %v1810_v32  ;;  %v5650_v30 = vmov 11   ;;  %v3798_v48 = vperm.slane %v5100_v16, 0 }
 0x2d0   :  { %1817 = vst [vmem:[#allocation3 + $0xf0] sm:$0xff] %v1808_v21 }
 0x2d1   :  { %1715 = vst [vmem:[#allocation3 + $0xd0] sm:$0xff] %v1706_v45 }
 0x2d2   :  { %2481 = vperm.xlu2 %5459, %v6615_v62   ;;  %v1582_v59 = vpop.permute.xlu1 %1581  ;;  %v1134_v22 = vpop.permute.xlu2 %1133 }
 0x2d3   :  { %v1343_v35 = vpop.permute.xlu0 %1342  ;;  %v1593_v58 = vrot.slane %v1582_v59, 4  ;;  %5463 = vset.pattern.permute.xlu1 %v5647_v49 }
 0x2d4   :  { %v1353_v50 = vrot.slane %v1343_v35, 4  ;;  %5469 = vset.pattern.permute.xlu0 %v5648_v42  ;;  %2617 = vperm.xlu1 %5463, %v6655_v0  }
 0x2d5   :  { %v1602_v33 = vsel %vm8794_vm5, %v1593_v58, %v1594_v51  ;;  %2789 = vperm.xlu0 %5469, %v6597_v47  }
 0x2d6   :  { %v1361_v10 = vsel %vm8794_vm5, %v1352_v4, %v1353_v50  ;;  %v1603_v25 = vsel %vm8814_vm8, %v1582_v59, %v1602_v33  ;;  %v5343_v1 = vld [vmem:[#allocation3 + $0xf4] sm:$0xf0]  ;;  %v5305_v50 = vld [vmem:[%s8718_s3 + $0x8] sm:$0xff] }
 0x2d7   :  { %v1362_v20 = vsel %vm8812_vm11, %v6671_v36, %v1361_v10  ;;  %1612 = vst [vmem:[#allocation3 + $0xb0] sm:$0xff] %v1603_v25  ;;  %v5040_v8 = vld [vmem:[#allocation3 + $0xf0] sm:$0xf]  ;;  %v5033_v36 = vor.u32 %v5341_v55, %v5032_v39  ;;  %v3799_v10 = vperm.slane %v5100_v16, 1  ;;  %v5016_v16 = vld [vmem:[#allocation3 + $0xc0] sm:$0xf] }
 0x2d8   :  { %1371 = vst [vmem:[#allocation3 + $0x50] sm:$0xff] %v1362_v20  ;;  %v5041_v17 = vor.u32 %v5343_v1, %v5040_v8  ;;  %4885 = vmatmul.msk.bf16.gmra.mxu3 %vm8795_vm6, %v5305_v50  ;;  %4883 = vmatmul.msk.bf16.gmra.mxu1 %vm8795_vm6, %v5305_v50  ;;  %v8876_v8 = vld [vmem:[#allocation24_spill] sm:$0xff]  ;;  %v4976_v39 = vld [vmem:[#allocation3 + $0x70] sm:$0xf] }
 0x2da   :  { %2201 = vmatpush.bf16.msrb.mxu2 %v5041_v17  ;;  %5462 = vset.pattern.permute.xlu2 %v5646_v11  ;;  %v1132_v57 = vpop.permute.xlu1 %1131  ;;  %v1347_v63 = vpop.permute.xlu2 %1346  ;;  %v1699_v17 = vrot.slane %v8876_v8, 4 }
 0x2db   :  { %v1240_v53 = vpop.permute.xlu0 %1239  ;;  %2501 = vperm.xlu2 %5462, %v6647_v26   ;;  %v1355_v13 = vrot.slane %v1347_v63, 4  ;;  %v1144_v38 = vrot.slane %v1132_v57, 4  ;;  %v8877_v63 = vld [vmem:[#allocation28_spill] sm:$0xff] }
 0x2dc   :  { %v1250_v27 = vrot.slane %v1240_v53, 4  ;;  %1893 = vrot.lane.b32.xlu1 %v1871_v18, %s5639_s29  ;;  %v1145_v18 = vrot.slane %v1134_v22, 4 }
 0x2dd   :  { %5473 = vset.pattern.permute.xlu0 %v5649_v5 }
 0x2de   :  { %v1258_v34 = vsel %vm8794_vm5, %v1249_v14, %v1250_v27  ;;  %2819 = vperm.xlu0 %5473, %v6647_v26   ;;  %2202 = vmatpush.bf16.msrb.mxu2 %v5033_v36  ;;  %v5326_v14 = vld [vmem:[#allocation3 + $0x74] sm:$0xf]  ;;  %v5008_v8 = vld [vmem:[#allocation3 + $0xb0] sm:$0xf] }
 0x2df   :  { %v1259_v11 = vsel %vm8813_vm0, %v6680_v40, %v1258_v34 }
 0x2e0   :  { %1268 = vst [vmem:[#allocation3 + $0x30] sm:$0xff] %v1259_v11 }
 0x2e2   :  { %v1450_v7 = vpop.permute.xlu1 %1449 }
 0x2e3   :  { %v1136_v23 = vpop.permute.xlu0 %1135  ;;  %5464 = vset.pattern.permute.xlu2 %v5647_v49  ;;  %v1244_v49 = vpop.permute.xlu2 %1243  ;;  %v1458_v21 = vrot.slane %v1450_v7, 4  ;;  %v4970_v7 = vld [vmem:[#allocation3 + $0x68] sm:$0xf0] }
 0x2e4   :  { %v1146_v37 = vrot.slane %v1136_v23, 4  ;;  %2629 = vperm.xlu1 %5463, %v6615_v62   ;;  %2621 = vperm.xlu2 %5464, %v6597_v47   ;;  %v1252_v56 = vrot.slane %v1244_v49, 4 }
 0x2e6   :  { %v1155_v43 = vsel %vm8794_vm5, %v1145_v18, %v1146_v37  ;;  %3466 = vrot.lane.b32.xlu0 %v3464_v29, %s5635_s30  ;;  %v5324_v18 = vld [vmem:[#allocation3 + $0x64] sm:$0xf]  ;;  %v1596_v37 = vrot.slane %v8877_v63, 4  ;;  %v5331_v63 = vld [vmem:[#allocation3 + $0x94] sm:$0xf0] }
 0x2e7   :  { %v1156_v40 = vsel %vm8808_vm4, %v1134_v22, %v1155_v43  ;;  %v4973_v28 = vor.u32 %v5324_v18, %v4970_v7 }
 0x2e8   :  { %1165 = vst [vmem:[#allocation3 + $0x10] sm:$0xff] %v1156_v40 }
 0x2ea   :  { %v1345_v41 = vpop.permute.xlu1 %1344 }
 0x2eb   :  { %v1130_v60 = vpop.permute.xlu0 %1129  ;;  %v1354_v12 = vrot.slane %v1345_v41, 4  ;;  %v1140_v4 = vpop.permute.xlu2 %1139 }
 0x2ec   :  { %v1143_v31 = vrot.slane %v1130_v60, 4  ;;  %5467 = vset.pattern.permute.xlu1 %v5650_v30  ;;  %5466 = vset.pattern.permute.xlu2 %v5650_v30  ;;  %v1148_v25 = vrot.slane %v1140_v4, 4 }
 0x2ed   :  { %v1363_v6 = vsel %vm8794_vm5, %v1354_v12, %v1355_v13  ;;  %2645 = vperm.xlu1 %5467, %v6597_v47   ;;  %2641 = vperm.xlu2 %5466, %v6655_v0  }
 0x2ee   :  { %v1153_v54 = vsel %vm8794_vm5, %v1143_v31, %v1144_v38  ;;  %v1364_v9 = vsel %vm8812_vm11, %v1345_v41, %v1363_v6  ;;  %3468 = vrot.lane.b32.xlu0 %v3465_v46, %s5635_s30  ;;  %v4960_v38 = vld [vmem:[#allocation3 + $0x50] sm:$0xf] }
 0x2ef   :  { %v1154_v24 = vsel %vm8808_vm4, %v1130_v60, %v1153_v54  ;;  %1372 = vst [vmem:[#allocation3 + $0x58] sm:$0xff] %v1364_v9  ;;  %v5024_v31 = vld [vmem:[#allocation3 + $0xd0] sm:$0xf]  ;;  %v5322_v54 = vld [vmem:[#allocation3 + $0x54] sm:$0xf] }
 0x2f0   :  { %1164 = vst [vmem:[#allocation3 + $0x8] sm:$0xff] %v1154_v24  ;;  %v5321_v24 = vld [vmem:[#allocation3 + $0x44] sm:$0xf0] }
 0x2f2   :  { %v1242_v3 = vpop.permute.xlu1 %1241 }
 0x2f3   :  { %v1448_v32 = vpop.permute.xlu0 %1447  ;;  %v1251_v45 = vrot.slane %v1242_v3, 4  ;;  %v1890_v41 = vpop.permute.xlu2 %1889 }
 0x2f4   :  { %v1457_v59 = vrot.slane %v1448_v32, 4 }
 0x2f5   :  { %v1260_v2 = vsel %vm8794_vm5, %v1251_v45, %v1252_v56  ;;  %2653 = vperm.xlu1 %5467, %v6615_v62   ;;  %2649 = vperm.xlu2 %5466, %v6647_v26   ;;  %v4954_v56 = vld [vmem:[#allocation3 + $0x48] sm:$0xf0]  ;;  %v4952_v45 = vld [vmem:[#allocation3 + $0x40] sm:$0xf] }
 0x2f6   :  { %v1466_v51 = vsel %vm8794_vm5, %v1457_v59, %v1458_v21  ;;  %v1261_v35 = vsel %vm8813_vm0, %v1242_v3, %v1260_v2  ;;  %3800 = vrot.lane.b32.xlu0 %v3798_v48, %s5634_s11  ;;  %v5323_v46 = vld [vmem:[#allocation3 + $0x54] sm:$0xf0]  ;;  %v4962_v60 = vld [vmem:[#allocation3 + $0x58] sm:$0xf0]  ;;  %v5337_v3 = vld [vmem:[#allocation3 + $0xc4] sm:$0xf0]  ;;  %v4953_v2 = vor.u32 %v5321_v24, %v4952_v45 }
 0x2f7   :  { %v1467_v58 = vsel %vm8810_vm3, %v1448_v32, %v1466_v51  ;;  %1269 = vst [vmem:[#allocation3 + $0x38] sm:$0xff] %v1261_v35  ;;  %v4961_v6 = vor.u32 %v5323_v46, %v4960_v38  ;;  %v4965_v9 = vor.u32 %v5322_v54, %v4962_v60  ;;  %v1901_v21 = vrot.slane %v1890_v41, 4  ;;  %v5329_v46 = vld [vmem:[#allocation3 + $0x84] sm:$0xf0]  ;;  %v5314_v60 = vld [vmem:[#allocation3 + $0x14] sm:$0xf] }
 0x2f8   :  { %1475 = vst [vmem:[#allocation3 + $0x78] sm:$0xff] %v1467_v58  ;;  %v5017_v51 = vor.u32 %v5337_v3, %v5016_v16  ;;  %v5342_v54 = vld [vmem:[#allocation3 + $0xf4] sm:$0xf] }
 0x2fa   :  { %v1138_v33 = vpop.permute.xlu1 %1137 }
 0x2fb   :  { %v1689_v1 = vpop.permute.xlu0 %1688  ;;  %v1147_v20 = vrot.slane %v1138_v33, 4 }
 0x2fc   :  { %v1698_v55 = vrot.slane %v1689_v1, 4 }
 0x2fd   :  { %v1157_v22 = vsel %vm8794_vm5, %v1147_v20, %v1148_v25  ;;  %5470 = vset.pattern.permute.xlu1 %v5648_v42  ;;  %5468 = vset.pattern.permute.xlu2 %v5648_v42  ;;  %v6779_v25 = vpop.permute.xlu2 %1895  ;;  %v4944_v20 = vld [vmem:[#allocation3 + $0x30] sm:$0xf] }
 0x2fe   :  { %v1707_v57 = vsel %vm8794_vm5, %v1698_v55, %v1699_v17  ;;  %v1158_v53 = vsel %vm8808_vm4, %v1138_v33, %v1157_v22  ;;  %3802 = vrot.lane.b32.xlu0 %v3799_v10, %s5634_s11  ;;  %2794 = vperm.xlu1 %5470, %v6647_v26   ;;  %v4968_v26 = vld [vmem:[#allocation3 + $0x60] sm:$0xf]  ;;  %v5319_v58 = vld [vmem:[#allocation3 + $0x34] sm:$0xf0]  ;;  %v4946_v50 = vld [vmem:[#allocation3 + $0x38] sm:$0xf0] }
 0x2ff   :  { %v1708_v27 = vsel %vm8811_vm1, %v1689_v1, %v1707_v57  ;;  %1166 = vst [vmem:[#allocation3 + $0x18] sm:$0xff] %v1158_v53  ;;  %2784 = vperm.xlu2 %5468, %v6655_v0   ;;  %v5327_v36 = vld [vmem:[#allocation3 + $0x74] sm:$0xf0]  ;;  %v4978_v34 = vld [vmem:[#allocation3 + $0x78] sm:$0xf0]  ;;  %v4969_v40 = vor.u32 %v5325_v15, %v4968_v26  ;;  %v4945_v55 = vor.u32 %v5319_v58, %v4944_v20 }
 0x300   :  { %1716 = vst [vmem:[#allocation3 + $0xd8] sm:$0xff] %v1708_v27  ;;  %v4977_v11 = vor.u32 %v5327_v36, %v4976_v39  ;;  %v4981_v42 = vor.u32 %v5326_v14, %v4978_v34  ;;  %v5000_v33 = vld [vmem:[#allocation3 + $0xa0] sm:$0xf]  ;;  %v5333_v10 = vld [vmem:[#allocation3 + $0xa4] sm:$0xf0] }
 0x301   :  { %v5318_v57 = vld [vmem:[#allocation3 + $0x34] sm:$0xf]  ;;  %v5317_v53 = vld [vmem:[#allocation3 + $0x24] sm:$0xf0]  ;;  %v4936_v27 = vld [vmem:[#allocation3 + $0x20] sm:$0xf] }
 0x302   :  { %2182 = vmatpush.bf16.msrb.mxu0 %v4977_v11  ;;  %2239 = vmatpush.bf16.msra.mxu3 %v4981_v42  ;;  %v6768_v29 = vpop.permute.xlu1 %1883  ;;  %v4949_v39 = vor.u32 %v5318_v57, %v4946_v50  ;;  %v4938_v36 = vld [vmem:[#allocation3 + $0x28] sm:$0xf0]  ;;  %v4937_v34 = vor.u32 %v5317_v53, %v4936_v27  ;;  %v5001_v11 = vor.u32 %v5333_v10, %v5000_v33  ;;  %v5316_v15 = vld [vmem:[#allocation3 + $0x24] sm:$0xf] }
 0x303   :  { %v1586_v23 = vpop.permute.xlu0 %1585  ;;  %v4941_v26 = vor.u32 %v5316_v15, %v4938_v36  ;;  %v5340_v33 = vld [vmem:[#allocation3 + $0xe4] sm:$0xf]  ;;  %v3150_v27 = vld [vmem:[%s8716_s4] ss:$8 sm:$0x3] }
 0x304   :  { %v1595_v43 = vrot.slane %v1586_v23, 4  ;;  %v5336_v53 = vld [vmem:[#allocation3 + $0xc4] sm:$0xf] }
 0x305   :  { %v1886_v38 = vpop.permute.xlu2 %1885 }
 0x306   :  { %v1604_v13 = vsel %vm8794_vm5, %v1595_v43, %v1596_v37  ;;  %2183 = vmatpush.bf16.msrb.mxu0 %v4969_v40  ;;  %2240 = vmatpush.bf16.msra.mxu3 %v4973_v28  ;;  %v5315_v18 = vld [vmem:[#allocation3 + $0x14] sm:$0xf0]  ;;  %v4930_v43 = vld [vmem:[#allocation3 + $0x18] sm:$0xf0]  ;;  %v4928_v28 = vld [vmem:[#allocation3 + $0x10] sm:$0xf] }
 0x307   :  { %v1605_v12 = vsel %vm8814_vm8, %v1586_v23, %v1604_v13  ;;  %5471 = vset.pattern.permute.xlu1 %v5649_v5  ;;  %2799 = vperm.xlu2 %5468, %v6615_v62   ;;  %v5339_v30 = vld [vmem:[#allocation3 + $0xd4] sm:$0xf0]  ;;  %v5026_v20 = vld [vmem:[#allocation3 + $0xd8] sm:$0xf0] }
 0x308   :  { %1613 = vst [vmem:[#allocation3 + $0xb8] sm:$0xff] %v1605_v12  ;;  %2811 = vperm.xlu1 %5471, %v6655_v0   ;;  %v5025_v49 = vor.u32 %v5339_v30, %v5024_v31  ;;  %v5320_v0 = vld [vmem:[#allocation3 + $0x44] sm:$0xf]  ;;  %v5313_v12 = vld [vmem:[#allocation3 + $0x4] sm:$0xf0]  ;;  %v4933_v31 = vor.u32 %v5314_v60, %v4930_v43 }
 0x309   :  { %v4957_v35 = vor.u32 %v5320_v0, %v4954_v56  ;;  %v4920_v30 = vld [vmem:[#allocation3] sm:$0xf]  ;;  %v5099_v56 = vld [vmem:[%s8716_s4 + $0x6] ss:$8 sm:$0x3] }
 0x30a   :  { %2184 = vmatpush.bf16.msrb.mxu0 %v4961_v6  ;;  %2203 = vmatpush.bf16.msrb.mxu2 %v5025_v49  ;;  %v6776_v48 = vpop.permute.xlu1 %2407  ;;  %v4984_v6 = vld [vmem:[#allocation3 + $0x80] sm:$0xf]  ;;  %v4922_v49 = vld [vmem:[#allocation3 + $0x8] sm:$0xf0]  ;;  %v4921_v16 = vor.u32 %v5313_v12, %v4920_v30  ;;  %v5330_v43 = vld [vmem:[#allocation3 + $0x94] sm:$0xf] }
 0x30b   :  { %2241 = vmatpush.bf16.msra.mxu3 %v4965_v9  ;;  %v1892_v32 = vpop.permute.xlu0 %1891  ;;  %v5042_v9 = vld [vmem:[#allocation3 + $0xf8] sm:$0xf0]  ;;  %v4985_v3 = vor.u32 %v5329_v46, %v4984_v6  ;;  %v5306_v12 = vld [vmem:[%s8719_s2 + $0x4] sm:$0xf]  ;;  %v4896_v6 = vld [vmem:[%s8719_s2] sm:$0xf] }
 0x30c   :  { %v1902_v59 = vrot.slane %v1892_v32, 4  ;;  %v1899_v32 = vrot.slane %v1886_v38, 4 }
 0x30e   :  { %v1910_v4 = vsel %vm8794_vm5, %v1901_v21, %v1902_v59  ;;  %2185 = vmatpush.bf16.msrb.mxu0 %v4953_v2  ;;  %2204 = vmatpush.bf16.msrb.mxu2 %v5017_v51  ;;  %v5312_v59 = vld [vmem:[#allocation3 + $0x4] sm:$0xf]  ;;  %v3698_v2 = vperm.slane %v5099_v56, 0  ;;  %v3699_v51 = vperm.slane %v5099_v56, 1 }
 0x30f   :  { %v1911_v1 = vsel %vm8807_vm7, %v1890_v41, %v1910_v4  ;;  %2242 = vmatpush.bf16.msra.mxu3 %v4957_v35  ;;  %5472 = vset.pattern.permute.xlu2 %v5649_v5  ;;  %v5335_v17 = vld [vmem:[#allocation3 + $0xb4] sm:$0xf0]  ;;  %v4992_v41 = vld [vmem:[#allocation3 + $0x90] sm:$0xf]  ;;  %v4925_v0 = vor.u32 %v5312_v59, %v4922_v49  ;;  %v5045_v35 = vor.u32 %v5342_v54, %v5042_v9  ;;  %v5034_v4 = vld [vmem:[#allocation3 + $0xe8] sm:$0xf0] }
 0x310   :  { %1920 = vst [vmem:[#allocation3 + $0x110] sm:$0xff] %v1911_v1  ;;  %2823 = vperm.xlu1 %5471, %v6615_v62   ;;  %2815 = vperm.xlu2 %5472, %v6597_v47   ;;  %v5009_v22 = vor.u32 %v5335_v17, %v5008_v8  ;;  %v5095_v62 = vld [vmem:[%s8716_s4 + $0x2] ss:$8 sm:$0x3]  ;;  %v1898_v47 = vrot.slane %v6768_v29, 4  ;;  %v4929_v29 = vor.u32 %v5315_v18, %v4928_v28  ;;  %v3165_v59 = vperm.slane %v3150_v27, 1 }
 0x311   :  { %v3364_v7 = vperm.slane %v5095_v62, 0  ;;  %v3365_v23 = vperm.slane %v5095_v62, 1  ;;  %v4993_v13 = vor.u32 %v5331_v63, %v4992_v41  ;;  %v5037_v10 = vor.u32 %v5340_v33, %v5034_v4  ;;  %v5094_v1 = vld [vmem:[%s8716_s4 + $0x1] ss:$8 sm:$0x3] }
 0x312   :  { %2186 = vmatpush.bf16.msrb.mxu0 %v4945_v55  ;;  %2205 = vmatpush.bf16.msrb.mxu2 %v5009_v22  ;;  %v6785_v14 = vpop.permute.xlu1 %2417  ;;  %v5338_v55 = vld [vmem:[#allocation3 + $0xd4] sm:$0xf]  ;;  %v3264_v22 = vperm.slane %v5094_v1, 0  ;;  %v4994_v63 = vld [vmem:[#allocation3 + $0x98] sm:$0xf0] }
 0x313   :  { %2243 = vmatpush.bf16.msra.mxu3 %v4949_v39  ;;  %v1882_v5 = vpop.permute.xlu0 %1881  ;;  %3368 = vrot.lane.b32.xlu0 %v3365_v23, %s5636_s12  ;;  %v5029_v57 = vor.u32 %v5338_v55, %v5026_v20  ;;  %v5018_v39 = vld [vmem:[#allocation3 + $0xc8] sm:$0xf0]  ;;  %v5332_v23 = vld [vmem:[#allocation3 + $0xa4] sm:$0xf]  ;;  %v4997_v41 = vor.u32 %v5330_v43, %v4994_v63  ;;  %v3779_v43 = vld [vmem:[#allocation4 + $0x1c] sm:$0xf] }
 0x314   :  { %v1897_v42 = vrot.slane %v1882_v5, 4  ;;  %v5021_v36 = vor.u32 %v5336_v53, %v5018_v39  ;;  %v5307_v49 = vld [vmem:[%s8719_s2 + $0x8] sm:$0xf0] }
 0x315   :  { %v4897_v54 = vor.u32 %v5307_v49, %v4896_v6  ;;  %v3777_v49 = vld [vmem:[#allocation4 + $0xc] sm:$0xf] }
 0x316   :  { %v1905_v37 = vsel %vm8794_vm5, %v1897_v42, %v1898_v47  ;;  %2187 = vmatpush.bf16.msrb.mxu0 %v4937_v34  ;;  %2206 = vmatpush.bf16.msrb.mxu2 %v5001_v11  ;;  %v5098_v34 = vld [vmem:[%s8716_s4 + $0x5] ss:$8 sm:$0x3]  ;;  %v5010_v11 = vld [vmem:[#allocation3 + $0xb8] sm:$0xf0] }
 0x317   :  { %v1907_v40 = vsel %vm8807_vm7, %v1882_v5, %v1905_v37  ;;  %2244 = vmatpush.bf16.msra.mxu3 %v4941_v26  ;;  %v3164_v5 = vperm.slane %v3150_v27, 0  ;;  %v5334_v47 = vld [vmem:[#allocation3 + $0xb4] sm:$0xf]  ;;  %v3598_v42 = vperm.slane %v5098_v34, 0  ;;  %v5002_v26 = vld [vmem:[#allocation3 + $0xa8] sm:$0xf0] }
 0x318   :  { %1918 = vst [vmem:[#allocation3 + $0x100] sm:$0xff] %v1907_v40  ;;  %3366 = vrot.lane.b32.xlu2 %v3364_v7, %s5636_s12  ;;  %3700 = vrot.lane.b32.xlu1 %v3698_v2, %s5640_s19  ;;  %v5013_v7 = vor.u32 %v5334_v47, %v5010_v11  ;;  %v5005_v18 = vor.u32 %v5332_v23, %v5002_v26  ;;  %v5101_v37 = vld [vmem:[%s8716_s4 + $0x10] ss:$8 sm:$0x3]  ;;  %v5346_v53 = vld [vmem:[#allocation3 + $0x114] sm:$0xf] }
 0x319   :  { %v3899_v40 = vperm.slane %v5101_v37, 1  ;;  %v3898_v2 = vperm.slane %v5101_v37, 0  ;;  %v5308_v11 = vld [vmem:[%s8719_s2 + $0x10] sm:$0xf0]  ;;  %v3781_v37 = vld [vmem:[#allocation4 + $0x2c] sm:$0xf] }
 0x31a   :  { %2188 = vmatpush.bf16.msrb.mxu0 %v4929_v29  ;;  %2207 = vmatpush.bf16.msrb.mxu2 %v4993_v13  ;;  %v4986_v29 = vld [vmem:[#allocation3 + $0x88] sm:$0xf0]  ;;  %v5328_v13 = vld [vmem:[#allocation3 + $0x84] sm:$0xf] }
 0x31b   :  { %2245 = vmatpush.bf16.msra.mxu3 %v4933_v31  ;;  %v1888_v24 = vpop.permute.xlu0 %1887  ;;  %v6798_v21 = vpop.permute.xlu1 %2433  ;;  %3702 = vrot.lane.b32.xlu0 %v3699_v51, %s5640_s19  ;;  %v4989_v60 = vor.u32 %v5328_v13, %v4986_v29  ;;  %v3265_v31 = vperm.slane %v5094_v1, 1  ;;  %v3793_v29 = vunpack.c.l.bf16 %v3781_v37  ;;  %v4916_v13 = vld [vmem:[%s8719_s2 + $0x20] sm:$0xf] }
 0x31c   :  { %v1900_v45 = vrot.slane %v1888_v24, 4 }
 0x31e   :  { %v1908_v58 = vsel %vm8794_vm5, %v1899_v32, %v1900_v45  ;;  %2189 = vmatpush.bf16.msrb.mxu0 %v4921_v16  ;;  %2208 = vmatpush.bf16.msrb.mxu2 %v4985_v3  ;;  %v3599_v16 = vperm.slane %v5098_v34, 1  ;;  %v5309_v32 = vld [vmem:[%s8719_s2 + $0x1c] sm:$0xf]  ;;  %v4910_v45 = vld [vmem:[%s8719_s2 + $0x24] sm:$0xf0] }
 0x31f   :  { %v1909_v50 = vsel %vm8807_vm7, %v1886_v38, %v1908_v58  ;;  %2246 = vmatpush.bf16.msra.mxu3 %v4925_v0  ;;  %v4898_v38 = vld [vmem:[%s8719_s2 + $0xc] sm:$0xf0]  ;;  %v4913_v51 = vor.u32 %v5309_v32, %v4910_v45  ;;  %v4908_v0 = vld [vmem:[%s8719_s2 + $0x18] sm:$0xf]  ;;  %v4904_v34 = vld [vmem:[%s8719_s2 + $0x8] sm:$0xf] }
 0x320   :  { %1919 = vst [vmem:[#allocation3 + $0x108] sm:$0xff] %v1909_v50  ;;  %3166 = vrot.lane.b32.xlu1 %v3164_v5, %s5639_s29  ;;  %v4901_v30 = vor.u32 %v5306_v12, %v4898_v38  ;;  %3268 = vrot.lane.b32.xlu2 %v3265_v31, %s5641_s18  ;;  %v1904_v50 = vrot.slane %v6779_v25, 4  ;;  %v5048_v47 = vld [vmem:[#allocation3 + $0x100] sm:$0xf]  ;;  %v3790_v12 = vunpack.c.l.bf16 %v3779_v43 }
 0x321   :  { %2190 = vmatmul.bf16.vlgmr.msrb.gmra.mxu0 %v4897_v54 }
 0x322   :  { %2258 = vmatpush.bf16.msra.mxu0 %v5045_v35  ;;  %2209 = vmatmul.bf16.vlgmr.msrb.gmra.mxu2 %v4901_v30  ;;  %v5310_v35 = vld [vmem:[%s8719_s2 + $0x20] sm:$0xf0] }
 0x323   :  { %v6807_v8 = vpop.permute.xlu0 %2402  ;;  %3266 = vrot.lane.b32.xlu0 %v3264_v22, %s5641_s18  ;;  %2247 = vmatmul.bf16.vlgmr.msra.gmra.mxu3 %v4897_v54  ;;  %v4909_v58 = vor.u32 %v5310_v35, %v4908_v0  ;;  %v5056_v22 = vld [vmem:[#allocation3 + $0x110] sm:$0xf] }
 0x324   :  { %v6809_v17 = vpop.permute.xlu1 %2469 }
 0x326   :  { %2259 = vmatpush.bf16.msra.mxu0 %v5037_v10 }
 0x327   :  { %v5345_v5 = vld [vmem:[#allocation3 + $0x104] sm:$0xf0]  ;;  %v5050_v25 = vld [vmem:[#allocation3 + $0x108] sm:$0xf0] }
 0x328   :  { %3902 = vrot.lane.b32.xlu1 %v3899_v40, %s5642_s21  ;;  %3602 = vrot.lane.b32.xlu2 %v3599_v16, %s5638_s27  ;;  %v3783_v40 = vld [vmem:[#allocation4 + $0x3c] sm:$0xf] }
 0x329   :  { %v3796_v38 = vunpack.c.l.bf16 %v3783_v40 }
 0x32a   :  { %2260 = vmatpush.bf16.msra.mxu0 %v5029_v57 }
 0x32b   :  { %3600 = vrot.lane.b32.xlu0 %v3598_v42, %s5638_s27  ;;  %v5344_v42 = vld [vmem:[#allocation3 + $0x104] sm:$0xf] }
 0x32c   :  { %v6819_v62 = vpop.permute.xlu0 %2441  ;;  %v6821_v15 = vpop.permute.xlu1 %2477  ;;  %v5053_v23 = vor.u32 %v5344_v42, %v5050_v25 }
 0x32e   :  { %2261 = vmatpush.bf16.msra.mxu0 %v5021_v36 }
 0x330   :  { %3900 = vrot.lane.b32.xlu2 %v3898_v2, %s5642_s21  ;;  %v3787_v2 = vunpack.c.l.bf16 %v3777_v49 }
 0x331   :  { %2195 = vmatmul.bf16.gmra.mxu0 %v4909_v58 }
 0x332   :  { %2262 = vmatpush.bf16.msra.mxu0 %v5013_v7  ;;  %2214 = vmatmul.bf16.gmra.mxu2 %v4913_v51  ;;  %v5049_v7 = vor.u32 %v5345_v5, %v5048_v47 }
 0x333   :  { %3168 = vrot.lane.b32.xlu0 %v3165_v59, %s5639_s29  ;;  %2252 = vmatmul.bf16.gmra.mxu3 %v4909_v58 }
 0x335   :  { %v6827_v28 = vpop.permute.xlu0 %2493  ;;  %v6829_v46 = vpop.permute.xlu1 %2497 }
 0x336   :  { %2263 = vmatpush.bf16.msra.mxu0 %v5005_v18  ;;  %8878 = vst [vmem:[#allocation33_spill] sm:$0xff] %v6829_v46  ;;  %v4905_v18 = vor.u32 %v5308_v11, %v4904_v34 }
 0x33a   :  { %2264 = vmatpush.bf16.msra.mxu0 %v4997_v41  ;;  %v6887_v41 = vpop.permute.xlu2 %2412 }
 0x33d   :  { %v6847_v24 = vpop.permute.xlu1 %2505 }
 0x33e   :  { %2265 = vmatpush.bf16.msra.mxu0 %v4989_v60  ;;  %v6845_v9 = vpop.permute.xlu0 %2625  ;;  %8880 = vst [vmem:[#allocation48_spill] sm:$0xff] %v6847_v24  ;;  %v5311_v60 = vld [vmem:[%s8719_s2 + $0x28] sm:$0xf0] }
 0x33f   :  { %8879 = vst [vmem:[#allocation26_spill] sm:$0xff] %v6845_v9 }
 0x341   :  { %2266 = vmatmul.bf16.vlgmr.msra.gmra.mxu0 %v4901_v30  ;;  %v4917_v30 = vor.u32 %v5311_v60, %v4916_v13 }
 0x346   :  { %v6850_v3 = vpop.permute.xlu1 %2617 }
 0x347   :  { %v6852_v56 = vpop.permute.xlu0 %2789 }
 0x348   :  { %8881 = vst [vmem:[#allocation49_spill] sm:$0xff] %v6852_v56 }
 0x34e   :  { %v1894_v4 = vpop.permute.xlu1 %1893 }
 0x34f   :  { %v1903_v33 = vrot.slane %v1894_v4, 4 }
 0x350   :  { %v6869_v10 = vpop.permute.xlu0 %2819 }
 0x351   :  { %8882 = vst [vmem:[#allocation34_spill] sm:$0xff] %v6869_v10  ;;  %v1912_v1 = vsel %vm8794_vm5, %v1903_v33, %v1904_v50  ;;  %2271 = vmatmul.bf16.gmra.mxu0 %v4913_v51  ;;  %v6903_v51 = vpop.permute.xlu2 %2429  ;;  %v6913_v50 = vpop.f32.mrf.mxu3 }
 0x352   :  { %v1913_v20 = vsel %vm8807_vm7, %v1894_v4, %v1912_v1  ;;  %v6911_v4 = vpop.f32.mrf.mxu1 }
 0x353   :  { %1921 = vst [vmem:[#allocation3 + $0x118] sm:$0xff] %v1913_v20 }
 0x358   :  { %v6873_v55 = vpop.permute.xlu0 %3466 }
 0x359   :  { %8883 = vst [vmem:[#allocation37_spill] sm:$0xff] %v6873_v55  ;;  %v6909_v58 = vpop.permute.xlu2 %2437  ;;  %v6919_v20 = vpop.f32.mrf.mxu3 }
 0x35a   :  { %v5347_v57 = vld [vmem:[#allocation3 + $0x114] sm:$0xf0]  ;;  %v5058_v39 = vld [vmem:[#allocation3 + $0x118] sm:$0xf0]  ;;  %v6917_v1 = vpop.f32.mrf.mxu1 }
 0x35b   :  { %v5057_v27 = vor.u32 %v5347_v57, %v5056_v22  ;;  %v5061_v36 = vor.u32 %v5346_v53, %v5058_v39  ;;  %v756_v39 = vadd.f32 %v6913_v50, %v6911_v4  ;;  %v759_v11 = vadd.f32 %v6919_v20, %v6917_v1 }
 0x35d   :  { %2226 = vmatpush.bf16.msra.mxu1 %v5057_v27  ;;  %2283 = vmatpush.bf16.msra.mxu2 %v5061_v36 }
 0x360   :  { %v6881_v26 = vpop.permute.xlu0 %3468 }
 0x361   :  { %8884 = vst [vmem:[#allocation22_spill] sm:$0xff] %v6881_v26  ;;  %2227 = vmatpush.bf16.msra.mxu1 %v5049_v7  ;;  %2284 = vmatpush.bf16.msra.mxu2 %v5053_v23  ;;  %v6915_v33 = vpop.permute.xlu2 %2473  ;;  %v6925_v53 = vpop.f32.mrf.mxu3 }
 0x362   :  { %v6923_v57 = vpop.f32.mrf.mxu1  ;;  %v6945_v7 = vpop.permute.xlu1 %2629 }
 0x363   :  { %v762_v27 = vadd.f32 %v6925_v53, %v6923_v57  ;;  %8890 = vst [vmem:[#allocation28_spill] sm:$0xff] %v6945_v7 }
 0x364   :  { %5064 = vmatmul.msk.bf16.vlgmr.msra.gmra.mxu2 %vm8795_vm6, %v4905_v18  ;;  %5062 = vmatmul.msk.bf16.vlgmr.msra.gmra.mxu1 %vm8795_vm6, %v4905_v18 }
 0x368   :  { %v6885_v63 = vpop.permute.xlu0 %3800 }
 0x369   :  { %8885 = vst [vmem:[#allocation23_spill] sm:$0xff] %v6885_v63  ;;  %v6921_v22 = vpop.permute.xlu2 %2481  ;;  %v6935_v25 = vpop.f32.mrf.mxu3 }
 0x36a   :  { %8887 = vst [vmem:[#allocation21_spill] sm:$0xff] %v6921_v22  ;;  %v6933_v5 = vpop.f32.mrf.mxu1  ;;  %v6951_v37 = vpop.permute.xlu1 %2645 }
 0x36b   :  { %v765_v34 = vadd.f32 %v6935_v25, %v6933_v5  ;;  %8892 = vst [vmem:[#allocation51_spill] sm:$0xff] %v6951_v37 }
 0x370   :  { %v6895_v31 = vpop.permute.xlu0 %3802 }
 0x371   :  { %8886 = vst [vmem:[#allocation25_spill] sm:$0xff] %v6895_v31  ;;  %v3816_v6 = vmul.f32 %v6895_v31, %v3793_v29  ;;  %v3813_v54 = vmul.f32 %v6895_v31, %v3790_v12  ;;  %v3819_v16 = vmul.f32 %v6895_v31, %v3796_v38  ;;  %v3810_v0 = vmul.f32 %v6895_v31, %v3787_v2  ;;  %v6931_v36 = vpop.permute.xlu2 %2501 }
 0x372   :  { %8888 = vst [vmem:[#allocation27_spill] sm:$0xff] %v6931_v36  ;;  %v6959_v13 = vpop.permute.xlu1 %2653 }
 0x373   :  { %v3825_v32 = vpack.c.bf16 %v3816_v6, %v3816_v6  ;;  %v3823_v45 = vpack.c.bf16 %v3813_v54, %v3813_v54  ;;  %v3827_v59 = vpack.c.bf16 %v3819_v16, %v3819_v16  ;;  %v3821_v35 = vpack.c.bf16 %v3810_v0, %v3810_v0  ;;  %8894 = vst [vmem:[#allocation53_spill] sm:$0xff] %v6959_v13 }
 0x374   :  { %5065 = vmatmul.msk.bf16.gmra.mxu2 %vm8795_vm6, %v4917_v30  ;;  %5063 = vmatmul.msk.bf16.gmra.mxu1 %vm8795_vm6, %v4917_v30 }
 0x375   :  { %3846 = vrot.lane.b32.xlu1 %v3825_v32, %s5641_s18  ;;  %3842 = vrot.lane.b32.xlu0 %v3823_v45, %s5641_s18 }
 0x376   :  { %3850 = vrot.lane.b32.xlu2 %v3827_v59, %s5641_s18 }
 0x379   :  { %v6941_v47 = vpop.permute.xlu2 %2621 }
 0x37a   :  { %v6967_v6 = vpop.permute.xlu1 %2794 }
 0x37b   :  { %8896 = vst [vmem:[#allocation55_spill] sm:$0xff] %v6967_v6 }
 0x37e   :  { %3838 = vrot.lane.b32.xlu2 %v3821_v35, %s5641_s18 }
 0x381   :  { %v6943_v42 = vpop.permute.xlu2 %2641 }
 0x382   :  { %8889 = vst [vmem:[#allocation24_spill] sm:$0xff] %v6943_v42  ;;  %v6975_v59 = vpop.permute.xlu1 %2811 }
 0x383   :  { %8899 = vst [vmem:[#allocation58_spill] sm:$0xff] %v6975_v59 }
 0x385   :  { %v6973_v45 = vpop.permute.xlu0 %3368 }
 0x386   :  { %8898 = vst [vmem:[#allocation57_spill] sm:$0xff] %v6973_v45 }
 0x389   :  { %v6947_v23 = vpop.permute.xlu2 %2649 }
 0x38a   :  { %8891 = vst [vmem:[#allocation50_spill] sm:$0xff] %v6947_v23  ;;  %v6981_v35 = vpop.permute.xlu1 %2823 }
 0x38b   :  { %8901 = vst [vmem:[#allocation60_spill] sm:$0xff] %v6981_v35 }
 0x38d   :  { %v6979_v0 = vpop.permute.xlu0 %3702 }
 0x391   :  { %v6955_v40 = vpop.permute.xlu2 %2784 }
 0x392   :  { %8893 = vst [vmem:[#allocation52_spill] sm:$0xff] %v6955_v40 }
 0x399   :  { %v6961_v12 = vpop.permute.xlu2 %2799 }
 0x39a   :  { %8895 = vst [vmem:[#allocation54_spill] sm:$0xff] %v6961_v12 }
 0x39e   :  { %v6949_v18 = vpop.f32.mrf.mxu0 }
 0x39f   :  { %757 = vadd.xlane.f32.xlu1 %v756_v39  ;;  %763 = vadd.xlane.f32.xlu0 %v762_v27  ;;  %v6985_v27 = vpop.permute.xlu1 %3700 }
 0x3a0   :  { %8903 = vst [vmem:[#allocation62_spill] sm:$0xff] %v6985_v27 }
 0x3a1   :  { %v6969_v49 = vpop.permute.xlu2 %2815 }
 0x3a2   :  { %8897 = vst [vmem:[#allocation56_spill] sm:$0xff] %v6969_v49 }
 0x3a5   :  { %v6953_v43 = vpop.f32.mrf.mxu2 }
 0x3a6   :  { %v6957_v29 = vpop.f32.mrf.mxu0  ;;  %v2248_v56 = vpop.f32.mrf.mxu3 }
 0x3a7   :  { %760 = vadd.xlane.f32.xlu2 %v759_v11  ;;  %766 = vadd.xlane.f32.xlu1 %v765_v34  ;;  %v6987_v34 = vpop.permute.xlu0 %3266 }
 0x3a8   :  { %8904 = vst [vmem:[#allocation63_spill] sm:$0xff] %v6987_v34 }
 0x3a9   :  { %v6977_v2 = vpop.permute.xlu2 %3366 }
 0x3aa   :  { %8900 = vst [vmem:[#allocation59_spill] sm:$0xff] %v6977_v2 }
 0x3ad   :  { %v2212_v60 = vpop.f32.mrf.mxu2 }
 0x3ae   :  { %v6963_v38 = vpop.f32.mrf.mxu0 }
 0x3b1   :  { %v6983_v39 = vpop.permute.xlu2 %3268 }
 0x3b2   :  { %8902 = vst [vmem:[#allocation61_spill] sm:$0xff] %v6983_v39 }
 0x3b5   :  { %v6965_v30 = vpop.f32.mrf.mxu2 }
 0x3b6   :  { %v2198_v54 = vpop.f32.mrf.mxu0  ;;  %v2216_v36 = vadd.f32 %v6965_v30, %v6963_v38  ;;  %v3679_v30 = vld [vmem:[#allocation4 + $0x1c] sm:$0xf] }
 0x3b9   :  { %v6989_v11 = vpop.permute.xlu2 %3602 }
 0x3ba   :  { %8905 = vst [vmem:[#allocation64_spill] sm:$0xff] %v6989_v11 }
 0x3bd   :  { %v2217_v16 = vpop.f32.mrf.mxu2 }
 0x3be   :  { %v6971_v32 = vadd.f32 %v2217_v16, %v2198_v54  ;;  %v6991_v54 = vpop.permute.xlu1 %3166  ;;  %v6993_v16 = vpop.permute.xlu0 %3600 }
 0x3bf   :  { %8906 = vst [vmem:[#allocation65_spill] sm:$0xff] %v6991_v54  ;;  %v2267_v40 = vpop.f32.mrf.mxu0 }
 0x3c0   :  { %8907 = vst [vmem:[#allocation66_spill] sm:$0xff] %v6993_v16 }
 0x3c1   :  { %v6995_v12 = vpop.permute.xlu2 %3900 }
 0x3c2   :  { %8908 = vst [vmem:[#allocation67_spill] sm:$0xff] %v6995_v12 }
 0x3c6   :  { %v6997_v10 = vpop.permute.xlu0 %3168  ;;  %v6999_v6 = vpop.permute.xlu1 %3902 }
 0x3c7   :  { %8909 = vst [vmem:[#allocation68_spill] sm:$0xff] %v6997_v10 }
 0x3c8   :  { %8910 = vst [vmem:[#allocation69_spill] sm:$0xff] %v6999_v6 }
 0x3d0   :  { %v7001_v49 = vpop.permute.xlu2 %3850 }
 0x3d1   :  { %8911 = vst [vmem:[#allocation70_spill] sm:$0xff] %v7001_v49  ;;  %v2250_v49 = vpop.f32.mrf.mxu3 }
 0x3d8   :  { %v7007_v24 = vpop.permute.xlu2 %3838 }
 0x3d9   :  { %8914 = vst [vmem:[#allocation73_spill] sm:$0xff] %v7007_v24 }
 0x3e1   :  { %v2229_v13 = vpop.f32.mrf.mxu1 }
 0x3e7   :  { %v7003_v35 = vpop.permute.xlu1 %3846  ;;  %v7005_v59 = vpop.permute.xlu0 %3842 }
 0x3e8   :  { %8912 = vst [vmem:[#allocation71_spill] sm:$0xff] %v7003_v35  ;;  %v2286_v7 = vpop.f32.mrf.mxu2  ;;  %v2269_v35 = vpop.f32.mrf.mxu0 }
 0x3e9   :  { %8913 = vst [vmem:[#allocation72_spill] sm:$0xff] %v7005_v59  ;;  %v2231_v27 = vpop.f32.mrf.mxu1 }
 0x412   :  { %v758_v54 = vpop.xlane.xlu1 %757  ;;  %v764_v34 = vpop.xlane.xlu0 %763 }
 0x413   :  { %v768_v16 = vmul.f32 0.00390625, %v758_v54  ;;  %v770_v12 = vmul.f32 0.00390625, %v764_v34 }
 0x415   :  { %v7010_v10 = vsub.f32 %v6911_v4, %v768_v16  ;;  %v7013_v2 = vsub.f32 %v6913_v50, %v768_v16  ;;  %v7020_v24 = vsub.f32 %v6923_v57, %v770_v12  ;;  %v7023_v54 = vsub.f32 %v6925_v53, %v770_v12  ;;  %v2288_v50 = vpop.f32.mrf.mxu2 }
 0x417   :  { %v780_v59 = vmul.f32 %v7010_v10, %v7010_v10  ;;  %v781_v22 = vmul.f32 %v7013_v2, %v7013_v2  ;;  %v784_v31 = vmul.f32 %v7020_v24, %v7020_v24  ;;  %v785_v45 = vmul.f32 %v7023_v54, %v7023_v54 }
 0x419   :  { %v788_v34 = vadd.f32 %v781_v22, %v780_v59  ;;  %v794_v26 = vadd.f32 %v785_v45, %v784_v31  ;;  %v3681_v31 = vld [vmem:[#allocation4 + $0x2c] sm:$0xf] }
 0x41a   :  { %v761_v4 = vpop.xlane.xlu2 %760  ;;  %v767_v39 = vpop.xlane.xlu1 %766  ;;  %v3693_v38 = vunpack.c.l.bf16 %v3681_v31 }
 0x41b   :  { %v769_v16 = vmul.f32 0.00390625, %v761_v4  ;;  %v771_v63 = vmul.f32 0.00390625, %v767_v39  ;;  %789 = vadd.xlane.f32.xlu2 %v788_v34  ;;  %v2268_v4 = vadd.f32 %v2267_v40, %v2248_v56 }
 0x41d   :  { %v7030_v57 = vsub.f32 %v6917_v1, %v769_v16  ;;  %v7033_v53 = vsub.f32 %v6919_v20, %v769_v16  ;;  %v7036_v22 = vsub.f32 %v6933_v5, %v771_v63  ;;  %v7039_v12 = vsub.f32 %v6935_v25, %v771_v63  ;;  %v2253_v25 = vpop.f32.mrf.mxu3  ;;  %v2272_v16 = vpop.f32.mrf.mxu0 }
 0x41e   :  { %v2211_v20 = vadd.f32 %v6953_v43, %v6949_v18  ;;  %v2213_v5 = vadd.f32 %v2212_v60, %v6957_v29  ;;  %v2270_v63 = vadd.f32 %v2269_v35, %v2250_v49  ;;  %v2273_v9 = vadd.f32 %v2272_v16, %v2253_v25  ;;  %v2234_v43 = vpop.f32.mrf.mxu1  ;;  %v2291_v29 = vpop.f32.mrf.mxu2 }
 0x41f   :  { %v782_v59 = vmul.f32 %v7030_v57, %v7030_v57  ;;  %v783_v39 = vmul.f32 %v7033_v53, %v7033_v53  ;;  %v786_v34 = vmul.f32 %v7036_v22, %v7036_v22  ;;  %v787_v1 = vmul.f32 %v7039_v12, %v7039_v12 }
 0x420   :  { %v2230_v37 = vadd.f32 %v2229_v13, %v2211_v20  ;;  %v2287_v46 = vadd.f32 %v2286_v7, %v2268_v4  ;;  %v2232_v42 = vadd.f32 %v2231_v27, %v2213_v5  ;;  %v2289_v18 = vadd.f32 %v2288_v50, %v2270_v63  ;;  %v3677_v63 = vld [vmem:[#allocation4 + $0xc] sm:$0xf] }
 0x421   :  { %v791_v55 = vadd.f32 %v783_v39, %v782_v59  ;;  %v797_v23 = vadd.f32 %v787_v1, %v786_v34  ;;  %v2235_v56 = vadd.f32 %v2234_v43, %v2216_v36  ;;  %v2292_v40 = vadd.f32 %v2291_v29, %v2273_v9 }
 0x422   :  { %v2296_v60 = vadd.f32 %v2287_v46, %v2230_v37  ;;  %v2299_v49 = vadd.f32 %v2289_v18, %v2232_v42  ;;  %v3687_v25 = vunpack.c.l.bf16 %v3677_v63  ;;  %v3577_v63 = vld [vmem:[#allocation4 + $0xc] sm:$0xf] }
 0x423   :  { %792 = vadd.xlane.f32.xlu1 %v791_v55  ;;  %795 = vadd.xlane.f32.xlu2 %v794_v26  ;;  %v2302_v35 = vadd.f32 %v2292_v40, %v2235_v56  ;;  %v3683_v55 = vld [vmem:[#allocation4 + $0x3c] sm:$0xf]  ;;  %v3690_v26 = vunpack.c.l.bf16 %v3679_v30 }
 0x424   :  { %798 = vadd.xlane.f32.xlu0 %v797_v23  ;;  %v3716_v23 = vmul.f32 %v6979_v0, %v3693_v38  ;;  %v3696_v7 = vunpack.c.l.bf16 %v3683_v55  ;;  %v3710_v16 = vmul.f32 %v6979_v0, %v3687_v25 }
 0x425   :  { %v3713_v13 = vmul.f32 %v6979_v0, %v3690_v26  ;;  %v2255_v50 = vpop.f32.mrf.mxu3  ;;  %v2274_v59 = vpop.f32.mrf.mxu0 }
 0x426   :  { %v3725_v45 = vpack.c.bf16 %v3716_v23, %v3716_v23  ;;  %v3719_v36 = vmul.f32 %v6979_v0, %v3696_v7  ;;  %v2275_v39 = vadd.f32 %v2274_v59, %v2255_v50  ;;  %v2236_v34 = vpop.f32.mrf.mxu1  ;;  %v2293_v1 = vpop.f32.mrf.mxu2  ;;  %v3721_v43 = vpack.c.bf16 %v3710_v16, %v3710_v16 }
 0x427   :  { %v3723_v9 = vpack.c.bf16 %v3713_v13, %v3713_v13  ;;  %v7061_v20 = vadd.f32 %v2236_v34, %v6971_v32 }
 0x428   :  { %v3727_v27 = vpack.c.bf16 %v3719_v36, %v3719_v36  ;;  %v7063_v5 = vadd.f32 %v2293_v1, %v2275_v39  ;;  %v3579_v1 = vld [vmem:[#allocation4 + $0x1c] sm:$0xf] }
 0x429   :  { %v3590_v25 = vunpack.c.l.bf16 %v3579_v1 }
 0x42a   :  { %v2305_v4 = vadd.f32 %v7063_v5, %v7061_v20 }
 0x42b   :  { %2297 = vadd.xlane.f32.xlu1 %v2296_v60  ;;  %2300 = vadd.xlane.f32.xlu2 %v2299_v49 }
 0x42c   :  { %2303 = vadd.xlane.f32.xlu0 %v2302_v35 }
 0x440   :  { %3746 = vrot.lane.b32.xlu0 %v3725_v45, %s5636_s12 }
 0x443   :  { %3742 = vrot.lane.b32.xlu2 %v3723_v9, %s5636_s12 }
 0x444   :  { %3750 = vrot.lane.b32.xlu1 %v3727_v27, %s5636_s12 }
 0x46e   :  { %2306 = vadd.xlane.f32.xlu1 %v2305_v4 }
 0x487   :  { %3738 = vrot.lane.b32.xlu1 %v3721_v43, %s5636_s12 }
 0x48e   :  { %v790_v29 = vpop.xlane.xlu2 %789 }
 0x496   :  { %v793_v60 = vpop.xlane.xlu1 %792  ;;  %v7069_v49 = vpop.xlane.xlu2 %795 }
 0x497   :  { %v7071_v35 = vpop.xlane.xlu0 %798 }
 0x49e   :  { %v2298_v32 = vpop.xlane.xlu1 %2297  ;;  %v2301_v38 = vpop.xlane.xlu2 %2300 }
 0x49f   :  { %v2308_v31 = vmul.f32 0.00390625, %v2298_v32  ;;  %v2304_v30 = vpop.xlane.xlu0 %2303  ;;  %v2309_v55 = vmul.f32 0.00390625, %v2301_v38  ;;  %v3587_v32 = vunpack.c.l.bf16 %v3577_v63  ;;  %v800_v38 = vmul.f32 0.00390625, %v790_v29 }
 0x4a0   :  { %v2310_v7 = vmul.f32 0.00390625, %v2304_v30  ;;  %v3883_v30 = vld [vmem:[#allocation4 + $0x3c] sm:$0xf]  ;;  %v801_v63 = vmul.f32 0.00390625, %v793_v60  ;;  %v407_v60 = vmul.f32 0.00390625, %v6536_v19 }
 0x4a1   :  { %v7073_v26 = vsub.f32 %v2230_v37, %v2308_v31  ;;  %v7075_v23 = vsub.f32 %v2287_v46, %v2308_v31  ;;  %v7077_v13 = vsub.f32 %v2232_v42, %v2309_v55  ;;  %v7079_v45 = vsub.f32 %v2289_v18, %v2309_v55 }
 0x4a2   :  { %v7085_v27 = vsub.f32 %v2235_v56, %v2310_v7  ;;  %v7087_v50 = vsub.f32 %v2292_v40, %v2310_v7  ;;  %v3583_v56 = vld [vmem:[#allocation4 + $0x3c] sm:$0xf]  ;;  %v3613_v31 = vmul.f32 %v6989_v11, %v3590_v25  ;;  %v3610_v55 = vmul.f32 %v6989_v11, %v3587_v32 }
 0x4a3   :  { %v2320_v36 = vmul.f32 %v7073_v26, %v7073_v26  ;;  %v2321_v9 = vmul.f32 %v7075_v23, %v7075_v23  ;;  %v2322_v37 = vmul.f32 %v7077_v13, %v7077_v13  ;;  %v2323_v46 = vmul.f32 %v7079_v45, %v7079_v45 }
 0x4a4   :  { %v2324_v42 = vmul.f32 %v7085_v27, %v7085_v27  ;;  %v2325_v18 = vmul.f32 %v7087_v50, %v7087_v50  ;;  %v3596_v40 = vunpack.c.l.bf16 %v3583_v56  ;;  %v405_v7 = vmul.f32 0.00390625, %v6562_v61 }
 0x4a5   :  { %v2328_v59 = vadd.f32 %v2321_v9, %v2320_v36  ;;  %v2331_v39 = vadd.f32 %v2323_v46, %v2322_v37  ;;  %v3881_v36 = vld [vmem:[#allocation4 + $0x2c] sm:$0xf]  ;;  %v3623_v9 = vpack.c.bf16 %v3613_v31, %v3613_v31  ;;  %v3896_v37 = vunpack.c.l.bf16 %v3883_v30 }
 0x4a6   :  { %v2334_v34 = vadd.f32 %v2325_v18, %v2324_v42  ;;  %v3619_v4 = vmul.f32 %v6989_v11, %v3596_v40  ;;  %v7104_v46 = vadd.f32 1e-05, %v800_v38  ;;  %v3621_v18 = vpack.c.bf16 %v3610_v55, %v3610_v55 }
 0x4a7   :  { %2329 = vadd.xlane.f32.xlu2 %v2328_v59  ;;  %2332 = vadd.xlane.f32.xlu0 %v2331_v39  ;;  %v3893_v59 = vunpack.c.l.bf16 %v3881_v36  ;;  %v3919_v29 = vmul.f32 %v6999_v6, %v3896_v37  ;;  %v7126_v31 = vadd.f32 1e-05, %v801_v63  ;;  %v802_v38 = vmul.f32 0.00390625, %v7069_v49 }
 0x4a8   :  { %v3627_v43 = vpack.c.bf16 %v3619_v4, %v3619_v4  ;;  %5503 = vrsqrt.f32 %v7104_v46  ;;  %vm814_vm12 = vweird.f32 %v7104_v46 }
 0x4a9   :  { %v3916_v40 = vmul.f32 %v6999_v6, %v3893_v59  ;;  %v3927_v25 = vpack.c.bf16 %v3919_v29, %v3919_v29  ;;  %v7136_v36 = vadd.f32 1e-05, %v802_v38 }
 0x4ab   :  { %v3925_v32 = vpack.c.bf16 %v3916_v40, %v3916_v40 }
 0x4b1   :  { %2335 = vadd.xlane.f32.xlu1 %v2334_v34  ;;  %v7107_v34 = vadd.f32 1e-05, %v405_v7 }
 0x4b3   :  { %5505 = vrsqrt.f32 %v7107_v34  ;;  %vm463_vm14 = vweird.f32 %v7107_v34 }
 0x4b4   :  { %5507 = vrsqrt.f32 %v7126_v31 }
 0x4b6   :  { %v7098_v16 = vpop.permute.xlu1 %3750 }
 0x4b7   :  { %8915 = vst [vmem:[#allocation74_spill] sm:$0xff] %v7098_v16  ;;  %v8920_v16 = vld [vmem:[#allocation14_spill] sm:$0xff] }
 0x4bb   :  { %3650 = vrot.lane.b32.xlu0 %v3627_v43, %s5635_s30 }
 0x4c3   :  { %3638 = vrot.lane.b32.xlu0 %v3621_v18, %s5635_s30 }
 0x4ca   :  { %3642 = vrot.lane.b32.xlu1 %v3623_v9, %s5635_s30  ;;  %v7139_v9 = vadd.f32 1e-05, %v407_v60 }
 0x4cb   :  { %3946 = vrot.lane.b32.xlu0 %v3925_v32, %s5639_s29 }
 0x4d2   :  { %3950 = vrot.lane.b32.xlu1 %v3927_v25, %s5639_s29  ;;  %v803_v25 = vmul.f32 0.00390625, %v7071_v35 }
 0x4e1   :  { %v2307_v42 = vpop.xlane.xlu1 %2306 }
 0x4e2   :  { %v2311_v39 = vmul.f32 0.00390625, %v2307_v42  ;;  %v3581_v42 = vld [vmem:[#allocation4 + $0x2c] sm:$0xf] }
 0x4e3   :  { %v3593_v29 = vunpack.c.l.bf16 %v3581_v42 }
 0x4e4   :  { %v7112_v56 = vsub.f32 %v7061_v20, %v2311_v39  ;;  %v7115_v61 = vsub.f32 %v7063_v5, %v2311_v39  ;;  %v406_v20 = vmul.f32 0.00390625, %v6574_v52  ;;  %v5504_v5 = vpop.eup %5503 }
 0x4e5   :  { %v5506_v30 = vpop.eup %5505  ;;  %v809_v7 = vmul.f32 %v5504_v5, %v7104_v46  ;;  %v3616_v38 = vmul.f32 %v6989_v11, %v3593_v29  ;;  %vm815_vm9 = vweird.f32 %v5504_v5 }
 0x4e6   :  { %v2326_v1 = vmul.f32 %v7112_v56, %v7112_v56  ;;  %v2327_v4 = vmul.f32 %v7115_v61, %v7115_v61  ;;  %v7130_v55 = vadd.f32 1e-05, %v406_v20  ;;  %v458_v52 = vmul.f32 %v5506_v30, %v7107_v34  ;;  %v7142_v18 = vpop.eup %5507  ;;  %vm816_vm13 = vmor %vm814_vm12, %vm815_vm9 }
 0x4e7   :  { %v810_v49 = vmul.f32 %v5504_v5, %v809_v7  ;;  %v819_v40 = vmul.f32 %v7142_v18, %v7126_v31  ;;  %vm464_vm10 = vweird.f32 %v5506_v30  ;;  %vm825_vm9 = vweird.f32 %v7142_v18 }
 0x4e8   :  { %v2337_v43 = vadd.f32 %v2327_v4, %v2326_v1  ;;  %5509 = vrsqrt.f32 %v7130_v55  ;;  %v459_v37 = vmul.f32 %v5506_v30, %v458_v52  ;;  %vm465_vm15 = vmor %vm463_vm14, %vm464_vm10  ;;  %vm824_vm12 = vweird.f32 %v7126_v31 }
 0x4e9   :  { %5511 = vrsqrt.f32 %v7136_v36  ;;  %v811_v19 = vmul.f32 0.5, %v810_v49  ;;  %v820_v60 = vmul.f32 %v7142_v18, %v819_v40  ;;  %vm826_vm14 = vmor %vm824_vm12, %vm825_vm9  ;;  %vm834_vm9 = vweird.f32 %v7136_v36 }
 0x4ea   :  { %2338 = vadd.xlane.f32.xlu2 %v2337_v43  ;;  %5513 = vrsqrt.f32 %v7139_v9  ;;  %v460_v39 = vmul.f32 0.5, %v459_v37  ;;  %v408_v43 = vmul.f32 0.00390625, %v6580_v44  ;;  %v7162_v37 = vadd.f32 1e-05, %v803_v25 }
 0x4eb   :  { %v812_v63 = vsub.f32 1.5, %v811_v19  ;;  %v3625_v19 = vpack.c.bf16 %v3616_v38, %v3616_v38 }
 0x4ec   :  { %v461_v32 = vsub.f32 1.5, %v460_v39  ;;  %v7166_v44 = vadd.f32 1e-05, %v408_v43  ;;  %v821_v39 = vmul.f32 0.5, %v820_v60  ;;  %5515 = vrsqrt.f32 %v7162_v37 }
 0x4ed   :  { %v813_v49 = vmul.f32 %v5504_v5, %v812_v63 }
 0x4ee   :  { %v7145_v59 = vpop.eup %5509  ;;  %v462_v42 = vmul.f32 %v5506_v30, %v461_v32  ;;  %5517 = vrsqrt.f32 %v7166_v44  ;;  %v822_v43 = vsub.f32 1.5, %v821_v39 }
 0x4ef   :  { %v7149_v1 = vpop.eup %5511  ;;  %v468_v4 = vmul.f32 %v7145_v59, %v7130_v55  ;;  %vm474_vm10 = vweird.f32 %v7145_v59 }
 0x4f0   :  { %v7155_v20 = vpop.eup %5513  ;;  %v829_v7 = vmul.f32 %v7149_v1, %v7136_v36  ;;  %v466_v25 = vsel %vm465_vm15, %v5506_v30, %v462_v42  ;;  %vm835_vm5 = vweird.f32 %v7149_v1  ;;  %v8924_v36 = vld [vmem:[#allocation31_spill] sm:$0xff] }
 0x4f1   :  { %v469_v52 = vmul.f32 %v7145_v59, %v468_v4  ;;  %v478_v35 = vmul.f32 %v7155_v20, %v7139_v9  ;;  %v817_v4 = vsel %vm816_vm13, %v5504_v5, %v813_v49  ;;  %v8918_v49 = vld [vmem:[#allocation30_spill] sm:$0xff]  ;;  %vm473_vm13 = vweird.f32 %v7130_v55  ;;  %vm836_vm12 = vmor %vm834_vm9, %vm835_vm5 }
 0x4f2   :  { %v830_v29 = vmul.f32 %v7149_v1, %v829_v7  ;;  %v848_v46 = vmul.f32 %v817_v4, %v7010_v10  ;;  %v849_v60 = vmul.f32 %v817_v4, %v7013_v2  ;;  %v8916_v7 = vld [vmem:[#allocation29_spill] sm:$0xff]  ;;  %v823_v10 = vmul.f32 %v7142_v18, %v822_v43  ;;  %vm475_vm15 = vmor %vm473_vm13, %vm474_vm10 }
 0x4f3   :  { %v470_v40 = vmul.f32 0.5, %v469_v52  ;;  %v479_v63 = vmul.f32 %v7155_v20, %v478_v35  ;;  %v7178_v5 = vmul.f32 %v466_v25, %v8916_v7  ;;  %v7180_v52 = vpop.eup %5515  ;;  %vm484_vm6 = vweird.f32 %v7155_v20 }
 0x4f4   :  { %v831_v32 = vmul.f32 0.5, %v830_v29  ;;  %v7185_v35 = vpop.eup %5517  ;;  %v872_v30 = vmul.f32 %v8920_v16, %v848_v46  ;;  %v873_v39 = vmul.f32 %v8920_v16, %v849_v60  ;;  %v8922_v16 = vld [vmem:[#allocation13_spill] sm:$0xff]  ;;  %v8923_v60 = vld [vmem:[#allocation6_spill] sm:$0xff]  ;;  %vm483_vm10 = vweird.f32 %v7139_v9  ;;  %v8926_v9 = vld [vmem:[#allocation32_spill] sm:$0xff] }
 0x4f5   :  { %v471_v38 = vsub.f32 1.5, %v470_v40  ;;  %v480_v34 = vmul.f32 0.5, %v479_v63  ;;  %8917 = vst [vmem:[#allocation29_spill] sm:$0xff] %v7178_v5  ;;  %v8921_v40 = vld [vmem:[#allocation7_spill] sm:$0xff]  ;;  %v839_v63 = vmul.f32 %v7180_v52, %v7162_v37  ;;  %vm485_vm13 = vmor %vm483_vm10, %vm484_vm6  ;;  %vm845_vm5 = vweird.f32 %v7180_v52 }
 0x4f6   :  { %v832_v42 = vsub.f32 1.5, %v831_v32  ;;  %v724_v4 = vmul.f32 %v8921_v40, %v7178_v5  ;;  %v896_v43 = vadd.f32 %v8922_v16, %v872_v30  ;;  %v827_v32 = vsel %vm826_vm14, %v7142_v18, %v823_v10 }
 0x4f7   :  { %v472_v2 = vmul.f32 %v7145_v59, %v471_v38  ;;  %v481_v29 = vsub.f32 1.5, %v480_v34  ;;  %v897_v55 = vadd.f32 %v8922_v16, %v873_v39  ;;  %v850_v30 = vmul.f32 %v827_v32, %v7030_v57 }
 0x4f8   :  { %v833_v38 = vmul.f32 %v7149_v1, %v832_v42  ;;  %v748_v34 = vadd.f32 %v8923_v60, %v724_v4  ;;  %v851_v42 = vmul.f32 %v827_v32, %v7033_v53  ;;  %vm494_vm6 = vweird.f32 %v7185_v35 }
 0x4f9   :  { %v476_v31 = vsel %vm475_vm15, %v7145_v59, %v472_v2  ;;  %v482_v7 = vmul.f32 %v7155_v20, %v481_v29  ;;  %vm844_vm14 = vweird.f32 %v7162_v37  ;;  %vm493_vm9 = vweird.f32 %v7166_v44 }
 0x4fa   :  { %v904_v59 = vadd.f32 %v896_v43, %v748_v34  ;;  %v837_v2 = vsel %vm836_vm12, %v7149_v1, %v833_v38  ;;  %v7223_v39 = vmul.f32 %v476_v31, %v8924_v36  ;;  %v8929_v43 = vld [vmem:[#allocation12_spill] sm:$0xff]  ;;  %v8930_v38 = vld [vmem:[#allocation35_spill] sm:$0xff]  ;;  %vm846_vm15 = vmor %vm844_vm14, %vm845_vm5 }
 0x4fb   :  { %v486_v57 = vsel %vm485_vm13, %v7155_v20, %v482_v7  ;;  %v853_v20 = vmul.f32 %v837_v2, %v7023_v54  ;;  %v8932_v7 = vld [vmem:[#allocation36_spill] sm:$0xff]  ;;  %vm495_vm10 = vmor %vm493_vm9, %vm494_vm6 }
 0x4fc   :  { %8925 = vst [vmem:[#allocation14_spill] sm:$0xff] %v7223_v39  ;;  %v912_v16 = vsub.f32 0.0, %v904_v59  ;;  %v726_v32 = vmul.f32 %v8929_v43, %v7223_v39 }
 0x502   :  { %3646 = vrot.lane.b32.xlu2 %v3625_v19, %s5635_s30  ;;  %v7183_v19 = vmul.f32 %v466_v25, %v8918_v49  ;;  %v488_v25 = vmul.f32 %v7185_v35, %v7166_v44  ;;  %v840_v49 = vmul.f32 %v7180_v52, %v839_v63  ;;  %v8928_v63 = vld [vmem:[#allocation10_spill] sm:$0xff] }
 0x503   :  { %v875_v1 = vmul.f32 %v8928_v63, %v851_v42  ;;  %v920_v42 = vmul.f32 1.442695, %v912_v16  ;;  %v8940_v44 = vld [vmem:[#allocation38_spill] sm:$0xff] }
 0x504   :  { %8919 = vst [vmem:[#allocation30_spill] sm:$0xff] %v7183_v19  ;;  %v725_v46 = vmul.f32 %v8921_v40, %v7183_v19  ;;  %v489_v10 = vmul.f32 %v7185_v35, %v488_v25  ;;  %v7226_v40 = vmul.f32 %v476_v31, %v8926_v9  ;;  %v841_v4 = vmul.f32 0.5, %v840_v49  ;;  %v8936_v9 = vld [vmem:[#allocation11_spill] sm:$0xff] }
 0x505   :  { %v874_v25 = vmul.f32 %v8928_v63, %v850_v30  ;;  %v7241_v49 = vmul.f32 %v486_v57, %v8932_v7  ;;  %v8935_v30 = vld [vmem:[#allocation18_spill] sm:$0xff]  ;;  %v750_v63 = vadd.f32 %v8936_v9, %v726_v32  ;;  %5519 = vpow2.f32 %v920_v42  ;;  %v8939_v32 = vld [vmem:[#allocation15_spill] sm:$0xff] }
 0x506   :  { %v749_v18 = vadd.f32 %v8923_v60, %v725_v46  ;;  %8927 = vst [vmem:[#allocation7_spill] sm:$0xff] %v7226_v40  ;;  %v852_v46 = vmul.f32 %v837_v2, %v7020_v24  ;;  %v490_v53 = vmul.f32 0.5, %v489_v10  ;;  %v7235_v60 = vmul.f32 %v486_v57, %v8930_v38  ;;  %v8934_v24 = vld [vmem:[#allocation19_spill] sm:$0xff] }
 0x507   :  { %v727_v31 = vmul.f32 %v8929_v43, %v7226_v40  ;;  %v842_v34 = vsub.f32 1.5, %v841_v4  ;;  %8933 = vst [vmem:[#allocation6_spill] sm:$0xff] %v7241_v49  ;;  %v899_v36 = vadd.f32 %v8934_v24, %v875_v1  ;;  %v877_v2 = vmul.f32 %v8935_v30, %v853_v20 }
 0x508   :  { %v905_v29 = vadd.f32 %v897_v55, %v749_v18  ;;  %8931 = vst [vmem:[#allocation13_spill] sm:$0xff] %v7235_v60  ;;  %v898_v18 = vadd.f32 %v8934_v24, %v874_v25  ;;  %v876_v10 = vmul.f32 %v8935_v30, %v852_v46  ;;  %v491_v59 = vsub.f32 1.5, %v490_v53  ;;  %v8938_v46 = vld [vmem:[#allocation16_spill] sm:$0xff] }
 0x509   :  { %v751_v54 = vadd.f32 %v8936_v9, %v727_v31  ;;  %v843_v57 = vmul.f32 %v7180_v52, %v842_v34  ;;  %v901_v31 = vadd.f32 %v8938_v46, %v877_v2 }
 0x50a   :  { %v913_v55 = vsub.f32 0.0, %v905_v29  ;;  %v8937_v29 = vld [vmem:[#allocation5_spill] sm:$0xff]  ;;  %v906_v25 = vadd.f32 %v898_v18, %v750_v63  ;;  %v900_v53 = vadd.f32 %v8938_v46, %v876_v10  ;;  %v492_v16 = vmul.f32 %v7185_v35, %v491_v59 }
 0x50b   :  { %v728_v38 = vmul.f32 %v8937_v29, %v7235_v60  ;;  %v729_v4 = vmul.f32 %v8937_v29, %v7241_v49  ;;  %v907_v1 = vadd.f32 %v899_v36, %v751_v54  ;;  %v847_v20 = vsel %vm846_vm15, %v7180_v52, %v843_v57  ;;  %v5520_v10 = vpop.eup %5519  ;;  %v8942_v29 = vld [vmem:[#allocation39_spill] sm:$0xff]  ;;  %v8944_v54 = vld [vmem:[#allocation17_spill] sm:$0xff] }
 0x50c   :  { %v922_v43 = vmul.f32 1.442695, %v913_v55  ;;  %v914_v34 = vsub.f32 0.0, %v906_v25  ;;  %v496_v24 = vsel %vm495_vm10, %v7185_v35, %v492_v16  ;;  %v854_v37 = vmul.f32 %v847_v20, %v7036_v22  ;;  %v8946_v16 = vld [vmem:[#allocation20_spill] sm:$0xff] }
 0x50d   :  { %v752_v55 = vadd.f32 %v8939_v32, %v728_v38  ;;  %v753_v18 = vadd.f32 %v8939_v32, %v729_v4  ;;  %v915_v30 = vsub.f32 0.0, %v907_v1  ;;  %v855_v42 = vmul.f32 %v847_v20, %v7039_v12  ;;  %v8945_v12 = vld [vmem:[#allocation9_spill] sm:$0xff] }
 0x50e   :  { %5521 = vpow2.f32 %v922_v43  ;;  %v7268_v9 = vmul.f32 %v496_v24, %v8940_v44  ;;  %v924_v63 = vmul.f32 1.442695, %v914_v34  ;;  %v7271_v38 = vmul.f32 %v496_v24, %v8942_v29  ;;  %v7299_v29 = vpop.permute.xlu0 %3746 }
 0x50f   :  { %v908_v7 = vadd.f32 %v900_v53, %v752_v55  ;;  %v909_v59 = vadd.f32 %v901_v31, %v753_v18  ;;  %v926_v43 = vmul.f32 1.442695, %v915_v30  ;;  %v7273_v35 = vadd.f32 1.0, %v5520_v10  ;;  %v8947_v31 = vld [vmem:[#allocation8_spill] sm:$0xff]  ;;  %8949 = vst [vmem:[#allocation12_spill] sm:$0xff] %v7299_v29 }
 0x510   :  { %8941 = vst [vmem:[#allocation31_spill] sm:$0xff] %v7268_v9  ;;  %v878_v2 = vmul.f32 %v8944_v54, %v854_v37  ;;  %v879_v4 = vmul.f32 %v8944_v54, %v855_v42  ;;  %v730_v25 = vmul.f32 %v8945_v12, %v7268_v9  ;;  %5523 = vpow2.f32 %v924_v63 }
 0x511   :  { %v916_v52 = vsub.f32 0.0, %v908_v7  ;;  %8943 = vst [vmem:[#allocation32_spill] sm:$0xff] %v7271_v38  ;;  %v917_v22 = vsub.f32 0.0, %v909_v59  ;;  %v731_v53 = vmul.f32 %v8945_v12, %v7271_v38  ;;  %5525 = vpow2.f32 %v926_v43  ;;  %v7301_v43 = vpop.permute.xlu1 %3738 }
 0x512   :  { %5527 = vrcp.f32 %v7273_v35  ;;  %v902_v1 = vadd.f32 %v8946_v16, %v878_v2  ;;  %v903_v55 = vadd.f32 %v8946_v16, %v879_v4  ;;  %v754_v20 = vadd.f32 %v8947_v31, %v730_v25  ;;  %8950 = vst [vmem:[#allocation35_spill] sm:$0xff] %v7301_v43 }
 0x513   :  { %v928_v46 = vmul.f32 1.442695, %v916_v52  ;;  %v930_v32 = vmul.f32 1.442695, %v917_v22  ;;  %v755_v34 = vadd.f32 %v8947_v31, %v731_v53  ;;  %v7297_v52 = vpop.permute.xlu2 %3742  ;;  %vm949_vm12 = vweird.f32 %v7273_v35 }
 0x514   :  { %v5522_v36 = vpop.eup %5521  ;;  %v910_v24 = vadd.f32 %v902_v1, %v754_v20  ;;  %8948 = vst [vmem:[#allocation10_spill] sm:$0xff] %v7297_v52 }
 0x515   :  { %v7276_v57 = vadd.f32 1.0, %v5522_v36  ;;  %v911_v30 = vadd.f32 %v903_v55, %v755_v34 }
 0x516   :  { %v5524_v7 = vpop.eup %5523  ;;  %v918_v44 = vsub.f32 0.0, %v910_v24 }
 0x517   :  { %5529 = vrcp.f32 %v7276_v57  ;;  %v5526_v18 = vpop.eup %5525  ;;  %v7293_v59 = vadd.f32 1.0, %v5524_v7  ;;  %v919_v63 = vsub.f32 0.0, %v911_v30  ;;  %v953_v30 = vand.u32 2147483647, %v7273_v35 }
 0x518   :  { %5531 = vpow2.f32 %v928_v46  ;;  %v7289_v37 = vpop.eup %5527  ;;  %v7295_v36 = vadd.f32 1.0, %v5526_v18  ;;  %v932_v12 = vmul.f32 1.442695, %v918_v44  ;;  %vm964_vm5 = vweird.f32 %v7276_v57 }
 0x519   :  { %5533 = vpow2.f32 %v930_v32  ;;  %v945_v54 = vmul.f32 %v7289_v37, %v7273_v35  ;;  %v934_v25 = vmul.f32 1.442695, %v919_v63  ;;  %vm950_vm13 = vweird.f32 %v7289_v37 }
 0x51a   :  { %5535 = vrcp.f32 %v7293_v59  ;;  %v2333_v55 = vpop.xlane.xlu0 %2332  ;;  %vm7343_vm6 = vcmp.eq.f32.partialorder %v953_v30, 8.507059e+37  ;;  %v985_v9 = vand.u32 2147483648, %v7293_v59  ;;  %vm7357_vm15 = vmor %vm949_vm12, %vm950_vm13  ;;  %vm979_vm12 = vweird.f32 %v7293_v59 }
 0x51b   :  { %5537 = vrcp.f32 %v7295_v36  ;;  %v946_v53 = vsub.f32 1.0, %v945_v54  ;;  %v2330_v32 = vpop.xlane.xlu2 %2329  ;;  %v2341_v34 = vmul.f32 0.00390625, %v2333_v55  ;;  %v955_v54 = vand.u32 2147483648, %v7273_v35 }
 0x51c   :  { %v2340_v20 = vmul.f32 0.00390625, %v2330_v32 }
 0x51d   :  { %v7291_v10 = vpop.eup %5529  ;;  %v947_v24 = vmul.f32 %v7289_v37, %v946_v53  ;;  %v7325_v63 = vadd.f32 1e-05, %v2341_v34  ;;  %v970_v53 = vand.u32 2147483648, %v7276_v57 }
 0x51e   :  { %v5532_v42 = vpop.eup %5531  ;;  %v960_v4 = vmul.f32 %v7291_v10, %v7276_v57  ;;  %v7323_v44 = vadd.f32 1e-05, %v2340_v20  ;;  %vm965_vm14 = vweird.f32 %v7291_v10 }
 0x51f   :  { %v5534_v2 = vpop.eup %5533  ;;  %v7306_v22 = vadd.f32 1.0, %v5532_v42  ;;  %v948_v55 = vadd.f32 %v7289_v37, %v947_v24  ;;  %v956_v24 = vor.u32 1.1754944e-38, %v955_v54  ;;  %v971_v40 = vor.u32 1.1754944e-38, %v970_v53  ;;  %vm7372_vm10 = vmor %vm964_vm5, %vm965_vm14 }
 0x520   :  { %v7311_v46 = vadd.f32 1.0, %v5534_v2  ;;  %v961_v16 = vsub.f32 1.0, %v960_v4  ;;  %v7314_v1 = vpop.eup %5535  ;;  %v983_v53 = vand.u32 2147483647, %v7293_v59  ;;  %vm994_vm5 = vweird.f32 %v7295_v36 }
 0x521   :  { %5539 = vrcp.f32 %v7306_v22  ;;  %v7316_v31 = vpop.eup %5537  ;;  %v975_v2 = vmul.f32 %v7314_v1, %v7293_v59  ;;  %v952_v54 = vsel %vm7357_vm15, %v7289_v37, %v948_v55  ;;  %vm980_vm13 = vweird.f32 %v7314_v1 }
 0x522   :  { %5541 = vpow2.f32 %v932_v12  ;;  %v962_v42 = vmul.f32 %v7291_v10, %v961_v16  ;;  %v990_v16 = vmul.f32 %v7316_v31, %v7295_v36  ;;  %v7388_v55 = vor.u32 1.1754944e-38, %v985_v9  ;;  %vm7427_vm3 = vmor %vm979_vm12, %vm980_vm13 }
 0x523   :  { %5543 = vpow2.f32 %v934_v25  ;;  %v968_v25 = vand.u32 2147483647, %v7276_v57  ;;  %v976_v38 = vsub.f32 1.0, %v975_v2  ;;  %vm995_vm14 = vweird.f32 %v7316_v31 }
 0x524   :  { %5545 = vrcp.f32 %v7311_v46  ;;  %v2336_v7 = vpop.xlane.xlu1 %2335  ;;  %v991_v60 = vsub.f32 1.0, %v990_v16  ;;  %v1000_v16 = vand.u32 2147483648, %v7295_v36  ;;  %v1015_v29 = vand.u32 2147483648, %v7306_v22  ;;  %vm7441_vm12 = vmor %vm994_vm5, %vm995_vm14 }
 0x525   :  { %v2342_v18 = vmul.f32 0.00390625, %v2336_v7  ;;  %5547 = vrsqrt.f32 %v7323_v44  ;;  %v963_v7 = vadd.f32 %v7291_v10, %v962_v42  ;;  %vm7361_vm9 = vcmp.eq.f32.partialorder %v968_v25, 8.507059e+37 }
 0x526   :  { %5549 = vrsqrt.f32 %v7325_v63  ;;  %v992_v35 = vmul.f32 %v7316_v31, %v991_v60  ;;  %vm7406_vm15 = vcmp.eq.f32.partialorder %v983_v53, 8.507059e+37  ;;  %v1001_v60 = vor.u32 1.1754944e-38, %v1000_v16 }
 0x527   :  { %v7330_v4 = vpop.eup %5539  ;;  %v7332_v12 = vadd.f32 1e-05, %v2342_v18  ;;  %v967_v25 = vsel %vm7372_vm10, %v7291_v10, %v963_v7  ;;  %v7395_v7 = vsel %vm7343_vm6, %v956_v24, %v952_v54  ;;  %vm1024_vm7 = vweird.f32 %v7311_v46 }
 0x528   :  { %v5542_v32 = vpop.eup %5541  ;;  %v1005_v2 = vmul.f32 %v7330_v4, %v7306_v22  ;;  %v7402_v9 = vsel %vm7361_vm9, %v971_v40, %v967_v25  ;;  %vm1009_vm9 = vweird.f32 %v7306_v22  ;;  %vm1010_vm10 = vweird.f32 %v7330_v4 }
 0x529   :  { %v5544_v20 = vpop.eup %5543  ;;  %5551 = vrsqrt.f32 %v7332_v12  ;;  %v7353_v49 = vadd.f32 1.0, %v5542_v32  ;;  %v977_v32 = vmul.f32 %v7314_v1, %v976_v38  ;;  %v1013_v40 = vand.u32 2147483647, %v7306_v22 }
 0x52a   :  { %v7349_v18 = vpop.eup %5545  ;;  %v7365_v19 = vadd.f32 1.0, %v5544_v20  ;;  %v998_v20 = vand.u32 2147483647, %v7295_v36  ;;  %v1006_v5 = vsub.f32 1.0, %v1005_v2  ;;  %v993_v25 = vadd.f32 %v7316_v31, %v992_v35 }
 0x52b   :  { %v1020_v57 = vmul.f32 %v7349_v18, %v7311_v46  ;;  %v5548_v37 = vpop.eup %5547  ;;  %v978_v6 = vadd.f32 %v7314_v1, %v977_v32  ;;  %vm1025_vm4 = vweird.f32 %v7349_v18  ;;  %v1016_v16 = vor.u32 1.1754944e-38, %v1015_v29 }
 0x52c   :  { %v5550_v30 = vpop.eup %5549  ;;  %v2349_v10 = vmul.f32 %v5548_v37, %v7323_v44  ;;  %vm7411_vm6 = vcmp.eq.f32.partialorder %v998_v20, 8.507059e+37  ;;  %v1007_v53 = vmul.f32 %v7330_v4, %v1006_v5  ;;  %vm2355_vm2 = vweird.f32 %v5548_v37 }
 0x52d   :  { %v2359_v39 = vmul.f32 %v5550_v30, %v7325_v63  ;;  %v1021_v24 = vsub.f32 1.0, %v1020_v57  ;;  %v1028_v57 = vand.u32 2147483647, %v7311_v46  ;;  %vm2365_vm1 = vweird.f32 %v5550_v30 }
 0x52e   :  { %v2350_v52 = vmul.f32 %v5548_v37, %v2349_v10  ;;  %v982_v5 = vsel %vm7427_vm3, %v7314_v1, %v978_v6  ;;  %v1030_v29 = vand.u32 2147483648, %v7311_v46  ;;  %vm2354_vm11 = vweird.f32 %v7323_v44 }
 0x52f   :  { %v5552_v38 = vpop.eup %5551  ;;  %v2360_v54 = vmul.f32 %v5550_v30, %v2359_v39  ;;  %vm2356_vm13 = vmor %vm2354_vm11, %vm2355_vm2  ;;  %vm2364_vm8 = vweird.f32 %v7325_v63  ;;  %v997_v6 = vsel %vm7441_vm12, %v7316_v31, %v993_v25  ;;  %v1008_v1 = vadd.f32 %v7330_v4, %v1007_v53 }
 0x530   :  { %v2369_v43 = vmul.f32 %v5552_v38, %v7332_v12  ;;  %v2351_v42 = vmul.f32 0.5, %v2350_v52  ;;  %vm2375_vm0 = vweird.f32 %v5552_v38  ;;  %vm7450_vm3 = vcmp.eq.f32.partialorder %v1013_v40, 8.507059e+37  ;;  %vm2366_vm5 = vmor %vm2364_vm8, %vm2365_vm1 }
 0x531   :  { %v2361_v39 = vmul.f32 0.5, %v2360_v54  ;;  %vm2374_vm14 = vweird.f32 %v7332_v12  ;;  %v987_v31 = vsel %vm7406_vm15, %v7388_v55, %v982_v5  ;;  %v1002_v12 = vsel %vm7411_vm6, %v1001_v60, %v997_v6  ;;  %vm7471_vm8 = vmor %vm1009_vm9, %vm1010_vm10 }
 0x532   :  { %v2370_v2 = vmul.f32 %v5552_v38, %v2369_v43  ;;  %v2352_v32 = vsub.f32 1.5, %v2351_v42  ;;  %v1022_v43 = vmul.f32 %v7349_v18, %v1021_v24  ;;  %vm2376_vm11 = vmor %vm2374_vm14, %vm2375_vm0  ;;  %v1031_v53 = vor.u32 1.1754944e-38, %v1030_v29 }
 0x533   :  { %v2362_v10 = vsub.f32 1.5, %v2361_v39  ;;  %vm7483_vm0 = vmor %vm1024_vm7, %vm1025_vm4  ;;  %vm1029_vm7 = vcmp.eq.f32.partialorder %v1028_v57, 8.507059e+37  ;;  %5553 = vrcp.f32 %v7353_v49  ;;  %vm1039_vm6 = vweird.f32 %v7353_v49 }
 0x534   :  { %v2371_v20 = vmul.f32 0.5, %v2370_v2  ;;  %v2353_v35 = vmul.f32 %v5548_v37, %v2352_v32  ;;  %v1023_v2 = vadd.f32 %v7349_v18, %v1022_v43  ;;  %5555 = vrcp.f32 %v7365_v19 }
 0x535   :  { %v2363_v24 = vmul.f32 %v5550_v30, %v2362_v10  ;;  %vm1054_vm12 = vweird.f32 %v7365_v19 }
 0x536   :  { %v2372_v54 = vsub.f32 1.5, %v2371_v20  ;;  %v2357_v42 = vsel %vm2356_vm13, %v5548_v37, %v2353_v35 }
 0x537   :  { %v2388_v63 = vmul.f32 %v2357_v42, %v7073_v26  ;;  %v2389_v39 = vmul.f32 %v2357_v42, %v7075_v23  ;;  %v2367_v32 = vsel %vm2366_vm5, %v5550_v30, %v2363_v24  ;;  %v1045_v26 = vand.u32 2147483648, %v7353_v49 }
 0x538   :  { %v2373_v36 = vmul.f32 %v5552_v38, %v2372_v54  ;;  %v2390_v37 = vmul.f32 %v2367_v32, %v7077_v13  ;;  %v2391_v40 = vmul.f32 %v2367_v32, %v7079_v45 }
 0x539   :  { %v2420_v13 = vmul.f32 %v6807_v8, %v2388_v63  ;;  %v2421_v45 = vmul.f32 %v6807_v8, %v2389_v39  ;;  %v1027_v8 = vsel %vm7483_vm0, %v7349_v18, %v1023_v2  ;;  %v5554_v35 = vpop.eup %5553 }
 0x53a   :  { %v2377_v25 = vsel %vm2376_vm11, %v5552_v38, %v2373_v36  ;;  %v2422_v22 = vmul.f32 %v6776_v48, %v2390_v37  ;;  %v2423_v30 = vmul.f32 %v6776_v48, %v2391_v40  ;;  %v5556_v54 = vpop.eup %5555  ;;  %v1035_v59 = vmul.f32 %v5554_v35, %v7353_v49 }
 0x53b   :  { %v2392_v23 = vmul.f32 %v2377_v25, %v7085_v27  ;;  %v2393_v55 = vmul.f32 %v2377_v25, %v7087_v50  ;;  %v1012_v27 = vsel %vm7471_vm8, %v7330_v4, %v1008_v1  ;;  %v2444_v50 = vadd.f32 %v6903_v51, %v2420_v13 }
 0x53c   :  { %v2445_v46 = vadd.f32 %v6903_v51, %v2421_v45  ;;  %v2446_v60 = vadd.f32 %v6798_v21, %v2422_v22  ;;  %v2447_v48 = vadd.f32 %v6798_v21, %v2423_v30  ;;  %v1032_v21 = vsel %vm1029_vm7, %v1031_v53, %v1027_v8  ;;  %v7545_v53 = vpop.permute.xlu1 %3642 }
 0x53d   :  { %v2424_v38 = vmul.f32 %v6887_v41, %v2392_v23  ;;  %v2425_v34 = vmul.f32 %v6887_v41, %v2393_v55  ;;  %v7502_v4 = vmul.f32 %v2444_v50, %v7395_v7  ;;  %v1017_v41 = vsel %vm7450_vm3, %v1016_v16, %v1012_v27  ;;  %8974 = vst [vmem:[#allocation19_spill] sm:$0xff] %v7545_v53 }
 0x53e   :  { %v7505_v20 = vmul.f32 %v2445_v46, %v7402_v9  ;;  %v7509_v52 = vmul.f32 %v2446_v60, %v987_v31  ;;  %v7511_v43 = vmul.f32 %v2447_v48, %v1002_v12  ;;  %v1050_v24 = vmul.f32 %v5556_v54, %v7365_v19  ;;  %v7541_v60 = vpop.permute.xlu0 %3650 }
 0x53f   :  { %v2448_v18 = vadd.f32 %v6909_v58, %v2424_v38  ;;  %v2449_v51 = vadd.f32 %v6909_v58, %v2425_v34  ;;  %v1036_v44 = vsub.f32 1.0, %v1035_v59  ;;  %vm1040_vm4 = vweird.f32 %v5554_v35  ;;  %8973 = vst [vmem:[#allocation36_spill] sm:$0xff] %v7541_v60 }
 0x540   :  { %v2516_v57 = vadd.f32 %v7505_v20, %v7502_v4  ;;  %v2519_v9 = vadd.f32 %v7511_v43, %v7509_v52  ;;  %v1051_v42 = vsub.f32 1.0, %v1050_v24  ;;  %vm1055_vm9 = vweird.f32 %v5556_v54  ;;  %vm1041_vm10 = vmor %vm1039_vm6, %vm1040_vm4 }
 0x541   :  { %v7517_v7 = vmul.f32 %v2448_v18, %v1017_v41  ;;  %v7519_v10 = vmul.f32 %v2449_v51, %v1032_v21  ;;  %v1037_v63 = vmul.f32 %v5554_v35, %v1036_v44  ;;  %v1043_v12 = vand.u32 2147483647, %v7353_v49  ;;  %vm1056_vm13 = vmor %vm1054_vm12, %vm1055_vm9 }
 0x542   :  { %2517 = vadd.xlane.f32.xlu2 %v2516_v57  ;;  %2520 = vadd.xlane.f32.xlu0 %v2519_v9  ;;  %v1052_v39 = vmul.f32 %v5556_v54, %v1051_v42  ;;  %v1060_v23 = vand.u32 2147483648, %v7365_v19  ;;  %v1058_v45 = vand.u32 2147483647, %v7365_v19  ;;  %v1046_v8 = vor.u32 1.1754944e-38, %v1045_v26 }
 0x543   :  { %v2522_v58 = vadd.f32 %v7519_v10, %v7517_v7  ;;  %v1038_v37 = vadd.f32 %v5554_v35, %v1037_v63  ;;  %vm1044_vm3 = vcmp.eq.f32.partialorder %v1043_v12, 8.507059e+37  ;;  %vm8992_vm6 = vcmask 1039360  }
 0x544   :  { %v1053_v40 = vadd.f32 %v5556_v54, %v1052_v39  ;;  %v1061_v49 = vor.u32 1.1754944e-38, %v1060_v23  ;;  %vm1059_vm5 = vcmp.eq.f32.partialorder %v1058_v45, 8.507059e+37  ;;  %v7551_v51 = vpop.permute.xlu1 %3950  ;;  %vm8996_vm9 = vcmask 130048  }
 0x545   :  { %2523 = vadd.xlane.f32.xlu1 %v2522_v58  ;;  %v1042_v11 = vsel %vm1041_vm10, %v5554_v35, %v1038_v37  ;;  %8977 = vst [vmem:[#allocation5_spill] sm:$0xff] %v7551_v51  ;;  %vm8998_vm10 = vcmask 121856  }
 0x546   :  { %v1057_v22 = vsel %vm1056_vm13, %v5556_v54, %v1053_v40  ;;  %v1047_v50 = vsel %vm1044_vm3, %v1046_v8, %v1042_v11  ;;  %v7543_v48 = vpop.permute.xlu0 %3638  ;;  %vm9004_vm3 = vcmask 924672  }
 0x547   :  { %v1062_v46 = vsel %vm1059_vm5, %v1061_v49, %v1057_v22  ;;  %vm9007_vm5 = vcmask 7168  }
 0x54e   :  { %v7549_v18 = vpop.permute.xlu0 %3946 }
 0x54f   :  { %8976 = vst [vmem:[#allocation11_spill] sm:$0xff] %v7549_v18 }
 0x55d   :  { %v2339_v16 = vpop.xlane.xlu2 %2338 }
 0x55e   :  { %v2343_v5 = vmul.f32 0.00390625, %v2339_v16 }
 0x560   :  { %v2347_v29 = vadd.f32 1e-05, %v2343_v5 }
 0x562   :  { %5557 = vrsqrt.f32 %v2347_v29  ;;  %vm2384_vm2 = vweird.f32 %v2347_v29 }
 0x568   :  { %v5558_v6 = vpop.eup %5557 }
 0x569   :  { %v2379_v1 = vmul.f32 %v5558_v6, %v2347_v29  ;;  %vm2385_vm1 = vweird.f32 %v5558_v6 }
 0x56a   :  { %vm2386_vm15 = vmor %vm2384_vm2, %vm2385_vm1 }
 0x56b   :  { %v2380_v36 = vmul.f32 %v5558_v6, %v2379_v1 }
 0x56d   :  { %v2381_v2 = vmul.f32 0.5, %v2380_v36 }
 0x56f   :  { %v2382_v32 = vsub.f32 1.5, %v2381_v2 }
 0x571   :  { %v2383_v31 = vmul.f32 %v5558_v6, %v2382_v32 }
 0x573   :  { %v2387_v25 = vsel %vm2386_vm15, %v5558_v6, %v2383_v31 }
 0x574   :  { %v2394_v55 = vmul.f32 %v2387_v25, %v7112_v56  ;;  %v2395_v13 = vmul.f32 %v2387_v25, %v7115_v61 }
 0x576   :  { %v2426_v30 = vmul.f32 %v6785_v14, %v2394_v55  ;;  %v2427_v27 = vmul.f32 %v6785_v14, %v2395_v13  ;;  %v7547_v14 = vpop.permute.xlu2 %3646 }
 0x577   :  { %8975 = vst [vmem:[#allocation18_spill] sm:$0xff] %v7547_v14 }
 0x578   :  { %v2450_v56 = vadd.f32 %v6819_v62, %v2426_v30  ;;  %v2451_v61 = vadd.f32 %v6819_v62, %v2427_v27 }
 0x57a   :  { %v2458_v38 = vmul.f32 %v2450_v56, %v1047_v50  ;;  %v2459_v34 = vmul.f32 %v2451_v61, %v1062_v46 }
 0x57c   :  { %v2525_v19 = vadd.f32 %v2459_v34, %v2458_v38 }
 0x57e   :  { %2526 = vadd.xlane.f32.xlu2 %v2525_v19  ;;  %v8978_v19 = vld [vmem:[#allocation42_spill] sm:$0xff] }
 0x5b5   :  { %v2518_v41 = vpop.xlane.xlu2 %2517  ;;  %v2521_v21 = vpop.xlane.xlu0 %2520 }
 0x5b6   :  { %v2528_v62 = vmul.f32 0.00390625, %v2518_v41  ;;  %v2529_v57 = vmul.f32 0.00390625, %v2521_v21  ;;  %v2486_v41 = vmul.f32 %v6915_v33, %v8978_v19 }
 0x5b8   :  { %v2524_v9 = vpop.xlane.xlu1 %2523  ;;  %v7554_v58 = vsub.f32 %v7502_v4, %v2528_v62  ;;  %v7557_v16 = vsub.f32 %v7505_v20, %v2528_v62  ;;  %v7560_v29 = vsub.f32 %v7509_v52, %v2529_v57  ;;  %v7563_v35 = vsub.f32 %v7511_v43, %v2529_v57  ;;  %v8979_v57 = vld [vmem:[#allocation43_spill] sm:$0xff] }
 0x5b9   :  { %v2530_v5 = vmul.f32 0.00390625, %v2524_v9  ;;  %v2487_v9 = vmul.f32 %v6915_v33, %v8979_v57 }
 0x5ba   :  { %v2540_v54 = vmul.f32 %v7554_v58, %v7554_v58  ;;  %v2541_v59 = vmul.f32 %v7557_v16, %v7557_v16  ;;  %v2542_v20 = vmul.f32 %v7560_v29, %v7560_v29  ;;  %v2543_v52 = vmul.f32 %v7563_v35, %v7563_v35 }
 0x5bb   :  { %v7570_v24 = vsub.f32 %v7517_v7, %v2530_v5  ;;  %v7573_v4 = vsub.f32 %v7519_v10, %v2530_v5  ;;  %v8980_v5 = vld [vmem:[#allocation40_spill] sm:$0xff] }
 0x5bc   :  { %v2548_v43 = vadd.f32 %v2541_v59, %v2540_v54  ;;  %v2551_v44 = vadd.f32 %v2543_v52, %v2542_v20  ;;  %v2484_v54 = vmul.f32 %v6809_v17, %v8980_v5  ;;  %v8981_v20 = vld [vmem:[#allocation41_spill] sm:$0xff] }
 0x5bd   :  { %v2544_v6 = vmul.f32 %v7570_v24, %v7570_v24  ;;  %v2545_v1 = vmul.f32 %v7573_v4, %v7573_v4  ;;  %v2485_v52 = vmul.f32 %v6809_v17, %v8981_v20 }
 0x5be   :  { %2549 = vadd.xlane.f32.xlu0 %v2548_v43  ;;  %2552 = vadd.xlane.f32.xlu1 %v2551_v44 }
 0x5bf   :  { %v2554_v7 = vadd.f32 %v2545_v1, %v2544_v6  ;;  %v8982_v1 = vld [vmem:[#allocation44_spill] sm:$0xff] }
 0x5c0   :  { %v2488_v44 = vmul.f32 %v6821_v15, %v8982_v1 }
 0x5c1   :  { %2555 = vadd.xlane.f32.xlu2 %v2554_v7 }
 0x5f1   :  { %v2527_v10 = vpop.xlane.xlu2 %2526 }
 0x5f2   :  { %v2531_v42 = vmul.f32 0.00390625, %v2527_v10 }
 0x5f4   :  { %v7583_v36 = vsub.f32 %v2458_v38, %v2531_v42  ;;  %v7585_v2 = vsub.f32 %v2459_v34, %v2531_v42 }
 0x5f6   :  { %v2546_v63 = vmul.f32 %v7583_v36, %v7583_v36  ;;  %v2547_v39 = vmul.f32 %v7585_v2, %v7585_v2 }
 0x5f8   :  { %v2557_v32 = vadd.f32 %v2547_v39, %v2546_v63 }
 0x5fa   :  { %2558 = vadd.xlane.f32.xlu0 %v2557_v32  ;;  %v8983_v32 = vld [vmem:[#allocation45_spill] sm:$0xff] }
 0x5fb   :  { %v2489_v17 = vmul.f32 %v6821_v15, %v8983_v32 }
 0x631   :  { %v2550_v31 = vpop.xlane.xlu0 %2549  ;;  %v2553_v40 = vpop.xlane.xlu1 %2552 }
 0x632   :  { %v2560_v37 = vmul.f32 0.00390625, %v2550_v31  ;;  %v2561_v25 = vmul.f32 0.00390625, %v2553_v40  ;;  %v2508_v31 = vadd.f32 %v6827_v28, %v2484_v54 }
 0x634   :  { %v2564_v12 = vadd.f32 1e-05, %v2560_v37  ;;  %v2565_v26 = vadd.f32 1e-05, %v2561_v25  ;;  %v2556_v23 = vpop.xlane.xlu2 %2555 }
 0x635   :  { %v2562_v55 = vmul.f32 0.00390625, %v2556_v23 }
 0x636   :  { %5559 = vrsqrt.f32 %v2564_v12  ;;  %vm2574_vm8 = vweird.f32 %v2564_v12  ;;  %vm2584_vm7 = vweird.f32 %v2565_v26 }
 0x637   :  { %5561 = vrsqrt.f32 %v2565_v26  ;;  %v2566_v13 = vadd.f32 1e-05, %v2562_v55  ;;  %v8985_v55 = vld [vmem:[#allocation33_spill] sm:$0xff] }
 0x639   :  { %5563 = vrsqrt.f32 %v2566_v13  ;;  %vm2594_vm4 = vweird.f32 %v2566_v13 }
 0x63c   :  { %v5560_v45 = vpop.eup %5559 }
 0x63d   :  { %v5562_v11 = vpop.eup %5561  ;;  %v2569_v22 = vmul.f32 %v5560_v45, %v2564_v12  ;;  %vm2575_vm14 = vweird.f32 %v5560_v45 }
 0x63e   :  { %v2579_v30 = vmul.f32 %v5562_v11, %v2565_v26  ;;  %vm2585_vm11 = vweird.f32 %v5562_v11  ;;  %vm2576_vm0 = vmor %vm2574_vm8, %vm2575_vm14  ;;  %vm9015_vm8 = vcmask 138240  }
 0x63f   :  { %v2570_v27 = vmul.f32 %v5560_v45, %v2569_v22  ;;  %v5564_v8 = vpop.eup %5563  ;;  %vm2586_vm1 = vmor %vm2584_vm7, %vm2585_vm11  ;;  %vm9009_vm11 = vcmask 916480   ;;  %vm9019_vm7 = vcmask 261120  }
 0x640   :  { %v2580_v49 = vmul.f32 %v5562_v11, %v2579_v30  ;;  %v2589_v61 = vmul.f32 %v5564_v8, %v2566_v13  ;;  %vm2595_vm2 = vweird.f32 %v5564_v8  ;;  %v2510_v13 = vadd.f32 %v8985_v55, %v2486_v41 }
 0x641   :  { %v2571_v56 = vmul.f32 0.5, %v2570_v27  ;;  %vm2596_vm15 = vmor %vm2594_vm4, %vm2595_vm2 }
 0x642   :  { %v2581_v50 = vmul.f32 0.5, %v2580_v49  ;;  %v2590_v38 = vmul.f32 %v5564_v8, %v2589_v61  ;;  %v8988_v49 = vld [vmem:[#allocation27_spill] sm:$0xff] }
 0x643   :  { %v2572_v46 = vsub.f32 1.5, %v2571_v56  ;;  %v2512_v56 = vadd.f32 %v8988_v49, %v2488_v44 }
 0x644   :  { %v2582_v34 = vsub.f32 1.5, %v2581_v50  ;;  %v2591_v21 = vmul.f32 0.5, %v2590_v38  ;;  %v8989_v38 = vld [vmem:[#allocation50_spill] sm:$0xff] }
 0x645   :  { %v2573_v62 = vmul.f32 %v5560_v45, %v2572_v46 }
 0x646   :  { %v2583_v59 = vmul.f32 %v5562_v11, %v2582_v34  ;;  %v2592_v6 = vsub.f32 1.5, %v2591_v21 }
 0x647   :  { %v2577_v43 = vsel %vm2576_vm0, %v5560_v45, %v2573_v62  ;;  %v8986_v45 = vld [vmem:[#allocation51_spill] sm:$0xff]  ;;  %vm9018_vm0 = vcmask 908288  }
 0x648   :  { %v2608_v7 = vmul.f32 %v2577_v43, %v7554_v58  ;;  %v2609_v33 = vmul.f32 %v2577_v43, %v7557_v16  ;;  %v2587_v10 = vsel %vm2586_vm1, %v5562_v11, %v2583_v59  ;;  %v2593_v39 = vmul.f32 %v5564_v8, %v2592_v6  ;;  %vm9020_vm1 = vmmov %vm9019_vm7 }
 0x649   :  { %v2610_v42 = vmul.f32 %v2587_v10, %v7560_v29  ;;  %v2611_v63 = vmul.f32 %v2587_v10, %v7563_v35  ;;  %v2509_v58 = vadd.f32 %v6827_v28, %v2485_v52  ;;  %v8984_v35 = vld [vmem:[#allocation24_spill] sm:$0xff]  ;;  %vm9021_vm2 = vmmov %vm9020_vm1 }
 0x64a   :  { %v2632_v37 = vmul.f32 %v6850_v3, %v2608_v7  ;;  %v2633_v40 = vmul.f32 %v6850_v3, %v2609_v33  ;;  %v2597_v25 = vsel %vm2596_vm15, %v5564_v8, %v2593_v39  ;;  %v2511_v3 = vadd.f32 %v8985_v55, %v2487_v9  ;;  %vm9022_vm4 = vmmov %vm9020_vm1 }
 0x64b   :  { %v2634_v16 = vmul.f32 %v6941_v47, %v2610_v42  ;;  %v2635_v29 = vmul.f32 %v6941_v47, %v2611_v63  ;;  %v2612_v15 = vmul.f32 %v2597_v25, %v7570_v24  ;;  %v2613_v23 = vmul.f32 %v2597_v25, %v7573_v4  ;;  %v8987_v47 = vld [vmem:[#allocation26_spill] sm:$0xff] }
 0x64c   :  { %v2656_v12 = vadd.f32 %v8984_v35, %v2632_v37  ;;  %v2657_v26 = vadd.f32 %v8984_v35, %v2633_v40  ;;  %v2513_v24 = vadd.f32 %v8988_v49, %v2489_v17  ;;  %vm9024_vm15 = vcmask 1043456  }
 0x64d   :  { %v2658_v11 = vadd.f32 %v8986_v45, %v2634_v16  ;;  %v2659_v28 = vadd.f32 %v8986_v45, %v2635_v29  ;;  %v2636_v27 = vmul.f32 %v8987_v47, %v2612_v15  ;;  %v2637_v8 = vmul.f32 %v8987_v47, %v2613_v23  ;;  %v8991_v16 = vld [vmem:[#allocation37_spill] sm:$0xff] }
 0x64e   :  { %v2664_v22 = vadd.f32 %v2656_v12, %v2508_v31  ;;  %v2665_v30 = vadd.f32 %v2657_v26, %v2509_v58  ;;  %v8990_v58 = vld [vmem:[#allocation22_spill] sm:$0xff]  ;;  %v8993_v15 = vld [vmem:[#allocation57_spill] sm:$0xff] }
 0x64f   :  { %v2666_v61 = vadd.f32 %v2658_v11, %v2510_v13  ;;  %v2667_v4 = vadd.f32 %v2659_v28, %v2511_v3  ;;  %v2660_v34 = vadd.f32 %v8989_v38, %v2636_v27  ;;  %v2661_v41 = vadd.f32 %v8989_v38, %v2637_v8  ;;  %v8994_v47 = vld [vmem:[#allocation25_spill] sm:$0xff]  ;;  %v8995_v27 = vld [vmem:[#allocation23_spill] sm:$0xff] }
 0x650   :  { %v2672_v50 = vmax.f32 %v2664_v22, 0.0  ;;  %v2673_v46 = vmax.f32 %v2665_v30, 0.0  ;;  %v7640_v29 = vsel %vm8992_vm6, %v8991_v16, %v8990_v58  ;;  %v7657_v8 = vsel %vm8996_vm9, %v8995_v27, %v8994_v47  ;;  %vm9025_vm6 = vmmov %vm9004_vm3 }
 0x651   :  { %v2674_v62 = vmax.f32 %v2666_v61, 0.0  ;;  %v2675_v21 = vmax.f32 %v2667_v4, 0.0  ;;  %v2668_v54 = vadd.f32 %v2660_v34, %v2512_v56  ;;  %v2669_v59 = vadd.f32 %v2661_v41, %v2513_v24  ;;  %v8997_v56 = vld [vmem:[#allocation62_spill] sm:$0xff]  ;;  %vm9027_vm9 = vmmov %vm9024_vm15 }
 0x652   :  { %v2680_v9 = vpack.c.bf16 %v2673_v46, %v2672_v50  ;;  %v7663_v24 = vsel %vm8998_vm10, %v8997_v56, %v6979_v0  ;;  %v8999_v50 = vld [vmem:[#allocation61_spill] sm:$0xff]  ;;  %vm9028_vm10 = vmmov %vm9007_vm5 }
 0x653   :  { %v7627_v52 = vpack.c.bf16 %v2675_v21, %v2674_v62  ;;  %v2676_v6 = vmax.f32 %v2668_v54, 0.0  ;;  %v2677_v44 = vmax.f32 %v2669_v59, 0.0  ;;  %v9001_v54 = vld [vmem:[#allocation21_spill] sm:$0xff] }
 0x654   :  { %2684 = vst [vmem:[#allocation4 + $0x4] sm:$0xff] %v2680_v9  ;;  %v7648_v13 = vunpack.c.l.bf16 %v2680_v9  ;;  %v7650_v3 = vunpack.c.h.bf16 %v2680_v9  ;;  %v9000_v9 = vld [vmem:[#allocation46_spill] sm:$0xff] }
 0x655   :  { %2685 = vst [vmem:[#allocation4 + $0x14] sm:$0xff] %v7627_v52  ;;  %v7630_v33 = vpack.c.bf16 %v2677_v44, %v2676_v6  ;;  %v2490_v59 = vmul.f32 %v9001_v54, %v9000_v9  ;;  %v9002_v44 = vld [vmem:[#allocation47_spill] sm:$0xff] }
 0x656   :  { %v3808_v61 = vmul.f32 %v8995_v27, %v7648_v13  ;;  %v3809_v4 = vmul.f32 %v7657_v8, %v7650_v3  ;;  %v3708_v38 = vmul.f32 %v7648_v13, %v8997_v56  ;;  %v3709_v34 = vmul.f32 %v7650_v3, %v7663_v24 }
 0x657   :  { %2686 = vst [vmem:[#allocation4 + $0x24] sm:$0xff] %v7630_v33 }
 0x658   :  { %v3820_v21 = vpack.c.bf16 %v3809_v4, %v3808_v61 }
 0x65b   :  { %v3443_v42 = vld [vmem:[#allocation4 + $0x8] sm:$0xf]  ;;  %v3442_v63 = vld [vmem:[#allocation4] sm:$0xff] }
 0x65c   :  { %v3343_v39 = vld [vmem:[#allocation4 + $0x8] sm:$0xf]  ;;  %v3453_v17 = vunpack.c.l.bf16 %v3443_v42  ;;  %v7633_v31 = vunpack.c.l.bf16 %v3442_v63  ;;  %v7635_v37 = vunpack.c.h.bf16 %v3442_v63  ;;  %v9003_v42 = vld [vmem:[#allocation59_spill] sm:$0xff]  ;;  %v3245_v5 = vld [vmem:[#allocation4 + $0x18] sm:$0xf] }
 0x65d   :  { %v3353_v40 = vunpack.c.l.bf16 %v3343_v39  ;;  %v3243_v25 = vld [vmem:[#allocation4 + $0x8] sm:$0xf]  ;;  %v7681_v63 = vsel %vm9004_vm3, %v9003_v42, %v8993_v15  ;;  %v9005_v39 = vld [vmem:[#allocation64_spill] sm:$0xff]  ;;  %v3256_v53 = vunpack.c.l.bf16 %v3245_v5  ;;  %vm9033_vm3 = vmmov %vm9009_vm11 }
 0x65e   :  { %v3476_v35 = vmul.f32 %v8990_v58, %v3453_v17  ;;  %v3474_v12 = vmul.f32 %v8991_v16, %v7633_v31  ;;  %v3475_v26 = vmul.f32 %v7640_v29, %v7635_v37  ;;  %v3253_v22 = vunpack.c.l.bf16 %v3243_v25  ;;  %v9006_v17 = vld [vmem:[#allocation66_spill] sm:$0xff] }
 0x65f   :  { %v3376_v23 = vmul.f32 %v8993_v15, %v3353_v40  ;;  %v7686_v40 = vsel %vm9007_vm5, %v9006_v17, %v9005_v39  ;;  %v5350_v57 = vld [vmem:[#allocation4 + $0x28] sm:$0xf]  ;;  %vm9034_vm5 = vcmask 130048  }
 0x660   :  { %v3487_v45 = vpack.c.bf16 %v3476_v35, %v3476_v35  ;;  %v3486_v11 = vpack.c.bf16 %v3475_v26, %v3474_v12  ;;  %v3276_v46 = vmul.f32 %v8999_v50, %v3253_v22  ;;  %v3608_v35 = vmul.f32 %v7648_v13, %v9006_v17  ;;  %v7706_v22 = vld [vmem:[#allocation4 + $0x8] sm:$0xff]  }
 0x661   :  { %v3387_v28 = vpack.c.bf16 %v3376_v23, %v3376_v23  ;;  %v3609_v12 = vmul.f32 %v7650_v3, %v7686_v40  ;;  %v3374_v23 = vmul.f32 %v7633_v31, %v9003_v42 }
 0x662   :  { %3504 = vrot.lane.b32.xlu0 %v3487_v45, %s5638_s27  ;;  %3502 = vrot.lane.b32.xlu1 %v3486_v11, %s5638_s27  ;;  %v3287_v0 = vpack.c.bf16 %v3276_v46, %v3276_v46  ;;  %v3375_v45 = vmul.f32 %v7635_v37, %v7681_v63  ;;  %v9011_v46 = vld [vmem:[#allocation28_spill] sm:$0xff] }
 0x663   :  { %3404 = vrot.lane.b32.xlu2 %v3387_v28, %s5640_s19 }
 0x66a   :  { %3836 = vrot.lane.b32.xlu0 %v3820_v21, %s5641_s18  ;;  %3304 = vrot.lane.b32.xlu1 %v3287_v0, %s5634_s11  ;;  %v3386_v21 = vpack.c.bf16 %v3375_v45, %v3374_v23  ;;  %v9012_v0 = vld [vmem:[#allocation53_spill] sm:$0xff]  ;;  %v3445_v45 = vld [vmem:[#allocation4 + $0x18] sm:$0xf] }
 0x66d   :  { %v2559_v43 = vpop.xlane.xlu0 %2558 }
 0x66e   :  { %v2563_v7 = vmul.f32 0.00390625, %v2559_v43  ;;  %v3720_v43 = vpack.c.bf16 %v3709_v34, %v3708_v38  ;;  %v3620_v34 = vpack.c.bf16 %v3609_v12, %v3608_v35  ;;  %v9016_v12 = vld [vmem:[#allocation68_spill] sm:$0xff] }
 0x670   :  { %v2567_v10 = vadd.f32 1e-05, %v2563_v7  ;;  %v2491_v7 = vmul.f32 %v9001_v54, %v9002_v44  ;;  %3736 = vrot.lane.b32.xlu2 %v3720_v43, %s5636_s12 }
 0x672   :  { %5565 = vrsqrt.f32 %v2567_v10  ;;  %vm2604_vm13 = vweird.f32 %v2567_v10  ;;  %3402 = vrot.lane.b32.xlu0 %v3386_v21, %s5640_s19  ;;  %3636 = vrot.lane.b32.xlu1 %v3620_v34, %s5635_s30  ;;  %v3456_v21 = vunpack.c.l.bf16 %v3445_v45 }
 0x678   :  { %v5566_v55 = vpop.eup %5565 }
 0x679   :  { %v2599_v30 = vmul.f32 %v5566_v55, %v2567_v10  ;;  %vm2605_vm12 = vweird.f32 %v5566_v55  ;;  %v9008_v10 = vld [vmem:[#allocation63_spill] sm:$0xff] }
 0x67a   :  { %vm2606_vm14 = vmor %vm2604_vm13, %vm2605_vm12  ;;  %v7693_v25 = vsel %vm9009_vm11, %v9008_v10, %v8999_v50 }
 0x67b   :  { %v2600_v49 = vmul.f32 %v5566_v55, %v2599_v30  ;;  %v3274_v30 = vmul.f32 %v7633_v31, %v9008_v10  ;;  %v3275_v47 = vmul.f32 %v7635_v37, %v7693_v25  ;;  %vm9031_vm12 = vmmov %vm9027_vm9 }
 0x67c   :  { %vm9032_vm13 = vmmov %vm9027_vm9 }
 0x67d   :  { %v2601_v41 = vmul.f32 0.5, %v2600_v49  ;;  %v7712_v49 = vld [vmem:[#allocation4 + $0x18] sm:$0xff]   ;;  %v3286_v35 = vpack.c.bf16 %v3275_v47, %v3274_v30  ;;  %vm9036_vm11 = vmmov %vm9027_vm9 }
 0x67e   :  { %v3356_v43 = vunpack.c.l.bf16 %v7712_v49 }
 0x67f   :  { %v2602_v62 = vsub.f32 1.5, %v2601_v41  ;;  %v7720_v41 = vunpack.c.l.bf16 %v7627_v52  ;;  %3302 = vrot.lane.b32.xlu2 %v3286_v35, %s5634_s11 }
 0x681   :  { %v2603_v6 = vmul.f32 %v5566_v55, %v2602_v62  ;;  %v7723_v62 = vunpack.c.h.bf16 %v7627_v52 }
 0x683   :  { %v2607_v26 = vsel %vm2606_vm14, %v5566_v55, %v2603_v6  ;;  %v9010_v55 = vld [vmem:[#allocation48_spill] sm:$0xff]  ;;  %v9013_v6 = vld [vmem:[#allocation69_spill] sm:$0xff]  ;;  %vm9035_vm14 = vmmov %vm9027_vm9 }
 0x684   :  { %v2614_v11 = vmul.f32 %v2607_v26, %v7583_v36  ;;  %v2615_v28 = vmul.f32 %v2607_v26, %v7585_v2  ;;  %v2514_v61 = vadd.f32 %v9010_v55, %v2490_v59  ;;  %v2515_v4 = vadd.f32 %v9010_v55, %v2491_v7  ;;  %v9014_v7 = vld [vmem:[#allocation67_spill] sm:$0xff]  ;;  %v9017_v26 = vld [vmem:[#allocation65_spill] sm:$0xff] }
 0x685   :  { %v3153_v2 = vunpack.c.l.bf16 %v7706_v22  ;;  %v7731_v39 = vsel %vm9015_vm8, %v9014_v7, %v9013_v6  ;;  %v7751_v47 = vmul.f32 %v9014_v7, %v7720_v41  ;;  %vm9037_vm8 = vcmask 121856  }
 0x686   :  { %v2638_v38 = vmul.f32 %v9011_v46, %v2614_v11  ;;  %v2639_v36 = vmul.f32 %v9011_v46, %v2615_v28  ;;  %v7736_v11 = vsel %vm9018_vm0, %v9017_v26, %v9016_v12  ;;  %v7743_v28 = vmul.f32 %v9014_v7, %v7648_v13  ;;  %v3444_v13 = vld [vmem:[#allocation4 + $0x10] sm:$0xff] }
 0x687   :  { %v7747_v30 = vmul.f32 %v7731_v39, %v7650_v3  ;;  %v7755_v55 = vmul.f32 %v7731_v39, %v7723_v62  ;;  %v3176_v46 = vmul.f32 %v9016_v12, %v3153_v2  ;;  %v3175_v3 = vmul.f32 %v7635_v37, %v7736_v11  ;;  %v5097_v2 = vld [vmem:[%s8716_s4 + $0x4] ss:$8 sm:$0x3] }
 0x688   :  { %v2662_v54 = vadd.f32 %v9012_v0, %v2638_v38  ;;  %v2663_v59 = vadd.f32 %v9012_v0, %v2639_v36  ;;  %v3379_v38 = vmul.f32 %v8993_v15, %v3356_v43  ;;  %v3174_v36 = vmul.f32 %v7633_v31, %v9017_v26  ;;  %v3544_v0 = vld [vmem:[#allocation4 + $0x24] sm:$0xff] }
 0x689   :  { %v3187_v43 = vpack.c.bf16 %v3176_v46, %v3176_v46  ;;  %v7773_v35 = vunpack.c.h.bf16 %v3444_v13  ;;  %v3479_v46 = vmul.f32 %v8990_v58, %v3456_v21  ;;  %v7786_v37 = vperm.slane %v5097_v2, 1 }
 0x68a   :  { %v2670_v52 = vadd.f32 %v2662_v54, %v2514_v61  ;;  %v2671_v23 = vadd.f32 %v2663_v59, %v2515_v4  ;;  %v7765_v54 = vunpack.c.l.bf16 %v3444_v13  ;;  %v3389_v31 = vpack.c.bf16 %v3379_v38, %v3379_v38 }
 0x68b   :  { %v3186_v45 = vpack.c.bf16 %v3175_v3, %v3174_v36  ;;  %v3552_v59 = vunpack.c.h.bf16 %v3544_v0  ;;  %3204 = vrot.lane.b32.xlu1 %v3187_v43, %s5642_s21  ;;  %v3712_v38 = vmul.f32 %v7663_v24, %v7723_v62  ;;  %v7784_v13 = vperm.slane %v5097_v2, 0 }
 0x68c   :  { %v2678_v61 = vmax.f32 %v2670_v52, 0.0  ;;  %v2679_v4 = vmax.f32 %v2671_v23, 0.0  ;;  %v3542_v52 = vld [vmem:[#allocation4 + $0x4] sm:$0xff]  ;;  %v3543_v23 = vld [vmem:[#allocation4 + $0x14] sm:$0xff]  ;;  %3408 = vrot.lane.b32.xlu0 %v3389_v31, %s5640_s19  ;;  %v3478_v43 = vmul.f32 %v7640_v29, %v7773_v35  ;;  %v3489_v18 = vpack.c.bf16 %v3479_v46, %v3479_v46 }
 0x68d   :  { %3202 = vrot.lane.b32.xlu2 %v3186_v45, %s5642_s21  ;;  %v3547_v36 = vunpack.c.l.bf16 %v3542_v52  ;;  %v3548_v3 = vunpack.c.h.bf16 %v3542_v52  ;;  %v3549_v44 = vunpack.c.l.bf16 %v3543_v23  ;;  %v3550_v9 = vunpack.c.h.bf16 %v3543_v23  ;;  %v5084_v23 = vld [vmem:[#allocation4 + $0x24] sm:$0xf] }
 0x68e   :  { %v7763_v34 = vpack.c.bf16 %v2679_v4, %v2678_v61  ;;  %v3711_v61 = vmul.f32 %v8997_v56, %v7720_v41  ;;  %v3551_v4 = vunpack.c.l.bf16 %v3544_v0  ;;  %v3477_v0 = vmul.f32 %v8991_v16, %v7765_v54 }
 0x68f   :  { %v3565_v31 = vmul.f32 %v7786_v37, %v3552_v59  ;;  %v3560_v20 = vmul.f32 %v7784_v13, %v3547_v36  ;;  %v3561_v2 = vmul.f32 %v7786_v37, %v3548_v3  ;;  %v3562_v45 = vmul.f32 %v7784_v13, %v3549_v44  ;;  %v5349_v44 = vld [vmem:[#allocation4 + $0x10] sm:$0xf0]  ;;  %v5078_v3 = vld [vmem:[#allocation4 + $0x14] sm:$0xf0] }
 0x690   :  { %2687 = vst [vmem:[#allocation4 + $0x34] sm:$0xff] %v7763_v34  ;;  %v3564_v21 = vmul.f32 %v7784_v13, %v3551_v4  ;;  %v3563_v52 = vmul.f32 %v7786_v37, %v3550_v9  ;;  %v3722_v4 = vpack.c.bf16 %v3712_v38, %v3711_v61  ;;  %v3488_v36 = vpack.c.bf16 %v3478_v43, %v3477_v0  ;;  %v5076_v9 = vld [vmem:[#allocation4 + $0x4] sm:$0xf] }
 0x691   :  { %v3568_v60 = vpack.c.bf16 %v3561_v2, %v3560_v20  ;;  %v5348_v20 = vld [vmem:[#allocation4 + $0x8] sm:$0xf]  ;;  %v3378_v38 = vmul.f32 %v7773_v35, %v7681_v63  ;;  %v3177_v0 = vmul.f32 %v7765_v54, %v9017_v26  ;;  %v3178_v43 = vmul.f32 %v7773_v35, %v7736_v11 }
 0x692   :  { %v3570_v32 = vpack.c.bf16 %v3565_v31, %v3564_v21  ;;  %v3569_v51 = vpack.c.bf16 %v3563_v52, %v3562_v45  ;;  %v5081_v5 = vor.u32 %v5348_v20, %v5078_v3  ;;  %v3611_v21 = vmul.f32 %v7720_v41, %v9006_v17  ;;  %v3347_v2 = vld [vmem:[#allocation4 + $0x28] sm:$0xf]  ;;  %v3446_v45 = vld [vmem:[#allocation4 + $0x20] sm:$0xff]  ;;  %v3145_v52 = vld [vmem:[#allocation4 + $0x18] sm:$0xf] }
 0x693   :  { %3572 = vst [vmem:[#allocation3 + $0x80] sm:$0xff] %v3568_v60  ;;  %3508 = vrot.lane.b32.xlu1 %v3489_v18, %s5638_s27  ;;  %v3277_v60 = vmul.f32 %v7765_v54, %v9008_v10  ;;  %v3278_v18 = vmul.f32 %v7773_v35, %v7693_v25  ;;  %v3612_v31 = vmul.f32 %v7723_v62, %v7686_v40  ;;  %v3156_v35 = vunpack.c.l.bf16 %v3145_v52  ;;  %v3247_v3 = vld [vmem:[#allocation4 + $0x28] sm:$0xf] }
 0x694   :  { %3574 = vst [vmem:[#allocation3 + $0x90] sm:$0xff] %v3570_v32  ;;  %3740 = vrot.lane.b32.xlu0 %v3722_v4, %s5636_s12  ;;  %v3188_v4 = vpack.c.bf16 %v3178_v43, %v3177_v0  ;;  %vm9038_vm0 = vcmask 1039360  }
 0x695   :  { %3573 = vst [vmem:[#allocation3 + $0x88] sm:$0xff] %v3569_v51  ;;  %3506 = vrot.lane.b32.xlu2 %v3488_v36, %s5638_s27  ;;  %v3279_v51 = vmul.f32 %v8999_v50, %v3256_v53  ;;  %v3288_v61 = vpack.c.bf16 %v3278_v18, %v3277_v60  ;;  %v3377_v53 = vmul.f32 %v7765_v54, %v9003_v42  ;;  %v7831_v36 = vunpack.c.l.bf16 %v3446_v45  ;;  %v3447_v60 = vld [vmem:[#allocation4 + $0x28] sm:$0xf] }
 0x696   :  { %v7833_v54 = vunpack.c.h.bf16 %v3446_v45  ;;  %v3179_v20 = vmul.f32 %v9016_v12, %v3156_v35  ;;  %v3691_v18 = vunpack.c.l.bf16 %v7630_v33 }
 0x697   :  { %v5351_v1 = vld [vmem:[#allocation4 + $0x30] sm:$0xf0]  ;;  %v5086_v19 = vld [vmem:[#allocation4 + $0x34] sm:$0xf0]  ;;  %v3289_v46 = vpack.c.bf16 %v3279_v51, %v3279_v51  ;;  %v5353_v51 = vld [vmem:[%s8718_s3 + $0x8] sm:$0xff]  ;;  %v3280_v35 = vmul.f32 %v7831_v36, %v9008_v10 }
 0x698   :  { %v5085_v14 = vor.u32 %v5351_v1, %v5084_v23  ;;  %v5089_v59 = vor.u32 %v5350_v57, %v5086_v19  ;;  %v3811_v1 = vmul.f32 %v8995_v27, %v7720_v41  ;;  %v3812_v19 = vmul.f32 %v7657_v8, %v7723_v62 }
 0x699   :  { %v5077_v57 = vor.u32 %v5349_v44, %v5076_v9  ;;  %v3388_v23 = vpack.c.bf16 %v3378_v38, %v3377_v53  ;;  %v3622_v9 = vpack.c.bf16 %v3612_v31, %v3611_v21  ;;  %v3480_v62 = vmul.f32 %v8991_v16, %v7831_v36  ;;  %v3545_v31 = vld [vmem:[#allocation4 + $0x34] sm:$0xff] }
 0x69a   :  { %2738 = vmatpush.bf16.msrb.mxu1 %v5085_v14  ;;  %2757 = vmatpush.bf16.msrb.mxu3 %v5089_v59  ;;  %v5352_v14 = vld [vmem:[%s8718_s3] sm:$0xff]  ;;  %v3822_v32 = vpack.c.bf16 %v3812_v19, %v3811_v1  ;;  %v3359_v59 = vunpack.c.l.bf16 %v3347_v2  ;;  %v3481_v44 = vmul.f32 %v7640_v29, %v7833_v54  ;;  %v7845_v1 = vunpack.c.l.bf16 %v7763_v34 }
 0x69b   :  { %v7848_v19 = vunpack.c.h.bf16 %v7763_v34  ;;  %v3692_v34 = vunpack.c.h.bf16 %v7630_v33  ;;  %v3459_v53 = vunpack.c.l.bf16 %v3447_v60  ;;  %v3714_v0 = vmul.f32 %v8997_v56, %v3691_v18 }
 0x69c   :  { %3840 = vrot.lane.b32.xlu1 %v3822_v32, %s5641_s18  ;;  %3306 = vrot.lane.b32.xlu0 %v3288_v61, %s5634_s11  ;;  %v3382_v41 = vmul.f32 %v8993_v15, %v3359_v59  ;;  %v3490_v32 = vpack.c.bf16 %v3481_v44, %v3480_v62  ;;  %v3259_v61 = vunpack.c.l.bf16 %v3247_v3  ;;  %v3553_v2 = vunpack.c.l.bf16 %v3545_v31 }
 0x69d   :  { %3308 = vrot.lane.b32.xlu2 %v3289_v46, %s5634_s11  ;;  %v3189_v46 = vpack.c.bf16 %v3179_v20, %v3179_v20  ;;  %v3715_v43 = vmul.f32 %v7663_v24, %v3692_v34  ;;  %v3482_v21 = vmul.f32 %v8990_v58, %v3459_v53  ;;  %v3554_v45 = vunpack.c.h.bf16 %v3545_v31  ;;  %v3448_v53 = vld [vmem:[#allocation4 + $0x30] sm:$0xff] }
 0x69e   :  { %2739 = vmatpush.bf16.msrb.mxu1 %v5077_v57  ;;  %2758 = vmatpush.bf16.msrb.mxu3 %v5081_v5  ;;  %v7856_v57 = vmul.f32 %v7845_v1, %v9006_v17  ;;  %v7860_v5 = vmul.f32 %v7848_v19, %v7686_v40  ;;  %v3282_v33 = vmul.f32 %v8999_v50, %v3259_v61  ;;  %v3461_v31 = vunpack.c.h.bf16 %v3448_v53 }
 0x69f   :  { %v3724_v52 = vpack.c.bf16 %v3715_v43, %v3714_v0  ;;  %v3566_v59 = vmul.f32 %v7784_v13, %v3553_v2  ;;  %v3614_v62 = vmul.f32 %v3691_v18, %v9006_v17  ;;  %v3615_v44 = vmul.f32 %v3692_v34, %v7686_v40  ;;  %v3449_v0 = vld [vmem:[#allocation4 + $0x38] sm:$0xf]  ;;  %v3147_v43 = vld [vmem:[#allocation4 + $0x28] sm:$0xf] }
 0x6a0   :  { %v3626_v38 = vpack.c.bf16 %v7860_v5, %v7856_v57  ;;  %v3814_v20 = vmul.f32 %v8995_v27, %v3691_v18  ;;  %v3815_v3 = vmul.f32 %v7657_v8, %v3692_v34  ;;  %v3915_v17 = vmul.f32 %v7731_v39, %v3692_v34 }
 0x6a1   :  { %5092 = vmatmul.msk.bf16.vlgmr.msrb.gmra.mxu3 %vm9019_vm7, %v5352_v14  ;;  %5090 = vmatmul.msk.bf16.vlgmr.msrb.gmra.mxu1 %vm9020_vm1, %v5352_v14  ;;  %v3391_v14 = vpack.c.bf16 %v3382_v41, %v3382_v41  ;;  %v3281_v41 = vmul.f32 %v7833_v54, %v7693_v25  ;;  %v3180_v40 = vmul.f32 %v7831_v36, %v9017_v26  ;;  %v3462_v34 = vunpack.c.l.bf16 %v3449_v0  ;;  %vm9040_vm7 = vmmov %vm9027_vm9 }
 0x6a2   :  { %v3380_v61 = vmul.f32 %v7831_v36, %v9003_v42  ;;  %vm9041_vm1 = vmmov %vm9040_vm7 }
 0x6a3   :  { %v3290_v13 = vpack.c.bf16 %v3281_v41, %v3280_v35 }
 0x6a4   :  { %3406 = vrot.lane.b32.xlu1 %v3388_v23, %s5640_s19  ;;  %3206 = vrot.lane.b32.xlu0 %v3188_v4, %s5642_s21  ;;  %v3291_v23 = vpack.c.bf16 %v3282_v33, %v3282_v33  ;;  %v3491_v4 = vpack.c.bf16 %v3482_v21, %v3482_v21 }
 0x6a5   :  { %3640 = vrot.lane.b32.xlu2 %v3622_v9, %s5635_s30  ;;  %v3567_v9 = vmul.f32 %v7786_v37, %v3554_v45  ;;  %v3914_v37 = vmul.f32 %v9014_v7, %v3691_v18  ;;  %v3460_v18 = vunpack.c.l.bf16 %v3448_v53  ;;  %v3159_v45 = vunpack.c.l.bf16 %v3147_v43 }
 0x6a6   :  { %v3284_v43 = vmul.f32 %v3461_v31, %v7693_v25 }
 0x6a7   :  { %v3571_v60 = vpack.c.bf16 %v3567_v9, %v3566_v59  ;;  %v3924_v33 = vpack.c.bf16 %v3915_v17, %v3914_v37  ;;  %v3483_v36 = vmul.f32 %v8991_v16, %v3460_v18  ;;  %v3349_v59 = vld [vmem:[#allocation4 + $0x38] sm:$0xf]  ;;  %v9023_v37 = vld [vmem:[#allocation35_spill] sm:$0xff]  ;;  %v3283_v0 = vmul.f32 %v3460_v18, %v9008_v10 }
 0x6a8   :  { %v3753_v17 = vrot.slane %v9023_v37, 4 }
 0x6a9   :  { %3575 = vst [vmem:[#allocation3 + $0x98] sm:$0xff] %v3571_v60 }
 0x6ac   :  { %3412 = vrot.lane.b32.xlu1 %v3391_v14, %s5640_s19  ;;  %3510 = vrot.lane.b32.xlu0 %v3490_v32, %s5638_s27  ;;  %v3824_v14 = vpack.c.bf16 %v3815_v3, %v3814_v20  ;;  %v3181_v32 = vmul.f32 %v7833_v54, %v7736_v11 }
 0x6ad   :  { %3208 = vrot.lane.b32.xlu2 %v3189_v46, %s5642_s21  ;;  %v3381_v46 = vmul.f32 %v7833_v54, %v7681_v63  ;;  %v3484_v54 = vmul.f32 %v7640_v29, %v3461_v31  ;;  %v3818_v29 = vmul.f32 %v7657_v8, %v7848_v19  ;;  %v3717_v8 = vmul.f32 %v7845_v1, %v8997_v56 }
 0x6ae   :  { %v3190_v21 = vpack.c.bf16 %v3181_v32, %v3180_v40  ;;  %v5651_v56 = vmov 14  }
 0x6af   :  { %v3390_v2 = vpack.c.bf16 %v3381_v46, %v3380_v61  ;;  %v3492_v9 = vpack.c.bf16 %v3484_v54, %v3483_v36  ;;  %5475 = vset.pattern.permute.xlu1 %v5651_v56  ;;  %5474 = vset.pattern.permute.xlu2 %v5651_v56  ;;  %v3890_v36 = vunpack.c.h.bf16 %v7712_v49 }
 0x6b0   :  { %5476 = vset.pattern.permute.xlu0 %v5651_v56 }
 0x6b1   :  { %5093 = vmatmul.msk.bf16.gmra.mxu3 %vm9021_vm2, %v5353_v51  ;;  %5091 = vmatmul.msk.bf16.gmra.mxu1 %vm9022_vm4, %v5353_v51  ;;  %v3624_v51 = vpack.c.bf16 %v3615_v44, %v3614_v62  ;;  %v3362_v44 = vunpack.c.l.bf16 %v3349_v59  ;;  %vm9042_vm2 = vcmask 138240   ;;  %vm9043_vm4 = vmmov %vm9038_vm0 }
 0x6b3   :  { %v3385_v3 = vmul.f32 %v8993_v15, %v3362_v44  ;;  %v3718_v15 = vmul.f32 %v7848_v19, %v7663_v24  ;;  %v3183_v24 = vmul.f32 %v3460_v18, %v9017_v26 }
 0x6b4   :  { %3744 = vrot.lane.b32.xlu1 %v3724_v52, %s5636_s12  ;;  %3312 = vrot.lane.b32.xlu0 %v3291_v23, %s5634_s11  ;;  %v3485_v52 = vmul.f32 %v8990_v58, %v3462_v34  ;;  %v3182_v23 = vmul.f32 %v9016_v12, %v3159_v45  ;;  %v3817_v58 = vmul.f32 %v8995_v27, %v7845_v1 }
 0x6b5   :  { %3512 = vrot.lane.b32.xlu2 %v3491_v4, %s5638_s27  ;;  %v3249_v4 = vld [vmem:[#allocation4 + $0x38] sm:$0xf]  ;;  %v3384_v27 = vmul.f32 %v3461_v31, %v7681_v63  ;;  %v3726_v53 = vpack.c.bf16 %v3718_v15, %v3717_v8  ;;  %v5652_v15 = vmov 15  }
 0x6b6   :  { %v3493_v35 = vpack.c.bf16 %v3485_v52, %v3485_v52  ;;  %v3262_v41 = vunpack.c.l.bf16 %v3249_v4  ;;  %v3191_v62 = vpack.c.bf16 %v3182_v23, %v3182_v23  ;;  %v9029_v52 = vpack.c.bf16 %v7755_v55, %v7751_v47 }
 0x6b7   :  { %v3913_v23 = vmul.f32 %v9013_v6, %v3890_v36  ;;  %v9048_v36 = vld [vmem:[#allocation72_spill] sm:$0xff] }
 0x6b8   :  { %v3285_v16 = vmul.f32 %v8999_v50, %v3262_v41  ;;  %v3383_v50 = vmul.f32 %v3460_v18, %v9003_v42  ;;  %v3184_v42 = vmul.f32 %v3461_v31, %v7736_v11  ;;  %v3917_v31 = vmul.f32 %v9014_v7, %v7845_v1  ;;  %v9030_v7 = vld [vmem:[#allocation73_spill] sm:$0xff] }
 0x6ba   :  { %v3293_v60 = vpack.c.bf16 %v3285_v16, %v3285_v16  ;;  %v3392_v61 = vpack.c.bf16 %v3384_v27, %v3383_v50  ;;  %v3192_v57 = vpack.c.bf16 %v3184_v42, %v3183_v24  ;;  %v5623_v16 = vld [vmem:[%s8714_s5 + $0x8] sm:$0xff] }
 0x6bc   :  { %3310 = vrot.lane.b32.xlu1 %v3290_v13, %s5634_s11  ;;  %3644 = vrot.lane.b32.xlu0 %v3624_v51, %s5635_s30  ;;  %v3826_v13 = vpack.c.bf16 %v3818_v29, %v3817_v58  ;;  %v3393_v51 = vpack.c.bf16 %v3385_v3, %v3385_v3  ;;  %v3653_v29 = vrot.slane %v7543_v48, 4  ;;  %v5624_v48 = vld [vmem:[%s8714_s5 + $0x10] sm:$0xff] }
 0x6bd   :  { %3844 = vrot.lane.b32.xlu2 %v3824_v14, %s5641_s18  ;;  %v7915_v20 = vpop.permute.xlu2 %3404 }
 0x6be   :  { %v3419_v3 = vrot.slane %v7915_v20, 4  ;;  %v5625_v20 = vld [vmem:[%s8714_s5] sm:$0xff] }
 0x6c4   :  { %3944 = vrot.lane.b32.xlu1 %v3924_v33, %s5639_s29  ;;  %3210 = vrot.lane.b32.xlu0 %v3190_v21, %s5642_s21  ;;  %v3149_v33 = vld [vmem:[#allocation4 + $0x38] sm:$0xf]  ;;  %v9026_v21 = vpack.c.bf16 %v7747_v30, %v7743_v28 }
 0x6c5   :  { %3410 = vrot.lane.b32.xlu2 %v3390_v2, %s5640_s19  ;;  %v3162_v5 = vunpack.c.l.bf16 %v3149_v33  ;;  %v3918_v2 = vmul.f32 %v7731_v39, %v7848_v19  ;;  %v3853_v39 = vrot.slane %v9030_v7, 4  ;;  %v5626_v33 = vld [vmem:[%s8714_s5 + $0x18] sm:$0xff] }
 0x6c7   :  { %v3185_v34 = vmul.f32 %v9016_v12, %v3162_v5  ;;  %v3926_v54 = vpack.c.bf16 %v3918_v2, %v3917_v31  ;;  %v3887_v12 = vunpack.c.h.bf16 %v7706_v22 }
 0x6c9   :  { %v3193_v30 = vpack.c.bf16 %v3185_v34, %v3185_v34 }
 0x6ca   :  { %v3737_v14 = vpop.permute.xlu2 %3736 }
 0x6cb   :  { %v3752_v40 = vrot.slane %v3737_v14, 4 }
 0x6cc   :  { %3514 = vrot.lane.b32.xlu1 %v3492_v9, %s5638_s27  ;;  %3516 = vrot.lane.b32.xlu0 %v3493_v35, %s5638_s27  ;;  %v3910_v9 = vmul.f32 %v9013_v6, %v3887_v12 }
 0x6cd   :  { %3212 = vrot.lane.b32.xlu2 %v3191_v62, %s5642_s21  ;;  %v3760_v32 = vsel %vm9024_vm15, %v3752_v40, %v3753_v17  ;;  %v3923_v62 = vpack.c.bf16 %v3913_v23, %v3913_v23  ;;  %vm9045_vm15 = vmmov %vm9041_vm1 }
 0x6ce   :  { %v3761_v46 = vsel %vm9025_vm6, %v3737_v14, %v3760_v32  ;;  %v3921_v44 = vpack.c.bf16 %v3910_v9, %v3910_v9  ;;  %vm9046_vm6 = vmmov %vm9041_vm1 }
 0x6cf   :  { %3772 = vst [vmem:[#allocation3 + $0xc0] sm:$0xff] %v3761_v46  ;;  %v9039_v46 = vld [vmem:[#allocation19_spill] sm:$0xff] }
 0x6d4   :  { %3316 = vrot.lane.b32.xlu1 %v3293_v60, %s5634_s11  ;;  %3848 = vrot.lane.b32.xlu0 %v3826_v13, %s5641_s18  ;;  %v3505_v26 = vpop.permute.xlu0 %3504  ;;  %v3503_v11 = vpop.permute.xlu1 %3502 }
 0x6d5   :  { %3416 = vrot.lane.b32.xlu2 %v3393_v51, %s5640_s19  ;;  %v3519_v10 = vrot.slane %v3505_v26, 4  ;;  %v3518_v25 = vrot.slane %v3503_v11, 4 }
 0x6d7   :  { %v3526_v45 = vsel %vm9027_vm9, %v3518_v25, %v3519_v10  ;;  %vm9047_vm9 = vcmask 924672  }
 0x6d8   :  { %v3527_v28 = vsel %vm9028_vm10, %v3503_v11, %v3526_v45 }
 0x6d9   :  { %v3303_v63 = vpop.permute.xlu2 %3302  ;;  %3538 = vst [vmem:[#allocation3 + $0x60] sm:$0xff] %v3527_v28 }
 0x6da   :  { %v3318_v49 = vrot.slane %v3303_v63, 4 }
 0x6dc   :  { %3648 = vrot.lane.b32.xlu1 %v3626_v38, %s5635_s30  ;;  %3414 = vrot.lane.b32.xlu0 %v3392_v61, %s5640_s19  ;;  %v3292_v38 = vpack.c.bf16 %v3284_v43, %v3283_v0  ;;  %v3837_v1 = vpop.permute.xlu0 %3836  ;;  %v3305_v19 = vpop.permute.xlu1 %3304  ;;  %v8001_v43 = vld [vmem:[%s8714_s5 + $0x8] sm:$0xff] }
 0x6dd   :  { %3748 = vrot.lane.b32.xlu2 %v3726_v53, %s5636_s12  ;;  %v3852_v4 = vrot.slane %v3837_v1, 4  ;;  %v3319_v22 = vrot.slane %v3305_v19, 4  ;;  %v3655_v53 = vrot.slane %v9039_v46, 4 }
 0x6df   :  { %v3860_v47 = vsel %vm9031_vm12, %v3852_v4, %v3853_v39  ;;  %v3326_v55 = vsel %vm9032_vm13, %v3318_v49, %v3319_v22  ;;  %vm9049_vm12 = vmmov %vm9041_vm1 }
 0x6e0   :  { %v3861_v35 = vsel %vm9033_vm3, %v3837_v1, %v3860_v47  ;;  %v3327_v41 = vsel %vm9034_vm5, %v3303_v63, %v3326_v55  ;;  %vm9050_vm13 = vmmov %vm9041_vm1 }
 0x6e1   :  { %3872 = vst [vmem:[#allocation3 + $0xe0] sm:$0xff] %v3861_v35  ;;  %vm9051_vm3 = vmmov %vm9034_vm5  ;;  %vm9052_vm5 = vcmask 916480  }
 0x6e2   :  { %3338 = vst [vmem:[#allocation3 + $0x20] sm:$0xff] %v3327_v41  ;;  %v9053_v41 = vld [vmem:[#allocation71_spill] sm:$0xff] }
 0x6e4   :  { %3214 = vrot.lane.b32.xlu1 %v3192_v57, %s5642_s21  ;;  %3936 = vrot.lane.b32.xlu0 %v9026_v21, %s5639_s29  ;;  %v3403_v6 = vpop.permute.xlu0 %3402  ;;  %v3637_v58 = vpop.permute.xlu1 %3636  ;;  %v5653_v57 = vmov 18   ;;  %v9044_v21 = vld [vmem:[#allocation10_spill] sm:$0xff] }
 0x6e5   :  { %3314 = vrot.lane.b32.xlu2 %v3292_v38, %s5634_s11  ;;  %v3418_v60 = vrot.slane %v3403_v6, 4  ;;  %v3652_v51 = vrot.slane %v3637_v58, 4  ;;  %v3755_v26 = vrot.slane %v9044_v21, 4 }
 0x6e7   :  { %v7947_v18 = vpop.permute.xlu2 %3202  ;;  %v3426_v50 = vsel %vm9035_vm14, %v3418_v60, %v3419_v3  ;;  %v3660_v27 = vsel %vm9036_vm11, %v3652_v51, %v3653_v29  ;;  %vm9054_vm14 = vmmov %vm9041_vm1 }
 0x6e8   :  { %v3427_v14 = vsel %vm9037_vm8, %v3403_v6, %v3426_v50  ;;  %v3661_v8 = vsel %vm9038_vm0, %v3637_v58, %v3660_v27  ;;  %v3218_v40 = vrot.slane %v7947_v18, 4  ;;  %vm9055_vm11 = vmmov %vm9041_vm1 }
 0x6e9   :  { %3438 = vst [vmem:[#allocation3 + $0x40] sm:$0xff] %v3427_v14  ;;  %vm9056_vm8 = vmmov %vm9041_vm1 }
 0x6ea   :  { %3672 = vst [vmem:[#allocation3 + $0xa0] sm:$0xff] %v3661_v8  ;;  %vm9057_vm0 = vmmov %vm9042_vm2 }
 0x6ec   :  { %3940 = vrot.lane.b32.xlu1 %v9029_v52, %s5639_s29  ;;  %3216 = vrot.lane.b32.xlu0 %v3193_v30, %s5642_s21 }
 0x6ed   :  { %3948 = vrot.lane.b32.xlu2 %v3926_v54, %s5639_s29  ;;  %v3855_v54 = vrot.slane %v9048_v36, 4 }
 0x6ef   :  { %v7965_v59 = vpop.permute.xlu2 %3506 }
 0x6f0   :  { %v3520_v11 = vrot.slane %v7965_v59, 4 }
 0x6f4   :  { %3942 = vrot.lane.b32.xlu0 %v3923_v62, %s5639_s29  ;;  %2939 = vperm.xlu1 %5475, %v5623_v16   ;;  %v3857_v62 = vrot.slane %v9053_v41, 4 }
 0x6f5   :  { %3938 = vrot.lane.b32.xlu2 %v3921_v44, %s5639_s29 }
 0x6f7   :  { %v3309_v13 = vpop.permute.xlu2 %3308 }
 0x6f8   :  { %v3321_v12 = vrot.slane %v3309_v13, 4  ;;  %v8030_v13 = vld [vmem:[%s8714_s5] sm:$0xff] }
 0x6fc   :  { %5478 = vset.pattern.permute.xlu1 %v5652_v15  ;;  %2943 = vperm.xlu0 %5476, %v5624_v48  }
 0x6fd   :  { %2935 = vperm.xlu2 %5474, %v5625_v20   ;;  %2963 = vperm.xlu1 %5478, %v5623_v16   ;;  %v3205_v17 = vpop.permute.xlu1 %3204 }
 0x6fe   :  { %v7989_v37 = vpop.permute.xlu0 %3408  ;;  %v3219_v61 = vrot.slane %v3205_v17, 4 }
 0x6ff   :  { %v3641_v32 = vpop.permute.xlu2 %3640  ;;  %v3421_v22 = vrot.slane %v7989_v37, 4 }
 0x700   :  { %v3654_v56 = vrot.slane %v3641_v32, 4  ;;  %v3226_v24 = vsel %vm9040_vm7, %v3218_v40, %v3219_v61  ;;  %vm9058_vm7 = vcmask 121856  }
 0x701   :  { %v3227_v63 = vsel %vm9042_vm2, %v7947_v18, %v3226_v24  ;;  %vm9060_vm2 = vmmov %vm9046_vm6  ;;  %v9064_v24 = vld [vmem:[#allocation12_spill] sm:$0xff] }
 0x702   :  { %v3662_v42 = vsel %vm9041_vm1, %v3654_v56, %v3655_v53  ;;  %3238 = vst [vmem:[#allocation3] sm:$0xff] %v3227_v63  ;;  %vm9059_vm1 = vmmov %vm9052_vm5 }
 0x703   :  { %v3663_v0 = vsel %vm9043_vm4, %v3641_v32, %v3662_v42  ;;  %vm9061_vm4 = vmmov %vm9028_vm10  ;;  %v3757_v42 = vrot.slane %v9064_v24, 4 }
 0x704   :  { %3673 = vst [vmem:[#allocation3 + $0xa8] sm:$0xff] %v3663_v0  ;;  %5479 = vset.pattern.permute.xlu0 %v5652_v15 }
 0x705   :  { %2947 = vperm.xlu2 %5474, %v5626_v33   ;;  %5481 = vset.pattern.permute.xlu1 %v5653_v57  ;;  %v3509_v38 = vpop.permute.xlu1 %3508 }
 0x706   :  { %v3741_v5 = vpop.permute.xlu0 %3740  ;;  %4461 = vperm.xlu1 %5481, %v8001_v43   ;;  %2967 = vperm.xlu0 %5479, %v5624_v48   ;;  %v3521_v18 = vrot.slane %v3509_v38, 4 }
 0x707   :  { %v3754_v34 = vrot.slane %v3741_v5, 4  ;;  %v3209_v10 = vpop.permute.xlu2 %3208 }
 0x708   :  { %v3528_v31 = vsel %vm9046_vm6, %v3520_v11, %v3521_v18  ;;  %v3221_v9 = vrot.slane %v3209_v10, 4  ;;  %vm9063_vm6 = vmmov %vm9058_vm7 }
 0x709   :  { %v3762_v25 = vsel %vm9045_vm15, %v3754_v34, %v3755_v26  ;;  %v3529_v45 = vsel %vm9028_vm10, %v7965_v59, %v3528_v31  ;;  %vm9062_vm15 = vmmov %vm9060_vm2  ;;  %vm9066_vm10 = vcmask 924672   ;;  %v9067_v34 = vld [vmem:[#allocation18_spill] sm:$0xff] }
 0x70a   :  { %v3763_v2 = vsel %vm9047_vm9, %v3741_v5, %v3762_v25  ;;  %3539 = vst [vmem:[#allocation3 + $0x68] sm:$0xff] %v3529_v45  ;;  %vm9065_vm9 = vmmov %vm9060_vm2  ;;  %v3657_v10 = vrot.slane %v9067_v34, 4 }
 0x70b   :  { %3773 = vst [vmem:[#allocation3 + $0xc8] sm:$0xff] %v3763_v2 }
 0x70d   :  { %5477 = vset.pattern.permute.xlu2 %v5652_v15 }
 0x70e   :  { %2959 = vperm.xlu2 %5477, %v5625_v20   ;;  %v3307_v28 = vpop.permute.xlu0 %3306  ;;  %v3841_v30 = vpop.permute.xlu1 %3840  ;;  %5482 = vset.pattern.permute.xlu0 %v5653_v57 }
 0x70f   :  { %v3320_v52 = vrot.slane %v3307_v28, 4  ;;  %v3513_v7 = vpop.permute.xlu2 %3512  ;;  %v3854_v39 = vrot.slane %v3841_v30, 4 }
 0x710   :  { %v3523_v14 = vrot.slane %v3513_v7, 4 }
 0x711   :  { %v3328_v1 = vsel %vm9049_vm12, %v3320_v52, %v3321_v12  ;;  %v3862_v19 = vsel %vm9050_vm13, %v3854_v39, %v3855_v54  ;;  %vm9068_vm12 = vmmov %vm9060_vm2  ;;  %v9072_v39 = vld [vmem:[#allocation11_spill] sm:$0xff] }
 0x712   :  { %v3329_v23 = vsel %vm9051_vm3, %v3307_v28, %v3328_v1  ;;  %v3863_v49 = vsel %vm9052_vm5, %v3841_v30, %v3862_v19  ;;  %vm9069_vm13 = vmmov %vm9060_vm2  ;;  %vm9070_vm3 = vcmask 1039360   ;;  %vm9071_vm5 = vcmask 130048  }
 0x713   :  { %3339 = vst [vmem:[#allocation3 + $0x28] sm:$0xff] %v3329_v23  ;;  %v3957_v1 = vrot.slane %v9072_v39, 4 }
 0x714   :  { %3873 = vst [vmem:[#allocation3 + $0xe8] sm:$0xff] %v3863_v49 }
 0x716   :  { %2971 = vperm.xlu2 %5477, %v5626_v33   ;;  %v3207_v4 = vpop.permute.xlu0 %3206  ;;  %v3407_v59 = vpop.permute.xlu1 %3406 }
 0x717   :  { %v3845_v47 = vpop.permute.xlu2 %3844  ;;  %v3220_v55 = vrot.slane %v3207_v4, 4  ;;  %v3420_v35 = vrot.slane %v3407_v59, 4 }
 0x718   :  { %v3856_v44 = vrot.slane %v3845_v47, 4 }
 0x719   :  { %v3228_v16 = vsel %vm9054_vm14, %v3220_v55, %v3221_v9  ;;  %v3428_v6 = vsel %vm9055_vm11, %v3420_v35, %v3421_v22  ;;  %vm9074_vm14 = vmmov %vm9060_vm2 }
 0x71a   :  { %v3864_v58 = vsel %vm9056_vm8, %v3856_v44, %v3857_v62  ;;  %v3229_v29 = vsel %vm9057_vm0, %v3207_v4, %v3228_v16  ;;  %v3429_v3 = vsel %vm9058_vm7, %v3407_v59, %v3428_v6  ;;  %v9073_v59 = vld [vmem:[#allocation74_spill] sm:$0xff]  ;;  %vm9075_vm11 = vmmov %vm9060_vm2  ;;  %vm9077_vm7 = vcmask 908288  }
 0x71b   :  { %v3865_v60 = vsel %vm9059_vm1, %v3845_v47, %v3864_v58  ;;  %3239 = vst [vmem:[#allocation3 + $0x8] sm:$0xff] %v3229_v29  ;;  %v3759_v22 = vrot.slane %v9073_v59, 4  ;;  %vm9076_vm8 = vmmov %vm9060_vm2 }
 0x71c   :  { %3874 = vst [vmem:[#allocation3 + $0xf0] sm:$0xff] %v3865_v60  ;;  %vm9078_vm1 = vmmov %vm9066_vm10 }
 0x71d   :  { %3439 = vst [vmem:[#allocation3 + $0x48] sm:$0xff] %v3429_v3 }
 0x71e   :  { %v8032_v51 = vpop.f32.mrf.mxu1  ;;  %5480 = vset.pattern.permute.xlu2 %v5653_v57  ;;  %v3511_v50 = vpop.permute.xlu0 %3510 }
 0x71f   :  { %v3413_v27 = vpop.permute.xlu1 %3412  ;;  %4456 = vperm.xlu2 %5480, %v8030_v13   ;;  %v3411_v8 = vpop.permute.xlu2 %3410  ;;  %v3522_v15 = vrot.slane %v3511_v50, 4 }
 0x720   :  { %v3423_v48 = vrot.slane %v3413_v27, 4  ;;  %v3422_v20 = vrot.slane %v3411_v8, 4 }
 0x721   :  { %v3530_v17 = vsel %vm9060_vm2, %v3522_v15, %v3523_v14 }
 0x722   :  { %v3531_v40 = vsel %vm9061_vm4, %v3511_v50, %v3530_v17  ;;  %v3430_v32 = vsel %vm9062_vm15, %v3422_v20, %v3423_v48  ;;  %v9079_v20 = vld [vmem:[#allocation70_spill] sm:$0xff]  ;;  %vm9081_vm15 = vmmov %vm9060_vm2 }
 0x723   :  { %3540 = vst [vmem:[#allocation3 + $0x70] sm:$0xff] %v3531_v40  ;;  %v3431_v61 = vsel %vm9063_vm6, %v3411_v8, %v3430_v32  ;;  %v3859_v17 = vrot.slane %v9079_v20, 4  ;;  %vm9082_vm6 = vmmov %vm9060_vm2 }
 0x724   :  { %v8035_v37 = vpop.f32.mrf.mxu3  ;;  %3440 = vst [vmem:[#allocation3 + $0x50] sm:$0xff] %v3431_v61 }
 0x725   :  { %v2834_v8 = vadd.f32 %v8035_v37, %v8032_v51 }
 0x726   :  { %v8041_v46 = vpop.f32.mrf.mxu1  ;;  %v3313_v53 = vpop.permute.xlu0 %3312 }
 0x727   :  { %v3745_v56 = vpop.permute.xlu1 %3744  ;;  %v3213_v63 = vpop.permute.xlu2 %3212  ;;  %v3323_v18 = vrot.slane %v3313_v53, 4 }
 0x728   :  { %v3756_v0 = vrot.slane %v3745_v56, 4  ;;  %v3223_v19 = vrot.slane %v3213_v63, 4 }
 0x72a   :  { %v3764_v57 = vsel %vm9065_vm9, %v3756_v0, %v3757_v42  ;;  %vm9083_vm9 = vmmov %vm9060_vm2  ;;  %v5374_v34 = vld [vmem:[#allocation3 + $0x74] sm:$0xf] }
 0x72b   :  { %v3765_v5 = vsel %vm9066_vm10, %v3745_v56, %v3764_v57  ;;  %v9080_v56 = vld [vmem:[#allocation5_spill] sm:$0xff]  ;;  %v5184_v57 = vld [vmem:[#allocation3 + $0x70] sm:$0xf]  ;;  %vm9084_vm10 = vcmask 916480  }
 0x72c   :  { %v8044_v33 = vpop.f32.mrf.mxu3  ;;  %3774 = vst [vmem:[#allocation3 + $0xd0] sm:$0xff] %v3765_v5  ;;  %v3959_v24 = vrot.slane %v9080_v56, 4  ;;  %v5168_v20 = vld [vmem:[#allocation3 + $0x50] sm:$0xf] }
 0x72d   :  { %v2837_v38 = vadd.f32 %v8044_v33, %v8041_v46 }
 0x72e   :  { %v8050_v21 = vpop.f32.mrf.mxu1  ;;  %v3645_v26 = vpop.permute.xlu0 %3644 }
 0x72f   :  { %v3311_v11 = vpop.permute.xlu1 %3310  ;;  %v8053_v25 = vpop.permute.xlu2 %3416  ;;  %v3656_v31 = vrot.slane %v3645_v26, 4 }
 0x730   :  { %v3322_v2 = vrot.slane %v3311_v11, 4  ;;  %2838 = vadd.xlane.f32.xlu1 %v2837_v38 }
 0x731   :  { %v3664_v28 = vsel %vm9068_vm12, %v3656_v31, %v3657_v10  ;;  %vm9085_vm12 = vmmov %vm9071_vm5 }
 0x732   :  { %v3330_v30 = vsel %vm9069_vm13, %v3322_v2, %v3323_v18  ;;  %v3665_v36 = vsel %vm9070_vm3, %v3645_v26, %v3664_v28  ;;  %vm9086_vm13 = vmmov %vm9077_vm7  ;;  %v5373_v28 = vld [vmem:[#allocation3 + $0x64] sm:$0xf0] }
 0x733   :  { %v3331_v54 = vsel %vm9071_vm5, %v3311_v11, %v3330_v30  ;;  %3674 = vst [vmem:[#allocation3 + $0xb0] sm:$0xff] %v3665_v36  ;;  %v5178_v36 = vld [vmem:[#allocation3 + $0x68] sm:$0xf0]  ;;  %vm9088_vm3 = vmmov %vm9060_vm2 }
 0x734   :  { %v8055_v45 = vpop.f32.mrf.mxu3  ;;  %3340 = vst [vmem:[#allocation3 + $0x30] sm:$0xff] %v3331_v54  ;;  %v5176_v54 = vld [vmem:[#allocation3 + $0x60] sm:$0xf]  ;;  %vm9089_vm5 = vmmov %vm9060_vm2 }
 0x735   :  { %v2840_v30 = vadd.f32 %v8055_v45, %v8050_v21 }
 0x736   :  { %v8061_v12 = vpop.f32.mrf.mxu1  ;;  %v3211_v52 = vpop.permute.xlu0 %3210 }
 0x737   :  { %v3945_v7 = vpop.permute.xlu1 %3944  ;;  %v3749_v23 = vpop.permute.xlu2 %3748  ;;  %v3222_v49 = vrot.slane %v3211_v52, 4 }
 0x738   :  { %v3956_v4 = vrot.slane %v3945_v7, 4  ;;  %v3758_v9 = vrot.slane %v3749_v23, 4 }
 0x739   :  { %v3230_v55 = vsel %vm9074_vm14, %v3222_v49, %v3223_v19  ;;  %v5177_v19 = vor.u32 %v5373_v28, %v5176_v54  ;;  %v3425_v49 = vrot.slane %v8053_v25, 4  ;;  %vm9090_vm14 = vcmask 121856  }
 0x73a   :  { %v3964_v35 = vsel %vm9075_vm11, %v3956_v4, %v3957_v1  ;;  %v3766_v62 = vsel %vm9076_vm8, %v3758_v9, %v3759_v22  ;;  %v3231_v44 = vsel %vm9057_vm0, %v3211_v52, %v3230_v55  ;;  %v9087_v52 = vld [vmem:[#allocation36_spill] sm:$0xff]  ;;  %vm9091_vm11 = vcmask 1039360   ;;  %vm9092_vm8 = vmmov %vm9060_vm2 }
 0x73b   :  { %v3965_v16 = vsel %vm9077_vm7, %v3945_v7, %v3964_v35  ;;  %v3767_v6 = vsel %vm9078_vm1, %v3749_v23, %v3766_v62  ;;  %3240 = vst [vmem:[#allocation3 + $0x10] sm:$0xff] %v3231_v44  ;;  %v3659_v7 = vrot.slane %v9087_v52, 4  ;;  %v5372_v23 = vld [vmem:[#allocation3 + $0x64] sm:$0xf]  ;;  %v5248_v62 = vld [vmem:[#allocation3 + $0xf0] sm:$0xf]  ;;  %vm9093_vm0 = vmmov %vm9077_vm7 }
 0x73c   :  { %v8065_v47 = vpop.f32.mrf.mxu3  ;;  %3775 = vst [vmem:[#allocation3 + $0xd8] sm:$0xff] %v3767_v6  ;;  %v5181_v22 = vor.u32 %v5372_v23, %v5178_v36  ;;  %vm9094_vm7 = vmmov %vm9060_vm2  ;;  %vm9095_vm1 = vcmask 138240  }
 0x73d   :  { %v2843_v41 = vadd.f32 %v8065_v47, %v8061_v12  ;;  %3974 = vst [vmem:[#allocation3 + $0x110] sm:$0xff] %v3965_v16 }
 0x73e   :  { %v3517_v58 = vpop.permute.xlu0 %3516 }
 0x73f   :  { %2844 = vadd.xlane.f32.xlu1 %v2843_v41  ;;  %v3515_v29 = vpop.permute.xlu1 %3514  ;;  %v3315_v3 = vpop.permute.xlu2 %3314  ;;  %v3525_v60 = vrot.slane %v3517_v58, 4 }
 0x740   :  { %v3524_v50 = vrot.slane %v3515_v29, 4  ;;  %v3324_v40 = vrot.slane %v3315_v3, 4 }
 0x742   :  { %v3532_v27 = vsel %vm9060_vm2, %v3524_v50, %v3525_v60  ;;  %v5240_v50 = vld [vmem:[#allocation3 + $0xe0] sm:$0xf] }
 0x743   :  { %v3533_v14 = vsel %vm9061_vm4, %v3515_v29, %v3532_v27  ;;  %vm9096_vm4 = vmmov %vm9093_vm0 }
 0x744   :  { %3541 = vst [vmem:[#allocation3 + $0x78] sm:$0xff] %v3533_v14  ;;  %v5264_v6 = vld [vmem:[#allocation3 + $0x110] sm:$0xf] }
 0x746   :  { %v3849_v15 = vpop.permute.xlu0 %3848 }
 0x747   :  { %v3317_v48 = vpop.permute.xlu1 %3316  ;;  %v3949_v32 = vpop.permute.xlu2 %3948  ;;  %v3858_v61 = vrot.slane %v3849_v15, 4 }
 0x748   :  { %v3325_v53 = vrot.slane %v3317_v48, 4  ;;  %v3958_v42 = vrot.slane %v3949_v32, 4  ;;  %2835 = vadd.xlane.f32.xlu2 %v2834_v8 }
 0x749   :  { %v3866_v63 = vsel %vm9081_vm15, %v3858_v61, %v3859_v17  ;;  %v5370_v17 = vld [vmem:[#allocation3 + $0x54] sm:$0xf]  ;;  %vm9097_vm15 = vcmask 261120  }
 0x74a   :  { %v3332_v0 = vsel %vm9082_vm6, %v3324_v40, %v3325_v53  ;;  %v3966_v5 = vsel %vm9083_vm9, %v3958_v42, %v3959_v24  ;;  %v3867_v38 = vsel %vm9084_vm10, %v3849_v15, %v3866_v63  ;;  %v5387_v15 = vld [vmem:[#allocation3 + $0xd4] sm:$0xf0]  ;;  %v5232_v53 = vld [vmem:[#allocation3 + $0xd0] sm:$0xf]  ;;  %vm9098_vm6 = vmmov %vm9097_vm15 }
 0x74b   :  { %v3333_v26 = vsel %vm9085_vm12, %v3315_v3, %v3332_v0  ;;  %v5375_v11 = vld [vmem:[#allocation3 + $0x74] sm:$0xf0]  ;;  %v5186_v10 = vld [vmem:[#allocation3 + $0x78] sm:$0xf0]  ;;  %v3967_v18 = vsel %vm9086_vm13, %v3949_v32, %v3966_v5  ;;  %3875 = vst [vmem:[#allocation3 + $0xf8] sm:$0xff] %v3867_v38  ;;  %v5233_v42 = vor.u32 %v5387_v15, %v5232_v53  ;;  %vm9099_vm9 = vmmov %vm9098_vm6 }
 0x74c   :  { %v5185_v31 = vor.u32 %v5375_v11, %v5184_v57  ;;  %v5189_v2 = vor.u32 %v5374_v34, %v5186_v10  ;;  %3975 = vst [vmem:[#allocation3 + $0x118] sm:$0xff] %v3967_v18  ;;  %v5389_v3 = vld [vmem:[#allocation3 + $0xe4] sm:$0xf0]  ;;  %v5162_v5 = vld [vmem:[#allocation3 + $0x48] sm:$0xf0]  ;;  %vm9100_vm10 = vmmov %vm9098_vm6 }
 0x74d   :  { %3341 = vst [vmem:[#allocation3 + $0x38] sm:$0xff] %v3333_v26  ;;  %v5241_v8 = vor.u32 %v5389_v3, %v5240_v50  ;;  %v5369_v0 = vld [vmem:[#allocation3 + $0x44] sm:$0xf0]  ;;  %v5160_v26 = vld [vmem:[#allocation3 + $0x40] sm:$0xf] }
 0x74e   :  { %4236 = vmatpush.bf16.msrb.mxu0 %v5185_v31  ;;  %4293 = vmatpush.bf16.msra.mxu3 %v5189_v2  ;;  %v3415_v39 = vpop.permute.xlu0 %3414  ;;  %v5385_v57 = vld [vmem:[#allocation3 + $0xc4] sm:$0xf0]  ;;  %v5224_v11 = vld [vmem:[#allocation3 + $0xc0] sm:$0xf]  ;;  %v5161_v18 = vor.u32 %v5369_v0, %v5160_v26  ;;  %v5368_v2 = vld [vmem:[#allocation3 + $0x44] sm:$0xf] }
 0x74f   :  { %v3649_v1 = vpop.permute.xlu1 %3648  ;;  %v3424_v4 = vrot.slane %v3415_v39, 4  ;;  %v3939_v58 = vpop.permute.xlu2 %3938  ;;  %v5225_v31 = vor.u32 %v5385_v57, %v5224_v11  ;;  %v5165_v28 = vor.u32 %v5368_v2, %v5162_v5  ;;  %v5379_v3 = vld [vmem:[#allocation3 + $0x94] sm:$0xf0]  ;;  %v5136_v50 = vld [vmem:[#allocation3 + $0x10] sm:$0xf] }
 0x750   :  { %v3658_v59 = vrot.slane %v3649_v1, 4  ;;  %2841 = vadd.xlane.f32.xlu2 %v2840_v30  ;;  %v3953_v27 = vrot.slane %v3939_v58, 4  ;;  %v5364_v58 = vld [vmem:[#allocation3 + $0x24] sm:$0xf]  ;;  %v5362_v15 = vld [vmem:[#allocation3 + $0x14] sm:$0xf] }
 0x751   :  { %v3432_v9 = vsel %vm9088_vm3, %v3424_v4, %v3425_v49  ;;  %v5366_v49 = vld [vmem:[#allocation3 + $0x34] sm:$0xf]  ;;  %v5377_v53 = vld [vmem:[#allocation3 + $0x84] sm:$0xf0]  ;;  %v5354_v0 = vld [vmem:[%s8719_s2 + $0x4] sm:$0xf] }
 0x752   :  { %v3666_v55 = vsel %vm9089_vm5, %v3658_v59, %v3659_v7  ;;  %4237 = vmatpush.bf16.msrb.mxu0 %v5177_v19  ;;  %4294 = vmatpush.bf16.msra.mxu3 %v5181_v22  ;;  %v3433_v35 = vsel %vm9090_vm14, %v3415_v39, %v3432_v9  ;;  %v5391_v44 = vld [vmem:[#allocation3 + $0xf4] sm:$0xf0]  ;;  %v5152_v39 = vld [vmem:[#allocation3 + $0x30] sm:$0xf]  ;;  %v5365_v22 = vld [vmem:[#allocation3 + $0x24] sm:$0xf0] }
 0x753   :  { %v3667_v41 = vsel %vm9091_vm11, %v3649_v1, %v3666_v55  ;;  %3441 = vst [vmem:[#allocation3 + $0x58] sm:$0xff] %v3433_v35  ;;  %v5249_v16 = vor.u32 %v5391_v44, %v5248_v62  ;;  %v5395_v25 = vld [vmem:[#allocation3 + $0x114] sm:$0xf0]  ;;  %v5216_v1 = vld [vmem:[#allocation3 + $0xb0] sm:$0xf] }
 0x754   :  { %3675 = vst [vmem:[#allocation3 + $0xb8] sm:$0xff] %v3667_v41  ;;  %v5265_v29 = vor.u32 %v5395_v25, %v5264_v6  ;;  %v5367_v30 = vld [vmem:[#allocation3 + $0x34] sm:$0xf0]  ;;  %v5154_v52 = vld [vmem:[#allocation3 + $0x38] sm:$0xf0] }
 0x755   :  { %4255 = vmatpush.bf16.msrb.mxu2 %v5249_v16  ;;  %v5153_v19 = vor.u32 %v5367_v30, %v5152_v39  ;;  %v5157_v59 = vor.u32 %v5366_v49, %v5154_v52  ;;  %v5381_v9 = vld [vmem:[#allocation3 + $0xa4] sm:$0xf0]  ;;  %v5146_v55 = vld [vmem:[#allocation3 + $0x28] sm:$0xf0]  ;;  %v5144_v41 = vld [vmem:[#allocation3 + $0x20] sm:$0xf] }
 0x756   :  { %4280 = vmatpush.bf16.msra.mxu1 %v5265_v29  ;;  %v3937_v60 = vpop.permute.xlu0 %3936  ;;  %v5208_v62 = vld [vmem:[#allocation3 + $0xa0] sm:$0xf]  ;;  %v5145_v6 = vor.u32 %v5365_v22, %v5144_v41  ;;  %v5149_v29 = vor.u32 %v5364_v58, %v5146_v55  ;;  %v5106_v57 = vld [vmem:[%s8719_s2 + $0xc] sm:$0xf0]  ;;  %v5394_v2 = vld [vmem:[#allocation3 + $0x114] sm:$0xf] }
 0x757   :  { %v3952_v14 = vrot.slane %v3937_v60, 4  ;;  %v3215_v32 = vpop.permute.xlu1 %3214  ;;  %v5209_v25 = vor.u32 %v5381_v9, %v5208_v62  ;;  %v5128_v5 = vld [vmem:[#allocation3] sm:$0xf]  ;;  %v8113_v30 = vor.u32 %v5354_v0, %v5106_v57  ;;  %v5356_v39 = vld [vmem:[%s8719_s2 + $0x10] sm:$0xf0] }
 0x758   :  { %v3224_v34 = vrot.slane %v3215_v32, 4  ;;  %v5234_v55 = vld [vmem:[#allocation3 + $0xd8] sm:$0xf0]  ;;  %v5226_v62 = vld [vmem:[#allocation3 + $0xc8] sm:$0xf0] }
 0x759   :  { %v3960_v48 = vsel %vm9092_vm8, %v3952_v14, %v3953_v27  ;;  %4256 = vmatpush.bf16.msrb.mxu2 %v5241_v8  ;;  %v5200_v27 = vld [vmem:[#allocation3 + $0x90] sm:$0xf]  ;;  %v5358_v58 = vld [vmem:[%s8719_s2 + $0x20] sm:$0xf0] }
 0x75a   :  { %v3961_v40 = vsel %vm9093_vm0, %v3937_v60, %v3960_v48  ;;  %v5371_v61 = vld [vmem:[#allocation3 + $0x54] sm:$0xf0]  ;;  %v5170_v56 = vld [vmem:[#allocation3 + $0x58] sm:$0xf0] }
 0x75b   :  { %3972 = vst [vmem:[#allocation3 + $0x100] sm:$0xff] %v3961_v40  ;;  %v5169_v24 = vor.u32 %v5371_v61, %v5168_v20  ;;  %v5173_v63 = vor.u32 %v5370_v17, %v5170_v56  ;;  %v5383_v36 = vld [vmem:[#allocation3 + $0xb4] sm:$0xf0]  ;;  %v5192_v20 = vld [vmem:[#allocation3 + $0x80] sm:$0xf]  ;;  %v5201_v40 = vor.u32 %v5379_v3, %v5200_v27 }
 0x75c   :  { %v5217_v23 = vor.u32 %v5383_v36, %v5216_v1  ;;  %v5361_v61 = vld [vmem:[#allocation3 + $0x4] sm:$0xf0]  ;;  %v5130_v56 = vld [vmem:[#allocation3 + $0x8] sm:$0xf0]  ;;  %v5193_v11 = vor.u32 %v5377_v53, %v5192_v20  ;;  %v5380_v20 = vld [vmem:[#allocation3 + $0xa4] sm:$0xf] }
 0x75d   :  { %4238 = vmatpush.bf16.msrb.mxu0 %v5169_v24  ;;  %4257 = vmatpush.bf16.msrb.mxu2 %v5233_v42  ;;  %v5250_v24 = vld [vmem:[#allocation3 + $0xf8] sm:$0xf0]  ;;  %v5104_v42 = vld [vmem:[%s8719_s2] sm:$0xf]  ;;  %v5129_v26 = vor.u32 %v5361_v61, %v5128_v5  ;;  %v5242_v36 = vld [vmem:[#allocation3 + $0xe8] sm:$0xf0] }
 0x75e   :  { %4295 = vmatpush.bf16.msra.mxu3 %v5173_v63  ;;  %v3217_v38 = vpop.permute.xlu0 %3216  ;;  %v5355_v63 = vld [vmem:[%s8719_s2 + $0x8] sm:$0xf0]  ;;  %v5118_v3 = vld [vmem:[%s8719_s2 + $0x24] sm:$0xf0]  ;;  %v5378_v53 = vld [vmem:[#allocation3 + $0x94] sm:$0xf] }
 0x75f   :  { %v3225_v10 = vrot.slane %v3217_v38, 4  ;;  %v3941_v4 = vpop.permute.xlu1 %3940  ;;  %v5266_v38 = vld [vmem:[#allocation3 + $0x118] sm:$0xf0] }
 0x760   :  { %v3954_v44 = vrot.slane %v3941_v4, 4 }
 0x761   :  { %v3232_v54 = vsel %vm9094_vm7, %v3224_v34, %v3225_v10  ;;  %4239 = vmatpush.bf16.msrb.mxu0 %v5161_v18  ;;  %4258 = vmatpush.bf16.msrb.mxu2 %v5225_v31  ;;  %v5360_v34 = vld [vmem:[#allocation3 + $0x4] sm:$0xf]  ;;  %v5390_v10 = vld [vmem:[#allocation3 + $0xf4] sm:$0xf] }
 0x762   :  { %v3233_v7 = vsel %vm9095_vm1, %v3215_v32, %v3232_v54  ;;  %4296 = vmatpush.bf16.msra.mxu3 %v5165_v28  ;;  %v5133_v18 = vor.u32 %v5360_v34, %v5130_v56  ;;  %v5253_v31 = vor.u32 %v5390_v10, %v5250_v24  ;;  %v5105_v28 = vor.u32 %v5355_v63, %v5104_v42  ;;  %v5256_v52 = vld [vmem:[#allocation3 + $0x100] sm:$0xf]  ;;  %v5376_v24 = vld [vmem:[#allocation3 + $0x84] sm:$0xf]  ;;  %v5194_v42 = vld [vmem:[#allocation3 + $0x88] sm:$0xf0]  ;;  %v8144_v63 = vpop.permute.xlu2 %2935 }
 0x763   :  { %3241 = vst [vmem:[#allocation3 + $0x18] sm:$0xff] %v3233_v7  ;;  %v5269_v54 = vor.u32 %v5394_v2, %v5266_v38  ;;  %v5112_v7 = vld [vmem:[%s8719_s2 + $0x8] sm:$0xf]  ;;  %v5197_v0 = vor.u32 %v5376_v24, %v5194_v42 }
 0x764   :  { %v5113_v9 = vor.u32 %v5356_v39, %v5112_v7 }
 0x765   :  { %4240 = vmatpush.bf16.msrb.mxu0 %v5153_v19  ;;  %4259 = vmatpush.bf16.msrb.mxu2 %v5217_v23  ;;  %v5392_v19 = vld [vmem:[#allocation3 + $0x104] sm:$0xf] }
 0x766   :  { %4297 = vmatpush.bf16.msra.mxu3 %v5157_v59  ;;  %v3943_v35 = vpop.permute.xlu0 %3942 }
 0x767   :  { %v3955_v16 = vrot.slane %v3943_v35, 4  ;;  %v5386_v35 = vld [vmem:[#allocation3 + $0xd4] sm:$0xf]  ;;  %v8141_v61 = vpop.permute.xlu1 %2939 }
 0x768   :  { %v5237_v41 = vor.u32 %v5386_v35, %v5234_v55 }
 0x769   :  { %v3962_v60 = vsel %vm9060_vm2, %v3954_v44, %v3955_v16  ;;  %4241 = vmatpush.bf16.msrb.mxu0 %v5145_v6  ;;  %4260 = vmatpush.bf16.msrb.mxu2 %v5209_v25  ;;  %v5384_v44 = vld [vmem:[#allocation3 + $0xc4] sm:$0xf]  ;;  %v5218_v6 = vld [vmem:[#allocation3 + $0xb8] sm:$0xf0]  ;;  %v5116_v25 = vld [vmem:[%s8719_s2 + $0x18] sm:$0xf] }
 0x76a   :  { %v3963_v14 = vsel %vm9096_vm4, %v3941_v4, %v3962_v60  ;;  %4298 = vmatpush.bf16.msra.mxu3 %v5149_v29  ;;  %v5363_v8 = vld [vmem:[#allocation3 + $0x14] sm:$0xf0]  ;;  %v5138_v48 = vld [vmem:[#allocation3 + $0x18] sm:$0xf0]  ;;  %v5388_v4 = vld [vmem:[#allocation3 + $0xe4] sm:$0xf]  ;;  %v5229_v16 = vor.u32 %v5384_v44, %v5226_v62  ;;  %v5117_v27 = vor.u32 %v5358_v58, %v5116_v25  ;;  %v8148_v5 = vpop.permute.xlu2 %2947 }
 0x76b   :  { %3973 = vst [vmem:[#allocation3 + $0x108] sm:$0xff] %v3963_v14  ;;  %v5137_v17 = vor.u32 %v5363_v8, %v5136_v50  ;;  %v5141_v32 = vor.u32 %v5362_v15, %v5138_v48  ;;  %v5245_v22 = vor.u32 %v5388_v4, %v5242_v36  ;;  %v5357_v29 = vld [vmem:[%s8719_s2 + $0x1c] sm:$0xf]  ;;  %v5382_v60 = vld [vmem:[#allocation3 + $0xb4] sm:$0xf] }
 0x76c   :  { %v5221_v50 = vor.u32 %v5382_v60, %v5218_v6  ;;  %v5121_v14 = vor.u32 %v5357_v29, %v5118_v3  ;;  %v5210_v8 = vld [vmem:[#allocation3 + $0xa8] sm:$0xf0]  ;;  %v5124_v15 = vld [vmem:[%s8719_s2 + $0x20] sm:$0xf] }
 0x76d   :  { %4242 = vmatpush.bf16.msrb.mxu0 %v5137_v17  ;;  %4261 = vmatpush.bf16.msrb.mxu2 %v5201_v40  ;;  %v5359_v48 = vld [vmem:[%s8719_s2 + $0x28] sm:$0xf0]  ;;  %v5213_v17 = vor.u32 %v5380_v20, %v5210_v8 }
 0x76e   :  { %4299 = vmatpush.bf16.msra.mxu3 %v5141_v32  ;;  %v5125_v40 = vor.u32 %v5359_v48, %v5124_v15  ;;  %v5202_v32 = vld [vmem:[#allocation3 + $0x98] sm:$0xf0] }
 0x76f   :  { %v5205_v56 = vor.u32 %v5378_v53, %v5202_v32  ;;  %v8146_v57 = vpop.permute.xlu1 %2963 }
 0x771   :  { %4243 = vmatpush.bf16.msrb.mxu0 %v5129_v26  ;;  %4262 = vmatpush.bf16.msrb.mxu2 %v5193_v11 }
 0x772   :  { %4300 = vmatpush.bf16.msra.mxu3 %v5133_v18  ;;  %v5393_v1 = vld [vmem:[#allocation3 + $0x104] sm:$0xf0]  ;;  %v5258_v23 = vld [vmem:[#allocation3 + $0x108] sm:$0xf0]  ;;  %v8155_v26 = vpop.permute.xlu2 %2959 }
 0x773   :  { %v5257_v49 = vor.u32 %v5393_v1, %v5256_v52  ;;  %v5261_v59 = vor.u32 %v5392_v19, %v5258_v23 }
 0x774   :  { %4244 = vmatmul.bf16.vlgmr.msrb.gmra.mxu0 %v5105_v28  ;;  %4263 = vmatmul.bf16.vlgmr.msrb.gmra.mxu2 %v8113_v30 }
 0x775   :  { %4312 = vmatpush.bf16.msra.mxu0 %v5253_v31  ;;  %4337 = vmatpush.bf16.msra.mxu2 %v5269_v54 }
 0x776   :  { %5404 = vmatpush.bf16.msrb.mxu3 %v5269_v54  ;;  %4281 = vmatpush.bf16.msra.mxu1 %v5257_v49 }
 0x777   :  { %4301 = vmatmul.bf16.vlgmr.msra.gmra.mxu3 %v5105_v28 }
 0x778   :  { %v8153_v38 = vpop.permute.xlu1 %4461 }
 0x779   :  { %4313 = vmatpush.bf16.msra.mxu0 %v5245_v22  ;;  %4338 = vmatpush.bf16.msra.mxu2 %v5261_v59 }
 0x77a   :  { %5396 = vmatpush.bf16.msrb.mxu1 %v5253_v31  ;;  %5405 = vmatpush.bf16.msrb.mxu3 %v5261_v59  ;;  %v8163_v31 = vpop.permute.xlu2 %2971 }
 0x77b   :  { %5270 = vmatmul.msk.bf16.vlgmr.msra.gmra.mxu1 %vm9097_vm15, %v5113_v9 }
 0x77d   :  { %4314 = vmatpush.bf16.msra.mxu0 %v5237_v41 }
 0x77e   :  { %5397 = vmatpush.bf16.msrb.mxu1 %v5245_v22 }
 0x781   :  { %4315 = vmatpush.bf16.msra.mxu0 %v5229_v16 }
 0x782   :  { %5398 = vmatpush.bf16.msrb.mxu1 %v5237_v41  ;;  %v8169_v36 = vpop.permute.xlu2 %4456 }
 0x784   :  { %4249 = vmatmul.bf16.gmra.mxu0 %v5117_v27  ;;  %4268 = vmatmul.bf16.gmra.mxu2 %v5121_v14 }
 0x785   :  { %4316 = vmatpush.bf16.msra.mxu0 %v5221_v50 }
 0x786   :  { %5399 = vmatpush.bf16.msrb.mxu1 %v5229_v16 }
 0x787   :  { %4306 = vmatmul.bf16.gmra.mxu3 %v5117_v27 }
 0x789   :  { %4317 = vmatpush.bf16.msra.mxu0 %v5213_v17 }
 0x78a   :  { %5400 = vmatpush.bf16.msrb.mxu1 %v5221_v50 }
 0x78b   :  { %5271 = vmatmul.msk.bf16.gmra.mxu1 %vm9098_vm6, %v5125_v40 }
 0x78d   :  { %4318 = vmatpush.bf16.msra.mxu0 %v5205_v56 }
 0x78e   :  { %5401 = vmatpush.bf16.msrb.mxu1 %v5213_v17 }
 0x791   :  { %4319 = vmatpush.bf16.msra.mxu0 %v5197_v0 }
 0x792   :  { %5402 = vmatpush.bf16.msrb.mxu1 %v5205_v56 }
 0x794   :  { %4320 = vmatmul.bf16.vlgmr.msra.gmra.mxu0 %v8113_v30  ;;  %5272 = vmatmul.msk.bf16.vlgmr.msra.gmra.mxu2 %vm9099_vm9, %v5113_v9 }
 0x796   :  { %5403 = vmatpush.bf16.msrb.mxu1 %v5197_v0 }
 0x797   :  { %5273 = vmatmul.msk.bf16.vlgmr.msrb.gmra.mxu3 %vm9100_vm10, %v5125_v40 }
 0x79b   :  { %4325 = vmatmul.bf16.vlgmr.msrb.gmra.mxu1 %v5121_v14 }
 0x7a3   :  { %v2839_v11 = vpop.xlane.xlu1 %2838 }
 0x7a4   :  { %v2847_v34 = vmul.f32 0.00390625, %v2839_v11 }
 0x7a6   :  { %v8158_v10 = vsub.f32 %v8041_v46, %v2847_v34  ;;  %v8161_v18 = vsub.f32 %v8044_v33, %v2847_v34 }
 0x7a8   :  { %v2860_v2 = vmul.f32 %v8158_v10, %v8158_v10  ;;  %v2861_v28 = vmul.f32 %v8161_v18, %v8161_v18 }
 0x7aa   :  { %v2869_v30 = vadd.f32 %v2861_v28, %v2860_v2 }
 0x7ac   :  { %2870 = vadd.xlane.f32.xlu2 %v2869_v30 }
 0x7b2   :  { %v2845_v54 = vpop.xlane.xlu1 %2844 }
 0x7b3   :  { %v2849_v46 = vmul.f32 0.00390625, %v2845_v54 }
 0x7b5   :  { %v8182_v23 = vsub.f32 %v8061_v12, %v2849_v46  ;;  %v8185_v49 = vsub.f32 %v8065_v47, %v2849_v46 }
 0x7b7   :  { %v2865_v22 = vmul.f32 %v8185_v49, %v8185_v49 }
 0x7bb   :  { %v2836_v52 = vpop.xlane.xlu2 %2835 }
 0x7bc   :  { %v2846_v7 = vmul.f32 0.00390625, %v2836_v52 }
 0x7be   :  { %v8172_v39 = vsub.f32 %v8032_v51, %v2846_v7  ;;  %v8175_v33 = vsub.f32 %v8035_v37, %v2846_v7  ;;  %v2864_v37 = vmul.f32 %v8182_v23, %v8182_v23 }
 0x7c0   :  { %v2858_v1 = vmul.f32 %v8172_v39, %v8172_v39  ;;  %v2859_v19 = vmul.f32 %v8175_v33, %v8175_v33  ;;  %v2875_v35 = vadd.f32 %v2865_v22, %v2864_v37 }
 0x7c2   :  { %v2866_v4 = vadd.f32 %v2859_v19, %v2858_v1 }
 0x7c3   :  { %v2842_v59 = vpop.xlane.xlu2 %2841 }
 0x7c4   :  { %2867 = vadd.xlane.f32.xlu0 %v2866_v4  ;;  %v2848_v51 = vmul.f32 0.00390625, %v2842_v59 }
 0x7c6   :  { %v8192_v9 = vsub.f32 %v8050_v21, %v2848_v51  ;;  %v8195_v55 = vsub.f32 %v8055_v45, %v2848_v51 }
 0x7c8   :  { %v2862_v12 = vmul.f32 %v8192_v9, %v8192_v9  ;;  %v2863_v47 = vmul.f32 %v8195_v55, %v8195_v55 }
 0x7ca   :  { %v2872_v41 = vadd.f32 %v2863_v47, %v2862_v12 }
 0x7cc   :  { %2873 = vadd.xlane.f32.xlu1 %v2872_v41  ;;  %2876 = vadd.xlane.f32.xlu0 %v2875_v35  ;;  %v8210_v35 = vld [vmem:[%s8714_s5 + $0x18] sm:$0xff]  ;;  %v5654_v41 = vmov 19  }
 0x7cd   :  { %5483 = vset.pattern.permute.xlu1 %v5654_v41 }
 0x7f1   :  { %v4245_v62 = vpop.f32.mrf.mxu0 }
 0x7f7   :  { %v4264_v16 = vpop.f32.mrf.mxu2 }
 0x7f8   :  { %v4283_v44 = vpop.f32.mrf.mxu1  ;;  %v4265_v20 = vadd.f32 %v4264_v16, %v4245_v62  ;;  %v5655_v62 = vmov 16  }
 0x7f9   :  { %v4247_v25 = vpop.f32.mrf.mxu0 }
 0x7fa   :  { %v4302_v6 = vpop.f32.mrf.mxu3  ;;  %v4284_v24 = vadd.f32 %v4283_v44, %v4265_v20  ;;  %v8216_v44 = vpop.permute.xlu0 %2943 }
 0x7ff   :  { %v4266_v58 = vpop.f32.mrf.mxu2 }
 0x800   :  { %v4285_v21 = vpop.f32.mrf.mxu1  ;;  %v4267_v54 = vadd.f32 %v4266_v58, %v4247_v25 }
 0x801   :  { %v4250_v45 = vpop.f32.mrf.mxu0 }
 0x802   :  { %v4304_v29 = vpop.f32.mrf.mxu3  ;;  %v4286_v4 = vadd.f32 %v4285_v21, %v4267_v54  ;;  %v8218_v16 = vpop.permute.xlu0 %2967 }
 0x807   :  { %v4269_v60 = vpop.f32.mrf.mxu2 }
 0x808   :  { %v4288_v3 = vpop.f32.mrf.mxu1  ;;  %v4270_v40 = vadd.f32 %v4269_v60, %v4250_v45 }
 0x809   :  { %v4252_v27 = vpop.f32.mrf.mxu0 }
 0x80a   :  { %v4307_v50 = vpop.f32.mrf.mxu3  ;;  %v4289_v11 = vadd.f32 %v4288_v3, %v4270_v40 }
 0x80f   :  { %v4271_v8 = vpop.f32.mrf.mxu2 }
 0x810   :  { %v4290_v14 = vpop.f32.mrf.mxu1  ;;  %v4272_v52 = vadd.f32 %v4271_v8, %v4252_v27 }
 0x811   :  { %v4321_v48 = vpop.f32.mrf.mxu0 }
 0x812   :  { %v4309_v15 = vpop.f32.mrf.mxu3  ;;  %v4322_v17 = vadd.f32 %v4321_v48, %v4302_v6  ;;  %v8201_v37 = vadd.f32 %v4290_v14, %v4272_v52 }
 0x817   :  { %v4340_v56 = vpop.f32.mrf.mxu2 }
 0x818   :  { %v4326_v32 = vpop.f32.mrf.mxu1  ;;  %v4341_v42 = vadd.f32 %v4340_v56, %v4322_v17 }
 0x819   :  { %v4327_v53 = vadd.f32 %v4326_v32, %v4307_v50  ;;  %v4323_v30 = vpop.f32.mrf.mxu0 }
 0x81a   :  { %v4345_v0 = vpop.f32.mrf.mxu3  ;;  %v4350_v2 = vadd.f32 %v4341_v42, %v4284_v24  ;;  %v4324_v46 = vadd.f32 %v4323_v30, %v4304_v29 }
 0x81b   :  { %v4346_v34 = vadd.f32 %v4345_v0, %v4327_v53 }
 0x81c   :  { %4351 = vadd.xlane.f32.xlu1 %v4350_v2  ;;  %v8249_v2 = vld [vmem:[%s8714_s5 + $0x10] sm:$0xff] }
 0x81d   :  { %v4356_v28 = vadd.f32 %v4346_v34, %v4289_v11 }
 0x81f   :  { %4357 = vadd.xlane.f32.xlu0 %v4356_v28  ;;  %v4342_v19 = vpop.f32.mrf.mxu2  ;;  %v2871_v58 = vpop.xlane.xlu2 %2870 }
 0x820   :  { %v4328_v7 = vpop.f32.mrf.mxu1  ;;  %v4343_v59 = vadd.f32 %v4342_v19, %v4324_v46  ;;  %v2879_v30 = vmul.f32 0.00390625, %v2871_v58 }
 0x821   :  { %v4329_v1 = vadd.f32 %v4328_v7, %v4309_v15 }
 0x822   :  { %v4347_v51 = vpop.f32.mrf.mxu3  ;;  %v4353_v12 = vadd.f32 %v4343_v59, %v4286_v4  ;;  %v2883_v52 = vadd.f32 1e-05, %v2879_v30 }
 0x823   :  { %v8203_v22 = vadd.f32 %v4347_v51, %v4329_v1  ;;  %v5656_v51 = vmov 20  }
 0x824   :  { %4354 = vadd.xlane.f32.xlu2 %v4353_v12  ;;  %vm2902_vm14 = vweird.f32 %v2883_v52 }
 0x825   :  { %v4359_v47 = vadd.f32 %v8203_v22, %v8201_v37 }
 0x827   :  { %4360 = vadd.xlane.f32.xlu1 %v4359_v47 }
 0x837   :  { %v2868_v6 = vpop.xlane.xlu0 %2867 }
 0x838   :  { %v2878_v28 = vmul.f32 0.00390625, %v2868_v6 }
 0x83a   :  { %v2882_v54 = vadd.f32 1e-05, %v2878_v28 }
 0x83c   :  { %4471 = vperm.xlu2 %5480, %v8210_v35   ;;  %5567 = vrsqrt.f32 %v2882_v54  ;;  %vm2892_vm13 = vweird.f32 %v2882_v54 }
 0x83d   :  { %5569 = vrsqrt.f32 %v2883_v52 }
 0x83f   :  { %v2874_v25 = vpop.xlane.xlu1 %2873  ;;  %v8220_v21 = vpop.xlane.xlu0 %2876 }
 0x840   :  { %v2880_v7 = vmul.f32 0.00390625, %v2874_v25 }
 0x842   :  { %v2884_v46 = vadd.f32 1e-05, %v2880_v7  ;;  %v5568_v1 = vpop.eup %5567 }
 0x843   :  { %v5570_v19 = vpop.eup %5569  ;;  %vm2893_vm12 = vweird.f32 %v5568_v1 }
 0x844   :  { %5484 = vset.pattern.permute.xlu2 %v5654_v41  ;;  %5571 = vrsqrt.f32 %v2884_v46  ;;  %vm2903_vm3 = vweird.f32 %v5570_v19  ;;  %vm2894_vm5 = vmor %vm2892_vm13, %vm2893_vm12  ;;  %vm2912_vm0 = vweird.f32 %v2884_v46 }
 0x845   :  { %4487 = vperm.xlu2 %5484, %v8001_v43   ;;  %vm2904_vm11 = vmor %vm2902_vm14, %vm2903_vm3 }
 0x84a   :  { %v5572_v47 = vpop.eup %5571 }
 0x84b   :  { %v2907_v25 = vmul.f32 %v5572_v47, %v2884_v46  ;;  %vm2913_vm8 = vweird.f32 %v5572_v47 }
 0x84c   :  { %vm2914_vm7 = vmor %vm2912_vm0, %vm2913_vm8 }
 0x84d   :  { %4495 = vperm.xlu2 %5484, %v8210_v35  }
 0x855   :  { %5485 = vset.pattern.permute.xlu2 %v5655_v62 }
 0x856   :  { %4523 = vperm.xlu2 %5485, %v8030_v13  }
 0x88f   :  { %v4352_v29 = vpop.xlane.xlu1 %4351 }
 0x890   :  { %v4362_v3 = vmul.f32 0.00390625, %v4352_v29 }
 0x892   :  { %v4358_v45 = vpop.xlane.xlu0 %4357  ;;  %v8222_v50 = vsub.f32 %v4284_v24, %v4362_v3  ;;  %v8224_v27 = vsub.f32 %v4341_v42, %v4362_v3 }
 0x893   :  { %v4364_v60 = vmul.f32 0.00390625, %v4358_v45 }
 0x894   :  { %v4374_v15 = vmul.f32 %v8222_v50, %v8222_v50  ;;  %v4375_v48 = vmul.f32 %v8224_v27, %v8224_v27 }
 0x895   :  { %v8226_v14 = vsub.f32 %v4289_v11, %v4364_v60  ;;  %v8228_v8 = vsub.f32 %v4346_v34, %v4364_v60 }
 0x896   :  { %v4382_v40 = vadd.f32 %v4375_v48, %v4374_v15 }
 0x897   :  { %v4378_v20 = vmul.f32 %v8226_v14, %v8226_v14  ;;  %v4379_v17 = vmul.f32 %v8228_v8, %v8228_v8  ;;  %v4355_v32 = vpop.xlane.xlu2 %4354 }
 0x898   :  { %v4363_v56 = vmul.f32 0.00390625, %v4355_v32  ;;  %4383 = vadd.xlane.f32.xlu1 %v4382_v40 }
 0x899   :  { %v4388_v53 = vadd.f32 %v4379_v17, %v4378_v20 }
 0x89a   :  { %v8238_v24 = vsub.f32 %v4286_v4, %v4363_v56  ;;  %v8240_v42 = vsub.f32 %v4343_v59, %v4363_v56  ;;  %v2887_v4 = vmul.f32 %v5568_v1, %v2882_v54  ;;  %v2897_v59 = vmul.f32 %v5570_v19, %v2883_v52  ;;  %v4361_v60 = vpop.xlane.xlu1 %4360  ;;  %v9102_v52 = vld [vmem:[#allocation52_spill] sm:$0xff] }
 0x89b   :  { %4389 = vadd.xlane.f32.xlu0 %v4388_v53 }
 0x89c   :  { %v4376_v0 = vmul.f32 %v8238_v24, %v8238_v24  ;;  %v4377_v11 = vmul.f32 %v8240_v42, %v8240_v42  ;;  %v2888_v12 = vmul.f32 %v5568_v1, %v2887_v4  ;;  %v2898_v41 = vmul.f32 %v5570_v19, %v2897_v59  ;;  %v9103_v4 = vld [vmem:[#allocation14_spill] sm:$0xff]  ;;  %v9104_v59 = vld [vmem:[#allocation49_spill] sm:$0xff] }
 0x89e   :  { %v4385_v34 = vadd.f32 %v4377_v11, %v4376_v0  ;;  %v2889_v6 = vmul.f32 0.5, %v2888_v12  ;;  %v9105_v12 = vld [vmem:[#allocation58_spill] sm:$0xff] }
 0x8a0   :  { %4386 = vadd.xlane.f32.xlu2 %v4385_v34  ;;  %v2890_v58 = vsub.f32 1.5, %v2889_v6 }
 0x8a2   :  { %v2891_v45 = vmul.f32 %v5568_v1, %v2890_v58 }
 0x8a4   :  { %v2895_v48 = vsel %vm2894_vm5, %v5568_v1, %v2891_v45 }
 0x8a5   :  { %v2926_v40 = vmul.f32 %v2895_v48, %v8172_v39  ;;  %v2927_v11 = vmul.f32 %v2895_v48, %v8175_v33 }
 0x8a7   :  { %v2950_v34 = vmul.f32 %v8144_v63, %v2926_v40 }
 0x8a9   :  { %v2974_v7 = vadd.f32 %v8155_v26, %v2950_v34  ;;  %v9112_v34 = vld [vmem:[#allocation34_spill] sm:$0xff] }
 0x8af   :  { %4466 = vperm.xlu0 %5482, %v8249_v2  }
 0x8b1   :  { %4483 = vperm.xlu1 %5483, %v8030_v13  }
 0x8b7   :  { %5487 = vset.pattern.permute.xlu0 %v5655_v62 }
 0x8b8   :  { %4531 = vperm.xlu2 %5485, %v8249_v2  }
 0x8b9   :  { %4491 = vperm.xlu1 %5483, %v8249_v2  }
 0x8c0   :  { %5488 = vset.pattern.permute.xlu2 %v5656_v51 }
 0x8c1   :  { %5486 = vset.pattern.permute.xlu1 %v5655_v62  ;;  %4671 = vperm.xlu2 %5488, %v8030_v13   ;;  %v2899_v62 = vmul.f32 0.5, %v2898_v41  ;;  %v4365_v13 = vmul.f32 0.00390625, %v4361_v60  ;;  %v9109_v60 = vld [vmem:[#allocation55_spill] sm:$0xff] }
 0x8c2   :  { %4527 = vperm.xlu1 %5486, %v8001_v43   ;;  %v2908_v43 = vmul.f32 %v5572_v47, %v2907_v25 }
 0x8c3   :  { %v2900_v29 = vsub.f32 1.5, %v2899_v62  ;;  %v8259_v53 = vsub.f32 %v8201_v37, %v4365_v13  ;;  %v8262_v56 = vsub.f32 %v8203_v22, %v4365_v13  ;;  %v2951_v22 = vmul.f32 %v8144_v63, %v2927_v11  ;;  %v9106_v63 = vld [vmem:[#allocation30_spill] sm:$0xff]  ;;  %v9107_v62 = vld [vmem:[#allocation56_spill] sm:$0xff] }
 0x8c4   :  { %v2909_v3 = vmul.f32 0.5, %v2908_v43  ;;  %v8289_v43 = vpop.permute.xlu2 %4471 }
 0x8c5   :  { %v2901_v15 = vmul.f32 %v5570_v19, %v2900_v29  ;;  %v4380_v39 = vmul.f32 %v8259_v53, %v8259_v53  ;;  %v4381_v30 = vmul.f32 %v8262_v56, %v8262_v56  ;;  %v2975_v6 = vadd.f32 %v8155_v26, %v2951_v22 }
 0x8c6   :  { %v2910_v20 = vsub.f32 1.5, %v2909_v3  ;;  %v9108_v3 = vld [vmem:[#allocation13_spill] sm:$0xff] }
 0x8c7   :  { %v2905_v17 = vsel %vm2904_vm11, %v5570_v19, %v2901_v15  ;;  %v4391_v19 = vadd.f32 %v4381_v30, %v4380_v39  ;;  %v2806_v15 = vmul.f32 %v9109_v60, %v9108_v3 }
 0x8c8   :  { %v2911_v32 = vmul.f32 %v5572_v47, %v2910_v20  ;;  %v2928_v0 = vmul.f32 %v2905_v17, %v8158_v10  ;;  %v2929_v54 = vmul.f32 %v2905_v17, %v8161_v18  ;;  %v9101_v10 = vld [vmem:[#allocation29_spill] sm:$0xff]  ;;  %v2803_v18 = vmul.f32 %v9102_v52, %v9106_v63  ;;  %v9110_v20 = vld [vmem:[#allocation7_spill] sm:$0xff] }
 0x8c9   :  { %v2802_v33 = vmul.f32 %v9102_v52, %v9101_v10  ;;  %v2805_v26 = vmul.f32 %v9104_v59, %v9110_v20 }
 0x8ca   :  { %5489 = vset.pattern.permute.xlu1 %v5656_v51  ;;  %v2915_v28 = vsel %vm2914_vm7, %v5572_v47, %v2911_v32  ;;  %v2952_v37 = vmul.f32 %v8141_v61, %v2928_v0  ;;  %v2804_v51 = vmul.f32 %v9104_v59, %v9103_v4  ;;  %v2953_v25 = vmul.f32 %v8141_v61, %v2929_v54  ;;  %v9111_v61 = vld [vmem:[#allocation6_spill] sm:$0xff] }
 0x8cb   :  { %v2930_v46 = vmul.f32 %v2915_v28, %v8192_v9  ;;  %v2931_v1 = vmul.f32 %v2915_v28, %v8195_v55  ;;  %v2826_v47 = vadd.f32 %v9105_v12, %v2802_v33  ;;  %v2827_v29 = vadd.f32 %v9105_v12, %v2803_v18 }
 0x8cc   :  { %v2976_v41 = vadd.f32 %v8146_v57, %v2952_v37  ;;  %v2828_v9 = vadd.f32 %v9107_v62, %v2804_v51  ;;  %v2807_v13 = vmul.f32 %v9109_v60, %v9111_v61  ;;  %v2977_v40 = vadd.f32 %v8146_v57, %v2953_v25 }
 0x8cd   :  { %v2982_v58 = vadd.f32 %v2974_v7, %v2826_v47  ;;  %v2954_v55 = vmul.f32 %v8216_v44, %v2930_v46  ;;  %v2955_v45 = vmul.f32 %v8216_v44, %v2931_v1  ;;  %v2983_v17 = vadd.f32 %v2975_v6, %v2827_v29  ;;  %v8306_v7 = vpop.permute.xlu2 %4487 }
 0x8ce   :  { %v2984_v48 = vadd.f32 %v2976_v41, %v2828_v9  ;;  %v2829_v11 = vadd.f32 %v9107_v62, %v2805_v26  ;;  %v2830_v28 = vadd.f32 %v9112_v34, %v2806_v15  ;;  %v2831_v30 = vadd.f32 %v9112_v34, %v2807_v13 }
 0x8cf   :  { %v2990_v32 = vsub.f32 0.0, %v2982_v58  ;;  %v2978_v0 = vadd.f32 %v8218_v16, %v2954_v55  ;;  %v2979_v44 = vadd.f32 %v8218_v16, %v2955_v45  ;;  %v2991_v37 = vsub.f32 0.0, %v2983_v17 }
 0x8d0   :  { %v2992_v39 = vsub.f32 0.0, %v2984_v48  ;;  %v2985_v22 = vadd.f32 %v2977_v40, %v2829_v11  ;;  %v2881_v57 = vmul.f32 0.00390625, %v8220_v21 }
 0x8d1   :  { %v2998_v54 = vmul.f32 1.442695, %v2990_v32  ;;  %v2986_v10 = vadd.f32 %v2978_v0, %v2830_v28  ;;  %v2987_v52 = vadd.f32 %v2979_v44, %v2831_v30  ;;  %v3000_v46 = vmul.f32 1.442695, %v2991_v37 }
 0x8d2   :  { %v3002_v33 = vmul.f32 1.442695, %v2992_v39  ;;  %v2993_v1 = vsub.f32 0.0, %v2985_v22  ;;  %v8308_v4 = vadd.f32 1e-05, %v2881_v57 }
 0x8d3   :  { %5573 = vpow2.f32 %v2998_v54  ;;  %v2995_v16 = vsub.f32 0.0, %v2987_v52 }
 0x8d4   :  { %5575 = vpow2.f32 %v3002_v33  ;;  %v3004_v59 = vmul.f32 1.442695, %v2993_v1 }
 0x8d5   :  { %5577 = vpow2.f32 %v3000_v46  ;;  %v3008_v12 = vmul.f32 1.442695, %v2995_v16  ;;  %v8311_v21 = vpop.permute.xlu2 %4495 }
 0x8d6   :  { %5579 = vrsqrt.f32 %v8308_v4 }
 0x8d7   :  { %5581 = vpow2.f32 %v3004_v59 }
 0x8d9   :  { %v5574_v47 = vpop.eup %5573 }
 0x8da   :  { %v5576_v41 = vpop.eup %5575  ;;  %v8313_v18 = vadd.f32 1.0, %v5574_v47 }
 0x8db   :  { %v5578_v63 = vpop.eup %5577  ;;  %v8315_v6 = vadd.f32 1.0, %v5576_v41 }
 0x8dc   :  { %v8317_v25 = vpop.eup %5579  ;;  %v8319_v62 = vadd.f32 1.0, %v5578_v63  ;;  %v3033_v28 = vand.u32 2147483648, %v8313_v18  ;;  %vm3027_vm1 = vweird.f32 %v8313_v18  ;;  %v3031_v1 = vand.u32 2147483647, %v8313_v18 }
 0x8dd   :  { %v5582_v9 = vpop.eup %5581  ;;  %v2917_v29 = vmul.f32 %v8317_v25, %v8308_v4  ;;  %v8332_v15 = vpop.permute.xlu2 %4523  ;;  %v3063_v41 = vand.u32 2147483648, %v8315_v6 }
 0x8de   :  { %v8326_v45 = vadd.f32 1.0, %v5582_v9  ;;  %9113 = vst [vmem:[#allocation16_spill] sm:$0xff] %v8332_v15  ;;  %v3048_v57 = vand.u32 2147483648, %v8319_v62  ;;  %v3046_v16 = vand.u32 2147483647, %v8319_v62  ;;  %vm8389_vm4 = vcmp.eq.f32.partialorder %v3031_v1, 8.507059e+37 }
 0x8df   :  { %v2918_v26 = vmul.f32 %v8317_v25, %v2917_v29  ;;  %vm3042_vm15 = vweird.f32 %v8319_v62 }
 0x8e0   :  { %v3076_v1 = vand.u32 2147483647, %v8326_v45  ;;  %vm8408_vm10 = vcmp.eq.f32.partialorder %v3046_v16, 8.507059e+37 }
 0x8e1   :  { %v8350_v34 = vmul.f32 0.5, %v2918_v26  ;;  %v8384_v26 = vor.u32 1.1754944e-38, %v3048_v57 }
 0x8ec   :  { %4392 = vadd.xlane.f32.xlu1 %v4391_v19  ;;  %v2994_v19 = vsub.f32 0.0, %v2986_v10 }
 0x8ee   :  { %v3006_v51 = vmul.f32 1.442695, %v2994_v19  ;;  %v8369_v19 = vor.u32 1.1754944e-38, %v3033_v28 }
 0x8f0   :  { %5583 = vpow2.f32 %v3006_v51 }
 0x8f1   :  { %5585 = vpow2.f32 %v3008_v12 }
 0x8f2   :  { %5587 = vrcp.f32 %v8313_v18 }
 0x8f3   :  { %5589 = vrcp.f32 %v8315_v6 }
 0x8f4   :  { %5591 = vrcp.f32 %v8319_v62 }
 0x8f5   :  { %5593 = vrcp.f32 %v8326_v45 }
 0x8f6   :  { %v5584_v58 = vpop.eup %5583 }
 0x8f7   :  { %v5586_v55 = vpop.eup %5585  ;;  %v8328_v3 = vadd.f32 1.0, %v5584_v58 }
 0x8f8   :  { %v8330_v60 = vadd.f32 1.0, %v5586_v55  ;;  %v8334_v20 = vpop.eup %5587 }
 0x8f9   :  { %v8338_v40 = vpop.eup %5589  ;;  %5595 = vrcp.f32 %v8328_v3  ;;  %v3023_v44 = vmul.f32 %v8334_v20, %v8313_v18  ;;  %vm3028_vm2 = vweird.f32 %v8334_v20  ;;  %v3091_v55 = vand.u32 2147483647, %v8328_v3 }
 0x8fa   :  { %v8343_v0 = vpop.eup %5591  ;;  %5597 = vrcp.f32 %v8330_v60  ;;  %v3053_v30 = vmul.f32 %v8338_v40, %v8315_v6  ;;  %vm3087_vm12 = vweird.f32 %v8328_v3  ;;  %vm8418_vm3 = vmor %vm3027_vm1, %vm3028_vm2  ;;  %vm3102_vm5 = vweird.f32 %v8330_v60 }
 0x8fb   :  { %v3038_v39 = vmul.f32 %v8343_v0, %v8319_v62  ;;  %v8359_v37 = vpop.eup %5593  ;;  %v3024_v54 = vsub.f32 1.0, %v3023_v44  ;;  %vm3043_vm6 = vweird.f32 %v8343_v0  ;;  %vm3058_vm14 = vweird.f32 %v8338_v40 }
 0x8fc   :  { %v3054_v47 = vsub.f32 1.0, %v3053_v30  ;;  %v8380_v29 = vmul.f32 %v8359_v37, %v8326_v45  ;;  %vm3073_vm8 = vweird.f32 %v8359_v37  ;;  %vm3057_vm1 = vweird.f32 %v8315_v6 }
 0x8fd   :  { %v3039_v12 = vsub.f32 1.0, %v3038_v39  ;;  %v3025_v58 = vmul.f32 %v8334_v20, %v3024_v54 }
 0x8fe   :  { %v8399_v30 = vmul.f32 %v8338_v40, %v3054_v47  ;;  %v3069_v57 = vsub.f32 1.0, %v8380_v29  ;;  %v3093_v47 = vand.u32 2147483648, %v8328_v3 }
 0x8ff   :  { %v8361_v10 = vpop.eup %5595  ;;  %v3040_v39 = vmul.f32 %v8343_v0, %v3039_v12 }
 0x900   :  { %v8365_v46 = vpop.eup %5597  ;;  %v3056_v12 = vadd.f32 %v8338_v40, %v8399_v30 }
 0x901   :  { %v3098_v44 = vmul.f32 %v8365_v46, %v8330_v60  ;;  %v3041_v16 = vadd.f32 %v8343_v0, %v3040_v39 }
 0x90b   :  { %v4384_v48 = vpop.xlane.xlu1 %4383 }
 0x90c   :  { %v4394_v13 = vmul.f32 0.00390625, %v4384_v48 }
 0x90e   :  { %v4390_v61 = vpop.xlane.xlu0 %4389  ;;  %v8341_v32 = vadd.f32 1e-05, %v4394_v13 }
 0x90f   :  { %v4396_v17 = vmul.f32 0.00390625, %v4390_v61  ;;  %v3083_v61 = vmul.f32 %v8361_v10, %v8328_v3 }
 0x910   :  { %5599 = vrsqrt.f32 %v8341_v32  ;;  %vm4408_vm11 = vweird.f32 %v8341_v32 }
 0x911   :  { %v8346_v11 = vadd.f32 1e-05, %v4396_v17  ;;  %v3084_v52 = vsub.f32 1.0, %v3083_v61 }
 0x913   :  { %5601 = vrsqrt.f32 %v8346_v11  ;;  %v4387_v22 = vpop.xlane.xlu2 %4386  ;;  %vm4428_vm0 = vweird.f32 %v8346_v11  ;;  %v3085_v39 = vmul.f32 %v8361_v10, %v3084_v52 }
 0x914   :  { %v4395_v33 = vmul.f32 0.00390625, %v4387_v22  ;;  %v8401_v22 = vor.u32 1.1754944e-38, %v3063_v41  ;;  %v3099_v41 = vsub.f32 1.0, %v3098_v44 }
 0x916   :  { %v5600_v59 = vpop.eup %5599  ;;  %v8372_v51 = vadd.f32 1e-05, %v4395_v33  ;;  %v3026_v33 = vadd.f32 %v8334_v20, %v3025_v58 }
 0x917   :  { %v4403_v9 = vmul.f32 %v5600_v59, %v8341_v32  ;;  %vm4409_vm9 = vweird.f32 %v5600_v59 }
 0x918   :  { %5603 = vrsqrt.f32 %v8372_v51  ;;  %vm4410_vm7 = vmor %vm4408_vm11, %vm4409_vm9 }
 0x919   :  { %v5602_v63 = vpop.eup %5601  ;;  %v4404_v13 = vmul.f32 %v5600_v59, %v4403_v9  ;;  %vm8447_vm9 = vmor %vm3042_vm15, %vm3043_vm6  ;;  %vm3103_vm15 = vweird.f32 %v8365_v46 }
 0x91a   :  { %v4423_v48 = vmul.f32 %v5602_v63, %v8346_v11  ;;  %vm4429_vm13 = vweird.f32 %v5602_v63 }
 0x91b   :  { %v4405_v54 = vmul.f32 0.5, %v4404_v13  ;;  %vm4430_vm2 = vmor %vm4428_vm0, %vm4429_vm13  ;;  %vm4418_vm0 = vweird.f32 %v8372_v51 }
 0x91c   :  { %v4424_v28 = vmul.f32 %v5602_v63, %v4423_v48  ;;  %v3078_v48 = vand.u32 2147483648, %v8326_v45 }
 0x91d   :  { %v4406_v15 = vsub.f32 1.5, %v4405_v54  ;;  %v3106_v54 = vand.u32 2147483647, %v8330_v60 }
 0x91e   :  { %v4425_v9 = vmul.f32 0.5, %v4424_v28  ;;  %v5604_v58 = vpop.eup %5603  ;;  %v3030_v28 = vsel %vm8418_vm3, %v8334_v20, %v3026_v33  ;;  %v3108_v20 = vand.u32 2147483648, %v8330_v60  ;;  %vm3072_vm3 = vweird.f32 %v8326_v45 }
 0x91f   :  { %v4407_v13 = vmul.f32 %v5600_v59, %v4406_v15  ;;  %v4413_v44 = vmul.f32 %v5604_v58, %v8372_v51  ;;  %v3035_v33 = vsel %vm8389_vm4, %v8369_v19, %v3030_v28  ;;  %vm3088_vm4 = vweird.f32 %v8361_v10 }
 0x920   :  { %v4426_v29 = vsub.f32 1.5, %v4425_v9  ;;  %v3100_v9 = vmul.f32 %v8365_v46, %v3099_v41  ;;  %v3070_v19 = vmul.f32 %v8359_v37, %v3069_v57  ;;  %vm4419_vm6 = vweird.f32 %v5604_v58  ;;  %vm8472_vm13 = vmor %vm3087_vm12, %vm3088_vm4 }
 0x921   :  { %v4414_v15 = vmul.f32 %v5604_v58, %v4413_v44  ;;  %v4411_v32 = vsel %vm4410_vm7, %v5600_v59, %v4407_v13  ;;  %v3086_v13 = vadd.f32 %v8361_v10, %v3085_v39  ;;  %vm4420_vm12 = vmor %vm4418_vm0, %vm4419_vm6  ;;  %vm8499_vm7 = vcmp.eq.f32.partialorder %v3091_v55, 8.507059e+37 }
 0x922   :  { %v4427_v18 = vmul.f32 %v5602_v63, %v4426_v29  ;;  %v4442_v59 = vmul.f32 %v4411_v32, %v8222_v50  ;;  %v4443_v41 = vmul.f32 %v4411_v32, %v8224_v27  ;;  %v3101_v44 = vadd.f32 %v8365_v46, %v3100_v9 }
 0x923   :  { %v4415_v29 = vmul.f32 0.5, %v4414_v15  ;;  %v4484_v61 = vpop.permute.xlu1 %4483  ;;  %v3071_v15 = vadd.f32 %v8359_v37, %v3070_v19  ;;  %v3094_v60 = vor.u32 1.1754944e-38, %v3093_v47  ;;  %v3090_v30 = vsel %vm8472_vm13, %v8361_v10, %v3086_v13 }
 0x924   :  { %v4431_v11 = vsel %vm4430_vm2, %v5602_v63, %v4427_v18  ;;  %v3045_v63 = vsel %vm8447_vm9, %v8343_v0, %v3041_v16  ;;  %v4474_v62 = vmul.f32 %v8169_v36, %v4442_v59  ;;  %v4475_v17 = vmul.f32 %v8169_v36, %v4443_v41  ;;  %v4467_v16 = vpop.permute.xlu0 %4466  ;;  %vm8525_vm2 = vmor %vm3072_vm3, %vm3073_vm8 }
 0x925   :  { %v4416_v50 = vsub.f32 1.5, %v4415_v29  ;;  %v4446_v27 = vmul.f32 %v4431_v11, %v8226_v14  ;;  %v4447_v0 = vmul.f32 %v4431_v11, %v8228_v8  ;;  %v3050_v57 = vsel %vm8408_vm10, %v8384_v26, %v3045_v63  ;;  %vm8485_vm10 = vmor %vm3102_vm5, %vm3103_vm15 }
 0x926   :  { %v4498_v28 = vadd.f32 %v4484_v61, %v4474_v62  ;;  %v4499_v18 = vadd.f32 %v4484_v61, %v4475_v17  ;;  %v9124_v14 = vand.u32 2147483647, %v8315_v6  ;;  %vm8513_vm5 = vmor %vm3057_vm1, %vm3058_vm14  ;;  %vm3107_vm14 = vcmp.eq.f32.partialorder %v3106_v54, 8.507059e+37 }
 0x927   :  { %v4417_v8 = vmul.f32 %v5604_v58, %v4416_v50  ;;  %v4478_v52 = vmul.f32 %v4467_v16, %v4446_v27  ;;  %v3109_v6 = vor.u32 1.1754944e-38, %v3108_v20  ;;  %v3095_v54 = vsel %vm8499_vm7, %v3094_v60, %v3090_v30 }
 0x928   :  { %vm8478_vm11 = vcmp.eq.f32.partialorder %v9124_v14, 8.507059e+37  ;;  %v8493_v32 = vmul.f32 %v4498_v28, %v3035_v33  ;;  %v8495_v9 = vmul.f32 %v4499_v18, %v3050_v57  ;;  %v3105_v33 = vsel %vm8485_vm10, %v8365_v46, %v3101_v44  ;;  %v9136_v57 = vld [vmem:[#allocation31_spill] sm:$0xff]  ;;  %v9137_v28 = vld [vmem:[#allocation54_spill] sm:$0xff]  ;;  %v9138_v14 = vld [vmem:[#allocation32_spill] sm:$0xff] }
 0x929   :  { %v4421_v11 = vsel %vm4420_vm12, %v5604_v58, %v4417_v8  ;;  %v4479_v58 = vmul.f32 %v4467_v16, %v4447_v0  ;;  %v3110_v20 = vsel %vm3107_vm14, %v3109_v6, %v3105_v33  ;;  %vm3077_vm8 = vcmp.eq.f32.partialorder %v3076_v1, 8.507059e+37  ;;  %v9139_v8 = vld [vmem:[#allocation60_spill] sm:$0xff] }
 0x92a   :  { %v4444_v55 = vmul.f32 %v4421_v11, %v8238_v24  ;;  %v4445_v47 = vmul.f32 %v4421_v11, %v8240_v42  ;;  %v4570_v10 = vadd.f32 %v8495_v9, %v8493_v32  ;;  %v3060_v24 = vsel %vm8513_vm5, %v8338_v40, %v3056_v12 }
 0x92b   :  { %v4492_v59 = vpop.permute.xlu1 %4491  ;;  %v3075_v42 = vsel %vm8525_vm2, %v8359_v37, %v3071_v15  ;;  %v3079_v40 = vor.u32 1.1754944e-38, %v3078_v48  ;;  %v9135_v48 = vsub.f32 1.5, %v8350_v34  ;;  %vm2923_vm1 = vweird.f32 %v8317_v25  ;;  %v8583_v15 = vld [vmem:[%s8714_s5 + $0x8] sm:$0xff] }
 0x92c   :  { %v4502_v41 = vadd.f32 %v4492_v59, %v4478_v52  ;;  %v4503_v29 = vadd.f32 %v4492_v59, %v4479_v58  ;;  %4571 = vadd.xlane.f32.xlu1 %v4570_v10  ;;  %v4476_v63 = vmul.f32 %v8153_v38, %v4444_v55  ;;  %v4477_v61 = vmul.f32 %v8153_v38, %v4445_v47  ;;  %v8593_v55 = vld [vmem:[%s8714_s5] sm:$0xff] }
 0x92d   :  { %v3065_v38 = vsel %vm8478_vm11, %v8401_v22, %v3060_v24  ;;  %v3080_v13 = vsel %vm3077_vm8, %v3079_v40, %v3075_v42  ;;  %v2921_v27 = vmul.f32 %v8317_v25, %v9135_v48  ;;  %vm2922_vm3 = vweird.f32 %v8308_v4 }
 0x92e   :  { %v8543_v19 = vmul.f32 %v4502_v41, %v3095_v54  ;;  %v8545_v37 = vmul.f32 %v4503_v29, %v3110_v20  ;;  %v4500_v62 = vadd.f32 %v8306_v7, %v4476_v63  ;;  %v4501_v17 = vadd.f32 %v8306_v7, %v4477_v61  ;;  %vm2924_vm9 = vmor %vm2922_vm3, %vm2923_vm1 }
 0x92f   :  { %v2925_v22 = vsel %vm2924_vm9, %v8317_v25, %v2921_v27  ;;  %v2808_v18 = vmul.f32 %v9137_v28, %v9136_v57  ;;  %v2809_v4 = vmul.f32 %v9137_v28, %v9138_v14  ;;  %v5657_v51 = vmov 17  }
 0x930   :  { %v4576_v50 = vadd.f32 %v8545_v37, %v8543_v19  ;;  %v8554_v1 = vmul.f32 %v4500_v62, %v3065_v38  ;;  %v8556_v45 = vmul.f32 %v4501_v17, %v3080_v13  ;;  %v2932_v44 = vmul.f32 %v2925_v22, %v8182_v23 }
 0x931   :  { %v2933_v0 = vmul.f32 %v2925_v22, %v8185_v49  ;;  %v2832_v25 = vadd.f32 %v9139_v8, %v2808_v18  ;;  %v2833_v23 = vadd.f32 %v9139_v8, %v2809_v4 }
 0x932   :  { %4577 = vadd.xlane.f32.xlu0 %v4576_v50  ;;  %v4573_v7 = vadd.f32 %v8556_v45, %v8554_v1  ;;  %v2956_v34 = vmul.f32 %v8148_v5, %v2932_v44 }
 0x933   :  { %v2957_v16 = vmul.f32 %v8148_v5, %v2933_v0 }
 0x934   :  { %4574 = vadd.xlane.f32.xlu2 %v4573_v7  ;;  %v2980_v36 = vadd.f32 %v8163_v31, %v2956_v34  ;;  %v8588_v52 = vpop.permute.xlu1 %4527 }
 0x935   :  { %v2981_v39 = vadd.f32 %v8163_v31, %v2957_v16 }
 0x936   :  { %v2988_v26 = vadd.f32 %v2980_v36, %v2832_v25 }
 0x937   :  { %v2989_v49 = vadd.f32 %v2981_v39, %v2833_v23  ;;  %v8603_v23 = vpop.permute.xlu2 %4531 }
 0x938   :  { %v2996_v5 = vsub.f32 0.0, %v2988_v26 }
 0x939   :  { %v2997_v12 = vsub.f32 0.0, %v2989_v49 }
 0x93a   :  { %v3010_v31 = vmul.f32 1.442695, %v2996_v5 }
 0x93b   :  { %v3012_v60 = vmul.f32 1.442695, %v2997_v12 }
 0x93c   :  { %5605 = vpow2.f32 %v3010_v31 }
 0x93d   :  { %5607 = vpow2.f32 %v3012_v60 }
 0x93f   :  { %v8606_v26 = vpop.permute.xlu2 %4671 }
 0x942   :  { %v5606_v11 = vpop.eup %5605 }
 0x943   :  { %v5608_v30 = vpop.eup %5607  ;;  %v3020_v33 = vadd.f32 1.0, %v5606_v11 }
 0x944   :  { %v3021_v3 = vadd.f32 1.0, %v5608_v30 }
 0x945   :  { %4683 = vperm.xlu1 %5489, %v8210_v35   ;;  %5609 = vrcp.f32 %v3020_v33  ;;  %vm3117_vm11 = vweird.f32 %v3020_v33  ;;  %v3121_v48 = vand.u32 2147483647, %v3020_v33  ;;  %v3123_v27 = vand.u32 2147483648, %v3020_v33 }
 0x946   :  { %4535 = vperm.xlu0 %5487, %v8210_v35   ;;  %5611 = vrcp.f32 %v3021_v3  ;;  %v3138_v7 = vand.u32 2147483648, %v3021_v3  ;;  %vm3132_vm12 = vweird.f32 %v3021_v3  ;;  %v3136_v0 = vand.u32 2147483647, %v3021_v3 }
 0x947   :  { %v3124_v18 = vor.u32 1.1754944e-38, %v3123_v27  ;;  %vm3122_vm5 = vcmp.eq.f32.partialorder %v3121_v48, 8.507059e+37 }
 0x948   :  { %v3139_v36 = vor.u32 1.1754944e-38, %v3138_v7  ;;  %vm3137_vm2 = vcmp.eq.f32.partialorder %v3136_v0, 8.507059e+37 }
 0x94b   :  { %v5610_v46 = vpop.eup %5609 }
 0x94c   :  { %4675 = vperm.xlu2 %5488, %v8583_v15   ;;  %v5612_v6 = vpop.eup %5611  ;;  %v3113_v59 = vmul.f32 %v5610_v46, %v3020_v33  ;;  %vm3118_vm6 = vweird.f32 %v5610_v46 }
 0x94d   :  { %5491 = vset.pattern.permute.xlu1 %v5657_v51  ;;  %v3128_v24 = vmul.f32 %v5612_v6, %v3021_v3  ;;  %vm3133_vm0 = vweird.f32 %v5612_v6  ;;  %vm3119_vm10 = vmor %vm3117_vm11, %vm3118_vm6 }
 0x94e   :  { %4551 = vperm.xlu1 %5491, %v8583_v15   ;;  %v3114_v29 = vsub.f32 1.0, %v3113_v59  ;;  %vm3134_vm7 = vmor %vm3132_vm12, %vm3133_vm0 }
 0x94f   :  { %v3129_v63 = vsub.f32 1.0, %v3128_v24 }
 0x950   :  { %v3115_v20 = vmul.f32 %v5610_v46, %v3114_v29 }
 0x951   :  { %v3130_v40 = vmul.f32 %v5612_v6, %v3129_v63 }
 0x952   :  { %v3116_v38 = vadd.f32 %v5610_v46, %v3115_v20 }
 0x953   :  { %v3131_v13 = vadd.f32 %v5612_v6, %v3130_v40 }
 0x954   :  { %4679 = vperm.xlu2 %5488, %v8249_v2   ;;  %v3120_v34 = vsel %vm3119_vm10, %v5610_v46, %v3116_v38 }
 0x955   :  { %v3135_v16 = vsel %vm3134_vm7, %v5612_v6, %v3131_v13  ;;  %v3125_v4 = vsel %vm3122_vm5, %v3124_v18, %v3120_v34 }
 0x95c   :  { %5490 = vset.pattern.permute.xlu2 %v5657_v51  ;;  %v5658_v51 = vmov 21  }
 0x95d   :  { %4547 = vperm.xlu2 %5490, %v8593_v55   ;;  %5492 = vset.pattern.permute.xlu0 %v5658_v51 }
 0x95f   :  { %v4393_v47 = vpop.xlane.xlu1 %4392 }
 0x960   :  { %v4397_v58 = vmul.f32 0.00390625, %v4393_v47 }
 0x962   :  { %v4401_v10 = vadd.f32 1e-05, %v4397_v58 }
 0x964   :  { %5613 = vrsqrt.f32 %v4401_v10  ;;  %vm4438_vm15 = vweird.f32 %v4401_v10 }
 0x965   :  { %4555 = vperm.xlu2 %5490, %v8249_v2  }
 0x96a   :  { %v5614_v42 = vpop.eup %5613 }
 0x96b   :  { %v4433_v41 = vmul.f32 %v5614_v42, %v4401_v10  ;;  %vm4439_vm4 = vweird.f32 %v5614_v42  ;;  %v9140_v10 = vld [vmem:[#allocation42_spill] sm:$0xff] }
 0x96c   :  { %vm4440_vm13 = vmor %vm4438_vm15, %vm4439_vm4  ;;  %v4540_v46 = vmul.f32 %v8588_v52, %v9140_v10 }
 0x96d   :  { %v4434_v61 = vmul.f32 %v5614_v42, %v4433_v41  ;;  %5493 = vset.pattern.permute.xlu2 %v5658_v51 }
 0x96e   :  { %4699 = vperm.xlu2 %5493, %v8583_v15  }
 0x96f   :  { %v4435_v54 = vmul.f32 0.5, %v4434_v61 }
 0x971   :  { %v4436_v62 = vsub.f32 1.5, %v4435_v54 }
 0x973   :  { %v4437_v17 = vmul.f32 %v5614_v42, %v4436_v62 }
 0x975   :  { %v4441_v50 = vsel %vm4440_vm13, %v5614_v42, %v4437_v17 }
 0x976   :  { %v4448_v22 = vmul.f32 %v4441_v50, %v8259_v53  ;;  %v4449_v44 = vmul.f32 %v4441_v50, %v8262_v56  ;;  %v3140_v56 = vsel %vm3137_vm2, %v3139_v36, %v3135_v16  ;;  %4707 = vperm.xlu2 %5493, %v8210_v35  }
 0x978   :  { %v4480_v57 = vmul.f32 %v8289_v43, %v4448_v22  ;;  %v4481_v28 = vmul.f32 %v8289_v43, %v4449_v44 }
 0x97a   :  { %v4504_v14 = vadd.f32 %v8311_v21, %v4480_v57  ;;  %v4505_v53 = vadd.f32 %v8311_v21, %v4481_v28 }
 0x97c   :  { %v4512_v39 = vmul.f32 %v4504_v14, %v3125_v4  ;;  %v4513_v8 = vmul.f32 %v4505_v53, %v3140_v56 }
 0x97e   :  { %v4579_v25 = vadd.f32 %v4513_v8, %v4512_v39 }
 0x980   :  { %4580 = vadd.xlane.f32.xlu1 %v4579_v25 }
 0x999   :  { %4559 = vperm.xlu1 %5491, %v8210_v35   ;;  %v9141_v35 = vld [vmem:[#allocation43_spill] sm:$0xff] }
 0x99a   :  { %v4541_v6 = vmul.f32 %v8588_v52, %v9141_v35  ;;  %v9142_v35 = vld [vmem:[#allocation44_spill] sm:$0xff] }
 0x99f   :  { %v4572_v11 = vpop.xlane.xlu1 %4571 }
 0x9a1   :  { %5494 = vset.pattern.permute.xlu1 %v5658_v51 }
 0x9a5   :  { %v4578_v3 = vpop.xlane.xlu0 %4577 }
 0x9a6   :  { %v4584_v58 = vmul.f32 0.00390625, %v4578_v3 }
 0x9a7   :  { %v4575_v43 = vpop.xlane.xlu2 %4574 }
 0x9a8   :  { %v4583_v49 = vmul.f32 0.00390625, %v4575_v43  ;;  %v8637_v24 = vsub.f32 %v8543_v19, %v4584_v58 }
 0x9aa   :  { %v8609_v5 = vsub.f32 %v8554_v1, %v4583_v49  ;;  %v8612_v12 = vsub.f32 %v8556_v45, %v4583_v49  ;;  %v4582_v1 = vmul.f32 0.00390625, %v4572_v11  ;;  %v4598_v29 = vmul.f32 %v8637_v24, %v8637_v24 }
 0x9ac   :  { %v4596_v21 = vmul.f32 %v8609_v5, %v8609_v5  ;;  %v4597_v31 = vmul.f32 %v8612_v12, %v8612_v12  ;;  %v8623_v30 = vsub.f32 %v8493_v32, %v4582_v1  ;;  %v8626_v33 = vsub.f32 %v8495_v9, %v4582_v1 }
 0x9ad   :  { %v8640_v9 = vsub.f32 %v8545_v37, %v4584_v58 }
 0x9ae   :  { %v4605_v60 = vadd.f32 %v4597_v31, %v4596_v21  ;;  %v4594_v47 = vmul.f32 %v8623_v30, %v8623_v30  ;;  %v4595_v15 = vmul.f32 %v8626_v33, %v8626_v33 }
 0x9af   :  { %v4599_v63 = vmul.f32 %v8640_v9, %v8640_v9  ;;  %v4676_v17 = vpop.permute.xlu2 %4675 }
 0x9b0   :  { %4606 = vadd.xlane.f32.xlu0 %v4605_v60  ;;  %v4602_v32 = vadd.f32 %v4595_v15, %v4594_v47 }
 0x9b1   :  { %v4608_v61 = vadd.f32 %v4599_v63, %v4598_v29 }
 0x9b7   :  { %v8620_v45 = vpop.permute.xlu1 %4683 }
 0x9b8   :  { %v8656_v38 = vpop.permute.xlu0 %4535 }
 0x9c0   :  { %v4552_v59 = vpop.permute.xlu1 %4551 }
 0x9c1   :  { %v4564_v42 = vadd.f32 %v4552_v59, %v4540_v46  ;;  %v4565_v41 = vadd.f32 %v4552_v59, %v4541_v6  ;;  %v4542_v6 = vmul.f32 %v8603_v23, %v9142_v35 }
 0x9c3   :  { %4603 = vadd.xlane.f32.xlu1 %v4602_v32  ;;  %v9143_v32 = vld [vmem:[#allocation45_spill] sm:$0xff] }
 0x9cb   :  { %4609 = vadd.xlane.f32.xlu1 %v4608_v61 }
 0x9e4   :  { %4703 = vperm.xlu1 %5494, %v8249_v2   ;;  %v4680_v2 = vpop.permute.xlu2 %4679 }
 0x9ec   :  { %v8658_v27 = vpop.permute.xlu2 %4547 }
 0x9f3   :  { %v4581_v52 = vpop.xlane.xlu1 %4580 }
 0x9f4   :  { %v4585_v54 = vmul.f32 0.00390625, %v4581_v52  ;;  %v4556_v34 = vpop.permute.xlu2 %4555 }
 0x9f5   :  { %v4566_v63 = vadd.f32 %v4556_v34, %v4542_v6 }
 0x9f6   :  { %v8647_v19 = vsub.f32 %v4512_v39, %v4585_v54  ;;  %v8649_v20 = vsub.f32 %v4513_v8, %v4585_v54 }
 0x9f8   :  { %v4600_v37 = vmul.f32 %v8647_v19, %v8647_v19  ;;  %v4601_v40 = vmul.f32 %v8649_v20, %v8649_v20 }
 0x9fa   :  { %v4611_v62 = vadd.f32 %v4601_v40, %v4600_v37 }
 0x9fc   :  { %4612 = vadd.xlane.f32.xlu0 %v4611_v62  ;;  %v4700_v53 = vpop.permute.xlu2 %4699 }
 0xa04   :  { %v4708_v35 = vpop.permute.xlu2 %4707 }
 0xa0b   :  { %v8660_v22 = vpop.permute.xlu1 %4559 }
 0xa10   :  { %4695 = vperm.xlu0 %5492, %v8593_v55  }
 0xa23   :  { %v4607_v13 = vpop.xlane.xlu0 %4606 }
 0xa24   :  { %v4615_v50 = vmul.f32 0.00390625, %v4607_v13 }
 0xa26   :  { %v4619_v48 = vadd.f32 1e-05, %v4615_v50 }
 0xa28   :  { %5615 = vrsqrt.f32 %v4619_v48  ;;  %vm4638_vm8 = vweird.f32 %v4619_v48 }
 0xa2e   :  { %v5616_v7 = vpop.eup %5615 }
 0xa2f   :  { %v4633_v44 = vmul.f32 %v5616_v7, %v4619_v48  ;;  %vm4639_vm14 = vweird.f32 %v5616_v7 }
 0xa30   :  { %vm4640_vm1 = vmor %vm4638_vm8, %vm4639_vm14 }
 0xa31   :  { %v4634_v0 = vmul.f32 %v5616_v7, %v4633_v44 }
 0xa33   :  { %v4635_v16 = vmul.f32 0.5, %v4634_v0 }
 0xa35   :  { %v4636_v57 = vsub.f32 1.5, %v4635_v16 }
 0xa36   :  { %v4604_v55 = vpop.xlane.xlu1 %4603 }
 0xa37   :  { %v4637_v28 = vmul.f32 %v5616_v7, %v4636_v57  ;;  %v4614_v58 = vmul.f32 0.00390625, %v4604_v55 }
 0xa39   :  { %v4641_v18 = vsel %vm4640_vm1, %v5616_v7, %v4637_v28  ;;  %v4618_v52 = vadd.f32 1e-05, %v4614_v58  ;;  %v9148_v58 = vld [vmem:[#allocation47_spill] sm:$0xff] }
 0xa3a   :  { %v4664_v36 = vmul.f32 %v4641_v18, %v8609_v5  ;;  %v4665_v14 = vmul.f32 %v4641_v18, %v8612_v12 }
 0xa3b   :  { %vm4628_vm6 = vweird.f32 %v4618_v52 }
 0xa3c   :  { %v4688_v4 = vmul.f32 %v4676_v17, %v4664_v36  ;;  %v4689_v56 = vmul.f32 %v4676_v17, %v4665_v14  ;;  %v9144_v14 = vld [vmem:[#allocation40_spill] sm:$0xff] }
 0xa3e   :  { %v4712_v39 = vadd.f32 %v4700_v53, %v4688_v4  ;;  %v4713_v8 = vadd.f32 %v4700_v53, %v4689_v56  ;;  %v4610_v25 = vpop.xlane.xlu1 %4609  ;;  %v9145_v53 = vld [vmem:[#allocation16_spill] sm:$0xff]  ;;  %v9146_v56 = vld [vmem:[#allocation41_spill] sm:$0xff] }
 0xa3f   :  { %v4616_v43 = vmul.f32 0.00390625, %v4610_v25  ;;  %v4538_v4 = vmul.f32 %v9145_v53, %v9144_v14 }
 0xa40   :  { %v4720_v49 = vadd.f32 %v4712_v39, %v4564_v42  ;;  %v4721_v21 = vadd.f32 %v4713_v8, %v4565_v41  ;;  %v4543_v42 = vmul.f32 %v8603_v23, %v9143_v32  ;;  %v4539_v39 = vmul.f32 %v9145_v53, %v9146_v56 }
 0xa41   :  { %v4620_v31 = vadd.f32 1e-05, %v4616_v43 }
 0xa42   :  { %v4728_v51 = vmax.f32 %v4720_v49, 0.0  ;;  %v4729_v60 = vmax.f32 %v4721_v21, 0.0  ;;  %v4567_v61 = vadd.f32 %v4556_v34, %v4543_v42  ;;  %v4562_v49 = vadd.f32 %v8658_v27, %v4538_v4 }
 0xa43   :  { %5617 = vrsqrt.f32 %v4620_v31  ;;  %vm4648_vm9 = vweird.f32 %v4620_v31  ;;  %v4563_v21 = vadd.f32 %v8658_v27, %v4539_v39  ;;  %v4545_v27 = vmul.f32 %v8656_v38, %v9148_v58 }
 0xa44   :  { %4736 = vst [vmem:[%s8720_s6 + $0x10] sm:$0xff] %v4728_v51  ;;  %5619 = vrsqrt.f32 %v4618_v52 }
 0xa45   :  { %4737 = vst [vmem:[%s8720_s6 + $0x18] sm:$0xff] %v4729_v60 }
 0xa49   :  { %v5618_v5 = vpop.eup %5617 }
 0xa4a   :  { %v4643_v12 = vmul.f32 %v5618_v5, %v4620_v31  ;;  %vm4649_vm3 = vweird.f32 %v5618_v5  ;;  %v5620_v23 = vpop.eup %5619 }
 0xa4b   :  { %vm4650_vm4 = vmor %vm4648_vm9, %vm4649_vm3  ;;  %vm4629_vm15 = vweird.f32 %v5620_v23 }
 0xa4c   :  { %v4644_v11 = vmul.f32 %v5618_v5, %v4643_v12  ;;  %vm4630_vm13 = vmor %vm4628_vm6, %vm4629_vm15 }
 0xa4e   :  { %v4645_v1 = vmul.f32 0.5, %v4644_v11 }
 0xa50   :  { %v4646_v3 = vsub.f32 1.5, %v4645_v1 }
 0xa52   :  { %v4647_v47 = vmul.f32 %v5618_v5, %v4646_v3 }
 0xa54   :  { %v4651_v15 = vsel %vm4650_vm4, %v5618_v5, %v4647_v47 }
 0xa55   :  { %v4666_v10 = vmul.f32 %v4651_v15, %v8637_v24  ;;  %v4667_v46 = vmul.f32 %v4651_v15, %v8640_v9  ;;  %v4623_v9 = vmul.f32 %v5620_v23, %v4618_v52 }
 0xa56   :  { %v4704_v59 = vpop.permute.xlu1 %4703 }
 0xa57   :  { %v4690_v41 = vmul.f32 %v4680_v2, %v4666_v10  ;;  %v4691_v29 = vmul.f32 %v4680_v2, %v4667_v46  ;;  %v4624_v2 = vmul.f32 %v5620_v23, %v4623_v9 }
 0xa59   :  { %v4714_v54 = vadd.f32 %v4704_v59, %v4690_v41  ;;  %v4715_v37 = vadd.f32 %v4704_v59, %v4691_v29  ;;  %v4625_v13 = vmul.f32 0.5, %v4624_v2 }
 0xa5b   :  { %v4722_v40 = vadd.f32 %v4714_v54, %v4566_v63  ;;  %v4723_v62 = vadd.f32 %v4715_v37, %v4567_v61  ;;  %v4626_v7 = vsub.f32 1.5, %v4625_v13 }
 0xa5d   :  { %v4730_v24 = vmax.f32 %v4722_v40, 0.0  ;;  %v4731_v17 = vmax.f32 %v4723_v62, 0.0  ;;  %v4627_v0 = vmul.f32 %v5620_v23, %v4626_v7 }
 0xa5f   :  { %4738 = vst [vmem:[%s8720_s6 + $0x20] sm:$0xff] %v4730_v24  ;;  %v4631_v16 = vsel %vm4630_vm13, %v5620_v23, %v4627_v0 }
 0xa60   :  { %4739 = vst [vmem:[%s8720_s6 + $0x28] sm:$0xff] %v4731_v17  ;;  %v4662_v28 = vmul.f32 %v4631_v16, %v8623_v30  ;;  %v4663_v18 = vmul.f32 %v4631_v16, %v8626_v33 }
 0xa62   :  { %v4686_v25 = vmul.f32 %v8606_v26, %v4662_v28  ;;  %v4687_v43 = vmul.f32 %v8606_v26, %v4663_v18  ;;  %v9147_v26 = vld [vmem:[#allocation46_spill] sm:$0xff] }
 0xa63   :  { %v4544_v15 = vmul.f32 %v8656_v38, %v9147_v26 }
 0xa6f   :  { %v4613_v50 = vpop.xlane.xlu0 %4612 }
 0xa70   :  { %v4617_v48 = vmul.f32 0.00390625, %v4613_v50 }
 0xa72   :  { %v4621_v44 = vadd.f32 1e-05, %v4617_v48 }
 0xa74   :  { %5621 = vrsqrt.f32 %v4621_v44  ;;  %vm4658_vm0 = vweird.f32 %v4621_v44 }
 0xa7a   :  { %v5622_v34 = vpop.eup %5621 }
 0xa7b   :  { %v4653_v57 = vmul.f32 %v5622_v34, %v4621_v44  ;;  %vm4659_vm11 = vweird.f32 %v5622_v34 }
 0xa7c   :  { %vm4660_vm10 = vmor %vm4658_vm0, %vm4659_vm11 }
 0xa7d   :  { %v4654_v55 = vmul.f32 %v5622_v34, %v4653_v57 }
 0xa7f   :  { %v4655_v36 = vmul.f32 0.5, %v4654_v55 }
 0xa81   :  { %v4656_v8 = vsub.f32 1.5, %v4655_v36 }
 0xa82   :  { %v4696_v30 = vpop.permute.xlu0 %4695 }
 0xa83   :  { %v4657_v33 = vmul.f32 %v5622_v34, %v4656_v8  ;;  %v4710_v31 = vadd.f32 %v4696_v30, %v4686_v25  ;;  %v4711_v51 = vadd.f32 %v4696_v30, %v4687_v43 }
 0xa85   :  { %v4661_v60 = vsel %vm4660_vm10, %v5622_v34, %v4657_v33  ;;  %v4718_v5 = vadd.f32 %v4710_v31, %v4562_v49  ;;  %v4719_v12 = vadd.f32 %v4711_v51, %v4563_v21 }
 0xa86   :  { %v4668_v11 = vmul.f32 %v4661_v60, %v8647_v19  ;;  %v4669_v1 = vmul.f32 %v4661_v60, %v8649_v20  ;;  %v4568_v19 = vadd.f32 %v8660_v22, %v4544_v15  ;;  %v4569_v20 = vadd.f32 %v8660_v22, %v4545_v27 }
 0xa87   :  { %v4726_v3 = vmax.f32 %v4718_v5, 0.0  ;;  %v4727_v47 = vmax.f32 %v4719_v12, 0.0 }
 0xa88   :  { %v4692_v10 = vmul.f32 %v8620_v45, %v4668_v11  ;;  %v4693_v46 = vmul.f32 %v8620_v45, %v4669_v1 }
 0xa89   :  { %4734 = vst [vmem:[%s8720_s6] sm:$0xff] %v4726_v3 }
 0xa8a   :  { %v4716_v6 = vadd.f32 %v4708_v35, %v4692_v10  ;;  %v4717_v59 = vadd.f32 %v4708_v35, %v4693_v46  ;;  %4735 = vst [vmem:[%s8720_s6 + $0x8] sm:$0xff] %v4727_v47 }
 0xa8c   :  { %v4724_v38 = vadd.f32 %v4716_v6, %v4568_v19  ;;  %v4725_v32 = vadd.f32 %v4717_v59, %v4569_v20 }
 0xa8e   :  { %v4732_v42 = vmax.f32 %v4724_v38, 0.0  ;;  %v4733_v41 = vmax.f32 %v4725_v32, 0.0 }
 0xa90   :  { %4740 = vst [vmem:[%s8720_s6 + $0x30] sm:$0xff] %v4732_v42 }
 0xa91   :  { %4741 = vst [vmem:[%s8720_s6 + $0x38] sm:$0xff] %v4733_v41 }

</bundles_post_ra>
